<compile_context>
chip_gen: v6e
topology: v6e:2x2x1
jax: 0.10.0
libtpu: 0.0.40
codegen_flags: <defaults>
</compile_context>

<pallas_src>
import functools

import jax
import jax.numpy as jnp
from jax.experimental import pallas as pl
from jax.experimental.pallas import tpu as pltpu

_LANE = 128
_SUBLANE = 8


def _round_up(x, m):
    return (x + m - 1) // m * m


# ----------------------------------------------------------------------------
# Fused kernel: encoder LSTM stack -> ReLU -> decoder LSTM stack -> Sigmoid,
# executed as a layer/timestep wavefront.  Gate order follows PyTorch: i,f,g,o.
# ----------------------------------------------------------------------------
def _lstm_ae_wavefront_kernel(x_ref, *rest, T, Bp, n_enc, n_dec, h_pads):
    L = n_enc + n_dec
    w_refs = rest[:3 * L]
    out_ref = rest[3 * L]       # (T*Bp, h_pads[-1])  lane-dense decoded output
    gx0_ref = rest[3 * L + 1]   # (T*Bp, 4*h_pads[0]) hoisted layer-0 projection

    # Read weights once per layer (hoisted out of the time loop).
    w_ih = [w_refs[3 * l][...] for l in range(L)]
    w_hh = [w_refs[3 * l + 1][...] for l in range(L)]
    b_raw = [w_refs[3 * l + 2][...] for l in range(L)]          # (1, 4*Hp_l)

    # Layer-0 input projection for ALL timesteps: one big MXU matmul entirely
    # off the recurrent critical path; result parked in VMEM scratch so the
    # unrolled wavefront only keeps (h, c, last_y) live in vregs.
    gx0_ref[...] = (
        jnp.dot(x_ref[...], w_ih[0], preferred_element_type=jnp.float32)
        + b_raw[0]
    )

    # Hoist the per-step bias broadcasts for the inner-layer projections
    # (broadcast_in_dim is not CSE'd across an unrolled loop).
    b_bc = [None] + [jnp.broadcast_to(b_raw[l], (Bp, 4 * h_pads[l]))
                     for l in range(1, L)]

    # Per-layer recurrent state (padded lanes stay exactly zero).
    h = [jnp.zeros((Bp, h_pads[l]), jnp.float32) for l in range(L)]
    c = [jnp.zeros((Bp, h_pads[l]), jnp.float32) for l in range(L)]
    last_y = [None] * L         # most recent output of each layer (register)

    def cell(gates, h_l, c_l, Hl):
        sig = jax.nn.sigmoid(gates)                  # one EUP pass over (Bp, 4H)
        g = jnp.tanh(gates[:, 2 * Hl:3 * Hl])
        c_new = sig[:, Hl:2 * Hl] * c_l + sig[:, 0:Hl] * g
        h_new = sig[:, 3 * Hl:4 * Hl] * jnp.tanh(c_new)
        return h_new, c_new

    # Wavefront: wave w runs layer l at timestep t = w - l.  Layers are
    # visited high->low inside a wave so last_y[l-1] still holds timestep
    # w - l (produced in wave w-1) when layer l consumes it.
    for w in range(T + L - 1):
        for l in reversed(range(L)):
            t = w - l
            if t < 0 or t >= T:
                continue
            Hl = h_pads[l]
            if l == 0:
                gin = gx0_ref[t * Bp:(t + 1) * Bp, :]            # aligned (8,4Hp)
            else:
                gin = jnp.dot(last_y[l - 1], w_ih[l],
                              preferred_element_type=jnp.float32) + b_bc[l]
            gates = gin + jnp.dot(h[l], w_hh[l],
                                  preferred_element_type=jnp.float32)
            h[l], c[l] = cell(gates, h[l], c[l], Hl)

            if l == n_enc - 1:                       # encoder output -> ReLU
                y = jnp.maximum(h[l], 0.0)
            elif l == L - 1:                         # decoder output -> Sigmoid
                y = jax.nn.sigmoid(h[l])
            else:
                y = h[l]

            if l == L - 1:
                # Full (8, 128*k) tile store -> unmasked vst.
                out_ref[t * Bp:(t + 1) * Bp, :] = y
            else:
                last_y[l] = y                        # value hand-off, no ref RAW


# ----------------------------------------------------------------------------
# Wrapper: batch-first (B,T,F) in / out, single gridless pallas_call.
# ----------------------------------------------------------------------------
def _pad_stack(params, fin_pad):
    """Pad each (w_ih (Fin,4H), w_hh (H,4H), b (1,4H)) so every gate block is
    a full multiple of 128 lanes and Fin matches the previous layer's padded
    output width.  Padded rows/cols are zero so padded state stays zero."""
    out = []
    for (w_ih, w_hh, b) in params:
        fin, four_h = w_ih.shape
        H = four_h // 4
        Hp = _round_up(H, _LANE)
        w_ih_p = jnp.zeros((fin_pad, 4 * Hp), jnp.float32)
        w_hh_p = jnp.zeros((Hp, 4 * Hp), jnp.float32)
        b_p = jnp.zeros((1, 4 * Hp), jnp.float32)
        for g in range(4):
            w_ih_p = w_ih_p.at[:fin, g * Hp:g * Hp + H].set(w_ih[:, g * H:(g + 1) * H])
            w_hh_p = w_hh_p.at[:H, g * Hp:g * Hp + H].set(w_hh[:, g * H:(g + 1) * H])
            b_p = b_p.at[:, g * Hp:g * Hp + H].set(b[:, g * H:(g + 1) * H])
        out.append((w_ih_p, w_hh_p, b_p, Hp))
        fin_pad = Hp
    return out


def lstm_ae_forward(x_bti, enc_params, dec_params):
    B, T, F = x_bti.shape
    n_enc, n_dec = len(enc_params), len(dec_params)

    Bp = _round_up(B, _SUBLANE)
    Fp = _round_up(F, _LANE)

    padded = _pad_stack(list(enc_params) + list(dec_params), Fp)
    h_pads = tuple(p[3] for p in padded)
    Hp_out = h_pads[-1]

    # batch-first -> time-major, zero-padded to (T, Bp, Fp) so every per-step
    # block in the kernel is a whole (8, 128) tile, then flattened to 2D.
    # TODO(synk): at production T*B*F the transpose/pad is a separate HBM pass;
    # fold it into the kernel via a time grid + index_map instead.
    x_tm = jnp.transpose(x_bti, (1, 0, 2)).astype(jnp.float32)
    x_pad = jnp.zeros((T, Bp, Fp), jnp.float32).at[:, :B, :F].set(x_tm)
    x2d = x_pad.reshape(T * Bp, Fp)

    flat_w = []
    for (w_ih, w_hh, b, _) in padded:
        flat_w.extend([w_ih, w_hh, b])

    kernel = functools.partial(
        _lstm_ae_wavefront_kernel, T=T, Bp=Bp, n_enc=n_enc, n_dec=n_dec,
        h_pads=h_pads)

    vmem_spec = functools.partial(
        pl.BlockSpec, memory_space=pltpu.MemorySpace.VMEM)

    out2d = pl.pallas_call(
        kernel,
        out_shape=jax.ShapeDtypeStruct((T * Bp, Hp_out), jnp.float32),
        in_specs=[vmem_spec() for _ in range(1 + len(flat_w))],
        out_specs=vmem_spec(),
        scratch_shapes=[
            pltpu.VMEM((T * Bp, 4 * h_pads[0]), jnp.float32),  # layer-0 gx
        ],
    )(x2d, *flat_w)

    # Un-pad: (T*Bp, Hp) -> (B, T, F)
    out = out2d.reshape(T, Bp, Hp_out)[:, :B, :F]
    return jnp.transpose(out, (1, 0, 2))


# ----------------------------------------------------------------------------
# Parameter construction (deterministic, synthetic; mirrors module shapes)
# ----------------------------------------------------------------------------
def make_lstm_params(key, in_size, hid_size, num_layers):
    """Returns list of (w_ih[(F_in,4H)], w_hh[(H,4H)], b[(1,4H)]) per layer."""
    params = []
    gain = jnp.sqrt(2.0)
    for layer in range(num_layers):
        f_in = in_size if layer == 0 else hid_size
        key, k1, k2, k3, k4 = jax.random.split(key, 5)
        # xavier_uniform with gain sqrt(2) (as in the module for layer 0)
        bound_ih = gain * jnp.sqrt(6.0 / (f_in + 4 * hid_size))
        bound_hh = gain * jnp.sqrt(6.0 / (hid_size + 4 * hid_size))
        w_ih = jax.random.uniform(k1, (f_in, 4 * hid_size), jnp.float32,
                                  -bound_ih, bound_ih)
        w_hh = jax.random.uniform(k2, (hid_size, 4 * hid_size), jnp.float32,
                                  -bound_hh, bound_hh)
        # PyTorch default bias init: U(-1/sqrt(H), 1/sqrt(H)); b = b_ih + b_hh
        bb = 1.0 / jnp.sqrt(hid_size)
        b_ih = jax.random.uniform(k3, (4 * hid_size,), jnp.float32, -bb, bb)
        b_hh = jax.random.uniform(k4, (4 * hid_size,), jnp.float32, -bb, bb)
        params.append((w_ih, w_hh, (b_ih + b_hh)[None, :]))
    return params


# ----------------------------------------------------------------------------
# Pure-JAX reference (lax.scan) for correctness checking
# ----------------------------------------------------------------------------
def _lstm_layer_ref(x_tbi, w_ih, w_hh, b, activation):
    T, B, _ = x_tbi.shape
    H = w_hh.shape[0]

    def step(carry, x_t):
        h, c = carry
        gates = x_t @ w_ih + h @ w_hh + b
        i = jax.nn.sigmoid(gates[:, :H])
        f = jax.nn.sigmoid(gates[:, H:2 * H])
        g = jnp.tanh(gates[:, 2 * H:3 * H])
        o = jax.nn.sigmoid(gates[:, 3 * H:])
        c = f * c + i * g
        h = o * jnp.tanh(c)
        return (h, c), h

    init = (jnp.zeros((B, H), jnp.float32), jnp.zeros((B, H), jnp.float32))
    _, hs = jax.lax.scan(step, init, x_tbi)
    if activation == "relu":
        hs = jnp.maximum(hs, 0.0)
    elif activation == "sigmoid":
        hs = jax.nn.sigmoid(hs)
    return hs


def lstm_ae_ref(x_bti, enc_params, dec_params):
    x = jnp.transpose(x_bti, (1, 0, 2))
    for layer, (w_ih, w_hh, b) in enumerate(enc_params):
        act = "relu" if layer == len(enc_params) - 1 else "none"
        x = _lstm_layer_ref(x, w_ih, w_hh, b, act)
    for layer, (w_ih, w_hh, b) in enumerate(dec_params):
        act = "sigmoid" if layer == len(dec_params) - 1 else "none"
        x = _lstm_layer_ref(x, w_ih, w_hh, b, act)
    return jnp.transpose(x, (1, 0, 2))


if __name__ == "__main__":
    # Small shapes implied by the module: batch=2, seq=8, input_size=16,
    # hidden_size=32.
    B, T = 2, 8
    input_size, hidden_size = 16, 32

    key = jax.random.PRNGKey(0)
    k_x, k_enc, k_dec = jax.random.split(key, 3)
    x = jax.random.normal(k_x, (B, T, input_size), dtype=jnp.float32)

    fwd = jax.jit(lstm_ae_forward)

    ok = True
    for num_layers in (1, 2):
        ke, kd = jax.random.split(jax.random.fold_in(k_enc, num_layers))
        enc_params = make_lstm_params(ke, input_size, hidden_size, num_layers)
        dec_params = make_lstm_params(kd, hidden_size, input_size, num_layers)

        out = jax.block_until_ready(fwd(x, enc_params, dec_params))
        ref = jax.block_until_ready(lstm_ae_ref(x, enc_params, dec_params))

        assert out.shape == (B, T, input_size)
        if not jnp.allclose(out, ref, atol=3e-5, rtol=3e-5):
            ok = False
            print(f"mismatch vs JAX reference (num_layers={num_layers}), "
                  f"max abs err = {jnp.max(jnp.abs(out - ref))}")

    assert ok, "mismatch vs JAX reference"
    print("KERNEL_OK")
</pallas_src>

<mosaic_0001>
module attributes {stable_mosaic.version = 11 : i64} {
  func.func @_lstm_ae_wavefront_kernel(%arg0: memref<64x128xf32, #tpu.memory_space<vmem>>, %arg1: memref<128x512xf32, #tpu.memory_space<vmem>>, %arg2: memref<128x512xf32, #tpu.memory_space<vmem>>, %arg3: memref<1x512xf32, #tpu.memory_space<vmem>>, %arg4: memref<128x512xf32, #tpu.memory_space<vmem>>, %arg5: memref<128x512xf32, #tpu.memory_space<vmem>>, %arg6: memref<1x512xf32, #tpu.memory_space<vmem>>, %arg7: memref<64x128xf32, #tpu.memory_space<vmem>>, %arg8: memref<64x512xf32, #tpu.memory_space<vmem>>) attributes {dimension_semantics = [], scalar_prefetch = 0 : i64, scratch_operands = 1 : i64, tpu.core_type = #tpu.core_type<tc>} {
    %c0 = arith.constant 0 : index
    %c0_0 = arith.constant 0 : index
    %0 = vector.load %arg1[%c0, %c0_0] : memref<128x512xf32, #tpu.memory_space<vmem>>, vector<128x512xf32>
    %c0_1 = arith.constant 0 : index
    %c0_2 = arith.constant 0 : index
    %1 = vector.load %arg4[%c0_1, %c0_2] : memref<128x512xf32, #tpu.memory_space<vmem>>, vector<128x512xf32>
    %c0_3 = arith.constant 0 : index
    %c0_4 = arith.constant 0 : index
    %2 = vector.load %arg2[%c0_3, %c0_4] : memref<128x512xf32, #tpu.memory_space<vmem>>, vector<128x512xf32>
    %c0_5 = arith.constant 0 : index
    %c0_6 = arith.constant 0 : index
    %3 = vector.load %arg5[%c0_5, %c0_6] : memref<128x512xf32, #tpu.memory_space<vmem>>, vector<128x512xf32>
    %c0_7 = arith.constant 0 : index
    %c0_8 = arith.constant 0 : index
    %4 = vector.load %arg3[%c0_7, %c0_8] : memref<1x512xf32, #tpu.memory_space<vmem>>, vector<1x512xf32>
    %c0_9 = arith.constant 0 : index
    %c0_10 = arith.constant 0 : index
    %5 = vector.load %arg6[%c0_9, %c0_10] : memref<1x512xf32, #tpu.memory_space<vmem>>, vector<1x512xf32>
    %c0_11 = arith.constant 0 : index
    %c0_12 = arith.constant 0 : index
    %6 = vector.load %arg0[%c0_11, %c0_12] : memref<64x128xf32, #tpu.memory_space<vmem>>, vector<64x128xf32>
    %cst = arith.constant dense<0.000000e+00> : vector<64x512xf32>
    %7 = tpu.matmul %6, %0, %cst {dimension_numbers = #tpu.dot_dimension_numbers<[1], [0], [0], [1], [0, 0, 1, 1], [], []>} : vector<64x128xf32>, vector<128x512xf32>, vector<64x512xf32> -> vector<64x512xf32>
    %8 = vector.broadcast %4 : vector<1x512xf32> to vector<64x512xf32>
    %9 = arith.addf %7, %8 : vector<64x512xf32>
    %c0_13 = arith.constant 0 : index
    %c0_14 = arith.constant 0 : index
    %10 = vector.load %arg8[%c0_13, %c0_14] : memref<64x512xf32, #tpu.memory_space<vmem>>, vector<64x512xf32>
    tpu.vector_store %arg8[%c0_13, %c0_14], %9 {strides = array<i32>} : memref<64x512xf32, #tpu.memory_space<vmem>>, vector<64x512xf32>,
    %11 = vector.shape_cast %5 : vector<1x512xf32> to vector<1x512xf32>
    %12 = vector.broadcast %11 : vector<1x512xf32> to vector<8x512xf32>
    %cst_15 = arith.constant 0.000000e+00 : f32
    %13 = vector.broadcast %cst_15 : f32 to vector<8x128xf32>
    %cst_16 = arith.constant 0.000000e+00 : f32
    %14 = vector.broadcast %cst_16 : f32 to vector<8x128xf32>
    %cst_17 = arith.constant 0.000000e+00 : f32
    %15 = vector.broadcast %cst_17 : f32 to vector<8x128xf32>
    %cst_18 = arith.constant 0.000000e+00 : f32
    %16 = vector.broadcast %cst_18 : f32 to vector<8x128xf32>
    %c0_19 = arith.constant 0 : index
    %c0_20 = arith.constant 0 : index
    %17 = vector.load %arg8[%c0_19, %c0_20] : memref<64x512xf32, #tpu.memory_space<vmem>>, vector<8x512xf32>
    %cst_21 = arith.constant dense<0.000000e+00> : vector<8x512xf32>
    %18 = tpu.matmul %13, %2, %cst_21 {dimension_numbers = #tpu.dot_dimension_numbers<[1], [0], [0], [1], [0, 0, 1, 1], [], []>} : vector<8x128xf32>, vector<128x512xf32>, vector<8x512xf32> -> vector<8x512xf32>
    %19 = arith.addf %17, %18 : vector<8x512xf32>
    %20 = arith.negf %19 : vector<8x512xf32>
    %21 = math.exp %20 : vector<8x512xf32>
    %cst_22 = arith.constant 1.000000e+00 : f32
    %22 = vector.broadcast %cst_22 : f32 to vector<8x512xf32>
    %23 = arith.addf %22, %21 : vector<8x512xf32>
    %24 = arith.divf %22, %23 : vector<8x512xf32>
    %25 = vector.extract_strided_slice %19 {offsets = [0, 256], sizes = [8, 128], strides = [1, 1]} : vector<8x512xf32> to vector<8x128xf32>
    %26 = math.tanh %25 : vector<8x128xf32>
    %27 = vector.extract_strided_slice %24 {offsets = [0, 128], sizes = [8, 128], strides = [1, 1]} : vector<8x512xf32> to vector<8x128xf32>
    %28 = arith.mulf %27, %15 : vector<8x128xf32>
    %29 = vector.extract_strided_slice %24 {offsets = [0, 0], sizes = [8, 128], strides = [1, 1]} : vector<8x512xf32> to vector<8x128xf32>
    %30 = arith.mulf %29, %26 : vector<8x128xf32>
    %31 = arith.addf %28, %30 : vector<8x128xf32>
    %32 = vector.extract_strided_slice %24 {offsets = [0, 384], sizes = [8, 128], strides = [1, 1]} : vector<8x512xf32> to vector<8x128xf32>
    %33 = math.tanh %31 : vector<8x128xf32>
    %34 = arith.mulf %32, %33 : vector<8x128xf32>
    %cst_23 = arith.constant 0.000000e+00 : f32
    %35 = vector.broadcast %cst_23 : f32 to vector<8x128xf32>
    %36 = arith.maximumf %34, %35 : vector<8x128xf32>
    %cst_24 = arith.constant dense<0.000000e+00> : vector<8x512xf32>
    %37 = tpu.matmul %36, %1, %cst_24 {dimension_numbers = #tpu.dot_dimension_numbers<[1], [0], [0], [1], [0, 0, 1, 1], [], []>} : vector<8x128xf32>, vector<128x512xf32>, vector<8x512xf32> -> vector<8x512xf32>
    %38 = arith.addf %37, %12 : vector<8x512xf32>
    %cst_25 = arith.constant dense<0.000000e+00> : vector<8x512xf32>
    %39 = tpu.matmul %14, %3, %cst_25 {dimension_numbers = #tpu.dot_dimension_numbers<[1], [0], [0], [1], [0, 0, 1, 1], [], []>} : vector<8x128xf32>, vector<128x512xf32>, vector<8x512xf32> -> vector<8x512xf32>
    %40 = arith.addf %38, %39 : vector<8x512xf32>
    %41 = arith.negf %40 : vector<8x512xf32>
    %42 = math.exp %41 : vector<8x512xf32>
    %cst_26 = arith.constant 1.000000e+00 : f32
    %43 = vector.broadcast %cst_26 : f32 to vector<8x512xf32>
    %44 = arith.addf %43, %42 : vector<8x512xf32>
    %45 = arith.divf %43, %44 : vector<8x512xf32>
    %46 = vector.extract_strided_slice %40 {offsets = [0, 256], sizes = [8, 128], strides = [1, 1]} : vector<8x512xf32> to vector<8x128xf32>
    %47 = math.tanh %46 : vector<8x128xf32>
    %48 = vector.extract_strided_slice %45 {offsets = [0, 128], sizes = [8, 128], strides = [1, 1]} : vector<8x512xf32> to vector<8x128xf32>
    %49 = arith.mulf %48, %16 : vector<8x128xf32>
    %50 = vector.extract_strided_slice %45 {offsets = [0, 0], sizes = [8, 128], strides = [1, 1]} : vector<8x512xf32> to vector<8x128xf32>
    %51 = arith.mulf %50, %47 : vector<8x128xf32>
    %52 = arith.addf %49, %51 : vector<8x128xf32>
    %53 = vector.extract_strided_slice %45 {offsets = [0, 384], sizes = [8, 128], strides = [1, 1]} : vector<8x512xf32> to vector<8x128xf32>
    %54 = math.tanh %52 : vector<8x128xf32>
    %55 = arith.mulf %53, %54 : vector<8x128xf32>
    %56 = arith.negf %55 : vector<8x128xf32>
    %57 = math.exp %56 : vector<8x128xf32>
    %cst_27 = arith.constant 1.000000e+00 : f32
    %58 = vector.broadcast %cst_27 : f32 to vector<8x128xf32>
    %59 = arith.addf %58, %57 : vector<8x128xf32>
    %60 = arith.divf %58, %59 : vector<8x128xf32>
    %c0_28 = arith.constant 0 : index
    %c0_29 = arith.constant 0 : index
    %61 = vector.load %arg7[%c0_28, %c0_29] : memref<64x128xf32, #tpu.memory_space<vmem>>, vector<8x128xf32>
    tpu.vector_store %arg7[%c0_28, %c0_29], %60 {strides = array<i32>} : memref<64x128xf32, #tpu.memory_space<vmem>>, vector<8x128xf32>,
    %c8 = arith.constant 8 : index
    %c0_30 = arith.constant 0 : index
    %62 = vector.load %arg8[%c8, %c0_30] : memref<64x512xf32, #tpu.memory_space<vmem>>, vector<8x512xf32>
    %cst_31 = arith.constant dense<0.000000e+00> : vector<8x512xf32>
    %63 = tpu.matmul %34, %2, %cst_31 {dimension_numbers = #tpu.dot_dimension_numbers<[1], [0], [0], [1], [0, 0, 1, 1], [], []>} : vector<8x128xf32>, vector<128x512xf32>, vector<8x512xf32> -> vector<8x512xf32>
    %64 = arith.addf %62, %63 : vector<8x512xf32>
    %65 = arith.negf %64 : vector<8x512xf32>
    %66 = math.exp %65 : vector<8x512xf32>
    %cst_32 = arith.constant 1.000000e+00 : f32
    %67 = vector.broadcast %cst_32 : f32 to vector<8x512xf32>
    %68 = arith.addf %67, %66 : vector<8x512xf32>
    %69 = arith.divf %67, %68 : vector<8x512xf32>
    %70 = vector.extract_strided_slice %64 {offsets = [0, 256], sizes = [8, 128], strides = [1, 1]} : vector<8x512xf32> to vector<8x128xf32>
    %71 = math.tanh %70 : vector<8x128xf32>
    %72 = vector.extract_strided_slice %69 {offsets = [0, 128], sizes = [8, 128], strides = [1, 1]} : vector<8x512xf32> to vector<8x128xf32>
    %73 = arith.mulf %72, %31 : vector<8x128xf32>
    %74 = vector.extract_strided_slice %69 {offsets = [0, 0], sizes = [8, 128], strides = [1, 1]} : vector<8x512xf32> to vector<8x128xf32>
    %75 = arith.mulf %74, %71 : vector<8x128xf32>
    %76 = arith.addf %73, %75 : vector<8x128xf32>
    %77 = vector.extract_strided_slice %69 {offsets = [0, 384], sizes = [8, 128], strides = [1, 1]} : vector<8x512xf32> to vector<8x128xf32>
    %78 = math.tanh %76 : vector<8x128xf32>
    %79 = arith.mulf %77, %78 : vector<8x128xf32>
    %cst_33 = arith.constant 0.000000e+00 : f32
    %80 = vector.broadcast %cst_33 : f32 to vector<8x128xf32>
    %81 = arith.maximumf %79, %80 : vector<8x128xf32>
    %cst_34 = arith.constant dense<0.000000e+00> : vector<8x512xf32>
    %82 = tpu.matmul %81, %1, %cst_34 {dimension_numbers = #tpu.dot_dimension_numbers<[1], [0], [0], [1], [0, 0, 1, 1], [], []>} : vector<8x128xf32>, vector<128x512xf32>, vector<8x512xf32> -> vector<8x512xf32>
    %83 = arith.addf %82, %12 : vector<8x512xf32>
    %cst_35 = arith.constant dense<0.000000e+00> : vector<8x512xf32>
    %84 = tpu.matmul %55, %3, %cst_35 {dimension_numbers = #tpu.dot_dimension_numbers<[1], [0], [0], [1], [0, 0, 1, 1], [], []>} : vector<8x128xf32>, vector<128x512xf32>, vector<8x512xf32> -> vector<8x512xf32>
    %85 = arith.addf %83, %84 : vector<8x512xf32>
    %86 = arith.negf %85 : vector<8x512xf32>
    %87 = math.exp %86 : vector<8x512xf32>
    %cst_36 = arith.constant 1.000000e+00 : f32
    %88 = vector.broadcast %cst_36 : f32 to vector<8x512xf32>
    %89 = arith.addf %88, %87 : vector<8x512xf32>
    %90 = arith.divf %88, %89 : vector<8x512xf32>
    %91 = vector.extract_strided_slice %85 {offsets = [0, 256], sizes = [8, 128], strides = [1, 1]} : vector<8x512xf32> to vector<8x128xf32>
    %92 = math.tanh %91 : vector<8x128xf32>
    %93 = vector.extract_strided_slice %90 {offsets = [0, 128], sizes = [8, 128], strides = [1, 1]} : vector<8x512xf32> to vector<8x128xf32>
    %94 = arith.mulf %93, %52 : vector<8x128xf32>
    %95 = vector.extract_strided_slice %90 {offsets = [0, 0], sizes = [8, 128], strides = [1, 1]} : vector<8x512xf32> to vector<8x128xf32>
    %96 = arith.mulf %95, %92 : vector<8x128xf32>
    %97 = arith.addf %94, %96 : vector<8x128xf32>
    %98 = vector.extract_strided_slice %90 {offsets = [0, 384], sizes = [8, 128], strides = [1, 1]} : vector<8x512xf32> to vector<8x128xf32>
    %99 = math.tanh %97 : vector<8x128xf32>
    %100 = arith.mulf %98, %99 : vector<8x128xf32>
    %101 = arith.negf %100 : vector<8x128xf32>
    %102 = math.exp %101 : vector<8x128xf32>
    %cst_37 = arith.constant 1.000000e+00 : f32
    %103 = vector.broadcast %cst_37 : f32 to vector<8x128xf32>
    %104 = arith.addf %103, %102 : vector<8x128xf32>
    %105 = arith.divf %103, %104 : vector<8x128xf32>
    %c8_38 = arith.constant 8 : index
    %c0_39 = arith.constant 0 : index
    %106 = vector.load %arg7[%c8_38, %c0_39] : memref<64x128xf32, #tpu.memory_space<vmem>>, vector<8x128xf32>
    tpu.vector_store %arg7[%c8_38, %c0_39], %105 {strides = array<i32>} : memref<64x128xf32, #tpu.memory_space<vmem>>, vector<8x128xf32>,
    %c16 = arith.constant 16 : index
    %c0_40 = arith.constant 0 : index
    %107 = vector.load %arg8[%c16, %c0_40] : memref<64x512xf32, #tpu.memory_space<vmem>>, vector<8x512xf32>
    %cst_41 = arith.constant dense<0.000000e+00> : vector<8x512xf32>
    %108 = tpu.matmul %79, %2, %cst_41 {dimension_numbers = #tpu.dot_dimension_numbers<[1], [0], [0], [1], [0, 0, 1, 1], [], []>} : vector<8x128xf32>, vector<128x512xf32>, vector<8x512xf32> -> vector<8x512xf32>
    %109 = arith.addf %107, %108 : vector<8x512xf32>
    %110 = arith.negf %109 : vector<8x512xf32>
    %111 = math.exp %110 : vector<8x512xf32>
    %cst_42 = arith.constant 1.000000e+00 : f32
    %112 = vector.broadcast %cst_42 : f32 to vector<8x512xf32>
    %113 = arith.addf %112, %111 : vector<8x512xf32>
    %114 = arith.divf %112, %113 : vector<8x512xf32>
    %115 = vector.extract_strided_slice %109 {offsets = [0, 256], sizes = [8, 128], strides = [1, 1]} : vector<8x512xf32> to vector<8x128xf32>
    %116 = math.tanh %115 : vector<8x128xf32>
    %117 = vector.extract_strided_slice %114 {offsets = [0, 128], sizes = [8, 128], strides = [1, 1]} : vector<8x512xf32> to vector<8x128xf32>
    %118 = arith.mulf %117, %76 : vector<8x128xf32>
    %119 = vector.extract_strided_slice %114 {offsets = [0, 0], sizes = [8, 128], strides = [1, 1]} : vector<8x512xf32> to vector<8x128xf32>
    %120 = arith.mulf %119, %116 : vector<8x128xf32>
    %121 = arith.addf %118, %120 : vector<8x128xf32>
    %122 = vector.extract_strided_slice %114 {offsets = [0, 384], sizes = [8, 128], strides = [1, 1]} : vector<8x512xf32> to vector<8x128xf32>
    %123 = math.tanh %121 : vector<8x128xf32>
    %124 = arith.mulf %122, %123 : vector<8x128xf32>
    %cst_43 = arith.constant 0.000000e+00 : f32
    %125 = vector.broadcast %cst_43 : f32 to vector<8x128xf32>
    %126 = arith.maximumf %124, %125 : vector<8x128xf32>
    %cst_44 = arith.constant dense<0.000000e+00> : vector<8x512xf32>
    %127 = tpu.matmul %126, %1, %cst_44 {dimension_numbers = #tpu.dot_dimension_numbers<[1], [0], [0], [1], [0, 0, 1, 1], [], []>} : vector<8x128xf32>, vector<128x512xf32>, vector<8x512xf32> -> vector<8x512xf32>
    %128 = arith.addf %127, %12 : vector<8x512xf32>
    %cst_45 = arith.constant dense<0.000000e+00> : vector<8x512xf32>
    %129 = tpu.matmul %100, %3, %cst_45 {dimension_numbers = #tpu.dot_dimension_numbers<[1], [0], [0], [1], [0, 0, 1, 1], [], []>} : vector<8x128xf32>, vector<128x512xf32>, vector<8x512xf32> -> vector<8x512xf32>
    %130 = arith.addf %128, %129 : vector<8x512xf32>
    %131 = arith.negf %130 : vector<8x512xf32>
    %132 = math.exp %131 : vector<8x512xf32>
    %cst_46 = arith.constant 1.000000e+00 : f32
    %133 = vector.broadcast %cst_46 : f32 to vector<8x512xf32>
    %134 = arith.addf %133, %132 : vector<8x512xf32>
    %135 = arith.divf %133, %134 : vector<8x512xf32>
    %136 = vector.extract_strided_slice %130 {offsets = [0, 256], sizes = [8, 128], strides = [1, 1]} : vector<8x512xf32> to vector<8x128xf32>
    %137 = math.tanh %136 : vector<8x128xf32>
    %138 = vector.extract_strided_slice %135 {offsets = [0, 128], sizes = [8, 128], strides = [1, 1]} : vector<8x512xf32> to vector<8x128xf32>
    %139 = arith.mulf %138, %97 : vector<8x128xf32>
    %140 = vector.extract_strided_slice %135 {offsets = [0, 0], sizes = [8, 128], strides = [1, 1]} : vector<8x512xf32> to vector<8x128xf32>
    %141 = arith.mulf %140, %137 : vector<8x128xf32>
    %142 = arith.addf %139, %141 : vector<8x128xf32>
    %143 = vector.extract_strided_slice %135 {offsets = [0, 384], sizes = [8, 128], strides = [1, 1]} : vector<8x512xf32> to vector<8x128xf32>
    %144 = math.tanh %142 : vector<8x128xf32>
    %145 = arith.mulf %143, %144 : vector<8x128xf32>
    %146 = arith.negf %145 : vector<8x128xf32>
    %147 = math.exp %146 : vector<8x128xf32>
    %cst_47 = arith.constant 1.000000e+00 : f32
    %148 = vector.broadcast %cst_47 : f32 to vector<8x128xf32>
    %149 = arith.addf %148, %147 : vector<8x128xf32>
    %150 = arith.divf %148, %149 : vector<8x128xf32>
    %c16_48 = arith.constant 16 : index
    %c0_49 = arith.constant 0 : index
    %151 = vector.load %arg7[%c16_48, %c0_49] : memref<64x128xf32, #tpu.memory_space<vmem>>, vector<8x128xf32>
    tpu.vector_store %arg7[%c16_48, %c0_49], %150 {strides = array<i32>} : memref<64x128xf32, #tpu.memory_space<vmem>>, vector<8x128xf32>,
    %c24 = arith.constant 24 : index
    %c0_50 = arith.constant 0 : index
    %152 = vector.load %arg8[%c24, %c0_50] : memref<64x512xf32, #tpu.memory_space<vmem>>, vector<8x512xf32>
    %cst_51 = arith.constant dense<0.000000e+00> : vector<8x512xf32>
    %153 = tpu.matmul %124, %2, %cst_51 {dimension_numbers = #tpu.dot_dimension_numbers<[1], [0], [0], [1], [0, 0, 1, 1], [], []>} : vector<8x128xf32>, vector<128x512xf32>, vector<8x512xf32> -> vector<8x512xf32>
    %154 = arith.addf %152, %153 : vector<8x512xf32>
    %155 = arith.negf %154 : vector<8x512xf32>
    %156 = math.exp %155 : vector<8x512xf32>
    %cst_52 = arith.constant 1.000000e+00 : f32
    %157 = vector.broadcast %cst_52 : f32 to vector<8x512xf32>
    %158 = arith.addf %157, %156 : vector<8x512xf32>
    %159 = arith.divf %157, %158 : vector<8x512xf32>
    %160 = vector.extract_strided_slice %154 {offsets = [0, 256], sizes = [8, 128], strides = [1, 1]} : vector<8x512xf32> to vector<8x128xf32>
    %161 = math.tanh %160 : vector<8x128xf32>
    %162 = vector.extract_strided_slice %159 {offsets = [0, 128], sizes = [8, 128], strides = [1, 1]} : vector<8x512xf32> to vector<8x128xf32>
    %163 = arith.mulf %162, %121 : vector<8x128xf32>
    %164 = vector.extract_strided_slice %159 {offsets = [0, 0], sizes = [8, 128], strides = [1, 1]} : vector<8x512xf32> to vector<8x128xf32>
    %165 = arith.mulf %164, %161 : vector<8x128xf32>
    %166 = arith.addf %163, %165 : vector<8x128xf32>
    %167 = vector.extract_strided_slice %159 {offsets = [0, 384], sizes = [8, 128], strides = [1, 1]} : vector<8x512xf32> to vector<8x128xf32>
    %168 = math.tanh %166 : vector<8x128xf32>
    %169 = arith.mulf %167, %168 : vector<8x128xf32>
    %cst_53 = arith.constant 0.000000e+00 : f32
    %170 = vector.broadcast %cst_53 : f32 to vector<8x128xf32>
    %171 = arith.maximumf %169, %170 : vector<8x128xf32>
    %cst_54 = arith.constant dense<0.000000e+00> : vector<8x512xf32>
    %172 = tpu.matmul %171, %1, %cst_54 {dimension_numbers = #tpu.dot_dimension_numbers<[1], [0], [0], [1], [0, 0, 1, 1], [], []>} : vector<8x128xf32>, vector<128x512xf32>, vector<8x512xf32> -> vector<8x512xf32>
    %173 = arith.addf %172, %12 : vector<8x512xf32>
    %cst_55 = arith.constant dense<0.000000e+00> : vector<8x512xf32>
    %174 = tpu.matmul %145, %3, %cst_55 {dimension_numbers = #tpu.dot_dimension_numbers<[1], [0], [0], [1], [0, 0, 1, 1], [], []>} : vector<8x128xf32>, vector<128x512xf32>, vector<8x512xf32> -> vector<8x512xf32>
    %175 = arith.addf %173, %174 : vector<8x512xf32>
    %176 = arith.negf %175 : vector<8x512xf32>
    %177 = math.exp %176 : vector<8x512xf32>
    %cst_56 = arith.constant 1.000000e+00 : f32
    %178 = vector.broadcast %cst_56 : f32 to vector<8x512xf32>
    %179 = arith.addf %178, %177 : vector<8x512xf32>
    %180 = arith.divf %178, %179 : vector<8x512xf32>
    %181 = vector.extract_strided_slice %175 {offsets = [0, 256], sizes = [8, 128], strides = [1, 1]} : vector<8x512xf32> to vector<8x128xf32>
    %182 = math.tanh %181 : vector<8x128xf32>
    %183 = vector.extract_strided_slice %180 {offsets = [0, 128], sizes = [8, 128], strides = [1, 1]} : vector<8x512xf32> to vector<8x128xf32>
    %184 = arith.mulf %183, %142 : vector<8x128xf32>
    %185 = vector.extract_strided_slice %180 {offsets = [0, 0], sizes = [8, 128], strides = [1, 1]} : vector<8x512xf32> to vector<8x128xf32>
    %186 = arith.mulf %185, %182 : vector<8x128xf32>
    %187 = arith.addf %184, %186 : vector<8x128xf32>
    %188 = vector.extract_strided_slice %180 {offsets = [0, 384], sizes = [8, 128], strides = [1, 1]} : vector<8x512xf32> to vector<8x128xf32>
    %189 = math.tanh %187 : vector<8x128xf32>
    %190 = arith.mulf %188, %189 : vector<8x128xf32>
    %191 = arith.negf %190 : vector<8x128xf32>
    %192 = math.exp %191 : vector<8x128xf32>
    %cst_57 = arith.constant 1.000000e+00 : f32
    %193 = vector.broadcast %cst_57 : f32 to vector<8x128xf32>
    %194 = arith.addf %193, %192 : vector<8x128xf32>
    %195 = arith.divf %193, %194 : vector<8x128xf32>
    %c24_58 = arith.constant 24 : index
    %c0_59 = arith.constant 0 : index
    %196 = vector.load %arg7[%c24_58, %c0_59] : memref<64x128xf32, #tpu.memory_space<vmem>>, vector<8x128xf32>
    tpu.vector_store %arg7[%c24_58, %c0_59], %195 {strides = array<i32>} : memref<64x128xf32, #tpu.memory_space<vmem>>, vector<8x128xf32>,
    %c32 = arith.constant 32 : index
    %c0_60 = arith.constant 0 : index
    %197 = vector.load %arg8[%c32, %c0_60] : memref<64x512xf32, #tpu.memory_space<vmem>>, vector<8x512xf32>
    %cst_61 = arith.constant dense<0.000000e+00> : vector<8x512xf32>
    %198 = tpu.matmul %169, %2, %cst_61 {dimension_numbers = #tpu.dot_dimension_numbers<[1], [0], [0], [1], [0, 0, 1, 1], [], []>} : vector<8x128xf32>, vector<128x512xf32>, vector<8x512xf32> -> vector<8x512xf32>
    %199 = arith.addf %197, %198 : vector<8x512xf32>
    %200 = arith.negf %199 : vector<8x512xf32>
    %201 = math.exp %200 : vector<8x512xf32>
    %cst_62 = arith.constant 1.000000e+00 : f32
    %202 = vector.broadcast %cst_62 : f32 to vector<8x512xf32>
    %203 = arith.addf %202, %201 : vector<8x512xf32>
    %204 = arith.divf %202, %203 : vector<8x512xf32>
    %205 = vector.extract_strided_slice %199 {offsets = [0, 256], sizes = [8, 128], strides = [1, 1]} : vector<8x512xf32> to vector<8x128xf32>
    %206 = math.tanh %205 : vector<8x128xf32>
    %207 = vector.extract_strided_slice %204 {offsets = [0, 128], sizes = [8, 128], strides = [1, 1]} : vector<8x512xf32> to vector<8x128xf32>
    %208 = arith.mulf %207, %166 : vector<8x128xf32>
    %209 = vector.extract_strided_slice %204 {offsets = [0, 0], sizes = [8, 128], strides = [1, 1]} : vector<8x512xf32> to vector<8x128xf32>
    %210 = arith.mulf %209, %206 : vector<8x128xf32>
    %211 = arith.addf %208, %210 : vector<8x128xf32>
    %212 = vector.extract_strided_slice %204 {offsets = [0, 384], sizes = [8, 128], strides = [1, 1]} : vector<8x512xf32> to vector<8x128xf32>
    %213 = math.tanh %211 : vector<8x128xf32>
    %214 = arith.mulf %212, %213 : vector<8x128xf32>
    %cst_63 = arith.constant 0.000000e+00 : f32
    %215 = vector.broadcast %cst_63 : f32 to vector<8x128xf32>
    %216 = arith.maximumf %214, %215 : vector<8x128xf32>
    %cst_64 = arith.constant dense<0.000000e+00> : vector<8x512xf32>
    %217 = tpu.matmul %216, %1, %cst_64 {dimension_numbers = #tpu.dot_dimension_numbers<[1], [0], [0], [1], [0, 0, 1, 1], [], []>} : vector<8x128xf32>, vector<128x512xf32>, vector<8x512xf32> -> vector<8x512xf32>
    %218 = arith.addf %217, %12 : vector<8x512xf32>
    %cst_65 = arith.constant dense<0.000000e+00> : vector<8x512xf32>
    %219 = tpu.matmul %190, %3, %cst_65 {dimension_numbers = #tpu.dot_dimension_numbers<[1], [0], [0], [1], [0, 0, 1, 1], [], []>} : vector<8x128xf32>, vector<128x512xf32>, vector<8x512xf32> -> vector<8x512xf32>
    %220 = arith.addf %218, %219 : vector<8x512xf32>
    %221 = arith.negf %220 : vector<8x512xf32>
    %222 = math.exp %221 : vector<8x512xf32>
    %cst_66 = arith.constant 1.000000e+00 : f32
    %223 = vector.broadcast %cst_66 : f32 to vector<8x512xf32>
    %224 = arith.addf %223, %222 : vector<8x512xf32>
    %225 = arith.divf %223, %224 : vector<8x512xf32>
    %226 = vector.extract_strided_slice %220 {offsets = [0, 256], sizes = [8, 128], strides = [1, 1]} : vector<8x512xf32> to vector<8x128xf32>
    %227 = math.tanh %226 : vector<8x128xf32>
    %228 = vector.extract_strided_slice %225 {offsets = [0, 128], sizes = [8, 128], strides = [1, 1]} : vector<8x512xf32> to vector<8x128xf32>
    %229 = arith.mulf %228, %187 : vector<8x128xf32>
    %230 = vector.extract_strided_slice %225 {offsets = [0, 0], sizes = [8, 128], strides = [1, 1]} : vector<8x512xf32> to vector<8x128xf32>
    %231 = arith.mulf %230, %227 : vector<8x128xf32>
    %232 = arith.addf %229, %231 : vector<8x128xf32>
    %233 = vector.extract_strided_slice %225 {offsets = [0, 384], sizes = [8, 128], strides = [1, 1]} : vector<8x512xf32> to vector<8x128xf32>
    %234 = math.tanh %232 : vector<8x128xf32>
    %235 = arith.mulf %233, %234 : vector<8x128xf32>
    %236 = arith.negf %235 : vector<8x128xf32>
    %237 = math.exp %236 : vector<8x128xf32>
    %cst_67 = arith.constant 1.000000e+00 : f32
    %238 = vector.broadcast %cst_67 : f32 to vector<8x128xf32>
    %239 = arith.addf %238, %237 : vector<8x128xf32>
    %240 = arith.divf %238, %239 : vector<8x128xf32>
    %c32_68 = arith.constant 32 : index
    %c0_69 = arith.constant 0 : index
    %241 = vector.load %arg7[%c32_68, %c0_69] : memref<64x128xf32, #tpu.memory_space<vmem>>, vector<8x128xf32>
    tpu.vector_store %arg7[%c32_68, %c0_69], %240 {strides = array<i32>} : memref<64x128xf32, #tpu.memory_space<vmem>>, vector<8x128xf32>,
    %c40 = arith.constant 40 : index
    %c0_70 = arith.constant 0 : index
    %242 = vector.load %arg8[%c40, %c0_70] : memref<64x512xf32, #tpu.memory_space<vmem>>, vector<8x512xf32>
    %cst_71 = arith.constant dense<0.000000e+00> : vector<8x512xf32>
    %243 = tpu.matmul %214, %2, %cst_71 {dimension_numbers = #tpu.dot_dimension_numbers<[1], [0], [0], [1], [0, 0, 1, 1], [], []>} : vector<8x128xf32>, vector<128x512xf32>, vector<8x512xf32> -> vector<8x512xf32>
    %244 = arith.addf %242, %243 : vector<8x512xf32>
    %245 = arith.negf %244 : vector<8x512xf32>
    %246 = math.exp %245 : vector<8x512xf32>
    %cst_72 = arith.constant 1.000000e+00 : f32
    %247 = vector.broadcast %cst_72 : f32 to vector<8x512xf32>
    %248 = arith.addf %247, %246 : vector<8x512xf32>
    %249 = arith.divf %247, %248 : vector<8x512xf32>
    %250 = vector.extract_strided_slice %244 {offsets = [0, 256], sizes = [8, 128], strides = [1, 1]} : vector<8x512xf32> to vector<8x128xf32>
    %251 = math.tanh %250 : vector<8x128xf32>
    %252 = vector.extract_strided_slice %249 {offsets = [0, 128], sizes = [8, 128], strides = [1, 1]} : vector<8x512xf32> to vector<8x128xf32>
    %253 = arith.mulf %252, %211 : vector<8x128xf32>
    %254 = vector.extract_strided_slice %249 {offsets = [0, 0], sizes = [8, 128], strides = [1, 1]} : vector<8x512xf32> to vector<8x128xf32>
    %255 = arith.mulf %254, %251 : vector<8x128xf32>
    %256 = arith.addf %253, %255 : vector<8x128xf32>
    %257 = vector.extract_strided_slice %249 {offsets = [0, 384], sizes = [8, 128], strides = [1, 1]} : vector<8x512xf32> to vector<8x128xf32>
    %258 = math.tanh %256 : vector<8x128xf32>
    %259 = arith.mulf %257, %258 : vector<8x128xf32>
    %cst_73 = arith.constant 0.000000e+00 : f32
    %260 = vector.broadcast %cst_73 : f32 to vector<8x128xf32>
    %261 = arith.maximumf %259, %260 : vector<8x128xf32>
    %cst_74 = arith.constant dense<0.000000e+00> : vector<8x512xf32>
    %262 = tpu.matmul %261, %1, %cst_74 {dimension_numbers = #tpu.dot_dimension_numbers<[1], [0], [0], [1], [0, 0, 1, 1], [], []>} : vector<8x128xf32>, vector<128x512xf32>, vector<8x512xf32> -> vector<8x512xf32>
    %263 = arith.addf %262, %12 : vector<8x512xf32>
    %cst_75 = arith.constant dense<0.000000e+00> : vector<8x512xf32>
    %264 = tpu.matmul %235, %3, %cst_75 {dimension_numbers = #tpu.dot_dimension_numbers<[1], [0], [0], [1], [0, 0, 1, 1], [], []>} : vector<8x128xf32>, vector<128x512xf32>, vector<8x512xf32> -> vector<8x512xf32>
    %265 = arith.addf %263, %264 : vector<8x512xf32>
    %266 = arith.negf %265 : vector<8x512xf32>
    %267 = math.exp %266 : vector<8x512xf32>
    %cst_76 = arith.constant 1.000000e+00 : f32
    %268 = vector.broadcast %cst_76 : f32 to vector<8x512xf32>
    %269 = arith.addf %268, %267 : vector<8x512xf32>
    %270 = arith.divf %268, %269 : vector<8x512xf32>
    %271 = vector.extract_strided_slice %265 {offsets = [0, 256], sizes = [8, 128], strides = [1, 1]} : vector<8x512xf32> to vector<8x128xf32>
    %272 = math.tanh %271 : vector<8x128xf32>
    %273 = vector.extract_strided_slice %270 {offsets = [0, 128], sizes = [8, 128], strides = [1, 1]} : vector<8x512xf32> to vector<8x128xf32>
    %274 = arith.mulf %273, %232 : vector<8x128xf32>
    %275 = vector.extract_strided_slice %270 {offsets = [0, 0], sizes = [8, 128], strides = [1, 1]} : vector<8x512xf32> to vector<8x128xf32>
    %276 = arith.mulf %275, %272 : vector<8x128xf32>
    %277 = arith.addf %274, %276 : vector<8x128xf32>
    %278 = vector.extract_strided_slice %270 {offsets = [0, 384], sizes = [8, 128], strides = [1, 1]} : vector<8x512xf32> to vector<8x128xf32>
    %279 = math.tanh %277 : vector<8x128xf32>
    %280 = arith.mulf %278, %279 : vector<8x128xf32>
    %281 = arith.negf %280 : vector<8x128xf32>
    %282 = math.exp %281 : vector<8x128xf32>
    %cst_77 = arith.constant 1.000000e+00 : f32
    %283 = vector.broadcast %cst_77 : f32 to vector<8x128xf32>
    %284 = arith.addf %283, %282 : vector<8x128xf32>
    %285 = arith.divf %283, %284 : vector<8x128xf32>
    %c40_78 = arith.constant 40 : index
    %c0_79 = arith.constant 0 : index
    %286 = vector.load %arg7[%c40_78, %c0_79] : memref<64x128xf32, #tpu.memory_space<vmem>>, vector<8x128xf32>
    tpu.vector_store %arg7[%c40_78, %c0_79], %285 {strides = array<i32>} : memref<64x128xf32, #tpu.memory_space<vmem>>, vector<8x128xf32>,
    %c48 = arith.constant 48 : index
    %c0_80 = arith.constant 0 : index
    %287 = vector.load %arg8[%c48, %c0_80] : memref<64x512xf32, #tpu.memory_space<vmem>>, vector<8x512xf32>
    %cst_81 = arith.constant dense<0.000000e+00> : vector<8x512xf32>
    %288 = tpu.matmul %259, %2, %cst_81 {dimension_numbers = #tpu.dot_dimension_numbers<[1], [0], [0], [1], [0, 0, 1, 1], [], []>} : vector<8x128xf32>, vector<128x512xf32>, vector<8x512xf32> -> vector<8x512xf32>
    %289 = arith.addf %287, %288 : vector<8x512xf32>
    %290 = arith.negf %289 : vector<8x512xf32>
    %291 = math.exp %290 : vector<8x512xf32>
    %cst_82 = arith.constant 1.000000e+00 : f32
    %292 = vector.broadcast %cst_82 : f32 to vector<8x512xf32>
    %293 = arith.addf %292, %291 : vector<8x512xf32>
    %294 = arith.divf %292, %293 : vector<8x512xf32>
    %295 = vector.extract_strided_slice %289 {offsets = [0, 256], sizes = [8, 128], strides = [1, 1]} : vector<8x512xf32> to vector<8x128xf32>
    %296 = math.tanh %295 : vector<8x128xf32>
    %297 = vector.extract_strided_slice %294 {offsets = [0, 128], sizes = [8, 128], strides = [1, 1]} : vector<8x512xf32> to vector<8x128xf32>
    %298 = arith.mulf %297, %256 : vector<8x128xf32>
    %299 = vector.extract_strided_slice %294 {offsets = [0, 0], sizes = [8, 128], strides = [1, 1]} : vector<8x512xf32> to vector<8x128xf32>
    %300 = arith.mulf %299, %296 : vector<8x128xf32>
    %301 = arith.addf %298, %300 : vector<8x128xf32>
    %302 = vector.extract_strided_slice %294 {offsets = [0, 384], sizes = [8, 128], strides = [1, 1]} : vector<8x512xf32> to vector<8x128xf32>
    %303 = math.tanh %301 : vector<8x128xf32>
    %304 = arith.mulf %302, %303 : vector<8x128xf32>
    %cst_83 = arith.constant 0.000000e+00 : f32
    %305 = vector.broadcast %cst_83 : f32 to vector<8x128xf32>
    %306 = arith.maximumf %304, %305 : vector<8x128xf32>
    %cst_84 = arith.constant dense<0.000000e+00> : vector<8x512xf32>
    %307 = tpu.matmul %306, %1, %cst_84 {dimension_numbers = #tpu.dot_dimension_numbers<[1], [0], [0], [1], [0, 0, 1, 1], [], []>} : vector<8x128xf32>, vector<128x512xf32>, vector<8x512xf32> -> vector<8x512xf32>
    %308 = arith.addf %307, %12 : vector<8x512xf32>
    %cst_85 = arith.constant dense<0.000000e+00> : vector<8x512xf32>
    %309 = tpu.matmul %280, %3, %cst_85 {dimension_numbers = #tpu.dot_dimension_numbers<[1], [0], [0], [1], [0, 0, 1, 1], [], []>} : vector<8x128xf32>, vector<128x512xf32>, vector<8x512xf32> -> vector<8x512xf32>
    %310 = arith.addf %308, %309 : vector<8x512xf32>
    %311 = arith.negf %310 : vector<8x512xf32>
    %312 = math.exp %311 : vector<8x512xf32>
    %cst_86 = arith.constant 1.000000e+00 : f32
    %313 = vector.broadcast %cst_86 : f32 to vector<8x512xf32>
    %314 = arith.addf %313, %312 : vector<8x512xf32>
    %315 = arith.divf %313, %314 : vector<8x512xf32>
    %316 = vector.extract_strided_slice %310 {offsets = [0, 256], sizes = [8, 128], strides = [1, 1]} : vector<8x512xf32> to vector<8x128xf32>
    %317 = math.tanh %316 : vector<8x128xf32>
    %318 = vector.extract_strided_slice %315 {offsets = [0, 128], sizes = [8, 128], strides = [1, 1]} : vector<8x512xf32> to vector<8x128xf32>
    %319 = arith.mulf %318, %277 : vector<8x128xf32>
    %320 = vector.extract_strided_slice %315 {offsets = [0, 0], sizes = [8, 128], strides = [1, 1]} : vector<8x512xf32> to vector<8x128xf32>
    %321 = arith.mulf %320, %317 : vector<8x128xf32>
    %322 = arith.addf %319, %321 : vector<8x128xf32>
    %323 = vector.extract_strided_slice %315 {offsets = [0, 384], sizes = [8, 128], strides = [1, 1]} : vector<8x512xf32> to vector<8x128xf32>
    %324 = math.tanh %322 : vector<8x128xf32>
    %325 = arith.mulf %323, %324 : vector<8x128xf32>
    %326 = arith.negf %325 : vector<8x128xf32>
    %327 = math.exp %326 : vector<8x128xf32>
    %cst_87 = arith.constant 1.000000e+00 : f32
    %328 = vector.broadcast %cst_87 : f32 to vector<8x128xf32>
    %329 = arith.addf %328, %327 : vector<8x128xf32>
    %330 = arith.divf %328, %329 : vector<8x128xf32>
    %c48_88 = arith.constant 48 : index
    %c0_89 = arith.constant 0 : index
    %331 = vector.load %arg7[%c48_88, %c0_89] : memref<64x128xf32, #tpu.memory_space<vmem>>, vector<8x128xf32>
    tpu.vector_store %arg7[%c48_88, %c0_89], %330 {strides = array<i32>} : memref<64x128xf32, #tpu.memory_space<vmem>>, vector<8x128xf32>,
    %c56 = arith.constant 56 : index
    %c0_90 = arith.constant 0 : index
    %332 = vector.load %arg8[%c56, %c0_90] : memref<64x512xf32, #tpu.memory_space<vmem>>, vector<8x512xf32>
    %cst_91 = arith.constant dense<0.000000e+00> : vector<8x512xf32>
    %333 = tpu.matmul %304, %2, %cst_91 {dimension_numbers = #tpu.dot_dimension_numbers<[1], [0], [0], [1], [0, 0, 1, 1], [], []>} : vector<8x128xf32>, vector<128x512xf32>, vector<8x512xf32> -> vector<8x512xf32>
    %334 = arith.addf %332, %333 : vector<8x512xf32>
    %335 = arith.negf %334 : vector<8x512xf32>
    %336 = math.exp %335 : vector<8x512xf32>
    %cst_92 = arith.constant 1.000000e+00 : f32
    %337 = vector.broadcast %cst_92 : f32 to vector<8x512xf32>
    %338 = arith.addf %337, %336 : vector<8x512xf32>
    %339 = arith.divf %337, %338 : vector<8x512xf32>
    %340 = vector.extract_strided_slice %334 {offsets = [0, 256], sizes = [8, 128], strides = [1, 1]} : vector<8x512xf32> to vector<8x128xf32>
    %341 = math.tanh %340 : vector<8x128xf32>
    %342 = vector.extract_strided_slice %339 {offsets = [0, 128], sizes = [8, 128], strides = [1, 1]} : vector<8x512xf32> to vector<8x128xf32>
    %343 = arith.mulf %342, %301 : vector<8x128xf32>
    %344 = vector.extract_strided_slice %339 {offsets = [0, 0], sizes = [8, 128], strides = [1, 1]} : vector<8x512xf32> to vector<8x128xf32>
    %345 = arith.mulf %344, %341 : vector<8x128xf32>
    %346 = arith.addf %343, %345 : vector<8x128xf32>
    %347 = vector.extract_strided_slice %339 {offsets = [0, 384], sizes = [8, 128], strides = [1, 1]} : vector<8x512xf32> to vector<8x128xf32>
    %348 = math.tanh %346 : vector<8x128xf32>
    %349 = arith.mulf %347, %348 : vector<8x128xf32>
    %cst_93 = arith.constant 0.000000e+00 : f32
    %350 = vector.broadcast %cst_93 : f32 to vector<8x128xf32>
    %351 = arith.maximumf %349, %350 : vector<8x128xf32>
    %cst_94 = arith.constant dense<0.000000e+00> : vector<8x512xf32>
    %352 = tpu.matmul %351, %1, %cst_94 {dimension_numbers = #tpu.dot_dimension_numbers<[1], [0], [0], [1], [0, 0, 1, 1], [], []>} : vector<8x128xf32>, vector<128x512xf32>, vector<8x512xf32> -> vector<8x512xf32>
    %353 = arith.addf %352, %12 : vector<8x512xf32>
    %cst_95 = arith.constant dense<0.000000e+00> : vector<8x512xf32>
    %354 = tpu.matmul %325, %3, %cst_95 {dimension_numbers = #tpu.dot_dimension_numbers<[1], [0], [0], [1], [0, 0, 1, 1], [], []>} : vector<8x128xf32>, vector<128x512xf32>, vector<8x512xf32> -> vector<8x512xf32>
    %355 = arith.addf %353, %354 : vector<8x512xf32>
    %356 = arith.negf %355 : vector<8x512xf32>
    %357 = math.exp %356 : vector<8x512xf32>
    %cst_96 = arith.constant 1.000000e+00 : f32
    %358 = vector.broadcast %cst_96 : f32 to vector<8x512xf32>
    %359 = arith.addf %358, %357 : vector<8x512xf32>
    %360 = arith.divf %358, %359 : vector<8x512xf32>
    %361 = vector.extract_strided_slice %355 {offsets = [0, 256], sizes = [8, 128], strides = [1, 1]} : vector<8x512xf32> to vector<8x128xf32>
    %362 = math.tanh %361 : vector<8x128xf32>
    %363 = vector.extract_strided_slice %360 {offsets = [0, 128], sizes = [8, 128], strides = [1, 1]} : vector<8x512xf32> to vector<8x128xf32>
    %364 = arith.mulf %363, %322 : vector<8x128xf32>
    %365 = vector.extract_strided_slice %360 {offsets = [0, 0], sizes = [8, 128], strides = [1, 1]} : vector<8x512xf32> to vector<8x128xf32>
    %366 = arith.mulf %365, %362 : vector<8x128xf32>
    %367 = arith.addf %364, %366 : vector<8x128xf32>
    %368 = vector.extract_strided_slice %360 {offsets = [0, 384], sizes = [8, 128], strides = [1, 1]} : vector<8x512xf32> to vector<8x128xf32>
    %369 = math.tanh %367 : vector<8x128xf32>
    %370 = arith.mulf %368, %369 : vector<8x128xf32>
    %371 = arith.negf %370 : vector<8x128xf32>
    %372 = math.exp %371 : vector<8x128xf32>
    %cst_97 = arith.constant 1.000000e+00 : f32
    %373 = vector.broadcast %cst_97 : f32 to vector<8x128xf32>
    %374 = arith.addf %373, %372 : vector<8x128xf32>
    %375 = arith.divf %373, %374 : vector<8x128xf32>
    %c56_98 = arith.constant 56 : index
    %c0_99 = arith.constant 0 : index
    %376 = vector.load %arg7[%c56_98, %c0_99] : memref<64x128xf32, #tpu.memory_space<vmem>>, vector<8x128xf32>
    tpu.vector_store %arg7[%c56_98, %c0_99], %375 {strides = array<i32>} : memref<64x128xf32, #tpu.memory_space<vmem>>, vector<8x128xf32>,
    return
  }
}

</mosaic_0001>

<bundles_post_ra>
// kernel: lstm_ae_forward.1
= control target key start
LH: loop header
LB: loop body
LE: loop exit
PB: predicated region body
PF: predicated region fallthrough
CT: control target
= control target key end

     0   :  { %v11512_v3 = vmov 0.0   ;;  %s11504_s1 = inlined_call_operand.vmem [shape: f32[128,512], index: 1, kind: input, shape index: {}]   ;;  %s11505_s0 = inlined_call_operand.vmem [shape: f32[64,128], index: 0, kind: input, shape index: {}]   ;;  %s11506_s2 = inlined_call_operand.vmem [shape: f32[128,512], index: 2, kind: input, shape index: {}]   ;;  %s11507_s4 = inlined_call_operand.vmem [shape: f32[128,512], index: 4, kind: input, shape index: {}]   ;;  %s11508_s5 = inlined_call_operand.vmem [shape: f32[128,512], index: 5, kind: input, shape index: {}]   ;;  %s11509_s3 = inlined_call_operand.vmem [shape: f32[1,512], index: 3, kind: input, shape index: {}]   ;;  %s11510_s6 = inlined_call_operand.vmem [shape: f32[1,512], index: 6, kind: input, shape index: {}]   ;;  %s11511_s7 = inlined_call_operand.vmem [shape: f32[64,128], index: 7, kind: output, shape index: {}]  }
   0x1   :  { %v87_v0 = vld [vmem:[%s11504_s1 + $0x1e8] sm:$0xff]  ;;  %v89_v1 = vld [vmem:[%s11504_s1 + $0x1f8] sm:$0xff]  ;;  %v86_v2 = vld [vmem:[%s11504_s1 + $0x1e0] sm:$0xff]  ;;  %377 = vmatprep.mubr.f32.mxu0 %v11512_v3  ;;  %490 = vmatprep.mubr.f32.mxu1 %v11512_v3 }
   0x2   :  { %313 = vmatprep.subr.mxu0 %v87_v0  ;;  %426 = vmatprep.subr.mxu1 %v89_v1  ;;  %v88_v4 = vld [vmem:[%s11504_s1 + $0x1f0] sm:$0xff]  ;;  %v83_v5 = vld [vmem:[%s11504_s1 + $0x1c8] sm:$0xff]  ;;  %v85_v6 = vld [vmem:[%s11504_s1 + $0x1d8] sm:$0xff] }
   0x3   :  { %314 = vmatpush1.msra.mxu0 %v86_v2  ;;  %427 = vmatpush1.msra.mxu1 %v88_v4  ;;  %v82_v7 = vld [vmem:[%s11504_s1 + $0x1c0] sm:$0xff]  ;;  %v84_v8 = vld [vmem:[%s11504_s1 + $0x1d0] sm:$0xff]  ;;  %v79_v9 = vld [vmem:[%s11504_s1 + $0x1a8] sm:$0xff] }
   0x4   :  { %315 = vmatprep.subr.mxu0 %v83_v5  ;;  %428 = vmatprep.subr.mxu1 %v85_v6  ;;  %v81_v10 = vld [vmem:[%s11504_s1 + $0x1b8] sm:$0xff]  ;;  %v78_v11 = vld [vmem:[%s11504_s1 + $0x1a0] sm:$0xff]  ;;  %v80_v12 = vld [vmem:[%s11504_s1 + $0x1b0] sm:$0xff] }
   0x5   :  { %316 = vmatpush1.msra.mxu0 %v82_v7  ;;  %429 = vmatpush1.msra.mxu1 %v84_v8  ;;  %v75_v13 = vld [vmem:[%s11504_s1 + $0x188] sm:$0xff]  ;;  %v77_v14 = vld [vmem:[%s11504_s1 + $0x198] sm:$0xff]  ;;  %v74_v15 = vld [vmem:[%s11504_s1 + $0x180] sm:$0xff] }
   0x6   :  { %317 = vmatprep.subr.mxu0 %v79_v9  ;;  %430 = vmatprep.subr.mxu1 %v81_v10  ;;  %v76_v16 = vld [vmem:[%s11504_s1 + $0x190] sm:$0xff]  ;;  %v71_v17 = vld [vmem:[%s11504_s1 + $0x168] sm:$0xff]  ;;  %v73_v18 = vld [vmem:[%s11504_s1 + $0x178] sm:$0xff] }
   0x7   :  { %318 = vmatpush1.msra.mxu0 %v78_v11  ;;  %431 = vmatpush1.msra.mxu1 %v80_v12  ;;  %v70_v19 = vld [vmem:[%s11504_s1 + $0x160] sm:$0xff]  ;;  %v72_v20 = vld [vmem:[%s11504_s1 + $0x170] sm:$0xff]  ;;  %v67_v21 = vld [vmem:[%s11504_s1 + $0x148] sm:$0xff] }
   0x8   :  { %319 = vmatprep.subr.mxu0 %v75_v13  ;;  %432 = vmatprep.subr.mxu1 %v77_v14  ;;  %v69_v22 = vld [vmem:[%s11504_s1 + $0x158] sm:$0xff]  ;;  %v66_v23 = vld [vmem:[%s11504_s1 + $0x140] sm:$0xff]  ;;  %v68_v24 = vld [vmem:[%s11504_s1 + $0x150] sm:$0xff] }
   0x9   :  { %320 = vmatpush1.msra.mxu0 %v74_v15  ;;  %433 = vmatpush1.msra.mxu1 %v76_v16  ;;  %v63_v25 = vld [vmem:[%s11504_s1 + $0x128] sm:$0xff]  ;;  %v65_v26 = vld [vmem:[%s11504_s1 + $0x138] sm:$0xff]  ;;  %v62_v27 = vld [vmem:[%s11504_s1 + $0x120] sm:$0xff] }
   0xa   :  { %321 = vmatprep.subr.mxu0 %v71_v17  ;;  %434 = vmatprep.subr.mxu1 %v73_v18  ;;  %v64_v28 = vld [vmem:[%s11504_s1 + $0x130] sm:$0xff]  ;;  %v59_v29 = vld [vmem:[%s11504_s1 + $0x108] sm:$0xff]  ;;  %v61_v30 = vld [vmem:[%s11504_s1 + $0x118] sm:$0xff] }
   0xb   :  { %322 = vmatpush1.msra.mxu0 %v70_v19  ;;  %435 = vmatpush1.msra.mxu1 %v72_v20  ;;  %v58_v31 = vld [vmem:[%s11504_s1 + $0x100] sm:$0xff]  ;;  %v60_v32 = vld [vmem:[%s11504_s1 + $0x110] sm:$0xff]  ;;  %v55_v33 = vld [vmem:[%s11504_s1 + $0xe8] sm:$0xff] }
   0xc   :  { %323 = vmatprep.subr.mxu0 %v67_v21  ;;  %436 = vmatprep.subr.mxu1 %v69_v22  ;;  %v57_v34 = vld [vmem:[%s11504_s1 + $0xf8] sm:$0xff]  ;;  %v54_v35 = vld [vmem:[%s11504_s1 + $0xe0] sm:$0xff]  ;;  %v56_v36 = vld [vmem:[%s11504_s1 + $0xf0] sm:$0xff] }
   0xd   :  { %324 = vmatpush1.msra.mxu0 %v66_v23  ;;  %437 = vmatpush1.msra.mxu1 %v68_v24  ;;  %v51_v37 = vld [vmem:[%s11504_s1 + $0xc8] sm:$0xff]  ;;  %v53_v38 = vld [vmem:[%s11504_s1 + $0xd8] sm:$0xff]  ;;  %v50_v39 = vld [vmem:[%s11504_s1 + $0xc0] sm:$0xff] }
   0xe   :  { %325 = vmatprep.subr.mxu0 %v63_v25  ;;  %438 = vmatprep.subr.mxu1 %v65_v26  ;;  %v52_v40 = vld [vmem:[%s11504_s1 + $0xd0] sm:$0xff]  ;;  %v47_v41 = vld [vmem:[%s11504_s1 + $0xa8] sm:$0xff]  ;;  %v49_v42 = vld [vmem:[%s11504_s1 + $0xb8] sm:$0xff] }
   0xf   :  { %326 = vmatpush1.msra.mxu0 %v62_v27  ;;  %439 = vmatpush1.msra.mxu1 %v64_v28  ;;  %v46_v43 = vld [vmem:[%s11504_s1 + $0xa0] sm:$0xff]  ;;  %v48_v44 = vld [vmem:[%s11504_s1 + $0xb0] sm:$0xff]  ;;  %v43_v45 = vld [vmem:[%s11504_s1 + $0x88] sm:$0xff] }
  0x10   :  { %327 = vmatprep.subr.mxu0 %v59_v29  ;;  %440 = vmatprep.subr.mxu1 %v61_v30  ;;  %v45_v46 = vld [vmem:[%s11504_s1 + $0x98] sm:$0xff]  ;;  %v42_v47 = vld [vmem:[%s11504_s1 + $0x80] sm:$0xff]  ;;  %v44_v48 = vld [vmem:[%s11504_s1 + $0x90] sm:$0xff] }
  0x11   :  { %328 = vmatpush1.msra.mxu0 %v58_v31  ;;  %441 = vmatpush1.msra.mxu1 %v60_v32  ;;  %v39_v49 = vld [vmem:[%s11504_s1 + $0x68] sm:$0xff]  ;;  %v41_v50 = vld [vmem:[%s11504_s1 + $0x78] sm:$0xff]  ;;  %v38_v51 = vld [vmem:[%s11504_s1 + $0x60] sm:$0xff] }
  0x12   :  { %329 = vmatprep.subr.mxu0 %v55_v33  ;;  %442 = vmatprep.subr.mxu1 %v57_v34  ;;  %v40_v52 = vld [vmem:[%s11504_s1 + $0x70] sm:$0xff]  ;;  %v35_v53 = vld [vmem:[%s11504_s1 + $0x48] sm:$0xff]  ;;  %v37_v54 = vld [vmem:[%s11504_s1 + $0x58] sm:$0xff] }
  0x13   :  { %330 = vmatpush1.msra.mxu0 %v54_v35  ;;  %443 = vmatpush1.msra.mxu1 %v56_v36  ;;  %v34_v55 = vld [vmem:[%s11504_s1 + $0x40] sm:$0xff]  ;;  %v36_v56 = vld [vmem:[%s11504_s1 + $0x50] sm:$0xff]  ;;  %v31_v57 = vld [vmem:[%s11504_s1 + $0x28] sm:$0xff] }
  0x14   :  { %331 = vmatprep.subr.mxu0 %v51_v37  ;;  %444 = vmatprep.subr.mxu1 %v53_v38  ;;  %v33_v58 = vld [vmem:[%s11504_s1 + $0x38] sm:$0xff]  ;;  %v30_v59 = vld [vmem:[%s11504_s1 + $0x20] sm:$0xff]  ;;  %v32_v60 = vld [vmem:[%s11504_s1 + $0x30] sm:$0xff] }
  0x15   :  { %332 = vmatpush1.msra.mxu0 %v50_v39  ;;  %445 = vmatpush1.msra.mxu1 %v52_v40  ;;  %v27_v61 = vld [vmem:[%s11504_s1 + $0x8] sm:$0xff]  ;;  %v29_v62 = vld [vmem:[%s11504_s1 + $0x18] sm:$0xff]  ;;  %v26_v63 = vld [vmem:[%s11504_s1] sm:$0xff] }
  0x16   :  { %333 = vmatprep.subr.mxu0 %v47_v41  ;;  %446 = vmatprep.subr.mxu1 %v49_v42  ;;  %v28_v0 = vld [vmem:[%s11504_s1 + $0x10] sm:$0xff]  ;;  %v284_v1 = vld [vmem:[%s11505_s0] sm:$0xff]  ;;  %v215_v2 = vld [vmem:[%s11506_s2 + $0x1e8] sm:$0xff] }
  0x17   :  { %334 = vmatpush1.msra.mxu0 %v46_v43  ;;  %447 = vmatpush1.msra.mxu1 %v48_v44  ;;  %v217_v4 = vld [vmem:[%s11506_s2 + $0x1f8] sm:$0xff]  ;;  %v214_v5 = vld [vmem:[%s11506_s2 + $0x1e0] sm:$0xff]  ;;  %v216_v6 = vld [vmem:[%s11506_s2 + $0x1f0] sm:$0xff] }
  0x18   :  { %335 = vmatprep.subr.mxu0 %v43_v45  ;;  %448 = vmatprep.subr.mxu1 %v45_v46  ;;  %v211_v7 = vld [vmem:[%s11506_s2 + $0x1c8] sm:$0xff]  ;;  %v213_v8 = vld [vmem:[%s11506_s2 + $0x1d8] sm:$0xff]  ;;  %v210_v9 = vld [vmem:[%s11506_s2 + $0x1c0] sm:$0xff] }
  0x19   :  { %336 = vmatpush1.msra.mxu0 %v42_v47  ;;  %449 = vmatpush1.msra.mxu1 %v44_v48  ;;  %v212_v10 = vld [vmem:[%s11506_s2 + $0x1d0] sm:$0xff]  ;;  %v285_v11 = vld [vmem:[%s11505_s0 + $0x8] sm:$0xff]  ;;  %v209_v13 = vld [vmem:[%s11506_s2 + $0x1b8] sm:$0xff] }
  0x1a   :  { %337 = vmatprep.subr.mxu0 %v39_v49  ;;  %450 = vmatprep.subr.mxu1 %v41_v50  ;;  %v207_v12 = vld [vmem:[%s11506_s2 + $0x1a8] sm:$0xff]  ;;  %v206_v14 = vld [vmem:[%s11506_s2 + $0x1a0] sm:$0xff]  ;;  %v208_v15 = vld [vmem:[%s11506_s2 + $0x1b0] sm:$0xff] }
  0x1b   :  { %338 = vmatpush1.msra.mxu0 %v38_v51  ;;  %451 = vmatpush1.msra.mxu1 %v40_v52  ;;  %v203_v16 = vld [vmem:[%s11506_s2 + $0x188] sm:$0xff]  ;;  %v205_v17 = vld [vmem:[%s11506_s2 + $0x198] sm:$0xff]  ;;  %v202_v18 = vld [vmem:[%s11506_s2 + $0x180] sm:$0xff] }
  0x1c   :  { %339 = vmatprep.subr.mxu0 %v35_v53  ;;  %452 = vmatprep.subr.mxu1 %v37_v54  ;;  %v204_v19 = vld [vmem:[%s11506_s2 + $0x190] sm:$0xff]  ;;  %v199_v21 = vld [vmem:[%s11506_s2 + $0x168] sm:$0xff]  ;;  %v201_v22 = vld [vmem:[%s11506_s2 + $0x178] sm:$0xff] }
  0x1d   :  { %340 = vmatpush1.msra.mxu0 %v34_v55  ;;  %453 = vmatpush1.msra.mxu1 %v36_v56  ;;  %v286_v20 = vld [vmem:[%s11505_s0 + $0x10] sm:$0xff]  ;;  %v198_v23 = vld [vmem:[%s11506_s2 + $0x160] sm:$0xff]  ;;  %v195_v25 = vld [vmem:[%s11506_s2 + $0x148] sm:$0xff] }
  0x1e   :  { %341 = vmatprep.subr.mxu0 %v31_v57  ;;  %454 = vmatprep.subr.mxu1 %v33_v58  ;;  %v200_v24 = vld [vmem:[%s11506_s2 + $0x170] sm:$0xff]  ;;  %v197_v26 = vld [vmem:[%s11506_s2 + $0x158] sm:$0xff]  ;;  %v194_v27 = vld [vmem:[%s11506_s2 + $0x140] sm:$0xff] }
  0x1f   :  { %342 = vmatpush1.msra.mxu0 %v30_v59  ;;  %455 = vmatpush1.msra.mxu1 %v32_v60  ;;  %v196_v28 = vld [vmem:[%s11506_s2 + $0x150] sm:$0xff]  ;;  %v287_v29 = vld [vmem:[%s11505_s0 + $0x18] sm:$0xff]  ;;  %v5821_v30 = vld [vmem:[%s11506_s2 + $0x128] sm:$0xff] }
  0x20   :  { %343 = vmatprep.subr.mxu0 %v27_v61  ;;  %456 = vmatprep.subr.mxu1 %v29_v62  ;;  %v5826_v31 = vld [vmem:[%s11506_s2 + $0x138] sm:$0xff]  ;;  %v5831_v32 = vld [vmem:[%s11506_s2 + $0x120] sm:$0xff]  ;;  %v5836_v33 = vld [vmem:[%s11506_s2 + $0x130] sm:$0xff] }
  0x21   :  { %344 = vmatpush1.msra.mxu0 %v26_v63  ;;  %457 = vmatpush1.msra.mxu1 %v28_v0  ;;  %v5841_v34 = vld [vmem:[%s11506_s2 + $0x108] sm:$0xff]  ;;  %v5846_v35 = vld [vmem:[%s11506_s2 + $0x118] sm:$0xff]  ;;  %v5855_v36 = vld [vmem:[%s11506_s2 + $0x100] sm:$0xff] }
  0x22   :  { %378 = vmatmul.mubr.f32.vlgmr.msra.gmra.mxu0 %v284_v1  ;;  %491 = vmatmul.mubr.f32.vlgmr.msra.gmra.mxu1 %v284_v1  ;;  %v5860_v37 = vld [vmem:[%s11506_s2 + $0x110] sm:$0xff]  ;;  %v288_v38 = vld [vmem:[%s11505_s0 + $0x20] sm:$0xff]  ;;  %v5872_v39 = vld [vmem:[%s11506_s2 + $0xe8] sm:$0xff] }
  0x23   :  { %596 = vmatprep.subr.mxu0 %v215_v2  ;;  %667 = vmatprep.subr.mxu1 %v217_v4  ;;  %v5877_v40 = vld [vmem:[%s11506_s2 + $0xf8] sm:$0xff]  ;;  %v5884_v41 = vld [vmem:[%s11506_s2 + $0xe0] sm:$0xff]  ;;  %v5889_v42 = vld [vmem:[%s11506_s2 + $0xf0] sm:$0xff] }
  0x24   :  { %597 = vmatpush1.msra.mxu0 %v214_v5  ;;  %668 = vmatpush1.msra.mxu1 %v216_v6  ;;  %v5894_v43 = vld [vmem:[%s11506_s2 + $0xc8] sm:$0xff]  ;;  %v5899_v44 = vld [vmem:[%s11506_s2 + $0xd8] sm:$0xff]  ;;  %v5908_v45 = vld [vmem:[%s11506_s2 + $0xc0] sm:$0xff] }
  0x25   :  { %598 = vmatprep.subr.mxu0 %v211_v7  ;;  %669 = vmatprep.subr.mxu1 %v213_v8  ;;  %v5913_v46 = vld [vmem:[%s11506_s2 + $0xd0] sm:$0xff]  ;;  %v289_v47 = vld [vmem:[%s11505_s0 + $0x28] sm:$0xff]  ;;  %v5930_v49 = vld [vmem:[%s11506_s2 + $0xb8] sm:$0xff] }
  0x26   :  { %383 = vmatprep.mubr.f32.mxu0 %v11512_v3  ;;  %496 = vmatprep.mubr.f32.mxu1 %v11512_v3  ;;  %v5925_v48 = vld [vmem:[%s11506_s2 + $0xa8] sm:$0xff]  ;;  %v5937_v50 = vld [vmem:[%s11506_s2 + $0xa0] sm:$0xff]  ;;  %v5942_v51 = vld [vmem:[%s11506_s2 + $0xb0] sm:$0xff] }
  0x27   :  { %599 = vmatpush1.msra.mxu0 %v210_v9  ;;  %670 = vmatpush1.msra.mxu1 %v212_v10  ;;  %v5947_v52 = vld [vmem:[%s11506_s2 + $0x88] sm:$0xff]  ;;  %v5952_v53 = vld [vmem:[%s11506_s2 + $0x98] sm:$0xff]  ;;  %v5961_v54 = vld [vmem:[%s11506_s2 + $0x80] sm:$0xff] }
  0x28   :  { %384 = vmatmul.mubr.f32.gmra.mxu0 %v285_v11  ;;  %497 = vmatmul.mubr.f32.gmra.mxu1 %v285_v11  ;;  %v5966_v55 = vld [vmem:[%s11506_s2 + $0x90] sm:$0xff]  ;;  %v5978_v57 = vld [vmem:[%s11506_s2 + $0x68] sm:$0xff]  ;;  %v5983_v58 = vld [vmem:[%s11506_s2 + $0x78] sm:$0xff] }
  0x29   :  { %600 = vmatprep.subr.mxu0 %v207_v12  ;;  %671 = vmatprep.subr.mxu1 %v209_v13  ;;  %v290_v56 = vld [vmem:[%s11505_s0 + $0x30] sm:$0xff]  ;;  %v5990_v59 = vld [vmem:[%s11506_s2 + $0x60] sm:$0xff]  ;;  %v6000_v61 = vld [vmem:[%s11506_s2 + $0x48] sm:$0xff] }
  0x2a   :  { %601 = vmatpush1.msra.mxu0 %v206_v14  ;;  %672 = vmatpush1.msra.mxu1 %v208_v15  ;;  %v5995_v60 = vld [vmem:[%s11506_s2 + $0x70] sm:$0xff]  ;;  %v6005_v62 = vld [vmem:[%s11506_s2 + $0x58] sm:$0xff]  ;;  %v6014_v63 = vld [vmem:[%s11506_s2 + $0x40] sm:$0xff] }
  0x2b   :  { %602 = vmatprep.subr.mxu0 %v203_v16  ;;  %673 = vmatprep.subr.mxu1 %v205_v17  ;;  %v6019_v0 = vld [vmem:[%s11506_s2 + $0x50] sm:$0xff]  ;;  %v291_v1 = vld [vmem:[%s11505_s0 + $0x38] sm:$0xff]  ;;  %v6031_v2 = vld [vmem:[%s11506_s2 + $0x28] sm:$0xff] }
  0x2c   :  { %389 = vmatprep.mubr.f32.mxu0 %v11512_v3  ;;  %502 = vmatprep.mubr.f32.mxu1 %v11512_v3  ;;  %v6036_v4 = vld [vmem:[%s11506_s2 + $0x38] sm:$0xff]  ;;  %v6043_v5 = vld [vmem:[%s11506_s2 + $0x20] sm:$0xff]  ;;  %v6048_v6 = vld [vmem:[%s11506_s2 + $0x30] sm:$0xff] }
  0x2d   :  { %603 = vmatpush1.msra.mxu0 %v202_v18  ;;  %674 = vmatpush1.msra.mxu1 %v204_v19  ;;  %v6053_v7 = vld [vmem:[%s11506_s2 + $0x8] sm:$0xff]  ;;  %v6058_v8 = vld [vmem:[%s11506_s2 + $0x18] sm:$0xff]  ;;  %v6065_v9 = vld [vmem:[%s11506_s2] sm:$0xff] }
  0x2e   :  { %390 = vmatmul.mubr.f32.gmra.mxu0 %v286_v20  ;;  %503 = vmatmul.mubr.f32.gmra.mxu1 %v286_v20  ;;  %v6072_v10 = vld [vmem:[%s11506_s2 + $0x10] sm:$0xff]  ;;  %v6087_v11 = vld [vmem:[%s11507_s4 + $0x1e8] sm:$0xff]  ;;  %v6092_v12 = vld [vmem:[%s11507_s4 + $0x1f8] sm:$0xff] }
  0x2f   :  { %604 = vmatprep.subr.mxu0 %v199_v21  ;;  %675 = vmatprep.subr.mxu1 %v201_v22  ;;  %12040 = vst [vmem:[#allocation3_spill] sm:$0xff] %v6092_v12  ;;  %v6099_v13 = vld [vmem:[%s11507_s4 + $0x1e0] sm:$0xff]  ;;  %v6104_v14 = vld [vmem:[%s11507_s4 + $0x1f0] sm:$0xff]  ;;  %v6111_v15 = vld [vmem:[%s11507_s4 + $0x1c8] sm:$0xff] }
  0x30   :  { %605 = vmatpush1.msra.mxu0 %v198_v23  ;;  %676 = vmatpush1.msra.mxu1 %v200_v24  ;;  %12041 = vst [vmem:[#allocation4_spill] sm:$0xff] %v6099_v13  ;;  %12042 = vst [vmem:[#allocation5_spill] sm:$0xff] %v6104_v14  ;;  %v6116_v16 = vld [vmem:[%s11507_s4 + $0x1d8] sm:$0xff]  ;;  %v6123_v17 = vld [vmem:[%s11507_s4 + $0x1c0] sm:$0xff] }
  0x31   :  { %606 = vmatprep.subr.mxu0 %v195_v25  ;;  %677 = vmatprep.subr.mxu1 %v197_v26  ;;  %12043 = vst [vmem:[#allocation6_spill] sm:$0xff] %v6111_v15  ;;  %12044 = vst [vmem:[#allocation7_spill] sm:$0xff] %v6116_v16  ;;  %v6128_v18 = vld [vmem:[%s11507_s4 + $0x1d0] sm:$0xff]  ;;  %v6135_v19 = vld [vmem:[%s11507_s4 + $0x1a8] sm:$0xff] }
  0x32   :  { %395 = vmatprep.mubr.f32.mxu0 %v11512_v3  ;;  %508 = vmatprep.mubr.f32.mxu1 %v11512_v3  ;;  %12045 = vst [vmem:[#allocation8_spill] sm:$0xff] %v6123_v17  ;;  %12046 = vst [vmem:[#allocation9_spill] sm:$0xff] %v6128_v18  ;;  %v6140_v20 = vld [vmem:[%s11507_s4 + $0x1b8] sm:$0xff]  ;;  %v6147_v21 = vld [vmem:[%s11507_s4 + $0x1a0] sm:$0xff] }
  0x33   :  { %607 = vmatpush1.msra.mxu0 %v194_v27  ;;  %678 = vmatpush1.msra.mxu1 %v196_v28  ;;  %12047 = vst [vmem:[#allocation10_spill] sm:$0xff] %v6135_v19  ;;  %12048 = vst [vmem:[#allocation11_spill] sm:$0xff] %v6140_v20  ;;  %v6152_v22 = vld [vmem:[%s11507_s4 + $0x1b0] sm:$0xff]  ;;  %v6159_v23 = vld [vmem:[%s11507_s4 + $0x188] sm:$0xff] }
  0x34   :  { %396 = vmatmul.mubr.f32.gmra.mxu0 %v287_v29  ;;  %509 = vmatmul.mubr.f32.gmra.mxu1 %v287_v29  ;;  %12049 = vst [vmem:[#allocation12_spill] sm:$0xff] %v6147_v21  ;;  %12050 = vst [vmem:[#allocation13_spill] sm:$0xff] %v6152_v22  ;;  %v6164_v24 = vld [vmem:[%s11507_s4 + $0x198] sm:$0xff]  ;;  %v6171_v25 = vld [vmem:[%s11507_s4 + $0x180] sm:$0xff] }
  0x35   :  { %608 = vmatprep.subr.mxu0 %v5821_v30  ;;  %679 = vmatprep.subr.mxu1 %v5826_v31  ;;  %12051 = vst [vmem:[#allocation14_spill] sm:$0xff] %v6159_v23  ;;  %12052 = vst [vmem:[#allocation15_spill] sm:$0xff] %v6164_v24  ;;  %v6176_v26 = vld [vmem:[%s11507_s4 + $0x190] sm:$0xff]  ;;  %v6183_v27 = vld [vmem:[%s11507_s4 + $0x168] sm:$0xff] }
  0x36   :  { %609 = vmatpush1.msra.mxu0 %v5831_v32  ;;  %680 = vmatpush1.msra.mxu1 %v5836_v33  ;;  %12053 = vst [vmem:[#allocation16_spill] sm:$0xff] %v6171_v25  ;;  %12054 = vst [vmem:[#allocation17_spill] sm:$0xff] %v6176_v26  ;;  %v6188_v28 = vld [vmem:[%s11507_s4 + $0x178] sm:$0xff]  ;;  %v6195_v29 = vld [vmem:[%s11507_s4 + $0x160] sm:$0xff] }
  0x37   :  { %610 = vmatprep.subr.mxu0 %v5841_v34  ;;  %681 = vmatprep.subr.mxu1 %v5846_v35  ;;  %12055 = vst [vmem:[#allocation18_spill] sm:$0xff] %v6183_v27  ;;  %12056 = vst [vmem:[#allocation19_spill] sm:$0xff] %v6188_v28 }
  0x38   :  { %401 = vmatprep.mubr.f32.mxu0 %v11512_v3  ;;  %514 = vmatprep.mubr.f32.mxu1 %v11512_v3  ;;  %12057 = vst [vmem:[#allocation20_spill] sm:$0xff] %v6195_v29 }
  0x39   :  { %611 = vmatpush1.msra.mxu0 %v5855_v36  ;;  %682 = vmatpush1.msra.mxu1 %v5860_v37 }
  0x3a   :  { %402 = vmatmul.mubr.f32.gmra.mxu0 %v288_v38  ;;  %515 = vmatmul.mubr.f32.gmra.mxu1 %v288_v38  ;;  %v6200_v38 = vld [vmem:[%s11507_s4 + $0x170] sm:$0xff] }
  0x3b   :  { %612 = vmatprep.subr.mxu0 %v5872_v39  ;;  %683 = vmatprep.subr.mxu1 %v5877_v40  ;;  %12058 = vst [vmem:[#allocation21_spill] sm:$0xff] %v6200_v38 }
  0x3c   :  { %613 = vmatpush1.msra.mxu0 %v5884_v41  ;;  %684 = vmatpush1.msra.mxu1 %v5889_v42 }
  0x3d   :  { %614 = vmatprep.subr.mxu0 %v5894_v43  ;;  %685 = vmatprep.subr.mxu1 %v5899_v44 }
  0x3e   :  { %407 = vmatprep.mubr.f32.mxu0 %v11512_v3  ;;  %520 = vmatprep.mubr.f32.mxu1 %v11512_v3 }
  0x3f   :  { %615 = vmatpush1.msra.mxu0 %v5908_v45  ;;  %686 = vmatpush1.msra.mxu1 %v5913_v46 }
  0x40   :  { %408 = vmatmul.mubr.f32.gmra.mxu0 %v289_v47  ;;  %521 = vmatmul.mubr.f32.gmra.mxu1 %v289_v47  ;;  %v6207_v47 = vld [vmem:[%s11507_s4 + $0x148] sm:$0xff] }
  0x41   :  { %616 = vmatprep.subr.mxu0 %v5925_v48  ;;  %687 = vmatprep.subr.mxu1 %v5930_v49  ;;  %12059 = vst [vmem:[#allocation22_spill] sm:$0xff] %v6207_v47 }
  0x42   :  { %617 = vmatpush1.msra.mxu0 %v5937_v50  ;;  %688 = vmatpush1.msra.mxu1 %v5942_v51 }
  0x43   :  { %618 = vmatprep.subr.mxu0 %v5947_v52  ;;  %689 = vmatprep.subr.mxu1 %v5952_v53 }
  0x44   :  { %413 = vmatprep.mubr.f32.mxu0 %v11512_v3  ;;  %526 = vmatprep.mubr.f32.mxu1 %v11512_v3 }
  0x45   :  { %619 = vmatpush1.msra.mxu0 %v5961_v54  ;;  %690 = vmatpush1.msra.mxu1 %v5966_v55 }
  0x46   :  { %414 = vmatmul.mubr.f32.gmra.mxu0 %v290_v56  ;;  %527 = vmatmul.mubr.f32.gmra.mxu1 %v290_v56  ;;  %v6212_v56 = vld [vmem:[%s11507_s4 + $0x158] sm:$0xff] }
  0x47   :  { %620 = vmatprep.subr.mxu0 %v5978_v57  ;;  %691 = vmatprep.subr.mxu1 %v5983_v58  ;;  %12060 = vst [vmem:[#allocation23_spill] sm:$0xff] %v6212_v56 }
  0x48   :  { %621 = vmatpush1.msra.mxu0 %v5990_v59  ;;  %692 = vmatpush1.msra.mxu1 %v5995_v60 }
  0x49   :  { %622 = vmatprep.subr.mxu0 %v6000_v61  ;;  %693 = vmatprep.subr.mxu1 %v6005_v62 }
  0x4a   :  { %419 = vmatprep.mubr.f32.mxu0 %v11512_v3  ;;  %532 = vmatprep.mubr.f32.mxu1 %v11512_v3 }
  0x4b   :  { %623 = vmatpush1.msra.mxu0 %v6014_v63  ;;  %694 = vmatpush1.msra.mxu1 %v6019_v0 }
  0x4c   :  { %420 = vmatmul.mubr.f32.gmra.mxu0 %v291_v1  ;;  %533 = vmatmul.mubr.f32.gmra.mxu1 %v291_v1  ;;  %v6219_v1 = vld [vmem:[%s11507_s4 + $0x140] sm:$0xff] }
  0x4d   :  { %624 = vmatprep.subr.mxu0 %v6031_v2  ;;  %695 = vmatprep.subr.mxu1 %v6036_v4  ;;  %12061 = vst [vmem:[#allocation24_spill] sm:$0xff] %v6219_v1 }
  0x4e   :  { %625 = vmatpush1.msra.mxu0 %v6043_v5  ;;  %696 = vmatpush1.msra.mxu1 %v6048_v6 }
  0x4f   :  { %626 = vmatprep.subr.mxu0 %v6053_v7  ;;  %697 = vmatprep.subr.mxu1 %v6058_v8 }
  0x50   :  { %627 = vmatpush1.msra.mxu0 %v6065_v9  ;;  %660 = vmatprep.mubr.f32.mxu0 %v11512_v3 }
  0x51   :  { %698 = vmatpush1.msra.mxu1 %v6072_v10  ;;  %731 = vmatprep.mubr.f32.mxu1 %v11512_v3 }
  0x52   :  { %661 = vmatmul.mubr.f32.vlgmr.msra.gmra.mxu0 %v11512_v3  ;;  %732 = vmatmul.mubr.f32.vlgmr.msra.gmra.mxu1 %v11512_v3 }
  0x53   :  { %831 = vmatprep.mubr.f32.mxu0 %v11512_v3  ;;  %902 = vmatprep.mubr.f32.mxu1 %v11512_v3  ;;  %v6224_v3 = vld [vmem:[%s11507_s4 + $0x150] sm:$0xff] }
  0x54   :  { %767 = vmatprep.subr.mxu0 %v6087_v11  ;;  %838 = vmatprep.subr.mxu1 %v6092_v12  ;;  %12062 = vst [vmem:[#allocation25_spill] sm:$0xff] %v6224_v3 }
  0x55   :  { %768 = vmatpush1.msra.mxu0 %v6099_v13  ;;  %839 = vmatpush1.msra.mxu1 %v6104_v14 }
  0x56   :  { %769 = vmatprep.subr.mxu0 %v6111_v15  ;;  %840 = vmatprep.subr.mxu1 %v6116_v16 }
  0x57   :  { %770 = vmatpush1.msra.mxu0 %v6123_v17  ;;  %841 = vmatpush1.msra.mxu1 %v6128_v18 }
  0x58   :  { %771 = vmatprep.subr.mxu0 %v6135_v19  ;;  %842 = vmatprep.subr.mxu1 %v6140_v20 }
  0x59   :  { %772 = vmatpush1.msra.mxu0 %v6147_v21  ;;  %843 = vmatpush1.msra.mxu1 %v6152_v22 }
  0x5a   :  { %773 = vmatprep.subr.mxu0 %v6159_v23  ;;  %844 = vmatprep.subr.mxu1 %v6164_v24 }
  0x5b   :  { %774 = vmatpush1.msra.mxu0 %v6171_v25  ;;  %845 = vmatpush1.msra.mxu1 %v6176_v26 }
  0x5c   :  { %775 = vmatprep.subr.mxu0 %v6183_v27  ;;  %846 = vmatprep.subr.mxu1 %v6188_v28  ;;  %v6311_v28 = vld [vmem:[%s11507_s4 + $0xc0] sm:$0xff]  ;;  %v6328_v27 = vld [vmem:[%s11507_s4 + $0xb8] sm:$0xff] }
  0x5d   :  { %776 = vmatpush1.msra.mxu0 %v6195_v29  ;;  %847 = vmatpush1.msra.mxu1 %v6200_v38  ;;  %v6277_v38 = vld [vmem:[%s11507_s4 + $0xe8] sm:$0xff]  ;;  %v6294_v29 = vld [vmem:[%s11507_s4 + $0xf0] sm:$0xff]  ;;  %12077 = vst [vmem:[#allocation40_spill] sm:$0xff] %v6311_v28  ;;  %12080 = vst [vmem:[#allocation43_spill] sm:$0xff] %v6328_v27 }
  0x5e   :  { %777 = vmatprep.subr.mxu0 %v6207_v47  ;;  %848 = vmatprep.subr.mxu1 %v6212_v56  ;;  %v6231_v47 = vld [vmem:[%s11507_s4 + $0x128] sm:$0xff]  ;;  %v6236_v56 = vld [vmem:[%s11507_s4 + $0x138] sm:$0xff]  ;;  %12071 = vst [vmem:[#allocation34_spill] sm:$0xff] %v6277_v38  ;;  %12074 = vst [vmem:[#allocation37_spill] sm:$0xff] %v6294_v29 }
  0x5f   :  { %778 = vmatpush1.msra.mxu0 %v6219_v1  ;;  %849 = vmatpush1.msra.mxu1 %v6224_v3  ;;  %12063 = vst [vmem:[#allocation26_spill] sm:$0xff] %v6231_v47  ;;  %12064 = vst [vmem:[#allocation27_spill] sm:$0xff] %v6236_v56  ;;  %v6243_v1 = vld [vmem:[%s11507_s4 + $0x120] sm:$0xff]  ;;  %v6248_v3 = vld [vmem:[%s11507_s4 + $0x130] sm:$0xff] }
  0x60   :  { %779 = vmatprep.subr.mxu0 %v6231_v47  ;;  %850 = vmatprep.subr.mxu1 %v6236_v56  ;;  %12065 = vst [vmem:[#allocation28_spill] sm:$0xff] %v6243_v1  ;;  %12066 = vst [vmem:[#allocation29_spill] sm:$0xff] %v6248_v3  ;;  %v6255_v47 = vld [vmem:[%s11507_s4 + $0x108] sm:$0xff]  ;;  %v6260_v56 = vld [vmem:[%s11507_s4 + $0x118] sm:$0xff] }
  0x61   :  { %780 = vmatpush1.msra.mxu0 %v6243_v1  ;;  %851 = vmatpush1.msra.mxu1 %v6248_v3  ;;  %12067 = vst [vmem:[#allocation30_spill] sm:$0xff] %v6255_v47  ;;  %12068 = vst [vmem:[#allocation31_spill] sm:$0xff] %v6260_v56  ;;  %v6267_v1 = vld [vmem:[%s11507_s4 + $0x100] sm:$0xff]  ;;  %v6272_v3 = vld [vmem:[%s11507_s4 + $0x110] sm:$0xff] }
  0x62   :  { %781 = vmatprep.subr.mxu0 %v6255_v47  ;;  %852 = vmatprep.subr.mxu1 %v6260_v56  ;;  %12069 = vst [vmem:[#allocation32_spill] sm:$0xff] %v6267_v1  ;;  %12070 = vst [vmem:[#allocation33_spill] sm:$0xff] %v6272_v3  ;;  %v6284_v56 = vld [vmem:[%s11507_s4 + $0xf8] sm:$0xff]  ;;  %v6289_v47 = vld [vmem:[%s11507_s4 + $0xe0] sm:$0xff] }
  0x63   :  { %782 = vmatpush1.msra.mxu0 %v6267_v1  ;;  %853 = vmatpush1.msra.mxu1 %v6272_v3  ;;  %12072 = vst [vmem:[#allocation35_spill] sm:$0xff] %v6284_v56  ;;  %12073 = vst [vmem:[#allocation36_spill] sm:$0xff] %v6289_v47  ;;  %v6301_v3 = vld [vmem:[%s11507_s4 + $0xc8] sm:$0xff]  ;;  %v6306_v1 = vld [vmem:[%s11507_s4 + $0xd8] sm:$0xff] }
  0x64   :  { %783 = vmatprep.subr.mxu0 %v6277_v38  ;;  %854 = vmatprep.subr.mxu1 %v6284_v56  ;;  %12075 = vst [vmem:[#allocation38_spill] sm:$0xff] %v6301_v3  ;;  %12076 = vst [vmem:[#allocation39_spill] sm:$0xff] %v6306_v1  ;;  %v6318_v56 = vld [vmem:[%s11507_s4 + $0xd0] sm:$0xff]  ;;  %v6323_v38 = vld [vmem:[%s11507_s4 + $0xa8] sm:$0xff] }
  0x65   :  { %784 = vmatpush1.msra.mxu0 %v6289_v47  ;;  %855 = vmatpush1.msra.mxu1 %v6294_v29  ;;  %12078 = vst [vmem:[#allocation41_spill] sm:$0xff] %v6318_v56  ;;  %12079 = vst [vmem:[#allocation42_spill] sm:$0xff] %v6323_v38  ;;  %v6335_v29 = vld [vmem:[%s11507_s4 + $0xa0] sm:$0xff]  ;;  %v6340_v47 = vld [vmem:[%s11507_s4 + $0xb0] sm:$0xff] }
  0x66   :  { %785 = vmatprep.subr.mxu0 %v6301_v3  ;;  %856 = vmatprep.subr.mxu1 %v6306_v1  ;;  %12081 = vst [vmem:[#allocation44_spill] sm:$0xff] %v6335_v29  ;;  %12082 = vst [vmem:[#allocation45_spill] sm:$0xff] %v6340_v47  ;;  %v6347_v3 = vld [vmem:[%s11507_s4 + $0x88] sm:$0xff]  ;;  %v6352_v1 = vld [vmem:[%s11507_s4 + $0x98] sm:$0xff] }
  0x67   :  { %786 = vmatpush1.msra.mxu0 %v6311_v28  ;;  %857 = vmatpush1.msra.mxu1 %v6318_v56  ;;  %12083 = vst [vmem:[#allocation46_spill] sm:$0xff] %v6347_v3  ;;  %12084 = vst [vmem:[#allocation47_spill] sm:$0xff] %v6352_v1  ;;  %v6359_v28 = vld [vmem:[%s11507_s4 + $0x80] sm:$0xff]  ;;  %v6364_v56 = vld [vmem:[%s11507_s4 + $0x90] sm:$0xff] }
  0x68   :  { %787 = vmatprep.subr.mxu0 %v6323_v38  ;;  %858 = vmatprep.subr.mxu1 %v6328_v27  ;;  %12085 = vst [vmem:[#allocation48_spill] sm:$0xff] %v6359_v28  ;;  %12086 = vst [vmem:[#allocation49_spill] sm:$0xff] %v6364_v56  ;;  %v6371_v38 = vld [vmem:[%s11507_s4 + $0x68] sm:$0xff]  ;;  %v6376_v27 = vld [vmem:[%s11507_s4 + $0x78] sm:$0xff] }
  0x69   :  { %788 = vmatpush1.msra.mxu0 %v6335_v29  ;;  %859 = vmatpush1.msra.mxu1 %v6340_v47  ;;  %12087 = vst [vmem:[#allocation50_spill] sm:$0xff] %v6371_v38  ;;  %12088 = vst [vmem:[#allocation51_spill] sm:$0xff] %v6376_v27  ;;  %v6383_v29 = vld [vmem:[%s11507_s4 + $0x60] sm:$0xff]  ;;  %v6388_v47 = vld [vmem:[%s11507_s4 + $0x70] sm:$0xff] }
  0x6a   :  { %789 = vmatprep.subr.mxu0 %v6347_v3  ;;  %860 = vmatprep.subr.mxu1 %v6352_v1  ;;  %12089 = vst [vmem:[#allocation52_spill] sm:$0xff] %v6383_v29  ;;  %12090 = vst [vmem:[#allocation53_spill] sm:$0xff] %v6388_v47  ;;  %v6395_v3 = vld [vmem:[%s11507_s4 + $0x48] sm:$0xff]  ;;  %v6400_v1 = vld [vmem:[%s11507_s4 + $0x58] sm:$0xff] }
  0x6b   :  { %790 = vmatpush1.msra.mxu0 %v6359_v28  ;;  %861 = vmatpush1.msra.mxu1 %v6364_v56  ;;  %12091 = vst [vmem:[#allocation54_spill] sm:$0xff] %v6395_v3  ;;  %12092 = vst [vmem:[#allocation55_spill] sm:$0xff] %v6400_v1  ;;  %v6407_v28 = vld [vmem:[%s11507_s4 + $0x40] sm:$0xff]  ;;  %v6412_v56 = vld [vmem:[%s11507_s4 + $0x50] sm:$0xff] }
  0x6c   :  { %791 = vmatprep.subr.mxu0 %v6371_v38  ;;  %862 = vmatprep.subr.mxu1 %v6376_v27  ;;  %12093 = vst [vmem:[#allocation56_spill] sm:$0xff] %v6407_v28  ;;  %12094 = vst [vmem:[#allocation57_spill] sm:$0xff] %v6412_v56  ;;  %v6419_v38 = vld [vmem:[%s11507_s4 + $0x28] sm:$0xff]  ;;  %v6424_v27 = vld [vmem:[%s11507_s4 + $0x38] sm:$0xff] }
  0x6d   :  { %792 = vmatpush1.msra.mxu0 %v6383_v29  ;;  %863 = vmatpush1.msra.mxu1 %v6388_v47  ;;  %12095 = vst [vmem:[#allocation58_spill] sm:$0xff] %v6419_v38  ;;  %12096 = vst [vmem:[#allocation59_spill] sm:$0xff] %v6424_v27  ;;  %v6431_v29 = vld [vmem:[%s11507_s4 + $0x20] sm:$0xff]  ;;  %v6436_v47 = vld [vmem:[%s11507_s4 + $0x30] sm:$0xff] }
  0x6e   :  { %793 = vmatprep.subr.mxu0 %v6395_v3  ;;  %864 = vmatprep.subr.mxu1 %v6400_v1  ;;  %12097 = vst [vmem:[#allocation60_spill] sm:$0xff] %v6431_v29  ;;  %12098 = vst [vmem:[#allocation61_spill] sm:$0xff] %v6436_v47  ;;  %v6443_v3 = vld [vmem:[%s11507_s4 + $0x8] sm:$0xff]  ;;  %v6448_v1 = vld [vmem:[%s11507_s4 + $0x18] sm:$0xff] }
  0x6f   :  { %794 = vmatpush1.msra.mxu0 %v6407_v28  ;;  %865 = vmatpush1.msra.mxu1 %v6412_v56  ;;  %12099 = vst [vmem:[#allocation62_spill] sm:$0xff] %v6443_v3  ;;  %12100 = vst [vmem:[#allocation63_spill] sm:$0xff] %v6448_v1  ;;  %v6455_v28 = vld [vmem:[%s11507_s4] sm:$0xff]  ;;  %v6460_v56 = vld [vmem:[%s11507_s4 + $0x10] sm:$0xff] }
  0x70   :  { %795 = vmatprep.subr.mxu0 %v6419_v38  ;;  %866 = vmatprep.subr.mxu1 %v6424_v27  ;;  %12101 = vst [vmem:[#allocation64_spill] sm:$0xff] %v6455_v28  ;;  %12102 = vst [vmem:[#allocation65_spill] sm:$0xff] %v6460_v56  ;;  %v6467_v38 = vld [vmem:[%s11508_s5 + $0x1e8] sm:$0xff]  ;;  %v6472_v27 = vld [vmem:[%s11508_s5 + $0x1f8] sm:$0xff] }
  0x71   :  { %796 = vmatpush1.msra.mxu0 %v6431_v29  ;;  %867 = vmatpush1.msra.mxu1 %v6436_v47  ;;  %12103 = vst [vmem:[#allocation66_spill] sm:$0xff] %v6467_v38  ;;  %12104 = vst [vmem:[#allocation67_spill] sm:$0xff] %v6472_v27  ;;  %v293_v47 = vlaneseq }
  0x72   :  { %797 = vmatprep.subr.mxu0 %v6443_v3  ;;  %868 = vmatprep.subr.mxu1 %v6448_v1 }
  0x73   :  { %798 = vmatpush1.msra.mxu0 %v6455_v28  ;;  %869 = vmatpush1.msra.mxu1 %v6460_v56  ;;  %v6480_v29 = vshrl.u32 %v293_v47, 7  ;;  %v282_v28 = vld [vmem:[%s11509_s3] sm:$0xf] }
  0x74   :  { %909 = vmatprep.subr.mxu0 %v6467_v38  ;;  %980 = vmatprep.subr.mxu1 %v6472_v27 }
  0x75   :  { %v11575_v24 = vsub.s32 0, %v6480_v29  ;;  %v11577_v3 = vsub.s32 2, %v6480_v29  ;;  %v11581_v27 = vsub.s32 1, %v6480_v29  ;;  %v11582_v47 = vsub.s32 3, %v6480_v29 }
  0x77   :  { %v296_v1 = vrot.slane %v282_v28, %v11575_v24  ;;  %v6501_v23 = vrot.slane %v282_v28, %v11577_v3  ;;  %v300_v20 = vrot.slane %v282_v28, %v11581_v27  ;;  %v6507_v19 = vrot.slane %v282_v28, %v11582_v47 }
  0xe2   :  { %v6482_v26 = vpop.f32.mrf.mxu0  ;;  %v6484_v25 = vpop.f32.mrf.mxu1 }
  0xe4   :  { %v6491_v56 = vpop.f32.mrf.mxu0  ;;  %v6493_v38 = vpop.f32.mrf.mxu1 }
  0xe8   :  { %v385_v22 = vpop.f32.mrf.mxu0  ;;  %v498_v21 = vpop.f32.mrf.mxu1 }
  0xe9   :  { %v6509_v18 = vadd.f32 %v385_v22, %v296_v1  ;;  %v6512_v17 = vadd.f32 %v498_v21, %v6501_v23 }
  0xea   :  { %v387_v16 = vpop.f32.mrf.mxu0  ;;  %v500_v24 = vpop.f32.mrf.mxu1 }
  0xeb   :  { %12105 = vst [vmem:[#allocation68_spill] sm:$0xff] %v6509_v18  ;;  %12106 = vst [vmem:[#allocation69_spill] sm:$0xff] %v6512_v17  ;;  %v6514_v15 = vadd.f32 %v387_v16, %v300_v20  ;;  %v6517_v3 = vadd.f32 %v500_v24, %v6507_v19 }
  0xed   :  { %12107 = vst [vmem:[#allocation70_spill] sm:$0xff] %v6514_v15  ;;  %12108 = vst [vmem:[#allocation71_spill] sm:$0xff] %v6517_v3 }
  0xee   :  { %v391_v14 = vpop.f32.mrf.mxu0  ;;  %v504_v13 = vpop.f32.mrf.mxu1 }
  0xef   :  { %v6519_v12 = vadd.f32 %v391_v14, %v296_v1  ;;  %v6522_v27 = vadd.f32 %v504_v13, %v6501_v23 }
  0xf0   :  { %v393_v28 = vpop.f32.mrf.mxu0  ;;  %v506_v22 = vpop.f32.mrf.mxu1 }
  0xf1   :  { %12109 = vst [vmem:[#allocation72_spill] sm:$0xff] %v6519_v12  ;;  %12110 = vst [vmem:[#allocation73_spill] sm:$0xff] %v6522_v27  ;;  %v6524_v47 = vadd.f32 %v393_v28, %v300_v20  ;;  %v6527_v21 = vadd.f32 %v506_v22, %v6507_v19 }
  0xf3   :  { %12111 = vst [vmem:[#allocation74_spill] sm:$0xff] %v6524_v47  ;;  %12112 = vst [vmem:[#allocation75_spill] sm:$0xff] %v6527_v21 }
  0xf4   :  { %v397_v17 = vpop.f32.mrf.mxu0  ;;  %v510_v16 = vpop.f32.mrf.mxu1 }
  0xf5   :  { %v6529_v15 = vadd.f32 %v397_v17, %v296_v1  ;;  %v6532_v24 = vadd.f32 %v510_v16, %v6501_v23 }
  0xf6   :  { %v399_v3 = vpop.f32.mrf.mxu0  ;;  %v512_v14 = vpop.f32.mrf.mxu1 }
  0xf7   :  { %12113 = vst [vmem:[#allocation76_spill] sm:$0xff] %v6529_v15  ;;  %12114 = vst [vmem:[#allocation77_spill] sm:$0xff] %v6532_v24  ;;  %v6534_v12 = vadd.f32 %v399_v3, %v300_v20  ;;  %v6537_v13 = vadd.f32 %v512_v14, %v6507_v19 }
  0xf9   :  { %12115 = vst [vmem:[#allocation78_spill] sm:$0xff] %v6534_v12  ;;  %12116 = vst [vmem:[#allocation79_spill] sm:$0xff] %v6537_v13 }
  0xfa   :  { %v403_v27 = vpop.f32.mrf.mxu0  ;;  %v516_v28 = vpop.f32.mrf.mxu1 }
  0xfb   :  { %v6539_v47 = vadd.f32 %v403_v27, %v296_v1  ;;  %v6542_v22 = vadd.f32 %v516_v28, %v6501_v23 }
  0xfc   :  { %v405_v21 = vpop.f32.mrf.mxu0  ;;  %v518_v17 = vpop.f32.mrf.mxu1 }
  0xfd   :  { %12117 = vst [vmem:[#allocation80_spill] sm:$0xff] %v6539_v47  ;;  %12118 = vst [vmem:[#allocation81_spill] sm:$0xff] %v6542_v22  ;;  %v6544_v15 = vadd.f32 %v405_v21, %v300_v20  ;;  %v6547_v16 = vadd.f32 %v518_v17, %v6507_v19 }
  0xff   :  { %12119 = vst [vmem:[#allocation82_spill] sm:$0xff] %v6544_v15  ;;  %12120 = vst [vmem:[#allocation83_spill] sm:$0xff] %v6547_v16 }
 0x100   :  { %v409_v24 = vpop.f32.mrf.mxu0  ;;  %v522_v3 = vpop.f32.mrf.mxu1 }
 0x101   :  { %v6549_v12 = vadd.f32 %v409_v24, %v296_v1  ;;  %v6552_v14 = vadd.f32 %v522_v3, %v6501_v23 }
 0x102   :  { %v411_v13 = vpop.f32.mrf.mxu0  ;;  %v524_v27 = vpop.f32.mrf.mxu1 }
 0x103   :  { %12121 = vst [vmem:[#allocation84_spill] sm:$0xff] %v6549_v12  ;;  %12122 = vst [vmem:[#allocation85_spill] sm:$0xff] %v6552_v14  ;;  %v6554_v47 = vadd.f32 %v411_v13, %v300_v20  ;;  %v6557_v28 = vadd.f32 %v524_v27, %v6507_v19 }
 0x105   :  { %12123 = vst [vmem:[#allocation86_spill] sm:$0xff] %v6554_v47  ;;  %12124 = vst [vmem:[#allocation87_spill] sm:$0xff] %v6557_v28 }
 0x106   :  { %v415_v22 = vpop.f32.mrf.mxu0  ;;  %v528_v21 = vpop.f32.mrf.mxu1 }
 0x107   :  { %v6559_v15 = vadd.f32 %v415_v22, %v296_v1  ;;  %v6562_v17 = vadd.f32 %v528_v21, %v6501_v23 }
 0x108   :  { %v417_v16 = vpop.f32.mrf.mxu0  ;;  %v530_v24 = vpop.f32.mrf.mxu1 }
 0x109   :  { %12125 = vst [vmem:[#allocation88_spill] sm:$0xff] %v6559_v15  ;;  %12126 = vst [vmem:[#allocation89_spill] sm:$0xff] %v6562_v17  ;;  %v6564_v12 = vadd.f32 %v417_v16, %v300_v20  ;;  %v6567_v3 = vadd.f32 %v530_v24, %v6507_v19  ;;  %v380_v16 = vadd.f32 %v6482_v26, %v296_v1 }
 0x10a   :  { %v382_v24 = vadd.f32 %v6491_v56, %v300_v20 }
 0x10b   :  { %12127 = vst [vmem:[#allocation90_spill] sm:$0xff] %v6564_v12  ;;  %12128 = vst [vmem:[#allocation91_spill] sm:$0xff] %v6567_v3 }
 0x10c   :  { %v421_v14 = vpop.f32.mrf.mxu0  ;;  %v534_v13 = vpop.f32.mrf.mxu1 }
 0x10d   :  { %v6569_v47 = vadd.f32 %v421_v14, %v296_v1  ;;  %v6572_v27 = vadd.f32 %v534_v13, %v6501_v23 }
 0x10e   :  { %v423_v28 = vpop.f32.mrf.mxu0  ;;  %v536_v22 = vpop.f32.mrf.mxu1 }
 0x10f   :  { %12129 = vst [vmem:[#allocation92_spill] sm:$0xff] %v6569_v47  ;;  %12130 = vst [vmem:[#allocation93_spill] sm:$0xff] %v6572_v27  ;;  %v6574_v15 = vadd.f32 %v423_v28, %v300_v20  ;;  %v6577_v21 = vadd.f32 %v536_v22, %v6507_v19  ;;  %v495_v28 = vadd.f32 %v6493_v38, %v6507_v19 }
 0x110   :  { %v493_v22 = vadd.f32 %v6484_v25, %v6501_v23 }
 0x111   :  { %12131 = vst [vmem:[#allocation94_spill] sm:$0xff] %v6574_v15  ;;  %12132 = vst [vmem:[#allocation95_spill] sm:$0xff] %v6577_v21 }
 0x112   :  { %v662_v17 = vpop.f32.mrf.mxu0  ;;  %v733_v47 = vpop.f32.mrf.mxu1 }
 0x113   :  { %v738_v3 = vadd.f32 %v662_v17, %v380_v16  ;;  %v740_v21 = vadd.f32 %v733_v47, %v493_v22  ;;  %v6614_v22 = vld [vmem:[%s11508_s5 + $0x1c0] sm:$0xff] }
 0x114   :  { %v664_v12 = vpop.f32.mrf.mxu0  ;;  %v735_v27 = vpop.f32.mrf.mxu1 }
 0x115   :  { %v4548_v18 = vmul.f32 -1.442695, %v738_v3  ;;  %v739_v14 = vadd.f32 %v664_v12, %v382_v24  ;;  %v741_v15 = vadd.f32 %v735_v27, %v495_v28  ;;  %v6609_v28 = vld [vmem:[%s11508_s5 + $0x1d8] sm:$0xff] }
 0x117   :  { %4605 = vpow2.f32 %v4548_v18  ;;  %v4549_v13 = vmul.f32 -1.442695, %v739_v14  ;;  %v4550_v26 = vmul.f32 -1.442695, %v741_v15  ;;  %v6599_v14 = vld [vmem:[%s11508_s5 + $0x1f0] sm:$0xff] }
 0x119   :  { %4607 = vpow2.f32 %v4549_v13  ;;  %v6604_v13 = vld [vmem:[%s11508_s5 + $0x1c8] sm:$0xff] }
 0x11a   :  { %4609 = vpow2.f32 %v4550_v26  ;;  %v6619_v26 = vld [vmem:[%s11508_s5 + $0x1d0] sm:$0xff] }
 0x124   :  { %v4606_v1 = vpop.eup %4605 }
 0x125   :  { %v751_v20 = vadd.f32 1.0, %v4606_v1  ;;  %v6626_v1 = vld [vmem:[%s11508_s5 + $0x1a8] sm:$0xff] }
 0x126   :  { %v4608_v56 = vpop.eup %4607 }
 0x127   :  { %4611 = vrcp.f32 %v751_v20  ;;  %v752_v12 = vadd.f32 1.0, %v4608_v56  ;;  %v4610_v18 = vpop.eup %4609  ;;  %v6631_v20 = vld [vmem:[%s11508_s5 + $0x1b8] sm:$0xff]  ;;  %v6638_v56 = vld [vmem:[%s11508_s5 + $0x1a0] sm:$0xff] }
 0x128   :  { %4613 = vtanh.f32 %v740_v21  ;;  %v753_v24 = vadd.f32 1.0, %v4610_v18  ;;  %v6594_v21 = vld [vmem:[%s11508_s5 + $0x1e0] sm:$0xff]  ;;  %v6650_v18 = vld [vmem:[%s11508_s5 + $0x188] sm:$0xff] }
 0x129   :  { %4615 = vrcp.f32 %v752_v12  ;;  %v6643_v12 = vld [vmem:[%s11508_s5 + $0x1b0] sm:$0xff] }
 0x12a   :  { %4617 = vrcp.f32 %v753_v24  ;;  %v6674_v24 = vld [vmem:[%s11508_s5 + $0x168] sm:$0xff] }
 0x12b   :  { %12135 = vst [vmem:[#allocation98_spill] sm:$0xff] %v6674_v24 }
 0x134   :  { %v4612_v17 = vpop.eup %4611 }
 0x135   :  { %v4614_v3 = vpop.eup %4613 }
 0x136   :  { %v4616_v16 = vpop.eup %4615  ;;  %v762_v38 = vmul.f32 %v4614_v3, %v4612_v17  ;;  %v6655_v17 = vld [vmem:[%s11508_s5 + $0x198] sm:$0xff]  ;;  %v6662_v3 = vld [vmem:[%s11508_s5 + $0x180] sm:$0xff] }
 0x137   :  { %v761_v19 = vmul.f32 0.0, %v4616_v16  ;;  %v4618_v15 = vpop.eup %4617  ;;  %12133 = vst [vmem:[#allocation96_spill] sm:$0xff] %v6662_v3  ;;  %v6667_v16 = vld [vmem:[%s11508_s5 + $0x190] sm:$0xff] }
 0x138   :  { %12134 = vst [vmem:[#allocation97_spill] sm:$0xff] %v6667_v16 }
 0x139   :  { %v6585_v27 = vadd.f32 %v762_v38, %v761_v19  ;;  %v6679_v19 = vld [vmem:[%s11508_s5 + $0x178] sm:$0xff]  ;;  %v6686_v38 = vld [vmem:[%s11508_s5 + $0x160] sm:$0xff] }
 0x13a   :  { %12136 = vst [vmem:[#allocation99_spill] sm:$0xff] %v6679_v19  ;;  %12137 = vst [vmem:[#allocation100_spill] sm:$0xff] %v6686_v38 }
 0x13b   :  { %4619 = vtanh.f32 %v6585_v27 }
 0x148   :  { %v4620_v23 = vpop.eup %4619 }
 0x149   :  { %v6588_v25 = vmul.f32 %v4620_v23, %v4618_v15  ;;  %v6691_v15 = vld [vmem:[%s11508_s5 + $0x170] sm:$0xff]  ;;  %v6698_v23 = vld [vmem:[%s11508_s5 + $0x148] sm:$0xff] }
 0x14a   :  { %12138 = vst [vmem:[#allocation101_spill] sm:$0xff] %v6691_v15  ;;  %12139 = vst [vmem:[#allocation102_spill] sm:$0xff] %v6698_v23 }
 0x14b   :  { %v766_v47 = vmax.f32 %v6588_v25, 0.0 }
 0x14d   :  { %832 = vmatmul.mubr.f32.vlgmr.msra.gmra.mxu0 %v766_v47  ;;  %903 = vmatmul.mubr.f32.vlgmr.msra.gmra.mxu1 %v766_v47  ;;  %v6703_v47 = vld [vmem:[%s11508_s5 + $0x158] sm:$0xff] }
 0x14e   :  { %910 = vmatpush1.msra.mxu0 %v6594_v21  ;;  %981 = vmatpush1.msra.mxu1 %v6599_v14  ;;  %12140 = vst [vmem:[#allocation103_spill] sm:$0xff] %v6703_v47 }
 0x14f   :  { %911 = vmatprep.subr.mxu0 %v6604_v13  ;;  %982 = vmatprep.subr.mxu1 %v6609_v28 }
 0x150   :  { %912 = vmatpush1.msra.mxu0 %v6614_v22  ;;  %983 = vmatpush1.msra.mxu1 %v6619_v26 }
 0x151   :  { %913 = vmatprep.subr.mxu0 %v6626_v1  ;;  %984 = vmatprep.subr.mxu1 %v6631_v20 }
 0x152   :  { %914 = vmatpush1.msra.mxu0 %v6638_v56  ;;  %985 = vmatpush1.msra.mxu1 %v6643_v12 }
 0x153   :  { %915 = vmatprep.subr.mxu0 %v6650_v18  ;;  %986 = vmatprep.subr.mxu1 %v6655_v17 }
 0x154   :  { %916 = vmatpush1.msra.mxu0 %v6662_v3  ;;  %987 = vmatpush1.msra.mxu1 %v6667_v16  ;;  %v6710_v3 = vld [vmem:[%s11508_s5 + $0x140] sm:$0xff]  ;;  %v6715_v16 = vld [vmem:[%s11508_s5 + $0x150] sm:$0xff] }
 0x155   :  { %917 = vmatprep.subr.mxu0 %v6674_v24  ;;  %988 = vmatprep.subr.mxu1 %v6679_v19  ;;  %12141 = vst [vmem:[#allocation104_spill] sm:$0xff] %v6710_v3  ;;  %12142 = vst [vmem:[#allocation105_spill] sm:$0xff] %v6715_v16  ;;  %v6722_v24 = vld [vmem:[%s11508_s5 + $0x128] sm:$0xff]  ;;  %v6727_v19 = vld [vmem:[%s11508_s5 + $0x138] sm:$0xff] }
 0x156   :  { %918 = vmatpush1.msra.mxu0 %v6686_v38  ;;  %989 = vmatpush1.msra.mxu1 %v6691_v15  ;;  %12143 = vst [vmem:[#allocation106_spill] sm:$0xff] %v6722_v24  ;;  %12144 = vst [vmem:[#allocation107_spill] sm:$0xff] %v6727_v19  ;;  %v6734_v38 = vld [vmem:[%s11508_s5 + $0x120] sm:$0xff]  ;;  %v6739_v15 = vld [vmem:[%s11508_s5 + $0x130] sm:$0xff] }
 0x157   :  { %919 = vmatprep.subr.mxu0 %v6698_v23  ;;  %990 = vmatprep.subr.mxu1 %v6703_v47  ;;  %12145 = vst [vmem:[#allocation108_spill] sm:$0xff] %v6734_v38  ;;  %12146 = vst [vmem:[#allocation109_spill] sm:$0xff] %v6739_v15  ;;  %v6746_v23 = vld [vmem:[%s11508_s5 + $0x108] sm:$0xff]  ;;  %v6751_v47 = vld [vmem:[%s11508_s5 + $0x118] sm:$0xff] }
 0x158   :  { %920 = vmatpush1.msra.mxu0 %v6710_v3  ;;  %991 = vmatpush1.msra.mxu1 %v6715_v16  ;;  %12147 = vst [vmem:[#allocation110_spill] sm:$0xff] %v6746_v23  ;;  %12148 = vst [vmem:[#allocation111_spill] sm:$0xff] %v6751_v47  ;;  %v6758_v3 = vld [vmem:[%s11508_s5 + $0x100] sm:$0xff]  ;;  %v6763_v16 = vld [vmem:[%s11508_s5 + $0x110] sm:$0xff] }
 0x159   :  { %921 = vmatprep.subr.mxu0 %v6722_v24  ;;  %992 = vmatprep.subr.mxu1 %v6727_v19  ;;  %12149 = vst [vmem:[#allocation112_spill] sm:$0xff] %v6758_v3  ;;  %12150 = vst [vmem:[#allocation113_spill] sm:$0xff] %v6763_v16  ;;  %v6770_v24 = vld [vmem:[%s11508_s5 + $0xe8] sm:$0xff]  ;;  %v6775_v19 = vld [vmem:[%s11508_s5 + $0xf8] sm:$0xff] }
 0x15a   :  { %922 = vmatpush1.msra.mxu0 %v6734_v38  ;;  %993 = vmatpush1.msra.mxu1 %v6739_v15  ;;  %12151 = vst [vmem:[#allocation114_spill] sm:$0xff] %v6770_v24  ;;  %12152 = vst [vmem:[#allocation115_spill] sm:$0xff] %v6775_v19  ;;  %v6782_v38 = vld [vmem:[%s11508_s5 + $0xe0] sm:$0xff]  ;;  %v6787_v15 = vld [vmem:[%s11508_s5 + $0xf0] sm:$0xff] }
 0x15b   :  { %923 = vmatprep.subr.mxu0 %v6746_v23  ;;  %994 = vmatprep.subr.mxu1 %v6751_v47  ;;  %12153 = vst [vmem:[#allocation116_spill] sm:$0xff] %v6782_v38  ;;  %12154 = vst [vmem:[#allocation117_spill] sm:$0xff] %v6787_v15  ;;  %v6794_v23 = vld [vmem:[%s11508_s5 + $0xc8] sm:$0xff]  ;;  %v6799_v47 = vld [vmem:[%s11508_s5 + $0xd8] sm:$0xff] }
 0x15c   :  { %924 = vmatpush1.msra.mxu0 %v6758_v3  ;;  %995 = vmatpush1.msra.mxu1 %v6763_v16  ;;  %12155 = vst [vmem:[#allocation118_spill] sm:$0xff] %v6794_v23  ;;  %12156 = vst [vmem:[#allocation119_spill] sm:$0xff] %v6799_v47  ;;  %v6806_v3 = vld [vmem:[%s11508_s5 + $0xc0] sm:$0xff]  ;;  %v6811_v16 = vld [vmem:[%s11508_s5 + $0xd0] sm:$0xff] }
 0x15d   :  { %925 = vmatprep.subr.mxu0 %v6770_v24  ;;  %996 = vmatprep.subr.mxu1 %v6775_v19  ;;  %12157 = vst [vmem:[#allocation120_spill] sm:$0xff] %v6806_v3  ;;  %12158 = vst [vmem:[#allocation121_spill] sm:$0xff] %v6811_v16  ;;  %v6818_v24 = vld [vmem:[%s11508_s5 + $0xa8] sm:$0xff]  ;;  %v6823_v19 = vld [vmem:[%s11508_s5 + $0xb8] sm:$0xff] }
 0x15e   :  { %926 = vmatpush1.msra.mxu0 %v6782_v38  ;;  %997 = vmatpush1.msra.mxu1 %v6787_v15  ;;  %12159 = vst [vmem:[#allocation122_spill] sm:$0xff] %v6818_v24  ;;  %12160 = vst [vmem:[#allocation123_spill] sm:$0xff] %v6823_v19  ;;  %v6830_v38 = vld [vmem:[%s11508_s5 + $0xa0] sm:$0xff]  ;;  %v6835_v15 = vld [vmem:[%s11508_s5 + $0xb0] sm:$0xff] }
 0x15f   :  { %927 = vmatprep.subr.mxu0 %v6794_v23  ;;  %998 = vmatprep.subr.mxu1 %v6799_v47  ;;  %12161 = vst [vmem:[#allocation124_spill] sm:$0xff] %v6830_v38  ;;  %12162 = vst [vmem:[#allocation125_spill] sm:$0xff] %v6835_v15  ;;  %v6842_v23 = vld [vmem:[%s11508_s5 + $0x88] sm:$0xff]  ;;  %v6847_v47 = vld [vmem:[%s11508_s5 + $0x98] sm:$0xff] }
 0x160   :  { %928 = vmatpush1.msra.mxu0 %v6806_v3  ;;  %999 = vmatpush1.msra.mxu1 %v6811_v16  ;;  %12163 = vst [vmem:[#allocation126_spill] sm:$0xff] %v6842_v23  ;;  %12164 = vst [vmem:[#allocation127_spill] sm:$0xff] %v6847_v47  ;;  %v6854_v3 = vld [vmem:[%s11508_s5 + $0x80] sm:$0xff]  ;;  %v6859_v16 = vld [vmem:[%s11508_s5 + $0x90] sm:$0xff] }
 0x161   :  { %929 = vmatprep.subr.mxu0 %v6818_v24  ;;  %1000 = vmatprep.subr.mxu1 %v6823_v19  ;;  %12165 = vst [vmem:[#allocation128_spill] sm:$0xff] %v6854_v3  ;;  %12166 = vst [vmem:[#allocation129_spill] sm:$0xff] %v6859_v16  ;;  %v6866_v24 = vld [vmem:[%s11508_s5 + $0x68] sm:$0xff]  ;;  %v6871_v19 = vld [vmem:[%s11508_s5 + $0x78] sm:$0xff] }
 0x162   :  { %930 = vmatpush1.msra.mxu0 %v6830_v38  ;;  %1001 = vmatpush1.msra.mxu1 %v6835_v15  ;;  %12167 = vst [vmem:[#allocation130_spill] sm:$0xff] %v6866_v24  ;;  %12168 = vst [vmem:[#allocation131_spill] sm:$0xff] %v6871_v19  ;;  %v6878_v38 = vld [vmem:[%s11508_s5 + $0x60] sm:$0xff]  ;;  %v6883_v15 = vld [vmem:[%s11508_s5 + $0x70] sm:$0xff] }
 0x163   :  { %931 = vmatprep.subr.mxu0 %v6842_v23  ;;  %1002 = vmatprep.subr.mxu1 %v6847_v47  ;;  %12169 = vst [vmem:[#allocation132_spill] sm:$0xff] %v6878_v38  ;;  %12170 = vst [vmem:[#allocation133_spill] sm:$0xff] %v6883_v15  ;;  %v6890_v23 = vld [vmem:[%s11508_s5 + $0x48] sm:$0xff]  ;;  %v6895_v47 = vld [vmem:[%s11508_s5 + $0x58] sm:$0xff] }
 0x164   :  { %932 = vmatpush1.msra.mxu0 %v6854_v3  ;;  %1003 = vmatpush1.msra.mxu1 %v6859_v16  ;;  %12171 = vst [vmem:[#allocation134_spill] sm:$0xff] %v6890_v23  ;;  %12172 = vst [vmem:[#allocation135_spill] sm:$0xff] %v6895_v47  ;;  %v6902_v3 = vld [vmem:[%s11508_s5 + $0x40] sm:$0xff]  ;;  %v6907_v16 = vld [vmem:[%s11508_s5 + $0x50] sm:$0xff] }
 0x165   :  { %933 = vmatprep.subr.mxu0 %v6866_v24  ;;  %1004 = vmatprep.subr.mxu1 %v6871_v19  ;;  %12173 = vst [vmem:[#allocation136_spill] sm:$0xff] %v6902_v3  ;;  %12174 = vst [vmem:[#allocation137_spill] sm:$0xff] %v6907_v16  ;;  %v6914_v24 = vld [vmem:[%s11508_s5 + $0x28] sm:$0xff]  ;;  %v6919_v19 = vld [vmem:[%s11508_s5 + $0x38] sm:$0xff] }
 0x166   :  { %934 = vmatpush1.msra.mxu0 %v6878_v38  ;;  %1005 = vmatpush1.msra.mxu1 %v6883_v15  ;;  %12175 = vst [vmem:[#allocation138_spill] sm:$0xff] %v6919_v19  ;;  %v6926_v38 = vld [vmem:[%s11508_s5 + $0x20] sm:$0xff]  ;;  %v6931_v15 = vld [vmem:[%s11508_s5 + $0x30] sm:$0xff] }
 0x167   :  { %935 = vmatprep.subr.mxu0 %v6890_v23  ;;  %1006 = vmatprep.subr.mxu1 %v6895_v47  ;;  %12176 = vst [vmem:[#allocation139_spill] sm:$0xff] %v6931_v15  ;;  %v6938_v23 = vld [vmem:[%s11508_s5 + $0x8] sm:$0xff]  ;;  %v6943_v47 = vld [vmem:[%s11508_s5 + $0x18] sm:$0xff] }
 0x168   :  { %936 = vmatpush1.msra.mxu0 %v6902_v3  ;;  %1007 = vmatpush1.msra.mxu1 %v6907_v16  ;;  %12177 = vst [vmem:[#allocation140_spill] sm:$0xff] %v6943_v47  ;;  %v6950_v3 = vld [vmem:[%s11508_s5] sm:$0xff]  ;;  %v6957_v16 = vld [vmem:[%s11508_s5 + $0x10] sm:$0xff] }
 0x169   :  { %937 = vmatprep.subr.mxu0 %v6914_v24  ;;  %1008 = vmatprep.subr.mxu1 %v6919_v19  ;;  %12178 = vst [vmem:[#allocation141_spill] sm:$0xff] %v6950_v3  ;;  %12179 = vst [vmem:[#allocation142_spill] sm:$0xff] %v6957_v16  ;;  %v12180_v19 = vmov 0.0  }
 0x16a   :  { %938 = vmatpush1.msra.mxu0 %v6926_v38  ;;  %1009 = vmatpush1.msra.mxu1 %v6931_v15  ;;  %v6970_v15 = vld [vmem:[%s11506_s2 + $0x1e8] sm:$0xff] }
 0x16b   :  { %939 = vmatprep.subr.mxu0 %v6938_v23  ;;  %1010 = vmatprep.subr.mxu1 %v6943_v47  ;;  %12181 = vst [vmem:[#allocation143_spill] sm:$0xff] %v6970_v15  ;;  %v6988_v47 = vld [vmem:[%s11506_s2 + $0x1f0] sm:$0xff] }
 0x16c   :  { %940 = vmatpush1.msra.mxu0 %v6950_v3  ;;  %973 = vmatprep.mubr.f32.mxu0 %v12180_v19  ;;  %v6976_v3 = vld [vmem:[%s11506_s2 + $0x1f8] sm:$0xff]  ;;  %12184 = vst [vmem:[#allocation146_spill] sm:$0xff] %v6988_v47 }
 0x16d   :  { %1011 = vmatpush1.msra.mxu1 %v6957_v16  ;;  %1044 = vmatprep.mubr.f32.mxu1 %v12180_v19  ;;  %12182 = vst [vmem:[#allocation144_spill] sm:$0xff] %v6976_v3  ;;  %v6982_v16 = vld [vmem:[%s11506_s2 + $0x1e0] sm:$0xff] }
 0x16e   :  { %974 = vmatmul.mubr.f32.vlgmr.msra.gmra.mxu0 %v12180_v19  ;;  %1045 = vmatmul.mubr.f32.vlgmr.msra.gmra.mxu1 %v12180_v19  ;;  %12183 = vst [vmem:[#allocation145_spill] sm:$0xff] %v6982_v16 }
 0x16f   :  { %1090 = vmatprep.subr.mxu0 %v6970_v15  ;;  %1161 = vmatprep.subr.mxu1 %v6976_v3  ;;  %v6994_v15 = vld [vmem:[%s11506_s2 + $0x1c8] sm:$0xff]  ;;  %v7000_v3 = vld [vmem:[%s11506_s2 + $0x1d8] sm:$0xff] }
 0x170   :  { %1091 = vmatpush1.msra.mxu0 %v6982_v16  ;;  %1162 = vmatpush1.msra.mxu1 %v6988_v47  ;;  %12185 = vst [vmem:[#allocation147_spill] sm:$0xff] %v6994_v15  ;;  %12186 = vst [vmem:[#allocation148_spill] sm:$0xff] %v7000_v3  ;;  %v7006_v16 = vld [vmem:[%s11506_s2 + $0x1c0] sm:$0xff]  ;;  %v7012_v47 = vld [vmem:[%s11506_s2 + $0x1d0] sm:$0xff] }
 0x171   :  { %1092 = vmatprep.subr.mxu0 %v6994_v15  ;;  %1163 = vmatprep.subr.mxu1 %v7000_v3  ;;  %12187 = vst [vmem:[#allocation149_spill] sm:$0xff] %v7006_v16  ;;  %12188 = vst [vmem:[#allocation150_spill] sm:$0xff] %v7012_v47  ;;  %v7018_v15 = vld [vmem:[%s11506_s2 + $0x1a8] sm:$0xff]  ;;  %v7024_v3 = vld [vmem:[%s11506_s2 + $0x1b8] sm:$0xff] }
 0x172   :  { %1093 = vmatpush1.msra.mxu0 %v7006_v16  ;;  %1164 = vmatpush1.msra.mxu1 %v7012_v47  ;;  %12189 = vst [vmem:[#allocation151_spill] sm:$0xff] %v7018_v15  ;;  %12190 = vst [vmem:[#allocation152_spill] sm:$0xff] %v7024_v3  ;;  %v7030_v16 = vld [vmem:[%s11506_s2 + $0x1a0] sm:$0xff]  ;;  %v7036_v47 = vld [vmem:[%s11506_s2 + $0x1b0] sm:$0xff] }
 0x173   :  { %1094 = vmatprep.subr.mxu0 %v7018_v15  ;;  %1165 = vmatprep.subr.mxu1 %v7024_v3  ;;  %12191 = vst [vmem:[#allocation153_spill] sm:$0xff] %v7030_v16  ;;  %12192 = vst [vmem:[#allocation154_spill] sm:$0xff] %v7036_v47  ;;  %v7042_v15 = vld [vmem:[%s11506_s2 + $0x188] sm:$0xff]  ;;  %v7048_v3 = vld [vmem:[%s11506_s2 + $0x198] sm:$0xff] }
 0x174   :  { %1095 = vmatpush1.msra.mxu0 %v7030_v16  ;;  %1166 = vmatpush1.msra.mxu1 %v7036_v47  ;;  %12193 = vst [vmem:[#allocation155_spill] sm:$0xff] %v7042_v15  ;;  %12194 = vst [vmem:[#allocation156_spill] sm:$0xff] %v7048_v3  ;;  %v7054_v16 = vld [vmem:[%s11506_s2 + $0x180] sm:$0xff]  ;;  %v7060_v47 = vld [vmem:[%s11506_s2 + $0x190] sm:$0xff] }
 0x175   :  { %1096 = vmatprep.subr.mxu0 %v7042_v15  ;;  %1167 = vmatprep.subr.mxu1 %v7048_v3  ;;  %12195 = vst [vmem:[#allocation157_spill] sm:$0xff] %v7054_v16  ;;  %12196 = vst [vmem:[#allocation158_spill] sm:$0xff] %v7060_v47  ;;  %v7066_v15 = vld [vmem:[%s11506_s2 + $0x168] sm:$0xff]  ;;  %v7072_v3 = vld [vmem:[%s11506_s2 + $0x178] sm:$0xff] }
 0x176   :  { %1097 = vmatpush1.msra.mxu0 %v7054_v16  ;;  %1168 = vmatpush1.msra.mxu1 %v7060_v47  ;;  %12197 = vst [vmem:[#allocation159_spill] sm:$0xff] %v7066_v15  ;;  %12198 = vst [vmem:[#allocation160_spill] sm:$0xff] %v7072_v3  ;;  %v7078_v16 = vld [vmem:[%s11506_s2 + $0x160] sm:$0xff]  ;;  %v7084_v47 = vld [vmem:[%s11506_s2 + $0x170] sm:$0xff] }
 0x177   :  { %1098 = vmatprep.subr.mxu0 %v7066_v15  ;;  %1169 = vmatprep.subr.mxu1 %v7072_v3  ;;  %12199 = vst [vmem:[#allocation161_spill] sm:$0xff] %v7078_v16  ;;  %12200 = vst [vmem:[#allocation162_spill] sm:$0xff] %v7084_v47  ;;  %v7090_v15 = vld [vmem:[%s11506_s2 + $0x148] sm:$0xff]  ;;  %v7096_v3 = vld [vmem:[%s11506_s2 + $0x158] sm:$0xff] }
 0x178   :  { %1099 = vmatpush1.msra.mxu0 %v7078_v16  ;;  %1170 = vmatpush1.msra.mxu1 %v7084_v47  ;;  %v7102_v16 = vld [vmem:[%s11506_s2 + $0x140] sm:$0xff]  ;;  %v7108_v47 = vld [vmem:[%s11506_s2 + $0x150] sm:$0xff] }
 0x179   :  { %1100 = vmatprep.subr.mxu0 %v7090_v15  ;;  %1171 = vmatprep.subr.mxu1 %v7096_v3 }
 0x17a   :  { %1101 = vmatpush1.msra.mxu0 %v7102_v16  ;;  %1172 = vmatpush1.msra.mxu1 %v7108_v47 }
 0x17b   :  { %1102 = vmatprep.subr.mxu0 %v5821_v30  ;;  %1173 = vmatprep.subr.mxu1 %v5826_v31  ;;  %v12201_v30 = vld [vmem:[#allocation3_spill] sm:$0xff]  ;;  %v12202_v31 = vld [vmem:[#allocation4_spill] sm:$0xff] }
 0x17c   :  { %1103 = vmatpush1.msra.mxu0 %v5831_v32  ;;  %1174 = vmatpush1.msra.mxu1 %v5836_v33  ;;  %v12203_v32 = vld [vmem:[#allocation5_spill] sm:$0xff]  ;;  %v12204_v33 = vld [vmem:[#allocation6_spill] sm:$0xff] }
 0x17d   :  { %1104 = vmatprep.subr.mxu0 %v5841_v34  ;;  %1175 = vmatprep.subr.mxu1 %v5846_v35  ;;  %v12205_v34 = vld [vmem:[#allocation7_spill] sm:$0xff]  ;;  %v12206_v35 = vld [vmem:[#allocation8_spill] sm:$0xff] }
 0x17e   :  { %1105 = vmatpush1.msra.mxu0 %v5855_v36  ;;  %1176 = vmatpush1.msra.mxu1 %v5860_v37  ;;  %v12207_v36 = vld [vmem:[#allocation9_spill] sm:$0xff]  ;;  %v12208_v37 = vld [vmem:[#allocation10_spill] sm:$0xff] }
 0x17f   :  { %1106 = vmatprep.subr.mxu0 %v5872_v39  ;;  %1177 = vmatprep.subr.mxu1 %v5877_v40  ;;  %v12209_v39 = vld [vmem:[#allocation11_spill] sm:$0xff]  ;;  %v12210_v40 = vld [vmem:[#allocation12_spill] sm:$0xff] }
 0x180   :  { %1107 = vmatpush1.msra.mxu0 %v5884_v41  ;;  %1178 = vmatpush1.msra.mxu1 %v5889_v42  ;;  %v12211_v41 = vld [vmem:[#allocation13_spill] sm:$0xff]  ;;  %v12212_v42 = vld [vmem:[#allocation14_spill] sm:$0xff] }
 0x181   :  { %1108 = vmatprep.subr.mxu0 %v5894_v43  ;;  %1179 = vmatprep.subr.mxu1 %v5899_v44  ;;  %v12213_v43 = vld [vmem:[#allocation15_spill] sm:$0xff]  ;;  %v12214_v44 = vld [vmem:[#allocation16_spill] sm:$0xff] }
 0x182   :  { %1109 = vmatpush1.msra.mxu0 %v5908_v45  ;;  %1180 = vmatpush1.msra.mxu1 %v5913_v46  ;;  %v12215_v45 = vld [vmem:[#allocation17_spill] sm:$0xff]  ;;  %v12216_v46 = vld [vmem:[#allocation18_spill] sm:$0xff] }
 0x183   :  { %1110 = vmatprep.subr.mxu0 %v5925_v48  ;;  %1181 = vmatprep.subr.mxu1 %v5930_v49  ;;  %v12217_v48 = vld [vmem:[#allocation19_spill] sm:$0xff]  ;;  %v12218_v49 = vld [vmem:[#allocation20_spill] sm:$0xff] }
 0x184   :  { %1111 = vmatpush1.msra.mxu0 %v5937_v50  ;;  %1182 = vmatpush1.msra.mxu1 %v5942_v51  ;;  %v12219_v50 = vld [vmem:[#allocation21_spill] sm:$0xff]  ;;  %v12220_v51 = vld [vmem:[#allocation22_spill] sm:$0xff] }
 0x185   :  { %1112 = vmatprep.subr.mxu0 %v5947_v52  ;;  %1183 = vmatprep.subr.mxu1 %v5952_v53  ;;  %v12221_v52 = vld [vmem:[#allocation23_spill] sm:$0xff]  ;;  %v12222_v53 = vld [vmem:[#allocation24_spill] sm:$0xff] }
 0x186   :  { %1113 = vmatpush1.msra.mxu0 %v5961_v54  ;;  %1184 = vmatpush1.msra.mxu1 %v5966_v55  ;;  %v12223_v54 = vld [vmem:[#allocation25_spill] sm:$0xff]  ;;  %v12224_v55 = vld [vmem:[#allocation26_spill] sm:$0xff] }
 0x187   :  { %1114 = vmatprep.subr.mxu0 %v5978_v57  ;;  %1185 = vmatprep.subr.mxu1 %v5983_v58  ;;  %v12225_v57 = vld [vmem:[#allocation27_spill] sm:$0xff]  ;;  %v12226_v58 = vld [vmem:[#allocation28_spill] sm:$0xff] }
 0x188   :  { %1115 = vmatpush1.msra.mxu0 %v5990_v59  ;;  %1186 = vmatpush1.msra.mxu1 %v5995_v60  ;;  %v12227_v59 = vld [vmem:[#allocation29_spill] sm:$0xff]  ;;  %v12228_v60 = vld [vmem:[#allocation30_spill] sm:$0xff] }
 0x189   :  { %1116 = vmatprep.subr.mxu0 %v6000_v61  ;;  %1187 = vmatprep.subr.mxu1 %v6005_v62  ;;  %v12229_v61 = vld [vmem:[#allocation31_spill] sm:$0xff]  ;;  %v12230_v62 = vld [vmem:[#allocation32_spill] sm:$0xff] }
 0x18a   :  { %1117 = vmatpush1.msra.mxu0 %v6014_v63  ;;  %1188 = vmatpush1.msra.mxu1 %v6019_v0  ;;  %v12231_v63 = vld [vmem:[#allocation33_spill] sm:$0xff]  ;;  %v12232_v0 = vld [vmem:[#allocation34_spill] sm:$0xff] }
 0x18b   :  { %1118 = vmatprep.subr.mxu0 %v6031_v2  ;;  %1189 = vmatprep.subr.mxu1 %v6036_v4  ;;  %v12233_v2 = vld [vmem:[#allocation35_spill] sm:$0xff]  ;;  %v12234_v4 = vld [vmem:[#allocation36_spill] sm:$0xff] }
 0x18c   :  { %1119 = vmatpush1.msra.mxu0 %v6043_v5  ;;  %1190 = vmatpush1.msra.mxu1 %v6048_v6  ;;  %v12235_v5 = vld [vmem:[#allocation37_spill] sm:$0xff]  ;;  %v12236_v6 = vld [vmem:[#allocation38_spill] sm:$0xff] }
 0x18d   :  { %1120 = vmatprep.subr.mxu0 %v6053_v7  ;;  %1191 = vmatprep.subr.mxu1 %v6058_v8  ;;  %v12237_v7 = vld [vmem:[#allocation39_spill] sm:$0xff]  ;;  %v12238_v8 = vld [vmem:[#allocation40_spill] sm:$0xff] }
 0x18e   :  { %1121 = vmatpush1.msra.mxu0 %v6065_v9  ;;  %1154 = vmatprep.mubr.f32.mxu0 %v12180_v19  ;;  %v12239_v9 = vld [vmem:[#allocation41_spill] sm:$0xff] }
 0x18f   :  { %1192 = vmatpush1.msra.mxu1 %v6072_v10  ;;  %1225 = vmatprep.mubr.f32.mxu1 %v12180_v19  ;;  %v12240_v10 = vld [vmem:[#allocation42_spill] sm:$0xff] }
 0x190   :  { %1155 = vmatmul.mubr.f32.vlgmr.msra.gmra.mxu0 %v6588_v25  ;;  %1226 = vmatmul.mubr.f32.vlgmr.msra.gmra.mxu1 %v6588_v25  ;;  %v12242_v25 = vld [vmem:[#allocation44_spill] sm:$0xff] }
 0x191   :  { %1261 = vmatprep.subr.mxu0 %v6087_v11  ;;  %1332 = vmatprep.subr.mxu1 %v12201_v30  ;;  %v12241_v11 = vld [vmem:[#allocation43_spill] sm:$0xff]  ;;  %v12243_v30 = vld [vmem:[#allocation45_spill] sm:$0xff] }
 0x192   :  { %1262 = vmatpush1.msra.mxu0 %v12202_v31  ;;  %1333 = vmatpush1.msra.mxu1 %v12203_v32  ;;  %v12244_v31 = vld [vmem:[#allocation46_spill] sm:$0xff]  ;;  %v12245_v32 = vld [vmem:[#allocation47_spill] sm:$0xff] }
 0x193   :  { %1263 = vmatprep.subr.mxu0 %v12204_v33  ;;  %1334 = vmatprep.subr.mxu1 %v12205_v34  ;;  %v12246_v33 = vld [vmem:[#allocation48_spill] sm:$0xff]  ;;  %v12247_v34 = vld [vmem:[#allocation49_spill] sm:$0xff] }
 0x194   :  { %1264 = vmatpush1.msra.mxu0 %v12206_v35  ;;  %1335 = vmatpush1.msra.mxu1 %v12207_v36  ;;  %v12248_v35 = vld [vmem:[#allocation50_spill] sm:$0xff]  ;;  %v12249_v36 = vld [vmem:[#allocation51_spill] sm:$0xff] }
 0x195   :  { %1265 = vmatprep.subr.mxu0 %v12208_v37  ;;  %1336 = vmatprep.subr.mxu1 %v12209_v39  ;;  %v12250_v37 = vld [vmem:[#allocation52_spill] sm:$0xff]  ;;  %v12251_v39 = vld [vmem:[#allocation53_spill] sm:$0xff] }
 0x196   :  { %1266 = vmatpush1.msra.mxu0 %v12210_v40  ;;  %1337 = vmatpush1.msra.mxu1 %v12211_v41  ;;  %v12252_v40 = vld [vmem:[#allocation54_spill] sm:$0xff]  ;;  %v12253_v41 = vld [vmem:[#allocation55_spill] sm:$0xff] }
 0x197   :  { %1267 = vmatprep.subr.mxu0 %v12212_v42  ;;  %1338 = vmatprep.subr.mxu1 %v12213_v43  ;;  %v12254_v42 = vld [vmem:[#allocation56_spill] sm:$0xff]  ;;  %v12255_v43 = vld [vmem:[#allocation57_spill] sm:$0xff] }
 0x198   :  { %1268 = vmatpush1.msra.mxu0 %v12214_v44  ;;  %1339 = vmatpush1.msra.mxu1 %v12215_v45  ;;  %v12256_v44 = vld [vmem:[#allocation58_spill] sm:$0xff]  ;;  %v12257_v45 = vld [vmem:[#allocation59_spill] sm:$0xff] }
 0x199   :  { %1269 = vmatprep.subr.mxu0 %v12216_v46  ;;  %1340 = vmatprep.subr.mxu1 %v12217_v48  ;;  %v12258_v46 = vld [vmem:[#allocation60_spill] sm:$0xff]  ;;  %v12259_v48 = vld [vmem:[#allocation61_spill] sm:$0xff] }
 0x19a   :  { %1270 = vmatpush1.msra.mxu0 %v12218_v49  ;;  %1341 = vmatpush1.msra.mxu1 %v12219_v50  ;;  %v12260_v49 = vld [vmem:[#allocation62_spill] sm:$0xff]  ;;  %v12261_v50 = vld [vmem:[#allocation63_spill] sm:$0xff] }
 0x19b   :  { %1271 = vmatprep.subr.mxu0 %v12220_v51  ;;  %1342 = vmatprep.subr.mxu1 %v12221_v52  ;;  %v12262_v51 = vld [vmem:[#allocation64_spill] sm:$0xff]  ;;  %v12263_v52 = vld [vmem:[#allocation65_spill] sm:$0xff] }
 0x19c   :  { %1272 = vmatpush1.msra.mxu0 %v12222_v53  ;;  %1343 = vmatpush1.msra.mxu1 %v12223_v54  ;;  %v12264_v53 = vld [vmem:[#allocation66_spill] sm:$0xff]  ;;  %v12265_v54 = vld [vmem:[#allocation67_spill] sm:$0xff] }
 0x19d   :  { %1273 = vmatprep.subr.mxu0 %v12224_v55  ;;  %1344 = vmatprep.subr.mxu1 %v12225_v57  ;;  %v283_v55 = vld [vmem:[%s11510_s6] sm:$0xf] }
 0x19e   :  { %1274 = vmatpush1.msra.mxu0 %v12226_v58  ;;  %1345 = vmatpush1.msra.mxu1 %v12227_v59  ;;  %v12266_v58 = vsub.s32 0, %v6480_v29 }
 0x19f   :  { %1275 = vmatprep.subr.mxu0 %v12228_v60  ;;  %1346 = vmatprep.subr.mxu1 %v12229_v61  ;;  %v12268_v60 = vsub.s32 1, %v6480_v29 }
 0x1a0   :  { %1276 = vmatpush1.msra.mxu0 %v12230_v62  ;;  %1347 = vmatpush1.msra.mxu1 %v12231_v63  ;;  %v7228_v59 = vrot.slane %v283_v55, %v12266_v58 }
 0x1a1   :  { %1277 = vmatprep.subr.mxu0 %v12232_v0  ;;  %1348 = vmatprep.subr.mxu1 %v12233_v2  ;;  %v7232_v61 = vrot.slane %v283_v55, %v12268_v60 }
 0x1a2   :  { %1278 = vmatpush1.msra.mxu0 %v12234_v4  ;;  %1349 = vmatpush1.msra.mxu1 %v12235_v5  ;;  %12267 = vst [vmem:[#allocation3_spill] sm:$0xff] %v7228_v59 }
 0x1a3   :  { %1279 = vmatprep.subr.mxu0 %v12236_v6  ;;  %1350 = vmatprep.subr.mxu1 %v12237_v7 }
 0x1a4   :  { %1280 = vmatpush1.msra.mxu0 %v12238_v8  ;;  %1351 = vmatpush1.msra.mxu1 %v12239_v9 }
 0x1a5   :  { %1281 = vmatprep.subr.mxu0 %v12240_v10  ;;  %1352 = vmatprep.subr.mxu1 %v12241_v11 }
 0x1a6   :  { %1282 = vmatpush1.msra.mxu0 %v12242_v25  ;;  %1353 = vmatpush1.msra.mxu1 %v12243_v30  ;;  %v12269_v25 = vsub.s32 3, %v6480_v29 }
 0x1a7   :  { %1283 = vmatprep.subr.mxu0 %v12244_v31  ;;  %1354 = vmatprep.subr.mxu1 %v12245_v32 }
 0x1a8   :  { %1284 = vmatpush1.msra.mxu0 %v12246_v33  ;;  %1355 = vmatpush1.msra.mxu1 %v12247_v34  ;;  %v7238_v30 = vrot.slane %v283_v55, %v12269_v25  ;;  %v12270_v33 = vsub.s32 2, %v6480_v29  ;;  %v12271_v29 = vld [vmem:[#allocation68_spill] sm:$0xff] }
 0x1a9   :  { %1285 = vmatprep.subr.mxu0 %v12248_v35  ;;  %1356 = vmatprep.subr.mxu1 %v12249_v36 }
 0x1aa   :  { %1286 = vmatpush1.msra.mxu0 %v12250_v37  ;;  %1357 = vmatpush1.msra.mxu1 %v12251_v39  ;;  %v7243_v34 = vrot.slane %v283_v55, %v12270_v33 }
 0x1ab   :  { %1287 = vmatprep.subr.mxu0 %v12252_v40  ;;  %1358 = vmatprep.subr.mxu1 %v12253_v41 }
 0x1ac   :  { %1288 = vmatpush1.msra.mxu0 %v12254_v42  ;;  %1359 = vmatpush1.msra.mxu1 %v12255_v43 }
 0x1ad   :  { %1289 = vmatprep.subr.mxu0 %v12256_v44  ;;  %1360 = vmatprep.subr.mxu1 %v12257_v45 }
 0x1ae   :  { %1290 = vmatpush1.msra.mxu0 %v12258_v46  ;;  %1361 = vmatpush1.msra.mxu1 %v12259_v48 }
 0x1af   :  { %1291 = vmatprep.subr.mxu0 %v12260_v49  ;;  %1362 = vmatprep.subr.mxu1 %v12261_v50 }
 0x1b0   :  { %1292 = vmatpush1.msra.mxu0 %v12262_v51  ;;  %1363 = vmatpush1.msra.mxu1 %v12263_v52 }
 0x1b1   :  { %1325 = vmatprep.mubr.f32.mxu0 %v12180_v19  ;;  %1396 = vmatprep.mubr.f32.mxu1 %v12180_v19 }
 0x1b2   :  { %1403 = vmatprep.subr.mxu0 %v12264_v53  ;;  %1474 = vmatprep.subr.mxu1 %v12265_v54 }
 0x20d   :  { %v833_v57 = vpop.f32.mrf.mxu0  ;;  %v904_v0 = vpop.f32.mrf.mxu1 }
 0x20e   :  { %v834_v63 = vadd.f32 %v833_v57, %v7228_v59  ;;  %v905_v36 = vadd.f32 %v904_v0, %v7243_v34  ;;  %v12272_v57 = vld [vmem:[#allocation70_spill] sm:$0xff] }
 0x20f   :  { %v835_v62 = vpop.f32.mrf.mxu0  ;;  %v906_v7 = vpop.f32.mrf.mxu1 }
 0x210   :  { %v836_v4 = vadd.f32 %v835_v62, %v7232_v61  ;;  %v907_v32 = vadd.f32 %v906_v7, %v7238_v30 }
 0x22e   :  { %v975_v2 = vpop.f32.mrf.mxu0  ;;  %v1046_v10 = vpop.f32.mrf.mxu1 }
 0x22f   :  { %v1051_v5 = vadd.f32 %v975_v2, %v834_v63  ;;  %v1053_v40 = vadd.f32 %v1046_v10, %v905_v36  ;;  %v12273_v2 = vld [vmem:[#allocation71_spill] sm:$0xff] }
 0x230   :  { %v977_v6 = vpop.f32.mrf.mxu0  ;;  %v1048_v31 = vpop.f32.mrf.mxu1 }
 0x231   :  { %v4551_v8 = vmul.f32 -1.442695, %v1051_v5  ;;  %v1052_v9 = vadd.f32 %v977_v6, %v836_v4  ;;  %v1054_v35 = vadd.f32 %v1048_v31, %v907_v32  ;;  %v12274_v5 = vld [vmem:[#allocation69_spill] sm:$0xff] }
 0x233   :  { %4621 = vpow2.f32 %v4551_v8  ;;  %v4552_v11 = vmul.f32 -1.442695, %v1052_v9  ;;  %v4553_v37 = vmul.f32 -1.442695, %v1054_v35 }
 0x235   :  { %4623 = vpow2.f32 %v4552_v11 }
 0x236   :  { %4625 = vpow2.f32 %v4553_v37 }
 0x240   :  { %v4622_v39 = vpop.eup %4621 }
 0x241   :  { %v1064_v41 = vadd.f32 1.0, %v4622_v39 }
 0x242   :  { %v4624_v42 = vpop.eup %4623 }
 0x243   :  { %4627 = vrcp.f32 %v1064_v41  ;;  %v1065_v43 = vadd.f32 1.0, %v4624_v42  ;;  %v4626_v44 = vpop.eup %4625 }
 0x244   :  { %4629 = vtanh.f32 %v1053_v40  ;;  %v1066_v51 = vadd.f32 1.0, %v4626_v44 }
 0x245   :  { %4631 = vrcp.f32 %v1065_v43 }
 0x250   :  { %v4628_v45 = vpop.eup %4627  ;;  %v1156_v46 = vpop.f32.mrf.mxu0 }
 0x251   :  { %v4630_v48 = vpop.eup %4629  ;;  %v1232_v49 = vadd.f32 %v1156_v46, %v12271_v29  ;;  %v1227_v62 = vpop.f32.mrf.mxu1 }
 0x252   :  { %v4632_v50 = vpop.eup %4631  ;;  %v1158_v52 = vpop.f32.mrf.mxu0  ;;  %v1075_v54 = vmul.f32 %v4630_v48, %v4628_v45  ;;  %v1234_v6 = vadd.f32 %v1227_v62, %v12274_v5  ;;  %v12295_v62 = vld [vmem:[#allocation116_spill] sm:$0xff]  ;;  %v12300_v5 = vld [vmem:[#allocation121_spill] sm:$0xff] }
 0x253   :  { %v1074_v53 = vmul.f32 0.0, %v4632_v50  ;;  %v4555_v55 = vmul.f32 -1.442695, %v1232_v49  ;;  %v1233_v58 = vadd.f32 %v1158_v52, %v12272_v57  ;;  %v1229_v0 = vpop.f32.mrf.mxu1  ;;  %v12289_v52 = vld [vmem:[#allocation110_spill] sm:$0xff] }
 0x254   :  { %v1235_v4 = vadd.f32 %v1229_v0, %v12273_v2  ;;  %v12293_v57 = vld [vmem:[#allocation114_spill] sm:$0xff]  ;;  %v12298_v2 = vld [vmem:[#allocation119_spill] sm:$0xff] }
 0x255   :  { %v7248_v60 = vadd.f32 %v1075_v54, %v1074_v53  ;;  %4633 = vpow2.f32 %v4555_v55  ;;  %v4556_v63 = vmul.f32 -1.442695, %v1233_v58  ;;  %v12290_v53 = vld [vmem:[#allocation111_spill] sm:$0xff]  ;;  %v12291_v54 = vld [vmem:[#allocation112_spill] sm:$0xff]  ;;  %v12292_v55 = vld [vmem:[#allocation113_spill] sm:$0xff] }
 0x256   :  { %4635 = vrcp.f32 %v1066_v51  ;;  %v4557_v7 = vmul.f32 -1.442695, %v1235_v4  ;;  %v12288_v51 = vld [vmem:[#allocation109_spill] sm:$0xff]  ;;  %v12294_v58 = vld [vmem:[#allocation115_spill] sm:$0xff]  ;;  %v12297_v0 = vld [vmem:[#allocation118_spill] sm:$0xff] }
 0x257   :  { %4637 = vtanh.f32 %v7248_v60  ;;  %v12299_v4 = vld [vmem:[#allocation120_spill] sm:$0xff] }
 0x258   :  { %4639 = vpow2.f32 %v4556_v63  ;;  %v12296_v63 = vld [vmem:[#allocation117_spill] sm:$0xff] }
 0x259   :  { %4641 = vtanh.f32 %v1234_v6  ;;  %v12301_v6 = vld [vmem:[#allocation122_spill] sm:$0xff] }
 0x25a   :  { %4643 = vpow2.f32 %v4557_v7  ;;  %v12302_v7 = vld [vmem:[#allocation123_spill] sm:$0xff] }
 0x262   :  { %v4634_v8 = vpop.eup %4633 }
 0x263   :  { %v4636_v9 = vpop.eup %4635  ;;  %v1245_v10 = vadd.f32 1.0, %v4634_v8  ;;  %v12303_v8 = vld [vmem:[#allocation124_spill] sm:$0xff] }
 0x264   :  { %v4638_v11 = vpop.eup %4637 }
 0x265   :  { %v4640_v25 = vpop.eup %4639  ;;  %4645 = vrcp.f32 %v1245_v10  ;;  %v7253_v31 = vmul.f32 %v4638_v11, %v4636_v9  ;;  %v12304_v9 = vld [vmem:[#allocation125_spill] sm:$0xff]  ;;  %v12305_v10 = vld [vmem:[#allocation126_spill] sm:$0xff]  ;;  %v12306_v11 = vld [vmem:[#allocation127_spill] sm:$0xff] }
 0x266   :  { %v1246_v32 = vadd.f32 1.0, %v4640_v25  ;;  %v4642_v35 = vpop.eup %4641  ;;  %v12307_v25 = vld [vmem:[#allocation128_spill] sm:$0xff] }
 0x267   :  { %v4554_v33 = vmul.f32 -1.442695, %v7253_v31  ;;  %v4644_v36 = vpop.eup %4643 }
 0x268   :  { %4647 = vrcp.f32 %v1246_v32  ;;  %v1247_v41 = vadd.f32 1.0, %v4644_v36  ;;  %v12308_v32 = vld [vmem:[#allocation129_spill] sm:$0xff]  ;;  %v12311_v36 = vld [vmem:[#allocation132_spill] sm:$0xff] }
 0x269   :  { %4649 = vpow2.f32 %v4554_v33  ;;  %v12309_v33 = vld [vmem:[#allocation130_spill] sm:$0xff] }
 0x26a   :  { %4651 = vrcp.f32 %v1247_v41  ;;  %v12315_v41 = vld [vmem:[#allocation136_spill] sm:$0xff] }
 0x272   :  { %v4646_v37 = vpop.eup %4645 }
 0x273   :  { %v1256_v39 = vmul.f32 %v4646_v37, %v4642_v35  ;;  %v12310_v35 = vld [vmem:[#allocation131_spill] sm:$0xff]  ;;  %v12312_v37 = vld [vmem:[#allocation133_spill] sm:$0xff] }
 0x275   :  { %v4648_v40 = vpop.eup %4647 }
 0x276   :  { %v1255_v42 = vmul.f32 %v4648_v40, %v6585_v27  ;;  %v4650_v43 = vpop.eup %4649  ;;  %v12275_v27 = vld [vmem:[#allocation96_spill] sm:$0xff]  ;;  %v12314_v40 = vld [vmem:[#allocation135_spill] sm:$0xff] }
 0x277   :  { %v1082_v45 = vadd.f32 1.0, %v4650_v43  ;;  %v4652_v46 = vpop.eup %4651  ;;  %v12317_v43 = vld [vmem:[#allocation138_spill] sm:$0xff] }
 0x278   :  { %v7257_v44 = vadd.f32 %v1256_v39, %v1255_v42  ;;  %v12313_v39 = vld [vmem:[#allocation134_spill] sm:$0xff]  ;;  %v12316_v42 = vld [vmem:[#allocation137_spill] sm:$0xff] }
 0x27a   :  { %4653 = vtanh.f32 %v7257_v44 }
 0x27b   :  { %4655 = vrcp.f32 %v1082_v45  ;;  %v12318_v45 = vld [vmem:[#allocation139_spill] sm:$0xff] }
 0x287   :  { %v4654_v48 = vpop.eup %4653 }
 0x288   :  { %v4656_v29 = vpop.eup %4655  ;;  %v7260_v49 = vmul.f32 %v4654_v48, %v4652_v46  ;;  %v12319_v46 = vld [vmem:[#allocation140_spill] sm:$0xff]  ;;  %v12320_v48 = vld [vmem:[#allocation141_spill] sm:$0xff] }
 0x289   :  { %1085 = vst [vmem:[%s11511_s7] sm:$0xff] %v4656_v29  ;;  %v12321_v29 = vld [vmem:[#allocation142_spill] sm:$0xff] }
 0x28a   :  { %v1260_v50 = vmax.f32 %v7260_v49, 0.0 }
 0x28c   :  { %1326 = vmatmul.mubr.f32.vlgmr.msra.gmra.mxu0 %v1260_v50  ;;  %1397 = vmatmul.mubr.f32.vlgmr.msra.gmra.mxu1 %v1260_v50  ;;  %v12324_v50 = vld [vmem:[#allocation145_spill] sm:$0xff] }
 0x28d   :  { %1404 = vmatpush1.msra.mxu0 %v6594_v21  ;;  %1475 = vmatpush1.msra.mxu1 %v6599_v14  ;;  %v12276_v21 = vld [vmem:[#allocation97_spill] sm:$0xff]  ;;  %v12277_v14 = vld [vmem:[#allocation98_spill] sm:$0xff] }
 0x28e   :  { %1405 = vmatprep.subr.mxu0 %v6604_v13  ;;  %1476 = vmatprep.subr.mxu1 %v6609_v28  ;;  %v12278_v13 = vld [vmem:[#allocation99_spill] sm:$0xff]  ;;  %v12279_v28 = vld [vmem:[#allocation100_spill] sm:$0xff] }
 0x28f   :  { %1406 = vmatpush1.msra.mxu0 %v6614_v22  ;;  %1477 = vmatpush1.msra.mxu1 %v6619_v26  ;;  %v12280_v22 = vld [vmem:[#allocation101_spill] sm:$0xff]  ;;  %v12281_v26 = vld [vmem:[#allocation102_spill] sm:$0xff] }
 0x290   :  { %1407 = vmatprep.subr.mxu0 %v6626_v1  ;;  %1478 = vmatprep.subr.mxu1 %v6631_v20  ;;  %v12282_v1 = vld [vmem:[#allocation103_spill] sm:$0xff]  ;;  %v12283_v20 = vld [vmem:[#allocation104_spill] sm:$0xff] }
 0x291   :  { %1408 = vmatpush1.msra.mxu0 %v6638_v56  ;;  %1479 = vmatpush1.msra.mxu1 %v6643_v12  ;;  %v12284_v56 = vld [vmem:[#allocation105_spill] sm:$0xff]  ;;  %v12285_v12 = vld [vmem:[#allocation106_spill] sm:$0xff] }
 0x292   :  { %1409 = vmatprep.subr.mxu0 %v6650_v18  ;;  %1480 = vmatprep.subr.mxu1 %v6655_v17  ;;  %v12286_v18 = vld [vmem:[#allocation107_spill] sm:$0xff]  ;;  %v12287_v17 = vld [vmem:[#allocation108_spill] sm:$0xff] }
 0x293   :  { %1410 = vmatpush1.msra.mxu0 %v12275_v27  ;;  %1481 = vmatpush1.msra.mxu1 %v12276_v21  ;;  %v12326_v27 = vld [vmem:[#allocation147_spill] sm:$0xff]  ;;  %v12327_v21 = vld [vmem:[#allocation148_spill] sm:$0xff] }
 0x294   :  { %1411 = vmatprep.subr.mxu0 %v12277_v14  ;;  %1482 = vmatprep.subr.mxu1 %v12278_v13  ;;  %v12328_v14 = vld [vmem:[#allocation149_spill] sm:$0xff]  ;;  %v12329_v13 = vld [vmem:[#allocation150_spill] sm:$0xff] }
 0x295   :  { %1412 = vmatpush1.msra.mxu0 %v12279_v28  ;;  %1483 = vmatpush1.msra.mxu1 %v12280_v22  ;;  %v12330_v28 = vld [vmem:[#allocation151_spill] sm:$0xff]  ;;  %v12331_v22 = vld [vmem:[#allocation152_spill] sm:$0xff] }
 0x296   :  { %1413 = vmatprep.subr.mxu0 %v12281_v26  ;;  %1484 = vmatprep.subr.mxu1 %v12282_v1  ;;  %v12333_v26 = vld [vmem:[#allocation154_spill] sm:$0xff]  ;;  %v12334_v1 = vld [vmem:[#allocation155_spill] sm:$0xff] }
 0x297   :  { %1414 = vmatpush1.msra.mxu0 %v12283_v20  ;;  %1485 = vmatpush1.msra.mxu1 %v12284_v56  ;;  %v12335_v20 = vld [vmem:[#allocation156_spill] sm:$0xff]  ;;  %v12336_v56 = vld [vmem:[#allocation157_spill] sm:$0xff] }
 0x298   :  { %1415 = vmatprep.subr.mxu0 %v12285_v12  ;;  %1486 = vmatprep.subr.mxu1 %v12286_v18  ;;  %v12337_v12 = vld [vmem:[#allocation158_spill] sm:$0xff]  ;;  %v12338_v18 = vld [vmem:[#allocation159_spill] sm:$0xff] }
 0x299   :  { %1416 = vmatpush1.msra.mxu0 %v12287_v17  ;;  %1487 = vmatpush1.msra.mxu1 %v12288_v51  ;;  %v12339_v17 = vld [vmem:[#allocation160_spill] sm:$0xff]  ;;  %v12340_v51 = vld [vmem:[#allocation161_spill] sm:$0xff] }
 0x29a   :  { %1417 = vmatprep.subr.mxu0 %v12289_v52  ;;  %1488 = vmatprep.subr.mxu1 %v12290_v53  ;;  %v12341_v52 = vld [vmem:[#allocation162_spill] sm:$0xff]  ;;  %v7359_v53 = vld [vmem:[%s11506_s2 + $0x128] sm:$0xff] }
 0x29b   :  { %1418 = vmatpush1.msra.mxu0 %v12291_v54  ;;  %1489 = vmatpush1.msra.mxu1 %v12292_v55  ;;  %v7365_v54 = vld [vmem:[%s11506_s2 + $0x138] sm:$0xff]  ;;  %v7395_v55 = vld [vmem:[%s11506_s2 + $0x100] sm:$0xff] }
 0x29c   :  { %1419 = vmatprep.subr.mxu0 %v12293_v57  ;;  %1490 = vmatprep.subr.mxu1 %v12294_v58  ;;  %v7401_v57 = vld [vmem:[%s11506_s2 + $0x110] sm:$0xff]  ;;  %v7407_v58 = vld [vmem:[%s11506_s2 + $0xe8] sm:$0xff] }
 0x29d   :  { %1420 = vmatpush1.msra.mxu0 %v12295_v62  ;;  %1491 = vmatpush1.msra.mxu1 %v12296_v63  ;;  %v7413_v62 = vld [vmem:[%s11506_s2 + $0xf8] sm:$0xff]  ;;  %v7419_v63 = vld [vmem:[%s11506_s2 + $0xe0] sm:$0xff] }
 0x29e   :  { %1421 = vmatprep.subr.mxu0 %v12297_v0  ;;  %1492 = vmatprep.subr.mxu1 %v12298_v2  ;;  %v7425_v0 = vld [vmem:[%s11506_s2 + $0xf0] sm:$0xff]  ;;  %v7431_v2 = vld [vmem:[%s11506_s2 + $0xc8] sm:$0xff] }
 0x29f   :  { %1422 = vmatpush1.msra.mxu0 %v12299_v4  ;;  %1493 = vmatpush1.msra.mxu1 %v12300_v5  ;;  %v7437_v4 = vld [vmem:[%s11506_s2 + $0xd8] sm:$0xff]  ;;  %v7443_v5 = vld [vmem:[%s11506_s2 + $0xc0] sm:$0xff] }
 0x2a0   :  { %1423 = vmatprep.subr.mxu0 %v12301_v6  ;;  %1494 = vmatprep.subr.mxu1 %v12302_v7  ;;  %v7449_v6 = vld [vmem:[%s11506_s2 + $0xd0] sm:$0xff]  ;;  %v7455_v7 = vld [vmem:[%s11506_s2 + $0xa8] sm:$0xff] }
 0x2a1   :  { %1424 = vmatpush1.msra.mxu0 %v12303_v8  ;;  %1495 = vmatpush1.msra.mxu1 %v12304_v9  ;;  %v7461_v8 = vld [vmem:[%s11506_s2 + $0xb8] sm:$0xff]  ;;  %v7467_v9 = vld [vmem:[%s11506_s2 + $0xa0] sm:$0xff] }
 0x2a2   :  { %1425 = vmatprep.subr.mxu0 %v12305_v10  ;;  %1496 = vmatprep.subr.mxu1 %v12306_v11  ;;  %v7473_v10 = vld [vmem:[%s11506_s2 + $0xb0] sm:$0xff]  ;;  %v7479_v11 = vld [vmem:[%s11506_s2 + $0x88] sm:$0xff] }
 0x2a3   :  { %1426 = vmatpush1.msra.mxu0 %v12307_v25  ;;  %1497 = vmatpush1.msra.mxu1 %v12308_v32  ;;  %v7485_v25 = vld [vmem:[%s11506_s2 + $0x98] sm:$0xff]  ;;  %v7491_v32 = vld [vmem:[%s11506_s2 + $0x80] sm:$0xff] }
 0x2a4   :  { %1427 = vmatprep.subr.mxu0 %v12309_v33  ;;  %1498 = vmatprep.subr.mxu1 %v12310_v35  ;;  %v7497_v33 = vld [vmem:[%s11506_s2 + $0x90] sm:$0xff]  ;;  %v7503_v35 = vld [vmem:[%s11506_s2 + $0x68] sm:$0xff] }
 0x2a5   :  { %1428 = vmatpush1.msra.mxu0 %v12311_v36  ;;  %1499 = vmatpush1.msra.mxu1 %v12312_v37  ;;  %v7509_v36 = vld [vmem:[%s11506_s2 + $0x78] sm:$0xff]  ;;  %v7515_v37 = vld [vmem:[%s11506_s2 + $0x60] sm:$0xff] }
 0x2a6   :  { %1429 = vmatprep.subr.mxu0 %v12313_v39  ;;  %1500 = vmatprep.subr.mxu1 %v12314_v40  ;;  %v7521_v39 = vld [vmem:[%s11506_s2 + $0x70] sm:$0xff]  ;;  %v7527_v40 = vld [vmem:[%s11506_s2 + $0x48] sm:$0xff] }
 0x2a7   :  { %1430 = vmatpush1.msra.mxu0 %v12315_v41  ;;  %1501 = vmatpush1.msra.mxu1 %v12316_v42  ;;  %v7533_v41 = vld [vmem:[%s11506_s2 + $0x58] sm:$0xff]  ;;  %v7539_v42 = vld [vmem:[%s11506_s2 + $0x40] sm:$0xff] }
 0x2a8   :  { %1431 = vmatprep.subr.mxu0 %v6914_v24  ;;  %1502 = vmatprep.subr.mxu1 %v12317_v43  ;;  %v12322_v24 = vld [vmem:[#allocation143_spill] sm:$0xff]  ;;  %v7545_v43 = vld [vmem:[%s11506_s2 + $0x50] sm:$0xff] }
 0x2a9   :  { %1432 = vmatpush1.msra.mxu0 %v6926_v38  ;;  %1503 = vmatpush1.msra.mxu1 %v12318_v45  ;;  %v12323_v38 = vld [vmem:[#allocation144_spill] sm:$0xff] }
 0x2aa   :  { %1433 = vmatprep.subr.mxu0 %v6938_v23  ;;  %1504 = vmatprep.subr.mxu1 %v12319_v46  ;;  %v12325_v23 = vld [vmem:[#allocation146_spill] sm:$0xff]  ;;  %v7551_v45 = vld [vmem:[%s11506_s2 + $0x28] sm:$0xff] }
 0x2ab   :  { %1434 = vmatpush1.msra.mxu0 %v12320_v48  ;;  %1467 = vmatprep.mubr.f32.mxu0 %v12180_v19  ;;  %v7557_v46 = vld [vmem:[%s11506_s2 + $0x38] sm:$0xff]  ;;  %v7563_v48 = vld [vmem:[%s11506_s2 + $0x20] sm:$0xff] }
 0x2ac   :  { %1505 = vmatpush1.msra.mxu1 %v12321_v29  ;;  %1538 = vmatprep.mubr.f32.mxu1 %v12180_v19  ;;  %v7569_v29 = vld [vmem:[%s11506_s2 + $0x30] sm:$0xff] }
 0x2ad   :  { %1468 = vmatmul.mubr.f32.vlgmr.msra.gmra.mxu0 %v7253_v31  ;;  %1539 = vmatmul.mubr.f32.vlgmr.msra.gmra.mxu1 %v7253_v31  ;;  %v12332_v31 = vld [vmem:[#allocation153_spill] sm:$0xff] }
 0x2ae   :  { %1584 = vmatprep.subr.mxu0 %v12322_v24  ;;  %1655 = vmatprep.subr.mxu1 %v12323_v38  ;;  %v7575_v24 = vld [vmem:[%s11506_s2 + $0x8] sm:$0xff]  ;;  %v7581_v38 = vld [vmem:[%s11506_s2 + $0x18] sm:$0xff] }
 0x2af   :  { %1585 = vmatpush1.msra.mxu0 %v12324_v50  ;;  %1656 = vmatpush1.msra.mxu1 %v12325_v23  ;;  %v7587_v50 = vld [vmem:[%s11506_s2] sm:$0xff]  ;;  %v7594_v23 = vld [vmem:[%s11506_s2 + $0x10] sm:$0xff] }
 0x2b0   :  { %1586 = vmatprep.subr.mxu0 %v12326_v27  ;;  %1657 = vmatprep.subr.mxu1 %v12327_v21  ;;  %12342 = vst [vmem:[#allocation4_spill] sm:$0xff] %v7587_v50  ;;  %12343 = vst [vmem:[#allocation5_spill] sm:$0xff] %v7594_v23  ;;  %v7603_v27 = vld [vmem:[%s11507_s4 + $0x1e8] sm:$0xff]  ;;  %v7609_v21 = vld [vmem:[%s11507_s4 + $0x1f8] sm:$0xff] }
 0x2b1   :  { %1587 = vmatpush1.msra.mxu0 %v12328_v14  ;;  %1658 = vmatpush1.msra.mxu1 %v12329_v13  ;;  %12344 = vst [vmem:[#allocation6_spill] sm:$0xff] %v7603_v27  ;;  %12345 = vst [vmem:[#allocation7_spill] sm:$0xff] %v7609_v21  ;;  %v7615_v14 = vld [vmem:[%s11507_s4 + $0x1e0] sm:$0xff]  ;;  %v7627_v13 = vld [vmem:[%s11507_s4 + $0x1c8] sm:$0xff] }
 0x2b2   :  { %1588 = vmatprep.subr.mxu0 %v12330_v28  ;;  %1659 = vmatprep.subr.mxu1 %v12331_v22  ;;  %12346 = vst [vmem:[#allocation8_spill] sm:$0xff] %v7615_v14  ;;  %12348 = vst [vmem:[#allocation10_spill] sm:$0xff] %v7627_v13  ;;  %v7633_v28 = vld [vmem:[%s11507_s4 + $0x1d8] sm:$0xff]  ;;  %v7639_v22 = vld [vmem:[%s11507_s4 + $0x1c0] sm:$0xff] }
 0x2b3   :  { %1589 = vmatpush1.msra.mxu0 %v12332_v31  ;;  %1660 = vmatpush1.msra.mxu1 %v12333_v26  ;;  %12349 = vst [vmem:[#allocation11_spill] sm:$0xff] %v7633_v28  ;;  %12350 = vst [vmem:[#allocation12_spill] sm:$0xff] %v7639_v22  ;;  %v7645_v31 = vld [vmem:[%s11507_s4 + $0x1d0] sm:$0xff]  ;;  %v7651_v26 = vld [vmem:[%s11507_s4 + $0x1a8] sm:$0xff] }
 0x2b4   :  { %1590 = vmatprep.subr.mxu0 %v12334_v1  ;;  %1661 = vmatprep.subr.mxu1 %v12335_v20  ;;  %12351 = vst [vmem:[#allocation13_spill] sm:$0xff] %v7645_v31  ;;  %12352 = vst [vmem:[#allocation14_spill] sm:$0xff] %v7651_v26  ;;  %v7657_v1 = vld [vmem:[%s11507_s4 + $0x1b8] sm:$0xff]  ;;  %v7663_v20 = vld [vmem:[%s11507_s4 + $0x1a0] sm:$0xff] }
 0x2b5   :  { %1591 = vmatpush1.msra.mxu0 %v12336_v56  ;;  %1662 = vmatpush1.msra.mxu1 %v12337_v12  ;;  %12353 = vst [vmem:[#allocation15_spill] sm:$0xff] %v7657_v1  ;;  %12354 = vst [vmem:[#allocation16_spill] sm:$0xff] %v7663_v20  ;;  %v7669_v56 = vld [vmem:[%s11507_s4 + $0x1b0] sm:$0xff]  ;;  %v7675_v12 = vld [vmem:[%s11507_s4 + $0x188] sm:$0xff] }
 0x2b6   :  { %1592 = vmatprep.subr.mxu0 %v12338_v18  ;;  %1663 = vmatprep.subr.mxu1 %v12339_v17  ;;  %12355 = vst [vmem:[#allocation17_spill] sm:$0xff] %v7669_v56  ;;  %12356 = vst [vmem:[#allocation18_spill] sm:$0xff] %v7675_v12  ;;  %v7681_v18 = vld [vmem:[%s11507_s4 + $0x198] sm:$0xff]  ;;  %v7687_v17 = vld [vmem:[%s11507_s4 + $0x180] sm:$0xff] }
 0x2b7   :  { %1593 = vmatpush1.msra.mxu0 %v12340_v51  ;;  %1664 = vmatpush1.msra.mxu1 %v12341_v52  ;;  %12357 = vst [vmem:[#allocation19_spill] sm:$0xff] %v7681_v18  ;;  %12358 = vst [vmem:[#allocation20_spill] sm:$0xff] %v7687_v17  ;;  %v7693_v51 = vld [vmem:[%s11507_s4 + $0x190] sm:$0xff]  ;;  %v7699_v52 = vld [vmem:[%s11507_s4 + $0x168] sm:$0xff] }
 0x2b8   :  { %1594 = vmatprep.subr.mxu0 %v7090_v15  ;;  %1665 = vmatprep.subr.mxu1 %v7096_v3  ;;  %v7371_v3 = vld [vmem:[%s11506_s2 + $0x120] sm:$0xff]  ;;  %v7383_v15 = vld [vmem:[%s11506_s2 + $0x108] sm:$0xff]  ;;  %12359 = vst [vmem:[#allocation21_spill] sm:$0xff] %v7693_v51  ;;  %12360 = vst [vmem:[#allocation22_spill] sm:$0xff] %v7699_v52 }
 0x2b9   :  { %1595 = vmatpush1.msra.mxu0 %v7102_v16  ;;  %1666 = vmatpush1.msra.mxu1 %v7108_v47  ;;  %v7377_v16 = vld [vmem:[%s11506_s2 + $0x130] sm:$0xff]  ;;  %v7389_v47 = vld [vmem:[%s11506_s2 + $0x118] sm:$0xff] }
 0x2ba   :  { %1596 = vmatprep.subr.mxu0 %v7359_v53  ;;  %1667 = vmatprep.subr.mxu1 %v7365_v54 }
 0x2bb   :  { %1597 = vmatpush1.msra.mxu0 %v7371_v3  ;;  %1668 = vmatpush1.msra.mxu1 %v7377_v16 }
 0x2bc   :  { %1598 = vmatprep.subr.mxu0 %v7383_v15  ;;  %1669 = vmatprep.subr.mxu1 %v7389_v47 }
 0x2bd   :  { %1599 = vmatpush1.msra.mxu0 %v7395_v55  ;;  %1670 = vmatpush1.msra.mxu1 %v7401_v57 }
 0x2be   :  { %1600 = vmatprep.subr.mxu0 %v7407_v58  ;;  %1671 = vmatprep.subr.mxu1 %v7413_v62 }
 0x2bf   :  { %1601 = vmatpush1.msra.mxu0 %v7419_v63  ;;  %1672 = vmatpush1.msra.mxu1 %v7425_v0 }
 0x2c0   :  { %1602 = vmatprep.subr.mxu0 %v7431_v2  ;;  %1673 = vmatprep.subr.mxu1 %v7437_v4 }
 0x2c1   :  { %1603 = vmatpush1.msra.mxu0 %v7443_v5  ;;  %1674 = vmatpush1.msra.mxu1 %v7449_v6 }
 0x2c2   :  { %1604 = vmatprep.subr.mxu0 %v7455_v7  ;;  %1675 = vmatprep.subr.mxu1 %v7461_v8 }
 0x2c3   :  { %1605 = vmatpush1.msra.mxu0 %v7467_v9  ;;  %1676 = vmatpush1.msra.mxu1 %v7473_v10 }
 0x2c4   :  { %1606 = vmatprep.subr.mxu0 %v7479_v11  ;;  %1677 = vmatprep.subr.mxu1 %v7485_v25 }
 0x2c5   :  { %1607 = vmatpush1.msra.mxu0 %v7491_v32  ;;  %1678 = vmatpush1.msra.mxu1 %v7497_v33 }
 0x2c6   :  { %1608 = vmatprep.subr.mxu0 %v7503_v35  ;;  %1679 = vmatprep.subr.mxu1 %v7509_v36 }
 0x2c7   :  { %1609 = vmatpush1.msra.mxu0 %v7515_v37  ;;  %1680 = vmatpush1.msra.mxu1 %v7521_v39 }
 0x2c8   :  { %1610 = vmatprep.subr.mxu0 %v7527_v40  ;;  %1681 = vmatprep.subr.mxu1 %v7533_v41 }
 0x2c9   :  { %1611 = vmatpush1.msra.mxu0 %v7539_v42  ;;  %1682 = vmatpush1.msra.mxu1 %v7545_v43 }
 0x2ca   :  { %1612 = vmatprep.subr.mxu0 %v7551_v45  ;;  %1683 = vmatprep.subr.mxu1 %v7557_v46 }
 0x2cb   :  { %1613 = vmatpush1.msra.mxu0 %v7563_v48  ;;  %1684 = vmatpush1.msra.mxu1 %v7569_v29 }
 0x2cc   :  { %1614 = vmatprep.subr.mxu0 %v7575_v24  ;;  %1685 = vmatprep.subr.mxu1 %v7581_v38 }
 0x2cd   :  { %1615 = vmatpush1.msra.mxu0 %v7587_v50  ;;  %1648 = vmatprep.mubr.f32.mxu0 %v12180_v19 }
 0x2ce   :  { %1686 = vmatpush1.msra.mxu1 %v7594_v23  ;;  %1719 = vmatprep.mubr.f32.mxu1 %v12180_v19 }
 0x2cf   :  { %1649 = vmatmul.mubr.f32.vlgmr.msra.gmra.mxu0 %v7260_v49  ;;  %1720 = vmatmul.mubr.f32.vlgmr.msra.gmra.mxu1 %v7260_v49  ;;  %v7621_v49 = vld [vmem:[%s11507_s4 + $0x1f0] sm:$0xff] }
 0x2d0   :  { %1755 = vmatprep.subr.mxu0 %v7603_v27  ;;  %1826 = vmatprep.subr.mxu1 %v7609_v21  ;;  %12347 = vst [vmem:[#allocation9_spill] sm:$0xff] %v7621_v49 }
 0x2d1   :  { %1756 = vmatpush1.msra.mxu0 %v7615_v14  ;;  %1827 = vmatpush1.msra.mxu1 %v7621_v49 }
 0x2d2   :  { %1757 = vmatprep.subr.mxu0 %v7627_v13  ;;  %1828 = vmatprep.subr.mxu1 %v7633_v28 }
 0x2d3   :  { %1758 = vmatpush1.msra.mxu0 %v7639_v22  ;;  %1829 = vmatpush1.msra.mxu1 %v7645_v31 }
 0x2d4   :  { %1759 = vmatprep.subr.mxu0 %v7651_v26  ;;  %1830 = vmatprep.subr.mxu1 %v7657_v1 }
 0x2d5   :  { %1760 = vmatpush1.msra.mxu0 %v7663_v20  ;;  %1831 = vmatpush1.msra.mxu1 %v7669_v56 }
 0x2d6   :  { %1761 = vmatprep.subr.mxu0 %v7675_v12  ;;  %1832 = vmatprep.subr.mxu1 %v7681_v18  ;;  %v7705_v18 = vld [vmem:[%s11507_s4 + $0x178] sm:$0xff] }
 0x2d7   :  { %1762 = vmatpush1.msra.mxu0 %v7687_v17  ;;  %1833 = vmatpush1.msra.mxu1 %v7693_v51  ;;  %12361 = vst [vmem:[#allocation23_spill] sm:$0xff] %v7705_v18  ;;  %v7711_v17 = vld [vmem:[%s11507_s4 + $0x160] sm:$0xff]  ;;  %v7717_v51 = vld [vmem:[%s11507_s4 + $0x170] sm:$0xff] }
 0x2d8   :  { %1763 = vmatprep.subr.mxu0 %v7699_v52  ;;  %1834 = vmatprep.subr.mxu1 %v7705_v18  ;;  %12362 = vst [vmem:[#allocation24_spill] sm:$0xff] %v7711_v17  ;;  %12363 = vst [vmem:[#allocation25_spill] sm:$0xff] %v7717_v51  ;;  %v7723_v52 = vld [vmem:[%s11507_s4 + $0x148] sm:$0xff]  ;;  %v7729_v18 = vld [vmem:[%s11507_s4 + $0x158] sm:$0xff] }
 0x2d9   :  { %1764 = vmatpush1.msra.mxu0 %v7711_v17  ;;  %1835 = vmatpush1.msra.mxu1 %v7717_v51  ;;  %12364 = vst [vmem:[#allocation26_spill] sm:$0xff] %v7723_v52  ;;  %12365 = vst [vmem:[#allocation27_spill] sm:$0xff] %v7729_v18  ;;  %v7735_v17 = vld [vmem:[%s11507_s4 + $0x140] sm:$0xff]  ;;  %v7741_v51 = vld [vmem:[%s11507_s4 + $0x150] sm:$0xff] }
 0x2da   :  { %1765 = vmatprep.subr.mxu0 %v7723_v52  ;;  %1836 = vmatprep.subr.mxu1 %v7729_v18  ;;  %12366 = vst [vmem:[#allocation28_spill] sm:$0xff] %v7735_v17  ;;  %12367 = vst [vmem:[#allocation29_spill] sm:$0xff] %v7741_v51  ;;  %v7747_v52 = vld [vmem:[%s11507_s4 + $0x128] sm:$0xff]  ;;  %v7753_v18 = vld [vmem:[%s11507_s4 + $0x138] sm:$0xff] }
 0x2db   :  { %1766 = vmatpush1.msra.mxu0 %v7735_v17  ;;  %1837 = vmatpush1.msra.mxu1 %v7741_v51  ;;  %12368 = vst [vmem:[#allocation30_spill] sm:$0xff] %v7747_v52  ;;  %12369 = vst [vmem:[#allocation31_spill] sm:$0xff] %v7753_v18  ;;  %v7759_v17 = vld [vmem:[%s11507_s4 + $0x120] sm:$0xff]  ;;  %v7765_v51 = vld [vmem:[%s11507_s4 + $0x130] sm:$0xff] }
 0x2dc   :  { %1767 = vmatprep.subr.mxu0 %v7747_v52  ;;  %1838 = vmatprep.subr.mxu1 %v7753_v18  ;;  %12370 = vst [vmem:[#allocation32_spill] sm:$0xff] %v7759_v17  ;;  %12371 = vst [vmem:[#allocation33_spill] sm:$0xff] %v7765_v51  ;;  %v7771_v52 = vld [vmem:[%s11507_s4 + $0x108] sm:$0xff]  ;;  %v7777_v18 = vld [vmem:[%s11507_s4 + $0x118] sm:$0xff] }
 0x2dd   :  { %1768 = vmatpush1.msra.mxu0 %v7759_v17  ;;  %1839 = vmatpush1.msra.mxu1 %v7765_v51  ;;  %12372 = vst [vmem:[#allocation34_spill] sm:$0xff] %v7771_v52  ;;  %12373 = vst [vmem:[#allocation35_spill] sm:$0xff] %v7777_v18  ;;  %v7783_v17 = vld [vmem:[%s11507_s4 + $0x100] sm:$0xff]  ;;  %v7789_v51 = vld [vmem:[%s11507_s4 + $0x110] sm:$0xff] }
 0x2de   :  { %1769 = vmatprep.subr.mxu0 %v7771_v52  ;;  %1840 = vmatprep.subr.mxu1 %v7777_v18  ;;  %12374 = vst [vmem:[#allocation36_spill] sm:$0xff] %v7783_v17  ;;  %12375 = vst [vmem:[#allocation37_spill] sm:$0xff] %v7789_v51  ;;  %v7795_v52 = vld [vmem:[%s11507_s4 + $0xe8] sm:$0xff]  ;;  %v7801_v18 = vld [vmem:[%s11507_s4 + $0xf8] sm:$0xff] }
 0x2df   :  { %1770 = vmatpush1.msra.mxu0 %v7783_v17  ;;  %1841 = vmatpush1.msra.mxu1 %v7789_v51  ;;  %12376 = vst [vmem:[#allocation38_spill] sm:$0xff] %v7795_v52  ;;  %12377 = vst [vmem:[#allocation39_spill] sm:$0xff] %v7801_v18  ;;  %v7807_v17 = vld [vmem:[%s11507_s4 + $0xe0] sm:$0xff]  ;;  %v7813_v51 = vld [vmem:[%s11507_s4 + $0xf0] sm:$0xff] }
 0x2e0   :  { %1771 = vmatprep.subr.mxu0 %v7795_v52  ;;  %1842 = vmatprep.subr.mxu1 %v7801_v18  ;;  %12378 = vst [vmem:[#allocation40_spill] sm:$0xff] %v7807_v17  ;;  %12379 = vst [vmem:[#allocation41_spill] sm:$0xff] %v7813_v51  ;;  %v7819_v52 = vld [vmem:[%s11507_s4 + $0xc8] sm:$0xff]  ;;  %v7825_v18 = vld [vmem:[%s11507_s4 + $0xd8] sm:$0xff] }
 0x2e1   :  { %1772 = vmatpush1.msra.mxu0 %v7807_v17  ;;  %1843 = vmatpush1.msra.mxu1 %v7813_v51  ;;  %12380 = vst [vmem:[#allocation42_spill] sm:$0xff] %v7819_v52  ;;  %12381 = vst [vmem:[#allocation43_spill] sm:$0xff] %v7825_v18  ;;  %v7831_v17 = vld [vmem:[%s11507_s4 + $0xc0] sm:$0xff]  ;;  %v7837_v51 = vld [vmem:[%s11507_s4 + $0xd0] sm:$0xff] }
 0x2e2   :  { %1773 = vmatprep.subr.mxu0 %v7819_v52  ;;  %1844 = vmatprep.subr.mxu1 %v7825_v18  ;;  %12382 = vst [vmem:[#allocation44_spill] sm:$0xff] %v7831_v17  ;;  %12383 = vst [vmem:[#allocation45_spill] sm:$0xff] %v7837_v51  ;;  %v7843_v52 = vld [vmem:[%s11507_s4 + $0xa8] sm:$0xff]  ;;  %v7849_v18 = vld [vmem:[%s11507_s4 + $0xb8] sm:$0xff] }
 0x2e3   :  { %1774 = vmatpush1.msra.mxu0 %v7831_v17  ;;  %1845 = vmatpush1.msra.mxu1 %v7837_v51  ;;  %12384 = vst [vmem:[#allocation46_spill] sm:$0xff] %v7843_v52  ;;  %12385 = vst [vmem:[#allocation47_spill] sm:$0xff] %v7849_v18  ;;  %v7855_v17 = vld [vmem:[%s11507_s4 + $0xa0] sm:$0xff]  ;;  %v7861_v51 = vld [vmem:[%s11507_s4 + $0xb0] sm:$0xff] }
 0x2e4   :  { %1775 = vmatprep.subr.mxu0 %v7843_v52  ;;  %1846 = vmatprep.subr.mxu1 %v7849_v18  ;;  %12386 = vst [vmem:[#allocation48_spill] sm:$0xff] %v7855_v17  ;;  %12387 = vst [vmem:[#allocation49_spill] sm:$0xff] %v7861_v51  ;;  %v7867_v52 = vld [vmem:[%s11507_s4 + $0x88] sm:$0xff]  ;;  %v7873_v18 = vld [vmem:[%s11507_s4 + $0x98] sm:$0xff] }
 0x2e5   :  { %1776 = vmatpush1.msra.mxu0 %v7855_v17  ;;  %1847 = vmatpush1.msra.mxu1 %v7861_v51  ;;  %12388 = vst [vmem:[#allocation50_spill] sm:$0xff] %v7867_v52  ;;  %12389 = vst [vmem:[#allocation51_spill] sm:$0xff] %v7873_v18  ;;  %v7879_v17 = vld [vmem:[%s11507_s4 + $0x80] sm:$0xff]  ;;  %v7885_v51 = vld [vmem:[%s11507_s4 + $0x90] sm:$0xff] }
 0x2e6   :  { %1777 = vmatprep.subr.mxu0 %v7867_v52  ;;  %1848 = vmatprep.subr.mxu1 %v7873_v18  ;;  %12390 = vst [vmem:[#allocation52_spill] sm:$0xff] %v7879_v17  ;;  %12391 = vst [vmem:[#allocation53_spill] sm:$0xff] %v7885_v51  ;;  %v7891_v52 = vld [vmem:[%s11507_s4 + $0x68] sm:$0xff]  ;;  %v7897_v18 = vld [vmem:[%s11507_s4 + $0x78] sm:$0xff] }
 0x2e7   :  { %1778 = vmatpush1.msra.mxu0 %v7879_v17  ;;  %1849 = vmatpush1.msra.mxu1 %v7885_v51  ;;  %12392 = vst [vmem:[#allocation54_spill] sm:$0xff] %v7891_v52  ;;  %12393 = vst [vmem:[#allocation55_spill] sm:$0xff] %v7897_v18  ;;  %v7903_v17 = vld [vmem:[%s11507_s4 + $0x60] sm:$0xff]  ;;  %v7909_v51 = vld [vmem:[%s11507_s4 + $0x70] sm:$0xff] }
 0x2e8   :  { %1779 = vmatprep.subr.mxu0 %v7891_v52  ;;  %1850 = vmatprep.subr.mxu1 %v7897_v18  ;;  %12394 = vst [vmem:[#allocation56_spill] sm:$0xff] %v7903_v17  ;;  %12395 = vst [vmem:[#allocation57_spill] sm:$0xff] %v7909_v51  ;;  %v7915_v52 = vld [vmem:[%s11507_s4 + $0x48] sm:$0xff]  ;;  %v7921_v18 = vld [vmem:[%s11507_s4 + $0x58] sm:$0xff] }
 0x2e9   :  { %1780 = vmatpush1.msra.mxu0 %v7903_v17  ;;  %1851 = vmatpush1.msra.mxu1 %v7909_v51  ;;  %12396 = vst [vmem:[#allocation58_spill] sm:$0xff] %v7915_v52  ;;  %12397 = vst [vmem:[#allocation59_spill] sm:$0xff] %v7921_v18  ;;  %v7927_v17 = vld [vmem:[%s11507_s4 + $0x40] sm:$0xff]  ;;  %v7933_v51 = vld [vmem:[%s11507_s4 + $0x50] sm:$0xff] }
 0x2ea   :  { %1781 = vmatprep.subr.mxu0 %v7915_v52  ;;  %1852 = vmatprep.subr.mxu1 %v7921_v18  ;;  %12398 = vst [vmem:[#allocation60_spill] sm:$0xff] %v7927_v17  ;;  %12399 = vst [vmem:[#allocation61_spill] sm:$0xff] %v7933_v51  ;;  %v7939_v52 = vld [vmem:[%s11507_s4 + $0x28] sm:$0xff]  ;;  %v7945_v18 = vld [vmem:[%s11507_s4 + $0x38] sm:$0xff] }
 0x2eb   :  { %1782 = vmatpush1.msra.mxu0 %v7927_v17  ;;  %1853 = vmatpush1.msra.mxu1 %v7933_v51  ;;  %12400 = vst [vmem:[#allocation62_spill] sm:$0xff] %v7939_v52  ;;  %12401 = vst [vmem:[#allocation63_spill] sm:$0xff] %v7945_v18  ;;  %v7951_v17 = vld [vmem:[%s11507_s4 + $0x20] sm:$0xff]  ;;  %v7957_v51 = vld [vmem:[%s11507_s4 + $0x30] sm:$0xff] }
 0x2ec   :  { %1783 = vmatprep.subr.mxu0 %v7939_v52  ;;  %1854 = vmatprep.subr.mxu1 %v7945_v18  ;;  %12402 = vst [vmem:[#allocation64_spill] sm:$0xff] %v7951_v17  ;;  %12403 = vst [vmem:[#allocation65_spill] sm:$0xff] %v7957_v51  ;;  %v7963_v52 = vld [vmem:[%s11507_s4 + $0x8] sm:$0xff]  ;;  %v7969_v18 = vld [vmem:[%s11507_s4 + $0x18] sm:$0xff] }
 0x2ed   :  { %1784 = vmatpush1.msra.mxu0 %v7951_v17  ;;  %1855 = vmatpush1.msra.mxu1 %v7957_v51  ;;  %12404 = vst [vmem:[#allocation66_spill] sm:$0xff] %v7963_v52  ;;  %12405 = vst [vmem:[#allocation67_spill] sm:$0xff] %v7969_v18  ;;  %v7975_v17 = vld [vmem:[%s11507_s4] sm:$0xff]  ;;  %v7981_v51 = vld [vmem:[%s11507_s4 + $0x10] sm:$0xff] }
 0x2ee   :  { %1785 = vmatprep.subr.mxu0 %v7963_v52  ;;  %1856 = vmatprep.subr.mxu1 %v7969_v18  ;;  %12406 = vst [vmem:[#allocation68_spill] sm:$0xff] %v7975_v17  ;;  %12407 = vst [vmem:[#allocation70_spill] sm:$0xff] %v7981_v51  ;;  %v7989_v18 = vld [vmem:[%s11508_s5 + $0x1e8] sm:$0xff] }
 0x2ef   :  { %1786 = vmatpush1.msra.mxu0 %v7975_v17  ;;  %1857 = vmatpush1.msra.mxu1 %v7981_v51  ;;  %12408 = vst [vmem:[#allocation71_spill] sm:$0xff] %v7989_v18  ;;  %v7995_v17 = vld [vmem:[%s11508_s5 + $0x1f8] sm:$0xff] }
 0x2f0   :  { %1819 = vmatprep.mubr.f32.mxu0 %v12180_v19  ;;  %1890 = vmatprep.mubr.f32.mxu1 %v12180_v19  ;;  %12409 = vst [vmem:[#allocation69_spill] sm:$0xff] %v7995_v17 }
 0x2f1   :  { %1897 = vmatprep.subr.mxu0 %v7989_v18  ;;  %1968 = vmatprep.subr.mxu1 %v7995_v17 }
 0x34c   :  { %v1327_v52 = vpop.f32.mrf.mxu0  ;;  %v1398_v20 = vpop.f32.mrf.mxu1 }
 0x34d   :  { %v1328_v12 = vadd.f32 %v1327_v52, %v7228_v59  ;;  %v1399_v21 = vadd.f32 %v1398_v20, %v7243_v34 }
 0x34e   :  { %v1329_v51 = vpop.f32.mrf.mxu0  ;;  %v1400_v18 = vpop.f32.mrf.mxu1 }
 0x34f   :  { %v1330_v1 = vadd.f32 %v1329_v51, %v7232_v61  ;;  %v1401_v17 = vadd.f32 %v1400_v18, %v7238_v30 }
 0x36d   :  { %v1469_v56 = vpop.f32.mrf.mxu0  ;;  %v1540_v49 = vpop.f32.mrf.mxu1 }
 0x36e   :  { %v1545_v26 = vadd.f32 %v1469_v56, %v1328_v12  ;;  %v1547_v52 = vadd.f32 %v1540_v49, %v1399_v21 }
 0x36f   :  { %v1471_v31 = vpop.f32.mrf.mxu0  ;;  %v1542_v14 = vpop.f32.mrf.mxu1 }
 0x370   :  { %v4558_v22 = vmul.f32 -1.442695, %v1545_v26  ;;  %v1546_v28 = vadd.f32 %v1471_v31, %v1330_v1  ;;  %v1548_v27 = vadd.f32 %v1542_v14, %v1401_v17  ;;  %v12410_v1 = vld [vmem:[#allocation72_spill] sm:$0xff] }
 0x372   :  { %4657 = vpow2.f32 %v4558_v22  ;;  %v4559_v13 = vmul.f32 -1.442695, %v1546_v28  ;;  %v4560_v23 = vmul.f32 -1.442695, %v1548_v27  ;;  %v12411_v27 = vld [vmem:[#allocation74_spill] sm:$0xff] }
 0x374   :  { %4659 = vpow2.f32 %v4559_v13 }
 0x375   :  { %4661 = vtanh.f32 %v1547_v52 }
 0x37f   :  { %v4658_v59 = vpop.eup %4657 }
 0x380   :  { %v1558_v50 = vadd.f32 1.0, %v4658_v59 }
 0x381   :  { %v4660_v51 = vpop.eup %4659 }
 0x382   :  { %4663 = vrcp.f32 %v1558_v50  ;;  %v1559_v26 = vadd.f32 1.0, %v4660_v51  ;;  %v4662_v22 = vpop.eup %4661  ;;  %v12412_v51 = vld [vmem:[#allocation75_spill] sm:$0xff] }
 0x383   :  { %4665 = vpow2.f32 %v4560_v23 }
 0x384   :  { %4667 = vrcp.f32 %v1559_v26 }
 0x38f   :  { %v4664_v28 = vpop.eup %4663  ;;  %v1650_v31 = vpop.f32.mrf.mxu0 }
 0x390   :  { %v4666_v13 = vpop.eup %4665  ;;  %v1726_v56 = vadd.f32 %v1650_v31, %v12410_v1  ;;  %v1569_v20 = vmul.f32 %v4664_v28, %v4662_v22  ;;  %v1721_v50 = vpop.f32.mrf.mxu1  ;;  %v12413_v31 = vld [vmem:[#allocation73_spill] sm:$0xff] }
 0x391   :  { %v4668_v12 = vpop.eup %4667  ;;  %v1652_v18 = vpop.f32.mrf.mxu0  ;;  %v1560_v49 = vadd.f32 1.0, %v4666_v13  ;;  %v1728_v22 = vadd.f32 %v1721_v50, %v12413_v31 }
 0x392   :  { %v1568_v21 = vmul.f32 %v4668_v12, %v7248_v60  ;;  %v4562_v14 = vmul.f32 -1.442695, %v1726_v56  ;;  %v1727_v59 = vadd.f32 %v1652_v18, %v12411_v27  ;;  %v1723_v52 = vpop.f32.mrf.mxu1 }
 0x393   :  { %v1729_v26 = vadd.f32 %v1723_v52, %v12412_v51 }
 0x394   :  { %v8005_v17 = vadd.f32 %v1569_v20, %v1568_v21  ;;  %4669 = vpow2.f32 %v4562_v14  ;;  %v4563_v23 = vmul.f32 -1.442695, %v1727_v59 }
 0x395   :  { %v4564_v28 = vmul.f32 -1.442695, %v1729_v26 }
 0x396   :  { %4671 = vpow2.f32 %v4563_v23 }
 0x397   :  { %4673 = vrcp.f32 %v1560_v49 }
 0x398   :  { %4675 = vtanh.f32 %v8005_v17 }
 0x399   :  { %4677 = vtanh.f32 %v1728_v22 }
 0x39a   :  { %4679 = vpow2.f32 %v4564_v28 }
 0x3a1   :  { %v4670_v60 = vpop.eup %4669 }
 0x3a2   :  { %v1739_v1 = vadd.f32 1.0, %v4670_v60 }
 0x3a3   :  { %v4672_v56 = vpop.eup %4671 }
 0x3a4   :  { %v4674_v13 = vpop.eup %4673  ;;  %4681 = vrcp.f32 %v1739_v1  ;;  %v1740_v12 = vadd.f32 1.0, %v4672_v56 }
 0x3a5   :  { %v4676_v18 = vpop.eup %4675 }
 0x3a6   :  { %4683 = vrcp.f32 %v1740_v12  ;;  %v8010_v20 = vmul.f32 %v4676_v18, %v4674_v13  ;;  %v4678_v14 = vpop.eup %4677  ;;  %v8032_v13 = vld [vmem:[%s11508_s5 + $0x1f0] sm:$0xff]  ;;  %v8038_v12 = vld [vmem:[%s11508_s5 + $0x1c8] sm:$0xff]  ;;  %v8044_v18 = vld [vmem:[%s11508_s5 + $0x1d8] sm:$0xff] }
 0x3a7   :  { %v4680_v27 = vpop.eup %4679 }
 0x3a8   :  { %v4561_v21 = vmul.f32 -1.442695, %v8010_v20  ;;  %v1741_v23 = vadd.f32 1.0, %v4680_v27  ;;  %v8062_v27 = vld [vmem:[%s11508_s5 + $0x1a8] sm:$0xff] }
 0x3aa   :  { %4685 = vpow2.f32 %v4561_v21  ;;  %v8050_v21 = vld [vmem:[%s11508_s5 + $0x1c0] sm:$0xff] }
 0x3ab   :  { %4687 = vrcp.f32 %v1741_v23  ;;  %v8086_v23 = vld [vmem:[%s11508_s5 + $0x188] sm:$0xff] }
 0x3b1   :  { %v4682_v59 = vpop.eup %4681 }
 0x3b2   :  { %v1750_v49 = vmul.f32 %v4682_v59, %v4678_v14  ;;  %v8056_v14 = vld [vmem:[%s11508_s5 + $0x1d0] sm:$0xff]  ;;  %v8068_v59 = vld [vmem:[%s11508_s5 + $0x1b8] sm:$0xff] }
 0x3b3   :  { %v4684_v50 = vpop.eup %4683 }
 0x3b4   :  { %v1749_v52 = vmul.f32 %v4684_v50, %v7257_v44  ;;  %v8026_v44 = vld [vmem:[%s11508_s5 + $0x1e0] sm:$0xff]  ;;  %v8080_v50 = vld [vmem:[%s11508_s5 + $0x1b0] sm:$0xff] }
 0x3b6   :  { %v8014_v51 = vadd.f32 %v1750_v49, %v1749_v52  ;;  %v8074_v49 = vld [vmem:[%s11508_s5 + $0x1a0] sm:$0xff]  ;;  %v8092_v52 = vld [vmem:[%s11508_s5 + $0x198] sm:$0xff] }
 0x3b7   :  { %v4686_v26 = vpop.eup %4685 }
 0x3b8   :  { %4689 = vtanh.f32 %v8014_v51  ;;  %v1576_v31 = vadd.f32 1.0, %v4686_v26  ;;  %v4688_v22 = vpop.eup %4687  ;;  %v8098_v26 = vld [vmem:[%s11508_s5 + $0x180] sm:$0xff] }
 0x3ba   :  { %4691 = vrcp.f32 %v1576_v31  ;;  %v8104_v31 = vld [vmem:[%s11508_s5 + $0x190] sm:$0xff] }
 0x3c5   :  { %v4690_v28 = vpop.eup %4689 }
 0x3c6   :  { %v8017_v60 = vmul.f32 %v4690_v28, %v4688_v22  ;;  %v8110_v22 = vld [vmem:[%s11508_s5 + $0x168] sm:$0xff]  ;;  %v8116_v28 = vld [vmem:[%s11508_s5 + $0x178] sm:$0xff] }
 0x3c7   :  { %v4692_v1 = vpop.eup %4691  ;;  %12414 = vst [vmem:[#allocation96_spill] sm:$0xff] %v8110_v22  ;;  %12415 = vst [vmem:[#allocation97_spill] sm:$0xff] %v8116_v28 }
 0x3c8   :  { %v1754_v56 = vmax.f32 %v8017_v60, 0.0  ;;  %1579 = vst [vmem:[%s11511_s7 + $0x8] sm:$0xff] %v4692_v1  ;;  %v8122_v1 = vld [vmem:[%s11508_s5 + $0x160] sm:$0xff] }
 0x3c9   :  { %12416 = vst [vmem:[#allocation98_spill] sm:$0xff] %v8122_v1 }
 0x3ca   :  { %1820 = vmatmul.mubr.f32.vlgmr.msra.gmra.mxu0 %v1754_v56  ;;  %1891 = vmatmul.mubr.f32.vlgmr.msra.gmra.mxu1 %v1754_v56  ;;  %v8128_v56 = vld [vmem:[%s11508_s5 + $0x170] sm:$0xff] }
 0x3cb   :  { %1898 = vmatpush1.msra.mxu0 %v8026_v44  ;;  %1969 = vmatpush1.msra.mxu1 %v8032_v13  ;;  %12417 = vst [vmem:[#allocation99_spill] sm:$0xff] %v8128_v56 }
 0x3cc   :  { %1899 = vmatprep.subr.mxu0 %v8038_v12  ;;  %1970 = vmatprep.subr.mxu1 %v8044_v18 }
 0x3cd   :  { %1900 = vmatpush1.msra.mxu0 %v8050_v21  ;;  %1971 = vmatpush1.msra.mxu1 %v8056_v14 }
 0x3ce   :  { %1901 = vmatprep.subr.mxu0 %v8062_v27  ;;  %1972 = vmatprep.subr.mxu1 %v8068_v59 }
 0x3cf   :  { %1902 = vmatpush1.msra.mxu0 %v8074_v49  ;;  %1973 = vmatpush1.msra.mxu1 %v8080_v50 }
 0x3d0   :  { %1903 = vmatprep.subr.mxu0 %v8086_v23  ;;  %1974 = vmatprep.subr.mxu1 %v8092_v52 }
 0x3d1   :  { %1904 = vmatpush1.msra.mxu0 %v8098_v26  ;;  %1975 = vmatpush1.msra.mxu1 %v8104_v31 }
 0x3d2   :  { %1905 = vmatprep.subr.mxu0 %v8110_v22  ;;  %1976 = vmatprep.subr.mxu1 %v8116_v28  ;;  %v8134_v22 = vld [vmem:[%s11508_s5 + $0x148] sm:$0xff]  ;;  %v8140_v28 = vld [vmem:[%s11508_s5 + $0x158] sm:$0xff] }
 0x3d3   :  { %1906 = vmatpush1.msra.mxu0 %v8122_v1  ;;  %1977 = vmatpush1.msra.mxu1 %v8128_v56  ;;  %12418 = vst [vmem:[#allocation100_spill] sm:$0xff] %v8134_v22  ;;  %12419 = vst [vmem:[#allocation101_spill] sm:$0xff] %v8140_v28  ;;  %v8146_v1 = vld [vmem:[%s11508_s5 + $0x140] sm:$0xff]  ;;  %v8152_v56 = vld [vmem:[%s11508_s5 + $0x150] sm:$0xff] }
 0x3d4   :  { %1907 = vmatprep.subr.mxu0 %v8134_v22  ;;  %1978 = vmatprep.subr.mxu1 %v8140_v28  ;;  %12420 = vst [vmem:[#allocation102_spill] sm:$0xff] %v8146_v1  ;;  %12421 = vst [vmem:[#allocation103_spill] sm:$0xff] %v8152_v56  ;;  %v8158_v22 = vld [vmem:[%s11508_s5 + $0x128] sm:$0xff]  ;;  %v8164_v28 = vld [vmem:[%s11508_s5 + $0x138] sm:$0xff] }
 0x3d5   :  { %1908 = vmatpush1.msra.mxu0 %v8146_v1  ;;  %1979 = vmatpush1.msra.mxu1 %v8152_v56  ;;  %12422 = vst [vmem:[#allocation104_spill] sm:$0xff] %v8158_v22  ;;  %12423 = vst [vmem:[#allocation105_spill] sm:$0xff] %v8164_v28  ;;  %v8170_v1 = vld [vmem:[%s11508_s5 + $0x120] sm:$0xff]  ;;  %v8176_v56 = vld [vmem:[%s11508_s5 + $0x130] sm:$0xff] }
 0x3d6   :  { %1909 = vmatprep.subr.mxu0 %v8158_v22  ;;  %1980 = vmatprep.subr.mxu1 %v8164_v28  ;;  %12424 = vst [vmem:[#allocation106_spill] sm:$0xff] %v8170_v1  ;;  %12425 = vst [vmem:[#allocation107_spill] sm:$0xff] %v8176_v56  ;;  %v8182_v22 = vld [vmem:[%s11508_s5 + $0x108] sm:$0xff]  ;;  %v8188_v28 = vld [vmem:[%s11508_s5 + $0x118] sm:$0xff] }
 0x3d7   :  { %1910 = vmatpush1.msra.mxu0 %v8170_v1  ;;  %1981 = vmatpush1.msra.mxu1 %v8176_v56  ;;  %12426 = vst [vmem:[#allocation108_spill] sm:$0xff] %v8182_v22  ;;  %12427 = vst [vmem:[#allocation109_spill] sm:$0xff] %v8188_v28  ;;  %v8194_v1 = vld [vmem:[%s11508_s5 + $0x100] sm:$0xff]  ;;  %v8200_v56 = vld [vmem:[%s11508_s5 + $0x110] sm:$0xff] }
 0x3d8   :  { %1911 = vmatprep.subr.mxu0 %v8182_v22  ;;  %1982 = vmatprep.subr.mxu1 %v8188_v28  ;;  %12428 = vst [vmem:[#allocation110_spill] sm:$0xff] %v8194_v1  ;;  %12429 = vst [vmem:[#allocation111_spill] sm:$0xff] %v8200_v56  ;;  %v8206_v22 = vld [vmem:[%s11508_s5 + $0xe8] sm:$0xff]  ;;  %v8212_v28 = vld [vmem:[%s11508_s5 + $0xf8] sm:$0xff] }
 0x3d9   :  { %1912 = vmatpush1.msra.mxu0 %v8194_v1  ;;  %1983 = vmatpush1.msra.mxu1 %v8200_v56  ;;  %12430 = vst [vmem:[#allocation112_spill] sm:$0xff] %v8206_v22  ;;  %12431 = vst [vmem:[#allocation113_spill] sm:$0xff] %v8212_v28  ;;  %v8218_v1 = vld [vmem:[%s11508_s5 + $0xe0] sm:$0xff]  ;;  %v8224_v56 = vld [vmem:[%s11508_s5 + $0xf0] sm:$0xff] }
 0x3da   :  { %1913 = vmatprep.subr.mxu0 %v8206_v22  ;;  %1984 = vmatprep.subr.mxu1 %v8212_v28  ;;  %12432 = vst [vmem:[#allocation114_spill] sm:$0xff] %v8218_v1  ;;  %12433 = vst [vmem:[#allocation115_spill] sm:$0xff] %v8224_v56  ;;  %v8230_v22 = vld [vmem:[%s11508_s5 + $0xc8] sm:$0xff]  ;;  %v8236_v28 = vld [vmem:[%s11508_s5 + $0xd8] sm:$0xff] }
 0x3db   :  { %1914 = vmatpush1.msra.mxu0 %v8218_v1  ;;  %1985 = vmatpush1.msra.mxu1 %v8224_v56  ;;  %12434 = vst [vmem:[#allocation116_spill] sm:$0xff] %v8230_v22  ;;  %12435 = vst [vmem:[#allocation117_spill] sm:$0xff] %v8236_v28  ;;  %v8242_v1 = vld [vmem:[%s11508_s5 + $0xc0] sm:$0xff]  ;;  %v8248_v56 = vld [vmem:[%s11508_s5 + $0xd0] sm:$0xff] }
 0x3dc   :  { %1915 = vmatprep.subr.mxu0 %v8230_v22  ;;  %1986 = vmatprep.subr.mxu1 %v8236_v28  ;;  %12436 = vst [vmem:[#allocation118_spill] sm:$0xff] %v8242_v1  ;;  %12437 = vst [vmem:[#allocation119_spill] sm:$0xff] %v8248_v56  ;;  %v8254_v22 = vld [vmem:[%s11508_s5 + $0xa8] sm:$0xff]  ;;  %v8260_v28 = vld [vmem:[%s11508_s5 + $0xb8] sm:$0xff] }
 0x3dd   :  { %1916 = vmatpush1.msra.mxu0 %v8242_v1  ;;  %1987 = vmatpush1.msra.mxu1 %v8248_v56  ;;  %12438 = vst [vmem:[#allocation120_spill] sm:$0xff] %v8254_v22  ;;  %12439 = vst [vmem:[#allocation121_spill] sm:$0xff] %v8260_v28  ;;  %v8266_v1 = vld [vmem:[%s11508_s5 + $0xa0] sm:$0xff]  ;;  %v8272_v56 = vld [vmem:[%s11508_s5 + $0xb0] sm:$0xff] }
 0x3de   :  { %1917 = vmatprep.subr.mxu0 %v8254_v22  ;;  %1988 = vmatprep.subr.mxu1 %v8260_v28  ;;  %12440 = vst [vmem:[#allocation122_spill] sm:$0xff] %v8266_v1  ;;  %12441 = vst [vmem:[#allocation123_spill] sm:$0xff] %v8272_v56  ;;  %v8278_v22 = vld [vmem:[%s11508_s5 + $0x88] sm:$0xff]  ;;  %v8284_v28 = vld [vmem:[%s11508_s5 + $0x98] sm:$0xff] }
 0x3df   :  { %1918 = vmatpush1.msra.mxu0 %v8266_v1  ;;  %1989 = vmatpush1.msra.mxu1 %v8272_v56  ;;  %12442 = vst [vmem:[#allocation124_spill] sm:$0xff] %v8278_v22  ;;  %12443 = vst [vmem:[#allocation125_spill] sm:$0xff] %v8284_v28  ;;  %v8290_v1 = vld [vmem:[%s11508_s5 + $0x80] sm:$0xff]  ;;  %v8296_v56 = vld [vmem:[%s11508_s5 + $0x90] sm:$0xff] }
 0x3e0   :  { %1919 = vmatprep.subr.mxu0 %v8278_v22  ;;  %1990 = vmatprep.subr.mxu1 %v8284_v28  ;;  %12444 = vst [vmem:[#allocation126_spill] sm:$0xff] %v8290_v1  ;;  %12445 = vst [vmem:[#allocation127_spill] sm:$0xff] %v8296_v56  ;;  %v8302_v22 = vld [vmem:[%s11508_s5 + $0x68] sm:$0xff]  ;;  %v8308_v28 = vld [vmem:[%s11508_s5 + $0x78] sm:$0xff] }
 0x3e1   :  { %1920 = vmatpush1.msra.mxu0 %v8290_v1  ;;  %1991 = vmatpush1.msra.mxu1 %v8296_v56  ;;  %12446 = vst [vmem:[#allocation128_spill] sm:$0xff] %v8302_v22  ;;  %12447 = vst [vmem:[#allocation129_spill] sm:$0xff] %v8308_v28  ;;  %v8314_v1 = vld [vmem:[%s11508_s5 + $0x60] sm:$0xff]  ;;  %v8320_v56 = vld [vmem:[%s11508_s5 + $0x70] sm:$0xff] }
 0x3e2   :  { %1921 = vmatprep.subr.mxu0 %v8302_v22  ;;  %1992 = vmatprep.subr.mxu1 %v8308_v28  ;;  %12448 = vst [vmem:[#allocation130_spill] sm:$0xff] %v8314_v1  ;;  %12449 = vst [vmem:[#allocation131_spill] sm:$0xff] %v8320_v56  ;;  %v8326_v22 = vld [vmem:[%s11508_s5 + $0x48] sm:$0xff]  ;;  %v8332_v28 = vld [vmem:[%s11508_s5 + $0x58] sm:$0xff] }
 0x3e3   :  { %1922 = vmatpush1.msra.mxu0 %v8314_v1  ;;  %1993 = vmatpush1.msra.mxu1 %v8320_v56  ;;  %12450 = vst [vmem:[#allocation132_spill] sm:$0xff] %v8326_v22  ;;  %12451 = vst [vmem:[#allocation133_spill] sm:$0xff] %v8332_v28  ;;  %v8338_v1 = vld [vmem:[%s11508_s5 + $0x40] sm:$0xff]  ;;  %v8344_v56 = vld [vmem:[%s11508_s5 + $0x50] sm:$0xff] }
 0x3e4   :  { %1923 = vmatprep.subr.mxu0 %v8326_v22  ;;  %1994 = vmatprep.subr.mxu1 %v8332_v28  ;;  %12452 = vst [vmem:[#allocation134_spill] sm:$0xff] %v8338_v1  ;;  %12453 = vst [vmem:[#allocation135_spill] sm:$0xff] %v8344_v56  ;;  %v8350_v22 = vld [vmem:[%s11508_s5 + $0x28] sm:$0xff]  ;;  %v8356_v28 = vld [vmem:[%s11508_s5 + $0x38] sm:$0xff] }
 0x3e5   :  { %1924 = vmatpush1.msra.mxu0 %v8338_v1  ;;  %1995 = vmatpush1.msra.mxu1 %v8344_v56  ;;  %12454 = vst [vmem:[#allocation136_spill] sm:$0xff] %v8350_v22  ;;  %12455 = vst [vmem:[#allocation137_spill] sm:$0xff] %v8356_v28  ;;  %v8362_v1 = vld [vmem:[%s11508_s5 + $0x20] sm:$0xff]  ;;  %v8368_v56 = vld [vmem:[%s11508_s5 + $0x30] sm:$0xff] }
 0x3e6   :  { %1925 = vmatprep.subr.mxu0 %v8350_v22  ;;  %1996 = vmatprep.subr.mxu1 %v8356_v28  ;;  %12456 = vst [vmem:[#allocation138_spill] sm:$0xff] %v8362_v1  ;;  %v8374_v22 = vld [vmem:[%s11508_s5 + $0x8] sm:$0xff]  ;;  %v8380_v28 = vld [vmem:[%s11508_s5 + $0x18] sm:$0xff] }
 0x3e7   :  { %1926 = vmatpush1.msra.mxu0 %v8362_v1  ;;  %1997 = vmatpush1.msra.mxu1 %v8368_v56  ;;  %12457 = vst [vmem:[#allocation139_spill] sm:$0xff] %v8374_v22  ;;  %12458 = vst [vmem:[#allocation140_spill] sm:$0xff] %v8380_v28  ;;  %v8386_v1 = vld [vmem:[%s11508_s5] sm:$0xff] }
 0x3e8   :  { %1927 = vmatprep.subr.mxu0 %v8374_v22  ;;  %1998 = vmatprep.subr.mxu1 %v8380_v28  ;;  %12459 = vst [vmem:[#allocation141_spill] sm:$0xff] %v8386_v1  ;;  %v8393_v22 = vld [vmem:[%s11508_s5 + $0x10] sm:$0xff]  ;;  %v8402_v28 = vld [vmem:[%s11506_s2 + $0x1e8] sm:$0xff] }
 0x3e9   :  { %1928 = vmatpush1.msra.mxu0 %v8386_v1  ;;  %1961 = vmatprep.mubr.f32.mxu0 %v12180_v19  ;;  %12460 = vst [vmem:[#allocation142_spill] sm:$0xff] %v8393_v22  ;;  %12461 = vst [vmem:[#allocation143_spill] sm:$0xff] %v8402_v28  ;;  %v8408_v1 = vld [vmem:[%s11506_s2 + $0x1f8] sm:$0xff] }
 0x3ea   :  { %1999 = vmatpush1.msra.mxu1 %v8393_v22  ;;  %2032 = vmatprep.mubr.f32.mxu1 %v12180_v19  ;;  %12462 = vst [vmem:[#allocation144_spill] sm:$0xff] %v8408_v1  ;;  %v8414_v22 = vld [vmem:[%s11506_s2 + $0x1e0] sm:$0xff] }
 0x3eb   :  { %1962 = vmatmul.mubr.f32.vlgmr.msra.gmra.mxu0 %v8010_v20  ;;  %2033 = vmatmul.mubr.f32.vlgmr.msra.gmra.mxu1 %v8010_v20  ;;  %12463 = vst [vmem:[#allocation145_spill] sm:$0xff] %v8414_v22  ;;  %v8420_v20 = vld [vmem:[%s11506_s2 + $0x1f0] sm:$0xff] }
 0x3ec   :  { %2078 = vmatprep.subr.mxu0 %v8402_v28  ;;  %2149 = vmatprep.subr.mxu1 %v8408_v1  ;;  %12464 = vst [vmem:[#allocation146_spill] sm:$0xff] %v8420_v20  ;;  %v8426_v28 = vld [vmem:[%s11506_s2 + $0x1c8] sm:$0xff]  ;;  %v8432_v1 = vld [vmem:[%s11506_s2 + $0x1d8] sm:$0xff] }
 0x3ed   :  { %2079 = vmatpush1.msra.mxu0 %v8414_v22  ;;  %2150 = vmatpush1.msra.mxu1 %v8420_v20  ;;  %12465 = vst [vmem:[#allocation147_spill] sm:$0xff] %v8426_v28  ;;  %12466 = vst [vmem:[#allocation148_spill] sm:$0xff] %v8432_v1  ;;  %v8438_v22 = vld [vmem:[%s11506_s2 + $0x1c0] sm:$0xff]  ;;  %v8444_v20 = vld [vmem:[%s11506_s2 + $0x1d0] sm:$0xff] }
 0x3ee   :  { %2080 = vmatprep.subr.mxu0 %v8426_v28  ;;  %2151 = vmatprep.subr.mxu1 %v8432_v1  ;;  %12467 = vst [vmem:[#allocation149_spill] sm:$0xff] %v8438_v22  ;;  %12468 = vst [vmem:[#allocation150_spill] sm:$0xff] %v8444_v20  ;;  %v8450_v28 = vld [vmem:[%s11506_s2 + $0x1a8] sm:$0xff]  ;;  %v8456_v1 = vld [vmem:[%s11506_s2 + $0x1b8] sm:$0xff] }
 0x3ef   :  { %2081 = vmatpush1.msra.mxu0 %v8438_v22  ;;  %2152 = vmatpush1.msra.mxu1 %v8444_v20  ;;  %12469 = vst [vmem:[#allocation151_spill] sm:$0xff] %v8450_v28  ;;  %12470 = vst [vmem:[#allocation152_spill] sm:$0xff] %v8456_v1  ;;  %v8462_v22 = vld [vmem:[%s11506_s2 + $0x1a0] sm:$0xff]  ;;  %v8468_v20 = vld [vmem:[%s11506_s2 + $0x1b0] sm:$0xff] }
 0x3f0   :  { %2082 = vmatprep.subr.mxu0 %v8450_v28  ;;  %2153 = vmatprep.subr.mxu1 %v8456_v1  ;;  %12471 = vst [vmem:[#allocation153_spill] sm:$0xff] %v8462_v22  ;;  %12472 = vst [vmem:[#allocation154_spill] sm:$0xff] %v8468_v20  ;;  %v8474_v28 = vld [vmem:[%s11506_s2 + $0x188] sm:$0xff]  ;;  %v8480_v1 = vld [vmem:[%s11506_s2 + $0x198] sm:$0xff] }
 0x3f1   :  { %2083 = vmatpush1.msra.mxu0 %v8462_v22  ;;  %2154 = vmatpush1.msra.mxu1 %v8468_v20  ;;  %12473 = vst [vmem:[#allocation155_spill] sm:$0xff] %v8474_v28  ;;  %12474 = vst [vmem:[#allocation156_spill] sm:$0xff] %v8480_v1  ;;  %v8486_v22 = vld [vmem:[%s11506_s2 + $0x180] sm:$0xff]  ;;  %v8492_v20 = vld [vmem:[%s11506_s2 + $0x190] sm:$0xff] }
 0x3f2   :  { %2084 = vmatprep.subr.mxu0 %v8474_v28  ;;  %2155 = vmatprep.subr.mxu1 %v8480_v1  ;;  %12475 = vst [vmem:[#allocation157_spill] sm:$0xff] %v8486_v22  ;;  %12476 = vst [vmem:[#allocation158_spill] sm:$0xff] %v8492_v20  ;;  %v8498_v28 = vld [vmem:[%s11506_s2 + $0x168] sm:$0xff]  ;;  %v8504_v1 = vld [vmem:[%s11506_s2 + $0x178] sm:$0xff] }
 0x3f3   :  { %2085 = vmatpush1.msra.mxu0 %v8486_v22  ;;  %2156 = vmatpush1.msra.mxu1 %v8492_v20  ;;  %12477 = vst [vmem:[#allocation159_spill] sm:$0xff] %v8498_v28  ;;  %12478 = vst [vmem:[#allocation160_spill] sm:$0xff] %v8504_v1  ;;  %v8510_v22 = vld [vmem:[%s11506_s2 + $0x160] sm:$0xff]  ;;  %v8516_v20 = vld [vmem:[%s11506_s2 + $0x170] sm:$0xff] }
 0x3f4   :  { %2086 = vmatprep.subr.mxu0 %v8498_v28  ;;  %2157 = vmatprep.subr.mxu1 %v8504_v1  ;;  %12479 = vst [vmem:[#allocation161_spill] sm:$0xff] %v8510_v22  ;;  %12480 = vst [vmem:[#allocation162_spill] sm:$0xff] %v8516_v20  ;;  %v8522_v28 = vld [vmem:[%s11506_s2 + $0x148] sm:$0xff]  ;;  %v8528_v1 = vld [vmem:[%s11506_s2 + $0x158] sm:$0xff] }
 0x3f5   :  { %2087 = vmatpush1.msra.mxu0 %v8510_v22  ;;  %2158 = vmatpush1.msra.mxu1 %v8516_v20  ;;  %v8534_v22 = vld [vmem:[%s11506_s2 + $0x140] sm:$0xff]  ;;  %v8540_v20 = vld [vmem:[%s11506_s2 + $0x150] sm:$0xff] }
 0x3f6   :  { %2088 = vmatprep.subr.mxu0 %v8522_v28  ;;  %2159 = vmatprep.subr.mxu1 %v8528_v1 }
 0x3f7   :  { %2089 = vmatpush1.msra.mxu0 %v8534_v22  ;;  %2160 = vmatpush1.msra.mxu1 %v8540_v20 }
 0x3f8   :  { %2090 = vmatprep.subr.mxu0 %v7359_v53  ;;  %2161 = vmatprep.subr.mxu1 %v7365_v54  ;;  %v12481_v53 = vld [vmem:[#allocation4_spill] sm:$0xff]  ;;  %v12482_v54 = vld [vmem:[#allocation5_spill] sm:$0xff] }
 0x3f9   :  { %2091 = vmatpush1.msra.mxu0 %v7371_v3  ;;  %2162 = vmatpush1.msra.mxu1 %v7377_v16  ;;  %v12483_v3 = vld [vmem:[#allocation6_spill] sm:$0xff]  ;;  %v12484_v16 = vld [vmem:[#allocation7_spill] sm:$0xff] }
 0x3fa   :  { %2092 = vmatprep.subr.mxu0 %v7383_v15  ;;  %2163 = vmatprep.subr.mxu1 %v7389_v47  ;;  %v12485_v15 = vld [vmem:[#allocation8_spill] sm:$0xff]  ;;  %v12486_v47 = vld [vmem:[#allocation9_spill] sm:$0xff] }
 0x3fb   :  { %2093 = vmatpush1.msra.mxu0 %v7395_v55  ;;  %2164 = vmatpush1.msra.mxu1 %v7401_v57  ;;  %v12487_v55 = vld [vmem:[#allocation10_spill] sm:$0xff]  ;;  %v12488_v57 = vld [vmem:[#allocation11_spill] sm:$0xff] }
 0x3fc   :  { %2094 = vmatprep.subr.mxu0 %v7407_v58  ;;  %2165 = vmatprep.subr.mxu1 %v7413_v62  ;;  %v12489_v58 = vld [vmem:[#allocation12_spill] sm:$0xff]  ;;  %v12490_v62 = vld [vmem:[#allocation13_spill] sm:$0xff] }
 0x3fd   :  { %2095 = vmatpush1.msra.mxu0 %v7419_v63  ;;  %2166 = vmatpush1.msra.mxu1 %v7425_v0  ;;  %v12491_v63 = vld [vmem:[#allocation14_spill] sm:$0xff]  ;;  %v12492_v0 = vld [vmem:[#allocation15_spill] sm:$0xff] }
 0x3fe   :  { %2096 = vmatprep.subr.mxu0 %v7431_v2  ;;  %2167 = vmatprep.subr.mxu1 %v7437_v4  ;;  %v12493_v2 = vld [vmem:[#allocation16_spill] sm:$0xff]  ;;  %v12494_v4 = vld [vmem:[#allocation17_spill] sm:$0xff] }
 0x3ff   :  { %2097 = vmatpush1.msra.mxu0 %v7443_v5  ;;  %2168 = vmatpush1.msra.mxu1 %v7449_v6  ;;  %v12495_v5 = vld [vmem:[#allocation18_spill] sm:$0xff]  ;;  %v12496_v6 = vld [vmem:[#allocation19_spill] sm:$0xff] }
 0x400   :  { %2098 = vmatprep.subr.mxu0 %v7455_v7  ;;  %2169 = vmatprep.subr.mxu1 %v7461_v8  ;;  %v12497_v7 = vld [vmem:[#allocation20_spill] sm:$0xff]  ;;  %v12498_v8 = vld [vmem:[#allocation21_spill] sm:$0xff] }
 0x401   :  { %2099 = vmatpush1.msra.mxu0 %v7467_v9  ;;  %2170 = vmatpush1.msra.mxu1 %v7473_v10  ;;  %v12499_v9 = vld [vmem:[#allocation22_spill] sm:$0xff]  ;;  %v12500_v10 = vld [vmem:[#allocation23_spill] sm:$0xff] }
 0x402   :  { %2100 = vmatprep.subr.mxu0 %v7479_v11  ;;  %2171 = vmatprep.subr.mxu1 %v7485_v25  ;;  %v12501_v11 = vld [vmem:[#allocation24_spill] sm:$0xff]  ;;  %v12502_v25 = vld [vmem:[#allocation25_spill] sm:$0xff] }
 0x403   :  { %2101 = vmatpush1.msra.mxu0 %v7491_v32  ;;  %2172 = vmatpush1.msra.mxu1 %v7497_v33  ;;  %v12503_v32 = vld [vmem:[#allocation26_spill] sm:$0xff]  ;;  %v12504_v33 = vld [vmem:[#allocation27_spill] sm:$0xff] }
 0x404   :  { %2102 = vmatprep.subr.mxu0 %v7503_v35  ;;  %2173 = vmatprep.subr.mxu1 %v7509_v36  ;;  %v12505_v35 = vld [vmem:[#allocation28_spill] sm:$0xff]  ;;  %v12506_v36 = vld [vmem:[#allocation29_spill] sm:$0xff] }
 0x405   :  { %2103 = vmatpush1.msra.mxu0 %v7515_v37  ;;  %2174 = vmatpush1.msra.mxu1 %v7521_v39  ;;  %v12507_v37 = vld [vmem:[#allocation30_spill] sm:$0xff]  ;;  %v12508_v39 = vld [vmem:[#allocation31_spill] sm:$0xff] }
 0x406   :  { %2104 = vmatprep.subr.mxu0 %v7527_v40  ;;  %2175 = vmatprep.subr.mxu1 %v7533_v41  ;;  %v12509_v40 = vld [vmem:[#allocation32_spill] sm:$0xff]  ;;  %v12510_v41 = vld [vmem:[#allocation33_spill] sm:$0xff] }
 0x407   :  { %2105 = vmatpush1.msra.mxu0 %v7539_v42  ;;  %2176 = vmatpush1.msra.mxu1 %v7545_v43  ;;  %v12511_v42 = vld [vmem:[#allocation34_spill] sm:$0xff]  ;;  %v12512_v43 = vld [vmem:[#allocation35_spill] sm:$0xff] }
 0x408   :  { %2106 = vmatprep.subr.mxu0 %v7551_v45  ;;  %2177 = vmatprep.subr.mxu1 %v7557_v46  ;;  %v12513_v45 = vld [vmem:[#allocation36_spill] sm:$0xff]  ;;  %v12514_v46 = vld [vmem:[#allocation37_spill] sm:$0xff] }
 0x409   :  { %2107 = vmatpush1.msra.mxu0 %v7563_v48  ;;  %2178 = vmatpush1.msra.mxu1 %v7569_v29  ;;  %v12515_v48 = vld [vmem:[#allocation38_spill] sm:$0xff]  ;;  %v12516_v29 = vld [vmem:[#allocation39_spill] sm:$0xff] }
 0x40a   :  { %2108 = vmatprep.subr.mxu0 %v7575_v24  ;;  %2179 = vmatprep.subr.mxu1 %v7581_v38  ;;  %v12517_v24 = vld [vmem:[#allocation40_spill] sm:$0xff]  ;;  %v12518_v38 = vld [vmem:[#allocation41_spill] sm:$0xff] }
 0x40b   :  { %2109 = vmatpush1.msra.mxu0 %v12481_v53  ;;  %2142 = vmatprep.mubr.f32.mxu0 %v12180_v19  ;;  %v12520_v53 = vld [vmem:[#allocation43_spill] sm:$0xff] }
 0x40c   :  { %2180 = vmatpush1.msra.mxu1 %v12482_v54  ;;  %2213 = vmatprep.mubr.f32.mxu1 %v12180_v19  ;;  %v12521_v54 = vld [vmem:[#allocation44_spill] sm:$0xff] }
 0x40d   :  { %2143 = vmatmul.mubr.f32.vlgmr.msra.gmra.mxu0 %v8017_v60  ;;  %2214 = vmatmul.mubr.f32.vlgmr.msra.gmra.mxu1 %v8017_v60  ;;  %v12519_v60 = vld [vmem:[#allocation42_spill] sm:$0xff] }
 0x40e   :  { %2249 = vmatprep.subr.mxu0 %v12483_v3  ;;  %2320 = vmatprep.subr.mxu1 %v12484_v16  ;;  %v12522_v3 = vld [vmem:[#allocation45_spill] sm:$0xff]  ;;  %v12523_v16 = vld [vmem:[#allocation46_spill] sm:$0xff] }
 0x40f   :  { %2250 = vmatpush1.msra.mxu0 %v12485_v15  ;;  %2321 = vmatpush1.msra.mxu1 %v12486_v47  ;;  %v12524_v15 = vld [vmem:[#allocation47_spill] sm:$0xff]  ;;  %v12525_v47 = vld [vmem:[#allocation48_spill] sm:$0xff] }
 0x410   :  { %2251 = vmatprep.subr.mxu0 %v12487_v55  ;;  %2322 = vmatprep.subr.mxu1 %v12488_v57  ;;  %v12526_v55 = vld [vmem:[#allocation49_spill] sm:$0xff]  ;;  %v12527_v57 = vld [vmem:[#allocation50_spill] sm:$0xff] }
 0x411   :  { %2252 = vmatpush1.msra.mxu0 %v12489_v58  ;;  %2323 = vmatpush1.msra.mxu1 %v12490_v62  ;;  %v12528_v58 = vld [vmem:[#allocation51_spill] sm:$0xff]  ;;  %v12529_v62 = vld [vmem:[#allocation52_spill] sm:$0xff] }
 0x412   :  { %2253 = vmatprep.subr.mxu0 %v12491_v63  ;;  %2324 = vmatprep.subr.mxu1 %v12492_v0  ;;  %v12530_v63 = vld [vmem:[#allocation53_spill] sm:$0xff]  ;;  %v12531_v0 = vld [vmem:[#allocation54_spill] sm:$0xff] }
 0x413   :  { %2254 = vmatpush1.msra.mxu0 %v12493_v2  ;;  %2325 = vmatpush1.msra.mxu1 %v12494_v4  ;;  %v12532_v2 = vld [vmem:[#allocation55_spill] sm:$0xff]  ;;  %v12533_v4 = vld [vmem:[#allocation56_spill] sm:$0xff] }
 0x414   :  { %2255 = vmatprep.subr.mxu0 %v12495_v5  ;;  %2326 = vmatprep.subr.mxu1 %v12496_v6  ;;  %v12534_v5 = vld [vmem:[#allocation57_spill] sm:$0xff]  ;;  %v12535_v6 = vld [vmem:[#allocation58_spill] sm:$0xff] }
 0x415   :  { %2256 = vmatpush1.msra.mxu0 %v12497_v7  ;;  %2327 = vmatpush1.msra.mxu1 %v12498_v8  ;;  %v12536_v7 = vld [vmem:[#allocation59_spill] sm:$0xff]  ;;  %v12537_v8 = vld [vmem:[#allocation60_spill] sm:$0xff] }
 0x416   :  { %2257 = vmatprep.subr.mxu0 %v12499_v9  ;;  %2328 = vmatprep.subr.mxu1 %v12500_v10  ;;  %v12538_v9 = vld [vmem:[#allocation61_spill] sm:$0xff]  ;;  %v12539_v10 = vld [vmem:[#allocation62_spill] sm:$0xff] }
 0x417   :  { %2258 = vmatpush1.msra.mxu0 %v12501_v11  ;;  %2329 = vmatpush1.msra.mxu1 %v12502_v25  ;;  %v12540_v11 = vld [vmem:[#allocation63_spill] sm:$0xff]  ;;  %v12541_v25 = vld [vmem:[#allocation64_spill] sm:$0xff] }
 0x418   :  { %2259 = vmatprep.subr.mxu0 %v12503_v32  ;;  %2330 = vmatprep.subr.mxu1 %v12504_v33  ;;  %v12542_v32 = vld [vmem:[#allocation65_spill] sm:$0xff]  ;;  %v12543_v33 = vld [vmem:[#allocation66_spill] sm:$0xff] }
 0x419   :  { %2260 = vmatpush1.msra.mxu0 %v12505_v35  ;;  %2331 = vmatpush1.msra.mxu1 %v12506_v36  ;;  %v12544_v35 = vld [vmem:[#allocation67_spill] sm:$0xff]  ;;  %v12545_v36 = vld [vmem:[#allocation68_spill] sm:$0xff] }
 0x41a   :  { %2261 = vmatprep.subr.mxu0 %v12507_v37  ;;  %2332 = vmatprep.subr.mxu1 %v12508_v39  ;;  %v12546_v37 = vld [vmem:[#allocation70_spill] sm:$0xff]  ;;  %v12547_v39 = vld [vmem:[#allocation71_spill] sm:$0xff] }
 0x41b   :  { %2262 = vmatpush1.msra.mxu0 %v12509_v40  ;;  %2333 = vmatpush1.msra.mxu1 %v12510_v41  ;;  %v12548_v40 = vld [vmem:[#allocation69_spill] sm:$0xff] }
 0x41c   :  { %2263 = vmatprep.subr.mxu0 %v12511_v42  ;;  %2334 = vmatprep.subr.mxu1 %v12512_v43  ;;  %v12549_v43 = vld [vmem:[#allocation3_spill] sm:$0xff] }
 0x41d   :  { %2264 = vmatpush1.msra.mxu0 %v12513_v45  ;;  %2335 = vmatpush1.msra.mxu1 %v12514_v46 }
 0x41e   :  { %2265 = vmatprep.subr.mxu0 %v12515_v48  ;;  %2336 = vmatprep.subr.mxu1 %v12516_v29 }
 0x41f   :  { %2266 = vmatpush1.msra.mxu0 %v12517_v24  ;;  %2337 = vmatpush1.msra.mxu1 %v12518_v38 }
 0x420   :  { %2267 = vmatprep.subr.mxu0 %v12519_v60  ;;  %2338 = vmatprep.subr.mxu1 %v12520_v53 }
 0x421   :  { %2268 = vmatpush1.msra.mxu0 %v12521_v54  ;;  %2339 = vmatpush1.msra.mxu1 %v12522_v3 }
 0x422   :  { %2269 = vmatprep.subr.mxu0 %v12523_v16  ;;  %2340 = vmatprep.subr.mxu1 %v12524_v15 }
 0x423   :  { %2270 = vmatpush1.msra.mxu0 %v12525_v47  ;;  %2341 = vmatpush1.msra.mxu1 %v12526_v55 }
 0x424   :  { %2271 = vmatprep.subr.mxu0 %v12527_v57  ;;  %2342 = vmatprep.subr.mxu1 %v12528_v58 }
 0x425   :  { %2272 = vmatpush1.msra.mxu0 %v12529_v62  ;;  %2343 = vmatpush1.msra.mxu1 %v12530_v63 }
 0x426   :  { %2273 = vmatprep.subr.mxu0 %v12531_v0  ;;  %2344 = vmatprep.subr.mxu1 %v12532_v2 }
 0x427   :  { %2274 = vmatpush1.msra.mxu0 %v12533_v4  ;;  %2345 = vmatpush1.msra.mxu1 %v12534_v5 }
 0x428   :  { %2275 = vmatprep.subr.mxu0 %v12535_v6  ;;  %2346 = vmatprep.subr.mxu1 %v12536_v7 }
 0x429   :  { %2276 = vmatpush1.msra.mxu0 %v12537_v8  ;;  %2347 = vmatpush1.msra.mxu1 %v12538_v9  ;;  %v12550_v9 = vld [vmem:[#allocation76_spill] sm:$0xff] }
 0x42a   :  { %2277 = vmatprep.subr.mxu0 %v12539_v10  ;;  %2348 = vmatprep.subr.mxu1 %v12540_v11 }
 0x42b   :  { %2278 = vmatpush1.msra.mxu0 %v12541_v25  ;;  %2349 = vmatpush1.msra.mxu1 %v12542_v32 }
 0x42c   :  { %2279 = vmatprep.subr.mxu0 %v12543_v33  ;;  %2350 = vmatprep.subr.mxu1 %v12544_v35 }
 0x42d   :  { %2280 = vmatpush1.msra.mxu0 %v12545_v36  ;;  %2351 = vmatpush1.msra.mxu1 %v12546_v37  ;;  %v12551_v36 = vld [vmem:[#allocation78_spill] sm:$0xff] }
 0x42e   :  { %2313 = vmatprep.mubr.f32.mxu0 %v12180_v19  ;;  %2384 = vmatprep.mubr.f32.mxu1 %v12180_v19 }
 0x42f   :  { %2391 = vmatprep.subr.mxu0 %v12547_v39  ;;  %2462 = vmatprep.subr.mxu1 %v12548_v40 }
 0x48a   :  { %v1821_v41 = vpop.f32.mrf.mxu0  ;;  %v1892_v48 = vpop.f32.mrf.mxu1 }
 0x48b   :  { %v1822_v45 = vadd.f32 %v1821_v41, %v12549_v43  ;;  %v1893_v55 = vadd.f32 %v1892_v48, %v7243_v34 }
 0x48c   :  { %v1823_v42 = vpop.f32.mrf.mxu0  ;;  %v1894_v54 = vpop.f32.mrf.mxu1 }
 0x48d   :  { %v1824_v29 = vadd.f32 %v1823_v42, %v7232_v61  ;;  %v1895_v47 = vadd.f32 %v1894_v54, %v7238_v30 }
 0x4ab   :  { %v1963_v46 = vpop.f32.mrf.mxu0  ;;  %v2034_v16 = vpop.f32.mrf.mxu1 }
 0x4ac   :  { %v2039_v24 = vadd.f32 %v1963_v46, %v1822_v45  ;;  %v2041_v58 = vadd.f32 %v2034_v16, %v1893_v55  ;;  %v12552_v46 = vld [vmem:[#allocation79_spill] sm:$0xff] }
 0x4ad   :  { %v1965_v38 = vpop.f32.mrf.mxu0  ;;  %v2036_v15 = vpop.f32.mrf.mxu1 }
 0x4ae   :  { %v4565_v60 = vmul.f32 -1.442695, %v2039_v24  ;;  %v2040_v53 = vadd.f32 %v1965_v38, %v1824_v29  ;;  %v2042_v57 = vadd.f32 %v2036_v15, %v1895_v47  ;;  %v12553_v29 = vld [vmem:[#allocation77_spill] sm:$0xff] }
 0x4b0   :  { %4693 = vpow2.f32 %v4565_v60  ;;  %v4566_v3 = vmul.f32 -1.442695, %v2040_v53  ;;  %v4567_v63 = vmul.f32 -1.442695, %v2042_v57 }
 0x4b2   :  { %4695 = vpow2.f32 %v4566_v3 }
 0x4b3   :  { %4697 = vtanh.f32 %v2041_v58 }
 0x4bd   :  { %v4694_v62 = vpop.eup %4693 }
 0x4be   :  { %v2052_v0 = vadd.f32 1.0, %v4694_v62 }
 0x4bf   :  { %v4696_v2 = vpop.eup %4695 }
 0x4c0   :  { %4699 = vrcp.f32 %v2052_v0  ;;  %v2053_v4 = vadd.f32 1.0, %v4696_v2  ;;  %v4698_v5 = vpop.eup %4697 }
 0x4c1   :  { %4701 = vpow2.f32 %v4567_v63 }
 0x4c2   :  { %4703 = vrcp.f32 %v2053_v4 }
 0x4cd   :  { %v4700_v6 = vpop.eup %4699  ;;  %v2144_v7 = vpop.f32.mrf.mxu0 }
 0x4ce   :  { %v4702_v8 = vpop.eup %4701  ;;  %v2220_v10 = vadd.f32 %v2144_v7, %v12550_v9  ;;  %v2063_v32 = vmul.f32 %v4700_v6, %v4698_v5  ;;  %v2215_v41 = vpop.f32.mrf.mxu1 }
 0x4cf   :  { %v4704_v11 = vpop.eup %4703  ;;  %v2146_v25 = vpop.f32.mrf.mxu0  ;;  %v2054_v39 = vadd.f32 1.0, %v4702_v8  ;;  %v2222_v24 = vadd.f32 %v2215_v41, %v12553_v29  ;;  %v12576_v41 = vld [vmem:[#allocation118_spill] sm:$0xff]  ;;  %v12581_v29 = vld [vmem:[#allocation123_spill] sm:$0xff] }
 0x4d0   :  { %v2062_v33 = vmul.f32 %v4704_v11, %v8005_v17  ;;  %v4569_v35 = vmul.f32 -1.442695, %v2220_v10  ;;  %v2221_v37 = vadd.f32 %v2146_v25, %v12551_v36  ;;  %v2217_v45 = vpop.f32.mrf.mxu1  ;;  %v12569_v25 = vld [vmem:[#allocation111_spill] sm:$0xff] }
 0x4d1   :  { %v2223_v48 = vadd.f32 %v2217_v45, %v12552_v46  ;;  %v12573_v36 = vld [vmem:[#allocation115_spill] sm:$0xff]  ;;  %v12578_v45 = vld [vmem:[#allocation120_spill] sm:$0xff]  ;;  %v12579_v46 = vld [vmem:[#allocation121_spill] sm:$0xff] }
 0x4d2   :  { %v8662_v40 = vadd.f32 %v2063_v32, %v2062_v33  ;;  %4705 = vpow2.f32 %v4569_v35  ;;  %v4570_v42 = vmul.f32 -1.442695, %v2221_v37  ;;  %v12570_v32 = vld [vmem:[#allocation112_spill] sm:$0xff]  ;;  %v12571_v33 = vld [vmem:[#allocation113_spill] sm:$0xff]  ;;  %v12572_v35 = vld [vmem:[#allocation114_spill] sm:$0xff] }
 0x4d3   :  { %v4571_v38 = vmul.f32 -1.442695, %v2223_v48  ;;  %v12574_v37 = vld [vmem:[#allocation116_spill] sm:$0xff]  ;;  %v12580_v48 = vld [vmem:[#allocation122_spill] sm:$0xff] }
 0x4d4   :  { %4707 = vpow2.f32 %v4570_v42  ;;  %v12577_v42 = vld [vmem:[#allocation119_spill] sm:$0xff] }
 0x4d5   :  { %4709 = vrcp.f32 %v2054_v39  ;;  %v12575_v39 = vld [vmem:[#allocation117_spill] sm:$0xff] }
 0x4d6   :  { %4711 = vtanh.f32 %v8662_v40 }
 0x4d7   :  { %4713 = vtanh.f32 %v2222_v24  ;;  %v12582_v24 = vld [vmem:[#allocation124_spill] sm:$0xff] }
 0x4d8   :  { %4715 = vpow2.f32 %v4571_v38  ;;  %v12583_v38 = vld [vmem:[#allocation125_spill] sm:$0xff] }
 0x4df   :  { %v4706_v17 = vpop.eup %4705 }
 0x4e0   :  { %v2233_v60 = vadd.f32 1.0, %v4706_v17  ;;  %v12584_v17 = vld [vmem:[#allocation126_spill] sm:$0xff] }
 0x4e1   :  { %v4708_v53 = vpop.eup %4707 }
 0x4e2   :  { %v4710_v54 = vpop.eup %4709  ;;  %4717 = vrcp.f32 %v2233_v60  ;;  %v2234_v3 = vadd.f32 1.0, %v4708_v53  ;;  %v12585_v60 = vld [vmem:[#allocation127_spill] sm:$0xff]  ;;  %v12586_v53 = vld [vmem:[#allocation128_spill] sm:$0xff] }
 0x4e3   :  { %v4712_v16 = vpop.eup %4711 }
 0x4e4   :  { %4719 = vrcp.f32 %v2234_v3  ;;  %v8667_v15 = vmul.f32 %v4712_v16, %v4710_v54  ;;  %v4714_v55 = vpop.eup %4713  ;;  %v12587_v54 = vld [vmem:[#allocation129_spill] sm:$0xff]  ;;  %v12588_v3 = vld [vmem:[#allocation130_spill] sm:$0xff]  ;;  %v12589_v16 = vld [vmem:[#allocation131_spill] sm:$0xff] }
 0x4e5   :  { %v4716_v57 = vpop.eup %4715 }
 0x4e6   :  { %v4568_v47 = vmul.f32 -1.442695, %v8667_v15  ;;  %v2235_v0 = vadd.f32 1.0, %v4716_v57  ;;  %v12592_v57 = vld [vmem:[#allocation134_spill] sm:$0xff] }
 0x4e8   :  { %4721 = vpow2.f32 %v4568_v47  ;;  %v12590_v47 = vld [vmem:[#allocation132_spill] sm:$0xff] }
 0x4e9   :  { %4723 = vrcp.f32 %v2235_v0  ;;  %v12596_v0 = vld [vmem:[#allocation138_spill] sm:$0xff] }
 0x4ef   :  { %v4718_v58 = vpop.eup %4717 }
 0x4f0   :  { %v2244_v62 = vmul.f32 %v4718_v58, %v4714_v55  ;;  %v12591_v55 = vld [vmem:[#allocation133_spill] sm:$0xff]  ;;  %v12593_v58 = vld [vmem:[#allocation135_spill] sm:$0xff] }
 0x4f1   :  { %v4720_v63 = vpop.eup %4719 }
 0x4f2   :  { %v2243_v2 = vmul.f32 %v4720_v63, %v8014_v51  ;;  %v12554_v51 = vld [vmem:[#allocation96_spill] sm:$0xff]  ;;  %v12595_v63 = vld [vmem:[#allocation137_spill] sm:$0xff] }
 0x4f4   :  { %v8671_v4 = vadd.f32 %v2244_v62, %v2243_v2  ;;  %v12594_v62 = vld [vmem:[#allocation136_spill] sm:$0xff]  ;;  %v12597_v2 = vld [vmem:[#allocation139_spill] sm:$0xff] }
 0x4f5   :  { %v4722_v5 = vpop.eup %4721 }
 0x4f6   :  { %4725 = vtanh.f32 %v8671_v4  ;;  %v2070_v6 = vadd.f32 1.0, %v4722_v5  ;;  %v4724_v7 = vpop.eup %4723  ;;  %v12598_v5 = vld [vmem:[#allocation140_spill] sm:$0xff] }
 0x4f8   :  { %4727 = vrcp.f32 %v2070_v6  ;;  %v12599_v6 = vld [vmem:[#allocation141_spill] sm:$0xff] }
 0x503   :  { %v4726_v8 = vpop.eup %4725 }
 0x504   :  { %v8674_v9 = vmul.f32 %v4726_v8, %v4724_v7  ;;  %v12600_v7 = vld [vmem:[#allocation142_spill] sm:$0xff]  ;;  %v12601_v8 = vld [vmem:[#allocation143_spill] sm:$0xff] }
 0x505   :  { %v4728_v10 = vpop.eup %4727 }
 0x506   :  { %v2248_v11 = vmax.f32 %v8674_v9, 0.0  ;;  %2073 = vst [vmem:[%s11511_s7 + $0x10] sm:$0xff] %v4728_v10  ;;  %v12602_v10 = vld [vmem:[#allocation144_spill] sm:$0xff] }
 0x508   :  { %2314 = vmatmul.mubr.f32.vlgmr.msra.gmra.mxu0 %v2248_v11  ;;  %2385 = vmatmul.mubr.f32.vlgmr.msra.gmra.mxu1 %v2248_v11  ;;  %v12604_v11 = vld [vmem:[#allocation146_spill] sm:$0xff] }
 0x509   :  { %2392 = vmatpush1.msra.mxu0 %v8026_v44  ;;  %2463 = vmatpush1.msra.mxu1 %v8032_v13  ;;  %v12555_v44 = vld [vmem:[#allocation97_spill] sm:$0xff]  ;;  %v12556_v13 = vld [vmem:[#allocation98_spill] sm:$0xff] }
 0x50a   :  { %2393 = vmatprep.subr.mxu0 %v8038_v12  ;;  %2464 = vmatprep.subr.mxu1 %v8044_v18  ;;  %v12557_v12 = vld [vmem:[#allocation99_spill] sm:$0xff]  ;;  %v12558_v18 = vld [vmem:[#allocation100_spill] sm:$0xff] }
 0x50b   :  { %2394 = vmatpush1.msra.mxu0 %v8050_v21  ;;  %2465 = vmatpush1.msra.mxu1 %v8056_v14  ;;  %v12559_v21 = vld [vmem:[#allocation101_spill] sm:$0xff]  ;;  %v12560_v14 = vld [vmem:[#allocation102_spill] sm:$0xff] }
 0x50c   :  { %2395 = vmatprep.subr.mxu0 %v8062_v27  ;;  %2466 = vmatprep.subr.mxu1 %v8068_v59  ;;  %v12561_v27 = vld [vmem:[#allocation103_spill] sm:$0xff]  ;;  %v12562_v59 = vld [vmem:[#allocation104_spill] sm:$0xff] }
 0x50d   :  { %2396 = vmatpush1.msra.mxu0 %v8074_v49  ;;  %2467 = vmatpush1.msra.mxu1 %v8080_v50  ;;  %v12563_v49 = vld [vmem:[#allocation105_spill] sm:$0xff]  ;;  %v12564_v50 = vld [vmem:[#allocation106_spill] sm:$0xff] }
 0x50e   :  { %2397 = vmatprep.subr.mxu0 %v8086_v23  ;;  %2468 = vmatprep.subr.mxu1 %v8092_v52  ;;  %v12565_v23 = vld [vmem:[#allocation107_spill] sm:$0xff]  ;;  %v12566_v52 = vld [vmem:[#allocation108_spill] sm:$0xff] }
 0x50f   :  { %2398 = vmatpush1.msra.mxu0 %v8098_v26  ;;  %2469 = vmatpush1.msra.mxu1 %v8104_v31  ;;  %v12567_v26 = vld [vmem:[#allocation109_spill] sm:$0xff]  ;;  %v12568_v31 = vld [vmem:[#allocation110_spill] sm:$0xff] }
 0x510   :  { %2399 = vmatprep.subr.mxu0 %v12554_v51  ;;  %2470 = vmatprep.subr.mxu1 %v12555_v44  ;;  %v12605_v51 = vld [vmem:[#allocation147_spill] sm:$0xff]  ;;  %v12606_v44 = vld [vmem:[#allocation148_spill] sm:$0xff] }
 0x511   :  { %2400 = vmatpush1.msra.mxu0 %v12556_v13  ;;  %2471 = vmatpush1.msra.mxu1 %v12557_v12  ;;  %v12607_v13 = vld [vmem:[#allocation149_spill] sm:$0xff]  ;;  %v12608_v12 = vld [vmem:[#allocation150_spill] sm:$0xff] }
 0x512   :  { %2401 = vmatprep.subr.mxu0 %v12558_v18  ;;  %2472 = vmatprep.subr.mxu1 %v12559_v21  ;;  %v12609_v18 = vld [vmem:[#allocation151_spill] sm:$0xff]  ;;  %v12610_v21 = vld [vmem:[#allocation152_spill] sm:$0xff] }
 0x513   :  { %2402 = vmatpush1.msra.mxu0 %v12560_v14  ;;  %2473 = vmatpush1.msra.mxu1 %v12561_v27  ;;  %v12612_v14 = vld [vmem:[#allocation154_spill] sm:$0xff]  ;;  %v12613_v27 = vld [vmem:[#allocation155_spill] sm:$0xff] }
 0x514   :  { %2403 = vmatprep.subr.mxu0 %v12562_v59  ;;  %2474 = vmatprep.subr.mxu1 %v12563_v49  ;;  %v12614_v59 = vld [vmem:[#allocation156_spill] sm:$0xff]  ;;  %v12615_v49 = vld [vmem:[#allocation157_spill] sm:$0xff] }
 0x515   :  { %2404 = vmatpush1.msra.mxu0 %v12564_v50  ;;  %2475 = vmatpush1.msra.mxu1 %v12565_v23  ;;  %v12616_v50 = vld [vmem:[#allocation158_spill] sm:$0xff]  ;;  %v12617_v23 = vld [vmem:[#allocation159_spill] sm:$0xff] }
 0x516   :  { %2405 = vmatprep.subr.mxu0 %v12566_v52  ;;  %2476 = vmatprep.subr.mxu1 %v12567_v26  ;;  %v12618_v52 = vld [vmem:[#allocation160_spill] sm:$0xff]  ;;  %v12619_v26 = vld [vmem:[#allocation161_spill] sm:$0xff] }
 0x517   :  { %2406 = vmatpush1.msra.mxu0 %v12568_v31  ;;  %2477 = vmatpush1.msra.mxu1 %v12569_v25  ;;  %v12620_v31 = vld [vmem:[#allocation162_spill] sm:$0xff]  ;;  %v8773_v25 = vld [vmem:[%s11506_s2 + $0x128] sm:$0xff] }
 0x518   :  { %2407 = vmatprep.subr.mxu0 %v12570_v32  ;;  %2478 = vmatprep.subr.mxu1 %v12571_v33  ;;  %v8779_v32 = vld [vmem:[%s11506_s2 + $0x138] sm:$0xff]  ;;  %v8809_v33 = vld [vmem:[%s11506_s2 + $0x100] sm:$0xff] }
 0x519   :  { %2408 = vmatpush1.msra.mxu0 %v12572_v35  ;;  %2479 = vmatpush1.msra.mxu1 %v12573_v36  ;;  %v8815_v35 = vld [vmem:[%s11506_s2 + $0x110] sm:$0xff]  ;;  %v8821_v36 = vld [vmem:[%s11506_s2 + $0xe8] sm:$0xff] }
 0x51a   :  { %2409 = vmatprep.subr.mxu0 %v12574_v37  ;;  %2480 = vmatprep.subr.mxu1 %v12575_v39  ;;  %v8827_v37 = vld [vmem:[%s11506_s2 + $0xf8] sm:$0xff]  ;;  %v8833_v39 = vld [vmem:[%s11506_s2 + $0xe0] sm:$0xff] }
 0x51b   :  { %2410 = vmatpush1.msra.mxu0 %v12576_v41  ;;  %2481 = vmatpush1.msra.mxu1 %v12577_v42  ;;  %v8839_v41 = vld [vmem:[%s11506_s2 + $0xf0] sm:$0xff]  ;;  %v8845_v42 = vld [vmem:[%s11506_s2 + $0xc8] sm:$0xff] }
 0x51c   :  { %2411 = vmatprep.subr.mxu0 %v12578_v45  ;;  %2482 = vmatprep.subr.mxu1 %v12579_v46  ;;  %v8851_v45 = vld [vmem:[%s11506_s2 + $0xd8] sm:$0xff]  ;;  %v8857_v46 = vld [vmem:[%s11506_s2 + $0xc0] sm:$0xff] }
 0x51d   :  { %2412 = vmatpush1.msra.mxu0 %v12580_v48  ;;  %2483 = vmatpush1.msra.mxu1 %v12581_v29  ;;  %v8863_v48 = vld [vmem:[%s11506_s2 + $0xd0] sm:$0xff]  ;;  %v8869_v29 = vld [vmem:[%s11506_s2 + $0xa8] sm:$0xff] }
 0x51e   :  { %2413 = vmatprep.subr.mxu0 %v12582_v24  ;;  %2484 = vmatprep.subr.mxu1 %v12583_v38  ;;  %v8875_v24 = vld [vmem:[%s11506_s2 + $0xb8] sm:$0xff]  ;;  %v8881_v38 = vld [vmem:[%s11506_s2 + $0xa0] sm:$0xff] }
 0x51f   :  { %2414 = vmatpush1.msra.mxu0 %v12584_v17  ;;  %2485 = vmatpush1.msra.mxu1 %v12585_v60  ;;  %v8887_v17 = vld [vmem:[%s11506_s2 + $0xb0] sm:$0xff]  ;;  %v8893_v60 = vld [vmem:[%s11506_s2 + $0x88] sm:$0xff] }
 0x520   :  { %2415 = vmatprep.subr.mxu0 %v12586_v53  ;;  %2486 = vmatprep.subr.mxu1 %v12587_v54  ;;  %v8899_v53 = vld [vmem:[%s11506_s2 + $0x98] sm:$0xff]  ;;  %v8905_v54 = vld [vmem:[%s11506_s2 + $0x80] sm:$0xff] }
 0x521   :  { %2416 = vmatpush1.msra.mxu0 %v12588_v3  ;;  %2487 = vmatpush1.msra.mxu1 %v12589_v16  ;;  %v8911_v3 = vld [vmem:[%s11506_s2 + $0x90] sm:$0xff]  ;;  %v8917_v16 = vld [vmem:[%s11506_s2 + $0x68] sm:$0xff] }
 0x522   :  { %2417 = vmatprep.subr.mxu0 %v12590_v47  ;;  %2488 = vmatprep.subr.mxu1 %v12591_v55  ;;  %v8923_v47 = vld [vmem:[%s11506_s2 + $0x78] sm:$0xff]  ;;  %v8929_v55 = vld [vmem:[%s11506_s2 + $0x60] sm:$0xff] }
 0x523   :  { %2418 = vmatpush1.msra.mxu0 %v12592_v57  ;;  %2489 = vmatpush1.msra.mxu1 %v12593_v58  ;;  %v8935_v57 = vld [vmem:[%s11506_s2 + $0x70] sm:$0xff]  ;;  %v8941_v58 = vld [vmem:[%s11506_s2 + $0x48] sm:$0xff] }
 0x524   :  { %2419 = vmatprep.subr.mxu0 %v12594_v62  ;;  %2490 = vmatprep.subr.mxu1 %v12595_v63  ;;  %v8947_v62 = vld [vmem:[%s11506_s2 + $0x58] sm:$0xff]  ;;  %v8953_v63 = vld [vmem:[%s11506_s2 + $0x40] sm:$0xff] }
 0x525   :  { %2420 = vmatpush1.msra.mxu0 %v12596_v0  ;;  %2491 = vmatpush1.msra.mxu1 %v8368_v56  ;;  %v12603_v56 = vld [vmem:[#allocation145_spill] sm:$0xff] }
 0x526   :  { %2421 = vmatprep.subr.mxu0 %v12597_v2  ;;  %2492 = vmatprep.subr.mxu1 %v12598_v5  ;;  %v8959_v0 = vld [vmem:[%s11506_s2 + $0x50] sm:$0xff]  ;;  %v8965_v2 = vld [vmem:[%s11506_s2 + $0x28] sm:$0xff]  ;;  %v8971_v5 = vld [vmem:[%s11506_s2 + $0x38] sm:$0xff] }
 0x527   :  { %2422 = vmatpush1.msra.mxu0 %v12599_v6  ;;  %2455 = vmatprep.mubr.f32.mxu0 %v12180_v19  ;;  %v8977_v6 = vld [vmem:[%s11506_s2 + $0x20] sm:$0xff] }
 0x528   :  { %2493 = vmatpush1.msra.mxu1 %v12600_v7  ;;  %2526 = vmatprep.mubr.f32.mxu1 %v12180_v19  ;;  %v8983_v7 = vld [vmem:[%s11506_s2 + $0x30] sm:$0xff] }
 0x529   :  { %2456 = vmatmul.mubr.f32.vlgmr.msra.gmra.mxu0 %v8667_v15  ;;  %2527 = vmatmul.mubr.f32.vlgmr.msra.gmra.mxu1 %v8667_v15  ;;  %v12611_v15 = vld [vmem:[#allocation153_spill] sm:$0xff] }
 0x52a   :  { %2572 = vmatprep.subr.mxu0 %v12601_v8  ;;  %2643 = vmatprep.subr.mxu1 %v12602_v10  ;;  %v8989_v8 = vld [vmem:[%s11506_s2 + $0x8] sm:$0xff]  ;;  %v8995_v10 = vld [vmem:[%s11506_s2 + $0x18] sm:$0xff] }
 0x52b   :  { %2573 = vmatpush1.msra.mxu0 %v12603_v56  ;;  %2644 = vmatpush1.msra.mxu1 %v12604_v11  ;;  %v9001_v56 = vld [vmem:[%s11506_s2] sm:$0xff]  ;;  %v9008_v11 = vld [vmem:[%s11506_s2 + $0x10] sm:$0xff] }
 0x52c   :  { %2574 = vmatprep.subr.mxu0 %v12605_v51  ;;  %2645 = vmatprep.subr.mxu1 %v12606_v44  ;;  %12621 = vst [vmem:[#allocation72_spill] sm:$0xff] %v9001_v56  ;;  %12622 = vst [vmem:[#allocation74_spill] sm:$0xff] %v9008_v11  ;;  %v9017_v51 = vld [vmem:[%s11507_s4 + $0x1e8] sm:$0xff]  ;;  %v9023_v44 = vld [vmem:[%s11507_s4 + $0x1f8] sm:$0xff] }
 0x52d   :  { %2575 = vmatpush1.msra.mxu0 %v12607_v13  ;;  %2646 = vmatpush1.msra.mxu1 %v12608_v12  ;;  %12623 = vst [vmem:[#allocation75_spill] sm:$0xff] %v9017_v51  ;;  %12624 = vst [vmem:[#allocation73_spill] sm:$0xff] %v9023_v44  ;;  %v9029_v13 = vld [vmem:[%s11507_s4 + $0x1e0] sm:$0xff]  ;;  %v9041_v12 = vld [vmem:[%s11507_s4 + $0x1c8] sm:$0xff] }
 0x52e   :  { %2576 = vmatprep.subr.mxu0 %v12609_v18  ;;  %2647 = vmatprep.subr.mxu1 %v12610_v21  ;;  %12625 = vst [vmem:[#allocation4_spill] sm:$0xff] %v9029_v13  ;;  %12627 = vst [vmem:[#allocation6_spill] sm:$0xff] %v9041_v12  ;;  %v9047_v18 = vld [vmem:[%s11507_s4 + $0x1d8] sm:$0xff]  ;;  %v9053_v21 = vld [vmem:[%s11507_s4 + $0x1c0] sm:$0xff] }
 0x52f   :  { %2577 = vmatpush1.msra.mxu0 %v12611_v15  ;;  %2648 = vmatpush1.msra.mxu1 %v12612_v14  ;;  %12628 = vst [vmem:[#allocation7_spill] sm:$0xff] %v9047_v18  ;;  %12629 = vst [vmem:[#allocation8_spill] sm:$0xff] %v9053_v21  ;;  %v9059_v15 = vld [vmem:[%s11507_s4 + $0x1d0] sm:$0xff]  ;;  %v9065_v14 = vld [vmem:[%s11507_s4 + $0x1a8] sm:$0xff] }
 0x530   :  { %2578 = vmatprep.subr.mxu0 %v12613_v27  ;;  %2649 = vmatprep.subr.mxu1 %v12614_v59  ;;  %12630 = vst [vmem:[#allocation9_spill] sm:$0xff] %v9059_v15  ;;  %12631 = vst [vmem:[#allocation10_spill] sm:$0xff] %v9065_v14  ;;  %v9071_v27 = vld [vmem:[%s11507_s4 + $0x1b8] sm:$0xff]  ;;  %v9077_v59 = vld [vmem:[%s11507_s4 + $0x1a0] sm:$0xff] }
 0x531   :  { %2579 = vmatpush1.msra.mxu0 %v12615_v49  ;;  %2650 = vmatpush1.msra.mxu1 %v12616_v50  ;;  %12632 = vst [vmem:[#allocation11_spill] sm:$0xff] %v9071_v27  ;;  %12633 = vst [vmem:[#allocation12_spill] sm:$0xff] %v9077_v59  ;;  %v9083_v49 = vld [vmem:[%s11507_s4 + $0x1b0] sm:$0xff]  ;;  %v9089_v50 = vld [vmem:[%s11507_s4 + $0x188] sm:$0xff] }
 0x532   :  { %2580 = vmatprep.subr.mxu0 %v12617_v23  ;;  %2651 = vmatprep.subr.mxu1 %v12618_v52  ;;  %12634 = vst [vmem:[#allocation13_spill] sm:$0xff] %v9083_v49  ;;  %12635 = vst [vmem:[#allocation14_spill] sm:$0xff] %v9089_v50  ;;  %v9095_v23 = vld [vmem:[%s11507_s4 + $0x198] sm:$0xff]  ;;  %v9101_v52 = vld [vmem:[%s11507_s4 + $0x180] sm:$0xff] }
 0x533   :  { %2581 = vmatpush1.msra.mxu0 %v12619_v26  ;;  %2652 = vmatpush1.msra.mxu1 %v12620_v31  ;;  %12636 = vst [vmem:[#allocation15_spill] sm:$0xff] %v9095_v23  ;;  %12637 = vst [vmem:[#allocation16_spill] sm:$0xff] %v9101_v52  ;;  %v9107_v26 = vld [vmem:[%s11507_s4 + $0x190] sm:$0xff]  ;;  %v9113_v31 = vld [vmem:[%s11507_s4 + $0x168] sm:$0xff] }
 0x534   :  { %2582 = vmatprep.subr.mxu0 %v8522_v28  ;;  %2653 = vmatprep.subr.mxu1 %v8528_v1  ;;  %v8791_v28 = vld [vmem:[%s11506_s2 + $0x130] sm:$0xff]  ;;  %v8797_v1 = vld [vmem:[%s11506_s2 + $0x108] sm:$0xff]  ;;  %12638 = vst [vmem:[#allocation17_spill] sm:$0xff] %v9107_v26  ;;  %12639 = vst [vmem:[#allocation18_spill] sm:$0xff] %v9113_v31 }
 0x535   :  { %2583 = vmatpush1.msra.mxu0 %v8534_v22  ;;  %2654 = vmatpush1.msra.mxu1 %v8540_v20  ;;  %v8785_v22 = vld [vmem:[%s11506_s2 + $0x120] sm:$0xff]  ;;  %v8803_v20 = vld [vmem:[%s11506_s2 + $0x118] sm:$0xff] }
 0x536   :  { %2584 = vmatprep.subr.mxu0 %v8773_v25  ;;  %2655 = vmatprep.subr.mxu1 %v8779_v32 }
 0x537   :  { %2585 = vmatpush1.msra.mxu0 %v8785_v22  ;;  %2656 = vmatpush1.msra.mxu1 %v8791_v28 }
 0x538   :  { %2586 = vmatprep.subr.mxu0 %v8797_v1  ;;  %2657 = vmatprep.subr.mxu1 %v8803_v20 }
 0x539   :  { %2587 = vmatpush1.msra.mxu0 %v8809_v33  ;;  %2658 = vmatpush1.msra.mxu1 %v8815_v35 }
 0x53a   :  { %2588 = vmatprep.subr.mxu0 %v8821_v36  ;;  %2659 = vmatprep.subr.mxu1 %v8827_v37 }
 0x53b   :  { %2589 = vmatpush1.msra.mxu0 %v8833_v39  ;;  %2660 = vmatpush1.msra.mxu1 %v8839_v41 }
 0x53c   :  { %2590 = vmatprep.subr.mxu0 %v8845_v42  ;;  %2661 = vmatprep.subr.mxu1 %v8851_v45 }
 0x53d   :  { %2591 = vmatpush1.msra.mxu0 %v8857_v46  ;;  %2662 = vmatpush1.msra.mxu1 %v8863_v48 }
 0x53e   :  { %2592 = vmatprep.subr.mxu0 %v8869_v29  ;;  %2663 = vmatprep.subr.mxu1 %v8875_v24 }
 0x53f   :  { %2593 = vmatpush1.msra.mxu0 %v8881_v38  ;;  %2664 = vmatpush1.msra.mxu1 %v8887_v17 }
 0x540   :  { %2594 = vmatprep.subr.mxu0 %v8893_v60  ;;  %2665 = vmatprep.subr.mxu1 %v8899_v53 }
 0x541   :  { %2595 = vmatpush1.msra.mxu0 %v8905_v54  ;;  %2666 = vmatpush1.msra.mxu1 %v8911_v3 }
 0x542   :  { %2596 = vmatprep.subr.mxu0 %v8917_v16  ;;  %2667 = vmatprep.subr.mxu1 %v8923_v47 }
 0x543   :  { %2597 = vmatpush1.msra.mxu0 %v8929_v55  ;;  %2668 = vmatpush1.msra.mxu1 %v8935_v57 }
 0x544   :  { %2598 = vmatprep.subr.mxu0 %v8941_v58  ;;  %2669 = vmatprep.subr.mxu1 %v8947_v62 }
 0x545   :  { %2599 = vmatpush1.msra.mxu0 %v8953_v63  ;;  %2670 = vmatpush1.msra.mxu1 %v8959_v0 }
 0x546   :  { %2600 = vmatprep.subr.mxu0 %v8965_v2  ;;  %2671 = vmatprep.subr.mxu1 %v8971_v5 }
 0x547   :  { %2601 = vmatpush1.msra.mxu0 %v8977_v6  ;;  %2672 = vmatpush1.msra.mxu1 %v8983_v7 }
 0x548   :  { %2602 = vmatprep.subr.mxu0 %v8989_v8  ;;  %2673 = vmatprep.subr.mxu1 %v8995_v10 }
 0x549   :  { %2603 = vmatpush1.msra.mxu0 %v9001_v56  ;;  %2636 = vmatprep.mubr.f32.mxu0 %v12180_v19 }
 0x54a   :  { %2674 = vmatpush1.msra.mxu1 %v9008_v11  ;;  %2707 = vmatprep.mubr.f32.mxu1 %v12180_v19 }
 0x54b   :  { %2637 = vmatmul.mubr.f32.vlgmr.msra.gmra.mxu0 %v8674_v9  ;;  %2708 = vmatmul.mubr.f32.vlgmr.msra.gmra.mxu1 %v8674_v9  ;;  %v9035_v9 = vld [vmem:[%s11507_s4 + $0x1f0] sm:$0xff] }
 0x54c   :  { %2743 = vmatprep.subr.mxu0 %v9017_v51  ;;  %2814 = vmatprep.subr.mxu1 %v9023_v44  ;;  %12626 = vst [vmem:[#allocation5_spill] sm:$0xff] %v9035_v9 }
 0x54d   :  { %2744 = vmatpush1.msra.mxu0 %v9029_v13  ;;  %2815 = vmatpush1.msra.mxu1 %v9035_v9 }
 0x54e   :  { %2745 = vmatprep.subr.mxu0 %v9041_v12  ;;  %2816 = vmatprep.subr.mxu1 %v9047_v18 }
 0x54f   :  { %2746 = vmatpush1.msra.mxu0 %v9053_v21  ;;  %2817 = vmatpush1.msra.mxu1 %v9059_v15 }
 0x550   :  { %2747 = vmatprep.subr.mxu0 %v9065_v14  ;;  %2818 = vmatprep.subr.mxu1 %v9071_v27 }
 0x551   :  { %2748 = vmatpush1.msra.mxu0 %v9077_v59  ;;  %2819 = vmatpush1.msra.mxu1 %v9083_v49 }
 0x552   :  { %2749 = vmatprep.subr.mxu0 %v9089_v50  ;;  %2820 = vmatprep.subr.mxu1 %v9095_v23  ;;  %v9119_v23 = vld [vmem:[%s11507_s4 + $0x178] sm:$0xff] }
 0x553   :  { %2750 = vmatpush1.msra.mxu0 %v9101_v52  ;;  %2821 = vmatpush1.msra.mxu1 %v9107_v26  ;;  %12640 = vst [vmem:[#allocation19_spill] sm:$0xff] %v9119_v23  ;;  %v9125_v52 = vld [vmem:[%s11507_s4 + $0x160] sm:$0xff]  ;;  %v9131_v26 = vld [vmem:[%s11507_s4 + $0x170] sm:$0xff] }
 0x554   :  { %2751 = vmatprep.subr.mxu0 %v9113_v31  ;;  %2822 = vmatprep.subr.mxu1 %v9119_v23  ;;  %12641 = vst [vmem:[#allocation20_spill] sm:$0xff] %v9125_v52  ;;  %12642 = vst [vmem:[#allocation21_spill] sm:$0xff] %v9131_v26  ;;  %v9137_v31 = vld [vmem:[%s11507_s4 + $0x148] sm:$0xff]  ;;  %v9143_v23 = vld [vmem:[%s11507_s4 + $0x158] sm:$0xff] }
 0x555   :  { %2752 = vmatpush1.msra.mxu0 %v9125_v52  ;;  %2823 = vmatpush1.msra.mxu1 %v9131_v26  ;;  %12643 = vst [vmem:[#allocation22_spill] sm:$0xff] %v9137_v31  ;;  %12644 = vst [vmem:[#allocation23_spill] sm:$0xff] %v9143_v23  ;;  %v9149_v52 = vld [vmem:[%s11507_s4 + $0x140] sm:$0xff]  ;;  %v9155_v26 = vld [vmem:[%s11507_s4 + $0x150] sm:$0xff] }
 0x556   :  { %2753 = vmatprep.subr.mxu0 %v9137_v31  ;;  %2824 = vmatprep.subr.mxu1 %v9143_v23  ;;  %12645 = vst [vmem:[#allocation24_spill] sm:$0xff] %v9149_v52  ;;  %12646 = vst [vmem:[#allocation25_spill] sm:$0xff] %v9155_v26  ;;  %v9161_v31 = vld [vmem:[%s11507_s4 + $0x128] sm:$0xff]  ;;  %v9167_v23 = vld [vmem:[%s11507_s4 + $0x138] sm:$0xff] }
 0x557   :  { %2754 = vmatpush1.msra.mxu0 %v9149_v52  ;;  %2825 = vmatpush1.msra.mxu1 %v9155_v26  ;;  %12647 = vst [vmem:[#allocation26_spill] sm:$0xff] %v9161_v31  ;;  %12648 = vst [vmem:[#allocation27_spill] sm:$0xff] %v9167_v23  ;;  %v9173_v52 = vld [vmem:[%s11507_s4 + $0x120] sm:$0xff]  ;;  %v9179_v26 = vld [vmem:[%s11507_s4 + $0x130] sm:$0xff] }
 0x558   :  { %2755 = vmatprep.subr.mxu0 %v9161_v31  ;;  %2826 = vmatprep.subr.mxu1 %v9167_v23  ;;  %12649 = vst [vmem:[#allocation28_spill] sm:$0xff] %v9173_v52  ;;  %12650 = vst [vmem:[#allocation29_spill] sm:$0xff] %v9179_v26  ;;  %v9185_v31 = vld [vmem:[%s11507_s4 + $0x108] sm:$0xff]  ;;  %v9191_v23 = vld [vmem:[%s11507_s4 + $0x118] sm:$0xff] }
 0x559   :  { %2756 = vmatpush1.msra.mxu0 %v9173_v52  ;;  %2827 = vmatpush1.msra.mxu1 %v9179_v26  ;;  %12651 = vst [vmem:[#allocation30_spill] sm:$0xff] %v9185_v31  ;;  %12652 = vst [vmem:[#allocation31_spill] sm:$0xff] %v9191_v23  ;;  %v9197_v52 = vld [vmem:[%s11507_s4 + $0x100] sm:$0xff]  ;;  %v9203_v26 = vld [vmem:[%s11507_s4 + $0x110] sm:$0xff] }
 0x55a   :  { %2757 = vmatprep.subr.mxu0 %v9185_v31  ;;  %2828 = vmatprep.subr.mxu1 %v9191_v23  ;;  %12653 = vst [vmem:[#allocation32_spill] sm:$0xff] %v9197_v52  ;;  %12654 = vst [vmem:[#allocation33_spill] sm:$0xff] %v9203_v26  ;;  %v9209_v31 = vld [vmem:[%s11507_s4 + $0xe8] sm:$0xff]  ;;  %v9215_v23 = vld [vmem:[%s11507_s4 + $0xf8] sm:$0xff] }
 0x55b   :  { %2758 = vmatpush1.msra.mxu0 %v9197_v52  ;;  %2829 = vmatpush1.msra.mxu1 %v9203_v26  ;;  %12655 = vst [vmem:[#allocation34_spill] sm:$0xff] %v9209_v31  ;;  %12656 = vst [vmem:[#allocation35_spill] sm:$0xff] %v9215_v23  ;;  %v9221_v52 = vld [vmem:[%s11507_s4 + $0xe0] sm:$0xff]  ;;  %v9227_v26 = vld [vmem:[%s11507_s4 + $0xf0] sm:$0xff] }
 0x55c   :  { %2759 = vmatprep.subr.mxu0 %v9209_v31  ;;  %2830 = vmatprep.subr.mxu1 %v9215_v23  ;;  %12657 = vst [vmem:[#allocation36_spill] sm:$0xff] %v9221_v52  ;;  %12658 = vst [vmem:[#allocation37_spill] sm:$0xff] %v9227_v26  ;;  %v9233_v31 = vld [vmem:[%s11507_s4 + $0xc8] sm:$0xff]  ;;  %v9239_v23 = vld [vmem:[%s11507_s4 + $0xd8] sm:$0xff] }
 0x55d   :  { %2760 = vmatpush1.msra.mxu0 %v9221_v52  ;;  %2831 = vmatpush1.msra.mxu1 %v9227_v26  ;;  %12659 = vst [vmem:[#allocation38_spill] sm:$0xff] %v9233_v31  ;;  %12660 = vst [vmem:[#allocation39_spill] sm:$0xff] %v9239_v23  ;;  %v9245_v52 = vld [vmem:[%s11507_s4 + $0xc0] sm:$0xff]  ;;  %v9251_v26 = vld [vmem:[%s11507_s4 + $0xd0] sm:$0xff] }
 0x55e   :  { %2761 = vmatprep.subr.mxu0 %v9233_v31  ;;  %2832 = vmatprep.subr.mxu1 %v9239_v23  ;;  %12661 = vst [vmem:[#allocation40_spill] sm:$0xff] %v9245_v52  ;;  %12662 = vst [vmem:[#allocation41_spill] sm:$0xff] %v9251_v26  ;;  %v9257_v31 = vld [vmem:[%s11507_s4 + $0xa8] sm:$0xff]  ;;  %v9263_v23 = vld [vmem:[%s11507_s4 + $0xb8] sm:$0xff] }
 0x55f   :  { %2762 = vmatpush1.msra.mxu0 %v9245_v52  ;;  %2833 = vmatpush1.msra.mxu1 %v9251_v26  ;;  %12663 = vst [vmem:[#allocation42_spill] sm:$0xff] %v9257_v31  ;;  %12664 = vst [vmem:[#allocation43_spill] sm:$0xff] %v9263_v23  ;;  %v9269_v52 = vld [vmem:[%s11507_s4 + $0xa0] sm:$0xff]  ;;  %v9275_v26 = vld [vmem:[%s11507_s4 + $0xb0] sm:$0xff] }
 0x560   :  { %2763 = vmatprep.subr.mxu0 %v9257_v31  ;;  %2834 = vmatprep.subr.mxu1 %v9263_v23  ;;  %12665 = vst [vmem:[#allocation44_spill] sm:$0xff] %v9269_v52  ;;  %12666 = vst [vmem:[#allocation45_spill] sm:$0xff] %v9275_v26  ;;  %v9281_v31 = vld [vmem:[%s11507_s4 + $0x88] sm:$0xff]  ;;  %v9287_v23 = vld [vmem:[%s11507_s4 + $0x98] sm:$0xff] }
 0x561   :  { %2764 = vmatpush1.msra.mxu0 %v9269_v52  ;;  %2835 = vmatpush1.msra.mxu1 %v9275_v26  ;;  %12667 = vst [vmem:[#allocation46_spill] sm:$0xff] %v9281_v31  ;;  %12668 = vst [vmem:[#allocation47_spill] sm:$0xff] %v9287_v23  ;;  %v9293_v52 = vld [vmem:[%s11507_s4 + $0x80] sm:$0xff]  ;;  %v9299_v26 = vld [vmem:[%s11507_s4 + $0x90] sm:$0xff] }
 0x562   :  { %2765 = vmatprep.subr.mxu0 %v9281_v31  ;;  %2836 = vmatprep.subr.mxu1 %v9287_v23  ;;  %12669 = vst [vmem:[#allocation48_spill] sm:$0xff] %v9293_v52  ;;  %12670 = vst [vmem:[#allocation49_spill] sm:$0xff] %v9299_v26  ;;  %v9305_v31 = vld [vmem:[%s11507_s4 + $0x68] sm:$0xff]  ;;  %v9311_v23 = vld [vmem:[%s11507_s4 + $0x78] sm:$0xff] }
 0x563   :  { %2766 = vmatpush1.msra.mxu0 %v9293_v52  ;;  %2837 = vmatpush1.msra.mxu1 %v9299_v26  ;;  %12671 = vst [vmem:[#allocation50_spill] sm:$0xff] %v9305_v31  ;;  %12672 = vst [vmem:[#allocation51_spill] sm:$0xff] %v9311_v23  ;;  %v9317_v52 = vld [vmem:[%s11507_s4 + $0x60] sm:$0xff]  ;;  %v9323_v26 = vld [vmem:[%s11507_s4 + $0x70] sm:$0xff] }
 0x564   :  { %2767 = vmatprep.subr.mxu0 %v9305_v31  ;;  %2838 = vmatprep.subr.mxu1 %v9311_v23  ;;  %12673 = vst [vmem:[#allocation52_spill] sm:$0xff] %v9317_v52  ;;  %12674 = vst [vmem:[#allocation53_spill] sm:$0xff] %v9323_v26  ;;  %v9329_v31 = vld [vmem:[%s11507_s4 + $0x48] sm:$0xff]  ;;  %v9335_v23 = vld [vmem:[%s11507_s4 + $0x58] sm:$0xff] }
 0x565   :  { %2768 = vmatpush1.msra.mxu0 %v9317_v52  ;;  %2839 = vmatpush1.msra.mxu1 %v9323_v26  ;;  %12675 = vst [vmem:[#allocation54_spill] sm:$0xff] %v9329_v31  ;;  %12676 = vst [vmem:[#allocation55_spill] sm:$0xff] %v9335_v23  ;;  %v9341_v52 = vld [vmem:[%s11507_s4 + $0x40] sm:$0xff]  ;;  %v9347_v26 = vld [vmem:[%s11507_s4 + $0x50] sm:$0xff] }
 0x566   :  { %2769 = vmatprep.subr.mxu0 %v9329_v31  ;;  %2840 = vmatprep.subr.mxu1 %v9335_v23  ;;  %12677 = vst [vmem:[#allocation56_spill] sm:$0xff] %v9341_v52  ;;  %12678 = vst [vmem:[#allocation57_spill] sm:$0xff] %v9347_v26  ;;  %v9353_v31 = vld [vmem:[%s11507_s4 + $0x28] sm:$0xff]  ;;  %v9359_v23 = vld [vmem:[%s11507_s4 + $0x38] sm:$0xff] }
 0x567   :  { %2770 = vmatpush1.msra.mxu0 %v9341_v52  ;;  %2841 = vmatpush1.msra.mxu1 %v9347_v26  ;;  %12679 = vst [vmem:[#allocation58_spill] sm:$0xff] %v9353_v31  ;;  %12680 = vst [vmem:[#allocation59_spill] sm:$0xff] %v9359_v23  ;;  %v9365_v52 = vld [vmem:[%s11507_s4 + $0x20] sm:$0xff]  ;;  %v9371_v26 = vld [vmem:[%s11507_s4 + $0x30] sm:$0xff] }
 0x568   :  { %2771 = vmatprep.subr.mxu0 %v9353_v31  ;;  %2842 = vmatprep.subr.mxu1 %v9359_v23  ;;  %12681 = vst [vmem:[#allocation60_spill] sm:$0xff] %v9365_v52  ;;  %12682 = vst [vmem:[#allocation61_spill] sm:$0xff] %v9371_v26  ;;  %v9377_v31 = vld [vmem:[%s11507_s4 + $0x8] sm:$0xff]  ;;  %v9383_v23 = vld [vmem:[%s11507_s4 + $0x18] sm:$0xff] }
 0x569   :  { %2772 = vmatpush1.msra.mxu0 %v9365_v52  ;;  %2843 = vmatpush1.msra.mxu1 %v9371_v26  ;;  %12683 = vst [vmem:[#allocation62_spill] sm:$0xff] %v9377_v31  ;;  %12684 = vst [vmem:[#allocation63_spill] sm:$0xff] %v9383_v23  ;;  %v9389_v52 = vld [vmem:[%s11507_s4] sm:$0xff]  ;;  %v9395_v26 = vld [vmem:[%s11507_s4 + $0x10] sm:$0xff] }
 0x56a   :  { %2773 = vmatprep.subr.mxu0 %v9377_v31  ;;  %2844 = vmatprep.subr.mxu1 %v9383_v23  ;;  %12685 = vst [vmem:[#allocation64_spill] sm:$0xff] %v9389_v52  ;;  %12686 = vst [vmem:[#allocation65_spill] sm:$0xff] %v9395_v26  ;;  %v9403_v23 = vld [vmem:[%s11508_s5 + $0x1e8] sm:$0xff] }
 0x56b   :  { %2774 = vmatpush1.msra.mxu0 %v9389_v52  ;;  %2845 = vmatpush1.msra.mxu1 %v9395_v26  ;;  %12687 = vst [vmem:[#allocation66_spill] sm:$0xff] %v9403_v23  ;;  %v9409_v52 = vld [vmem:[%s11508_s5 + $0x1f8] sm:$0xff] }
 0x56c   :  { %2807 = vmatprep.mubr.f32.mxu0 %v12180_v19  ;;  %2878 = vmatprep.mubr.f32.mxu1 %v12180_v19  ;;  %12688 = vst [vmem:[#allocation67_spill] sm:$0xff] %v9409_v52 }
 0x56d   :  { %2885 = vmatprep.subr.mxu0 %v9403_v23  ;;  %2956 = vmatprep.subr.mxu1 %v9409_v52 }
 0x5c8   :  { %v2315_v31 = vpop.f32.mrf.mxu0  ;;  %v2386_v59 = vpop.f32.mrf.mxu1 }
 0x5c9   :  { %v2316_v50 = vadd.f32 %v2315_v31, %v12549_v43  ;;  %v2387_v44 = vadd.f32 %v2386_v59, %v7243_v34 }
 0x5ca   :  { %v2317_v26 = vpop.f32.mrf.mxu0  ;;  %v2388_v23 = vpop.f32.mrf.mxu1 }
 0x5cb   :  { %v2318_v27 = vadd.f32 %v2317_v26, %v7232_v61  ;;  %v2389_v52 = vadd.f32 %v2388_v23, %v7238_v30 }
 0x5e9   :  { %v2457_v49 = vpop.f32.mrf.mxu0  ;;  %v2528_v9 = vpop.f32.mrf.mxu1 }
 0x5ea   :  { %v2533_v14 = vadd.f32 %v2457_v49, %v2316_v50  ;;  %v2535_v31 = vadd.f32 %v2528_v9, %v2387_v44 }
 0x5eb   :  { %v2459_v15 = vpop.f32.mrf.mxu0  ;;  %v2530_v13 = vpop.f32.mrf.mxu1 }
 0x5ec   :  { %v4572_v21 = vmul.f32 -1.442695, %v2533_v14  ;;  %v2534_v18 = vadd.f32 %v2459_v15, %v2318_v27  ;;  %v2536_v51 = vadd.f32 %v2530_v13, %v2389_v52  ;;  %v12689_v27 = vld [vmem:[#allocation80_spill] sm:$0xff] }
 0x5ee   :  { %4729 = vpow2.f32 %v4572_v21  ;;  %v4573_v12 = vmul.f32 -1.442695, %v2534_v18  ;;  %v4574_v11 = vmul.f32 -1.442695, %v2536_v51  ;;  %v12690_v51 = vld [vmem:[#allocation82_spill] sm:$0xff] }
 0x5f0   :  { %4731 = vpow2.f32 %v4573_v12 }
 0x5f1   :  { %4733 = vtanh.f32 %v2535_v31 }
 0x5fb   :  { %v4730_v43 = vpop.eup %4729 }
 0x5fc   :  { %v2546_v56 = vadd.f32 1.0, %v4730_v43 }
 0x5fd   :  { %v4732_v26 = vpop.eup %4731 }
 0x5fe   :  { %4735 = vrcp.f32 %v2546_v56  ;;  %v2547_v14 = vadd.f32 1.0, %v4732_v26  ;;  %v4734_v21 = vpop.eup %4733  ;;  %v12691_v26 = vld [vmem:[#allocation83_spill] sm:$0xff] }
 0x5ff   :  { %4737 = vpow2.f32 %v4574_v11 }
 0x600   :  { %4739 = vrcp.f32 %v2547_v14 }
 0x60b   :  { %v4736_v18 = vpop.eup %4735  ;;  %v2638_v15 = vpop.f32.mrf.mxu0 }
 0x60c   :  { %v4738_v12 = vpop.eup %4737  ;;  %v2714_v49 = vadd.f32 %v2638_v15, %v12689_v27  ;;  %v2557_v59 = vmul.f32 %v4736_v18, %v4734_v21  ;;  %v2709_v56 = vpop.f32.mrf.mxu1  ;;  %v12692_v15 = vld [vmem:[#allocation81_spill] sm:$0xff] }
 0x60d   :  { %v4740_v50 = vpop.eup %4739  ;;  %v2640_v23 = vpop.f32.mrf.mxu0  ;;  %v2548_v9 = vadd.f32 1.0, %v4738_v12  ;;  %v2716_v21 = vadd.f32 %v2709_v56, %v12692_v15 }
 0x60e   :  { %v2556_v44 = vmul.f32 %v4740_v50, %v8662_v40  ;;  %v4576_v13 = vmul.f32 -1.442695, %v2714_v49  ;;  %v2715_v43 = vadd.f32 %v2640_v23, %v12690_v51  ;;  %v2711_v31 = vpop.f32.mrf.mxu1 }
 0x60f   :  { %v2717_v14 = vadd.f32 %v2711_v31, %v12691_v26 }
 0x610   :  { %v9419_v52 = vadd.f32 %v2557_v59, %v2556_v44  ;;  %4741 = vpow2.f32 %v4576_v13  ;;  %v4577_v11 = vmul.f32 -1.442695, %v2715_v43 }
 0x611   :  { %v4578_v18 = vmul.f32 -1.442695, %v2717_v14 }
 0x612   :  { %4743 = vpow2.f32 %v4577_v11 }
 0x613   :  { %4745 = vrcp.f32 %v2548_v9 }
 0x614   :  { %4747 = vtanh.f32 %v9419_v52 }
 0x615   :  { %4749 = vtanh.f32 %v2716_v21 }
 0x616   :  { %4751 = vpow2.f32 %v4578_v18 }
 0x61d   :  { %v4742_v40 = vpop.eup %4741 }
 0x61e   :  { %v2727_v27 = vadd.f32 1.0, %v4742_v40 }
 0x61f   :  { %v4744_v49 = vpop.eup %4743 }
 0x620   :  { %v4746_v12 = vpop.eup %4745  ;;  %4753 = vrcp.f32 %v2727_v27  ;;  %v2728_v50 = vadd.f32 1.0, %v4744_v49 }
 0x621   :  { %v4748_v23 = vpop.eup %4747 }
 0x622   :  { %4755 = vrcp.f32 %v2728_v50  ;;  %v9424_v59 = vmul.f32 %v4748_v23, %v4746_v12  ;;  %v4750_v13 = vpop.eup %4749  ;;  %v9446_v12 = vld [vmem:[%s11508_s5 + $0x1f0] sm:$0xff]  ;;  %v9452_v50 = vld [vmem:[%s11508_s5 + $0x1c8] sm:$0xff]  ;;  %v9458_v23 = vld [vmem:[%s11508_s5 + $0x1d8] sm:$0xff] }
 0x623   :  { %v4752_v51 = vpop.eup %4751 }
 0x624   :  { %v4575_v44 = vmul.f32 -1.442695, %v9424_v59  ;;  %v2729_v11 = vadd.f32 1.0, %v4752_v51  ;;  %v9476_v51 = vld [vmem:[%s11508_s5 + $0x1a8] sm:$0xff] }
 0x626   :  { %4757 = vpow2.f32 %v4575_v44  ;;  %v9464_v44 = vld [vmem:[%s11508_s5 + $0x1c0] sm:$0xff] }
 0x627   :  { %4759 = vrcp.f32 %v2729_v11  ;;  %v9500_v11 = vld [vmem:[%s11508_s5 + $0x188] sm:$0xff] }
 0x62d   :  { %v4754_v43 = vpop.eup %4753 }
 0x62e   :  { %v2738_v9 = vmul.f32 %v4754_v43, %v4750_v13  ;;  %v9470_v13 = vld [vmem:[%s11508_s5 + $0x1d0] sm:$0xff]  ;;  %v9482_v43 = vld [vmem:[%s11508_s5 + $0x1b8] sm:$0xff] }
 0x62f   :  { %v4756_v56 = vpop.eup %4755 }
 0x630   :  { %v2737_v31 = vmul.f32 %v4756_v56, %v8671_v4  ;;  %v9440_v4 = vld [vmem:[%s11508_s5 + $0x1e0] sm:$0xff]  ;;  %v9494_v56 = vld [vmem:[%s11508_s5 + $0x1b0] sm:$0xff] }
 0x632   :  { %v9428_v26 = vadd.f32 %v2738_v9, %v2737_v31  ;;  %v9488_v9 = vld [vmem:[%s11508_s5 + $0x1a0] sm:$0xff]  ;;  %v9506_v31 = vld [vmem:[%s11508_s5 + $0x198] sm:$0xff] }
 0x633   :  { %v4758_v14 = vpop.eup %4757 }
 0x634   :  { %4761 = vtanh.f32 %v9428_v26  ;;  %v2564_v15 = vadd.f32 1.0, %v4758_v14  ;;  %v4760_v21 = vpop.eup %4759  ;;  %v9512_v14 = vld [vmem:[%s11508_s5 + $0x180] sm:$0xff] }
 0x636   :  { %4763 = vrcp.f32 %v2564_v15  ;;  %v9518_v15 = vld [vmem:[%s11508_s5 + $0x190] sm:$0xff] }
 0x641   :  { %v4762_v18 = vpop.eup %4761 }
 0x642   :  { %v9431_v40 = vmul.f32 %v4762_v18, %v4760_v21  ;;  %v9524_v21 = vld [vmem:[%s11508_s5 + $0x168] sm:$0xff]  ;;  %v9530_v18 = vld [vmem:[%s11508_s5 + $0x178] sm:$0xff] }
 0x643   :  { %v4764_v27 = vpop.eup %4763  ;;  %12693 = vst [vmem:[#allocation68_spill] sm:$0xff] %v9524_v21  ;;  %12694 = vst [vmem:[#allocation70_spill] sm:$0xff] %v9530_v18 }
 0x644   :  { %v2742_v49 = vmax.f32 %v9431_v40, 0.0  ;;  %2567 = vst [vmem:[%s11511_s7 + $0x18] sm:$0xff] %v4764_v27  ;;  %v9536_v27 = vld [vmem:[%s11508_s5 + $0x160] sm:$0xff] }
 0x645   :  { %12695 = vst [vmem:[#allocation71_spill] sm:$0xff] %v9536_v27 }
 0x646   :  { %2808 = vmatmul.mubr.f32.vlgmr.msra.gmra.mxu0 %v2742_v49  ;;  %2879 = vmatmul.mubr.f32.vlgmr.msra.gmra.mxu1 %v2742_v49  ;;  %v9542_v49 = vld [vmem:[%s11508_s5 + $0x170] sm:$0xff] }
 0x647   :  { %2886 = vmatpush1.msra.mxu0 %v9440_v4  ;;  %2957 = vmatpush1.msra.mxu1 %v9446_v12  ;;  %12696 = vst [vmem:[#allocation69_spill] sm:$0xff] %v9542_v49 }
 0x648   :  { %2887 = vmatprep.subr.mxu0 %v9452_v50  ;;  %2958 = vmatprep.subr.mxu1 %v9458_v23 }
 0x649   :  { %2888 = vmatpush1.msra.mxu0 %v9464_v44  ;;  %2959 = vmatpush1.msra.mxu1 %v9470_v13 }
 0x64a   :  { %2889 = vmatprep.subr.mxu0 %v9476_v51  ;;  %2960 = vmatprep.subr.mxu1 %v9482_v43 }
 0x64b   :  { %2890 = vmatpush1.msra.mxu0 %v9488_v9  ;;  %2961 = vmatpush1.msra.mxu1 %v9494_v56 }
 0x64c   :  { %2891 = vmatprep.subr.mxu0 %v9500_v11  ;;  %2962 = vmatprep.subr.mxu1 %v9506_v31 }
 0x64d   :  { %2892 = vmatpush1.msra.mxu0 %v9512_v14  ;;  %2963 = vmatpush1.msra.mxu1 %v9518_v15 }
 0x64e   :  { %2893 = vmatprep.subr.mxu0 %v9524_v21  ;;  %2964 = vmatprep.subr.mxu1 %v9530_v18  ;;  %v9548_v21 = vld [vmem:[%s11508_s5 + $0x148] sm:$0xff]  ;;  %v9554_v18 = vld [vmem:[%s11508_s5 + $0x158] sm:$0xff] }
 0x64f   :  { %2894 = vmatpush1.msra.mxu0 %v9536_v27  ;;  %2965 = vmatpush1.msra.mxu1 %v9542_v49  ;;  %12697 = vst [vmem:[#allocation76_spill] sm:$0xff] %v9548_v21  ;;  %12698 = vst [vmem:[#allocation78_spill] sm:$0xff] %v9554_v18  ;;  %v9560_v27 = vld [vmem:[%s11508_s5 + $0x140] sm:$0xff]  ;;  %v9566_v49 = vld [vmem:[%s11508_s5 + $0x150] sm:$0xff] }
 0x650   :  { %2895 = vmatprep.subr.mxu0 %v9548_v21  ;;  %2966 = vmatprep.subr.mxu1 %v9554_v18  ;;  %12699 = vst [vmem:[#allocation79_spill] sm:$0xff] %v9560_v27  ;;  %12700 = vst [vmem:[#allocation77_spill] sm:$0xff] %v9566_v49  ;;  %v9572_v21 = vld [vmem:[%s11508_s5 + $0x128] sm:$0xff]  ;;  %v9578_v18 = vld [vmem:[%s11508_s5 + $0x138] sm:$0xff] }
 0x651   :  { %2896 = vmatpush1.msra.mxu0 %v9560_v27  ;;  %2967 = vmatpush1.msra.mxu1 %v9566_v49  ;;  %12701 = vst [vmem:[#allocation96_spill] sm:$0xff] %v9572_v21  ;;  %12702 = vst [vmem:[#allocation97_spill] sm:$0xff] %v9578_v18  ;;  %v9584_v27 = vld [vmem:[%s11508_s5 + $0x120] sm:$0xff]  ;;  %v9590_v49 = vld [vmem:[%s11508_s5 + $0x130] sm:$0xff] }
 0x652   :  { %2897 = vmatprep.subr.mxu0 %v9572_v21  ;;  %2968 = vmatprep.subr.mxu1 %v9578_v18  ;;  %12703 = vst [vmem:[#allocation98_spill] sm:$0xff] %v9584_v27  ;;  %12704 = vst [vmem:[#allocation99_spill] sm:$0xff] %v9590_v49  ;;  %v9596_v21 = vld [vmem:[%s11508_s5 + $0x108] sm:$0xff]  ;;  %v9602_v18 = vld [vmem:[%s11508_s5 + $0x118] sm:$0xff] }
 0x653   :  { %2898 = vmatpush1.msra.mxu0 %v9584_v27  ;;  %2969 = vmatpush1.msra.mxu1 %v9590_v49  ;;  %12705 = vst [vmem:[#allocation100_spill] sm:$0xff] %v9596_v21  ;;  %12706 = vst [vmem:[#allocation101_spill] sm:$0xff] %v9602_v18  ;;  %v9608_v27 = vld [vmem:[%s11508_s5 + $0x100] sm:$0xff]  ;;  %v9614_v49 = vld [vmem:[%s11508_s5 + $0x110] sm:$0xff] }
 0x654   :  { %2899 = vmatprep.subr.mxu0 %v9596_v21  ;;  %2970 = vmatprep.subr.mxu1 %v9602_v18  ;;  %12707 = vst [vmem:[#allocation102_spill] sm:$0xff] %v9608_v27  ;;  %12708 = vst [vmem:[#allocation103_spill] sm:$0xff] %v9614_v49  ;;  %v9620_v21 = vld [vmem:[%s11508_s5 + $0xe8] sm:$0xff]  ;;  %v9626_v18 = vld [vmem:[%s11508_s5 + $0xf8] sm:$0xff] }
 0x655   :  { %2900 = vmatpush1.msra.mxu0 %v9608_v27  ;;  %2971 = vmatpush1.msra.mxu1 %v9614_v49  ;;  %12709 = vst [vmem:[#allocation104_spill] sm:$0xff] %v9620_v21  ;;  %12710 = vst [vmem:[#allocation105_spill] sm:$0xff] %v9626_v18  ;;  %v9632_v27 = vld [vmem:[%s11508_s5 + $0xe0] sm:$0xff]  ;;  %v9638_v49 = vld [vmem:[%s11508_s5 + $0xf0] sm:$0xff] }
 0x656   :  { %2901 = vmatprep.subr.mxu0 %v9620_v21  ;;  %2972 = vmatprep.subr.mxu1 %v9626_v18  ;;  %12711 = vst [vmem:[#allocation106_spill] sm:$0xff] %v9632_v27  ;;  %12712 = vst [vmem:[#allocation107_spill] sm:$0xff] %v9638_v49  ;;  %v9644_v21 = vld [vmem:[%s11508_s5 + $0xc8] sm:$0xff]  ;;  %v9650_v18 = vld [vmem:[%s11508_s5 + $0xd8] sm:$0xff] }
 0x657   :  { %2902 = vmatpush1.msra.mxu0 %v9632_v27  ;;  %2973 = vmatpush1.msra.mxu1 %v9638_v49  ;;  %12713 = vst [vmem:[#allocation108_spill] sm:$0xff] %v9644_v21  ;;  %12714 = vst [vmem:[#allocation109_spill] sm:$0xff] %v9650_v18  ;;  %v9656_v27 = vld [vmem:[%s11508_s5 + $0xc0] sm:$0xff]  ;;  %v9662_v49 = vld [vmem:[%s11508_s5 + $0xd0] sm:$0xff] }
 0x658   :  { %2903 = vmatprep.subr.mxu0 %v9644_v21  ;;  %2974 = vmatprep.subr.mxu1 %v9650_v18  ;;  %12715 = vst [vmem:[#allocation110_spill] sm:$0xff] %v9656_v27  ;;  %12716 = vst [vmem:[#allocation111_spill] sm:$0xff] %v9662_v49  ;;  %v9668_v21 = vld [vmem:[%s11508_s5 + $0xa8] sm:$0xff]  ;;  %v9674_v18 = vld [vmem:[%s11508_s5 + $0xb8] sm:$0xff] }
 0x659   :  { %2904 = vmatpush1.msra.mxu0 %v9656_v27  ;;  %2975 = vmatpush1.msra.mxu1 %v9662_v49  ;;  %12717 = vst [vmem:[#allocation112_spill] sm:$0xff] %v9668_v21  ;;  %12718 = vst [vmem:[#allocation113_spill] sm:$0xff] %v9674_v18  ;;  %v9680_v27 = vld [vmem:[%s11508_s5 + $0xa0] sm:$0xff]  ;;  %v9686_v49 = vld [vmem:[%s11508_s5 + $0xb0] sm:$0xff] }
 0x65a   :  { %2905 = vmatprep.subr.mxu0 %v9668_v21  ;;  %2976 = vmatprep.subr.mxu1 %v9674_v18  ;;  %12719 = vst [vmem:[#allocation114_spill] sm:$0xff] %v9680_v27  ;;  %12720 = vst [vmem:[#allocation115_spill] sm:$0xff] %v9686_v49  ;;  %v9692_v21 = vld [vmem:[%s11508_s5 + $0x88] sm:$0xff]  ;;  %v9698_v18 = vld [vmem:[%s11508_s5 + $0x98] sm:$0xff] }
 0x65b   :  { %2906 = vmatpush1.msra.mxu0 %v9680_v27  ;;  %2977 = vmatpush1.msra.mxu1 %v9686_v49  ;;  %12721 = vst [vmem:[#allocation116_spill] sm:$0xff] %v9692_v21  ;;  %12722 = vst [vmem:[#allocation117_spill] sm:$0xff] %v9698_v18  ;;  %v9704_v27 = vld [vmem:[%s11508_s5 + $0x80] sm:$0xff]  ;;  %v9710_v49 = vld [vmem:[%s11508_s5 + $0x90] sm:$0xff] }
 0x65c   :  { %2907 = vmatprep.subr.mxu0 %v9692_v21  ;;  %2978 = vmatprep.subr.mxu1 %v9698_v18  ;;  %12723 = vst [vmem:[#allocation118_spill] sm:$0xff] %v9704_v27  ;;  %12724 = vst [vmem:[#allocation119_spill] sm:$0xff] %v9710_v49  ;;  %v9716_v21 = vld [vmem:[%s11508_s5 + $0x68] sm:$0xff]  ;;  %v9722_v18 = vld [vmem:[%s11508_s5 + $0x78] sm:$0xff] }
 0x65d   :  { %2908 = vmatpush1.msra.mxu0 %v9704_v27  ;;  %2979 = vmatpush1.msra.mxu1 %v9710_v49  ;;  %12725 = vst [vmem:[#allocation120_spill] sm:$0xff] %v9716_v21  ;;  %12726 = vst [vmem:[#allocation121_spill] sm:$0xff] %v9722_v18  ;;  %v9728_v27 = vld [vmem:[%s11508_s5 + $0x60] sm:$0xff]  ;;  %v9734_v49 = vld [vmem:[%s11508_s5 + $0x70] sm:$0xff] }
 0x65e   :  { %2909 = vmatprep.subr.mxu0 %v9716_v21  ;;  %2980 = vmatprep.subr.mxu1 %v9722_v18  ;;  %12727 = vst [vmem:[#allocation122_spill] sm:$0xff] %v9728_v27  ;;  %12728 = vst [vmem:[#allocation123_spill] sm:$0xff] %v9734_v49  ;;  %v9740_v21 = vld [vmem:[%s11508_s5 + $0x48] sm:$0xff]  ;;  %v9746_v18 = vld [vmem:[%s11508_s5 + $0x58] sm:$0xff] }
 0x65f   :  { %2910 = vmatpush1.msra.mxu0 %v9728_v27  ;;  %2981 = vmatpush1.msra.mxu1 %v9734_v49  ;;  %12729 = vst [vmem:[#allocation124_spill] sm:$0xff] %v9740_v21  ;;  %12730 = vst [vmem:[#allocation125_spill] sm:$0xff] %v9746_v18  ;;  %v9752_v27 = vld [vmem:[%s11508_s5 + $0x40] sm:$0xff]  ;;  %v9758_v49 = vld [vmem:[%s11508_s5 + $0x50] sm:$0xff] }
 0x660   :  { %2911 = vmatprep.subr.mxu0 %v9740_v21  ;;  %2982 = vmatprep.subr.mxu1 %v9746_v18  ;;  %12731 = vst [vmem:[#allocation126_spill] sm:$0xff] %v9752_v27  ;;  %12732 = vst [vmem:[#allocation127_spill] sm:$0xff] %v9758_v49  ;;  %v9764_v21 = vld [vmem:[%s11508_s5 + $0x28] sm:$0xff]  ;;  %v9770_v18 = vld [vmem:[%s11508_s5 + $0x38] sm:$0xff] }
 0x661   :  { %2912 = vmatpush1.msra.mxu0 %v9752_v27  ;;  %2983 = vmatpush1.msra.mxu1 %v9758_v49  ;;  %12733 = vst [vmem:[#allocation128_spill] sm:$0xff] %v9764_v21  ;;  %12734 = vst [vmem:[#allocation129_spill] sm:$0xff] %v9770_v18  ;;  %v9776_v27 = vld [vmem:[%s11508_s5 + $0x20] sm:$0xff]  ;;  %v9782_v49 = vld [vmem:[%s11508_s5 + $0x30] sm:$0xff] }
 0x662   :  { %2913 = vmatprep.subr.mxu0 %v9764_v21  ;;  %2984 = vmatprep.subr.mxu1 %v9770_v18  ;;  %12735 = vst [vmem:[#allocation130_spill] sm:$0xff] %v9776_v27  ;;  %v9788_v21 = vld [vmem:[%s11508_s5 + $0x8] sm:$0xff]  ;;  %v9794_v18 = vld [vmem:[%s11508_s5 + $0x18] sm:$0xff] }
 0x663   :  { %2914 = vmatpush1.msra.mxu0 %v9776_v27  ;;  %2985 = vmatpush1.msra.mxu1 %v9782_v49  ;;  %12736 = vst [vmem:[#allocation131_spill] sm:$0xff] %v9788_v21  ;;  %12737 = vst [vmem:[#allocation132_spill] sm:$0xff] %v9794_v18  ;;  %v9800_v27 = vld [vmem:[%s11508_s5] sm:$0xff] }
 0x664   :  { %2915 = vmatprep.subr.mxu0 %v9788_v21  ;;  %2986 = vmatprep.subr.mxu1 %v9794_v18  ;;  %12738 = vst [vmem:[#allocation133_spill] sm:$0xff] %v9800_v27  ;;  %v9807_v21 = vld [vmem:[%s11508_s5 + $0x10] sm:$0xff]  ;;  %v9816_v18 = vld [vmem:[%s11506_s2 + $0x1e8] sm:$0xff] }
 0x665   :  { %2916 = vmatpush1.msra.mxu0 %v9800_v27  ;;  %2949 = vmatprep.mubr.f32.mxu0 %v12180_v19  ;;  %12739 = vst [vmem:[#allocation134_spill] sm:$0xff] %v9807_v21  ;;  %12740 = vst [vmem:[#allocation135_spill] sm:$0xff] %v9816_v18  ;;  %v9822_v27 = vld [vmem:[%s11506_s2 + $0x1f8] sm:$0xff] }
 0x666   :  { %2987 = vmatpush1.msra.mxu1 %v9807_v21  ;;  %3020 = vmatprep.mubr.f32.mxu1 %v12180_v19  ;;  %12741 = vst [vmem:[#allocation136_spill] sm:$0xff] %v9822_v27  ;;  %v9828_v21 = vld [vmem:[%s11506_s2 + $0x1e0] sm:$0xff] }
 0x667   :  { %2950 = vmatmul.mubr.f32.vlgmr.msra.gmra.mxu0 %v9424_v59  ;;  %3021 = vmatmul.mubr.f32.vlgmr.msra.gmra.mxu1 %v9424_v59  ;;  %12742 = vst [vmem:[#allocation137_spill] sm:$0xff] %v9828_v21  ;;  %v9834_v59 = vld [vmem:[%s11506_s2 + $0x1f0] sm:$0xff] }
 0x668   :  { %3066 = vmatprep.subr.mxu0 %v9816_v18  ;;  %3137 = vmatprep.subr.mxu1 %v9822_v27  ;;  %12743 = vst [vmem:[#allocation138_spill] sm:$0xff] %v9834_v59  ;;  %v9840_v18 = vld [vmem:[%s11506_s2 + $0x1c8] sm:$0xff]  ;;  %v9846_v27 = vld [vmem:[%s11506_s2 + $0x1d8] sm:$0xff] }
 0x669   :  { %3067 = vmatpush1.msra.mxu0 %v9828_v21  ;;  %3138 = vmatpush1.msra.mxu1 %v9834_v59  ;;  %12744 = vst [vmem:[#allocation139_spill] sm:$0xff] %v9840_v18  ;;  %12745 = vst [vmem:[#allocation140_spill] sm:$0xff] %v9846_v27  ;;  %v9852_v21 = vld [vmem:[%s11506_s2 + $0x1c0] sm:$0xff]  ;;  %v9858_v59 = vld [vmem:[%s11506_s2 + $0x1d0] sm:$0xff] }
 0x66a   :  { %3068 = vmatprep.subr.mxu0 %v9840_v18  ;;  %3139 = vmatprep.subr.mxu1 %v9846_v27  ;;  %12746 = vst [vmem:[#allocation141_spill] sm:$0xff] %v9852_v21  ;;  %12747 = vst [vmem:[#allocation142_spill] sm:$0xff] %v9858_v59  ;;  %v9864_v18 = vld [vmem:[%s11506_s2 + $0x1a8] sm:$0xff]  ;;  %v9870_v27 = vld [vmem:[%s11506_s2 + $0x1b8] sm:$0xff] }
 0x66b   :  { %3069 = vmatpush1.msra.mxu0 %v9852_v21  ;;  %3140 = vmatpush1.msra.mxu1 %v9858_v59  ;;  %12748 = vst [vmem:[#allocation143_spill] sm:$0xff] %v9864_v18  ;;  %12749 = vst [vmem:[#allocation144_spill] sm:$0xff] %v9870_v27  ;;  %v9876_v21 = vld [vmem:[%s11506_s2 + $0x1a0] sm:$0xff]  ;;  %v9882_v59 = vld [vmem:[%s11506_s2 + $0x1b0] sm:$0xff] }
 0x66c   :  { %3070 = vmatprep.subr.mxu0 %v9864_v18  ;;  %3141 = vmatprep.subr.mxu1 %v9870_v27  ;;  %12750 = vst [vmem:[#allocation145_spill] sm:$0xff] %v9876_v21  ;;  %12751 = vst [vmem:[#allocation146_spill] sm:$0xff] %v9882_v59  ;;  %v9888_v18 = vld [vmem:[%s11506_s2 + $0x188] sm:$0xff]  ;;  %v9894_v27 = vld [vmem:[%s11506_s2 + $0x198] sm:$0xff] }
 0x66d   :  { %3071 = vmatpush1.msra.mxu0 %v9876_v21  ;;  %3142 = vmatpush1.msra.mxu1 %v9882_v59  ;;  %12752 = vst [vmem:[#allocation147_spill] sm:$0xff] %v9888_v18  ;;  %12753 = vst [vmem:[#allocation148_spill] sm:$0xff] %v9894_v27  ;;  %v9900_v21 = vld [vmem:[%s11506_s2 + $0x180] sm:$0xff]  ;;  %v9906_v59 = vld [vmem:[%s11506_s2 + $0x190] sm:$0xff] }
 0x66e   :  { %3072 = vmatprep.subr.mxu0 %v9888_v18  ;;  %3143 = vmatprep.subr.mxu1 %v9894_v27  ;;  %12754 = vst [vmem:[#allocation149_spill] sm:$0xff] %v9900_v21  ;;  %12755 = vst [vmem:[#allocation150_spill] sm:$0xff] %v9906_v59  ;;  %v9912_v18 = vld [vmem:[%s11506_s2 + $0x168] sm:$0xff]  ;;  %v9918_v27 = vld [vmem:[%s11506_s2 + $0x178] sm:$0xff] }
 0x66f   :  { %3073 = vmatpush1.msra.mxu0 %v9900_v21  ;;  %3144 = vmatpush1.msra.mxu1 %v9906_v59  ;;  %12756 = vst [vmem:[#allocation151_spill] sm:$0xff] %v9912_v18  ;;  %12757 = vst [vmem:[#allocation152_spill] sm:$0xff] %v9918_v27  ;;  %v9924_v21 = vld [vmem:[%s11506_s2 + $0x160] sm:$0xff]  ;;  %v9930_v59 = vld [vmem:[%s11506_s2 + $0x170] sm:$0xff] }
 0x670   :  { %3074 = vmatprep.subr.mxu0 %v9912_v18  ;;  %3145 = vmatprep.subr.mxu1 %v9918_v27  ;;  %12758 = vst [vmem:[#allocation153_spill] sm:$0xff] %v9924_v21  ;;  %12759 = vst [vmem:[#allocation154_spill] sm:$0xff] %v9930_v59  ;;  %v9936_v18 = vld [vmem:[%s11506_s2 + $0x148] sm:$0xff]  ;;  %v9942_v27 = vld [vmem:[%s11506_s2 + $0x158] sm:$0xff] }
 0x671   :  { %3075 = vmatpush1.msra.mxu0 %v9924_v21  ;;  %3146 = vmatpush1.msra.mxu1 %v9930_v59  ;;  %v9948_v21 = vld [vmem:[%s11506_s2 + $0x140] sm:$0xff]  ;;  %v9954_v59 = vld [vmem:[%s11506_s2 + $0x150] sm:$0xff] }
 0x672   :  { %3076 = vmatprep.subr.mxu0 %v9936_v18  ;;  %3147 = vmatprep.subr.mxu1 %v9942_v27 }
 0x673   :  { %3077 = vmatpush1.msra.mxu0 %v9948_v21  ;;  %3148 = vmatpush1.msra.mxu1 %v9954_v59 }
 0x674   :  { %3078 = vmatprep.subr.mxu0 %v8773_v25  ;;  %3149 = vmatprep.subr.mxu1 %v8779_v32  ;;  %v12760_v25 = vld [vmem:[#allocation72_spill] sm:$0xff]  ;;  %v12761_v32 = vld [vmem:[#allocation74_spill] sm:$0xff] }
 0x675   :  { %3079 = vmatpush1.msra.mxu0 %v8785_v22  ;;  %3150 = vmatpush1.msra.mxu1 %v8791_v28  ;;  %v12762_v22 = vld [vmem:[#allocation75_spill] sm:$0xff]  ;;  %v12763_v28 = vld [vmem:[#allocation73_spill] sm:$0xff] }
 0x676   :  { %3080 = vmatprep.subr.mxu0 %v8797_v1  ;;  %3151 = vmatprep.subr.mxu1 %v8803_v20  ;;  %v12764_v1 = vld [vmem:[#allocation4_spill] sm:$0xff]  ;;  %v12765_v20 = vld [vmem:[#allocation5_spill] sm:$0xff] }
 0x677   :  { %3081 = vmatpush1.msra.mxu0 %v8809_v33  ;;  %3152 = vmatpush1.msra.mxu1 %v8815_v35  ;;  %v12766_v33 = vld [vmem:[#allocation6_spill] sm:$0xff]  ;;  %v12767_v35 = vld [vmem:[#allocation7_spill] sm:$0xff] }
 0x678   :  { %3082 = vmatprep.subr.mxu0 %v8821_v36  ;;  %3153 = vmatprep.subr.mxu1 %v8827_v37  ;;  %v12768_v36 = vld [vmem:[#allocation8_spill] sm:$0xff]  ;;  %v12769_v37 = vld [vmem:[#allocation9_spill] sm:$0xff] }
 0x679   :  { %3083 = vmatpush1.msra.mxu0 %v8833_v39  ;;  %3154 = vmatpush1.msra.mxu1 %v8839_v41  ;;  %v12770_v39 = vld [vmem:[#allocation10_spill] sm:$0xff]  ;;  %v12771_v41 = vld [vmem:[#allocation11_spill] sm:$0xff] }
 0x67a   :  { %3084 = vmatprep.subr.mxu0 %v8845_v42  ;;  %3155 = vmatprep.subr.mxu1 %v8851_v45  ;;  %v12772_v42 = vld [vmem:[#allocation12_spill] sm:$0xff]  ;;  %v12773_v45 = vld [vmem:[#allocation13_spill] sm:$0xff] }
 0x67b   :  { %3085 = vmatpush1.msra.mxu0 %v8857_v46  ;;  %3156 = vmatpush1.msra.mxu1 %v8863_v48  ;;  %v12774_v46 = vld [vmem:[#allocation14_spill] sm:$0xff]  ;;  %v12775_v48 = vld [vmem:[#allocation15_spill] sm:$0xff] }
 0x67c   :  { %3086 = vmatprep.subr.mxu0 %v8869_v29  ;;  %3157 = vmatprep.subr.mxu1 %v8875_v24  ;;  %v12776_v29 = vld [vmem:[#allocation16_spill] sm:$0xff]  ;;  %v12777_v24 = vld [vmem:[#allocation17_spill] sm:$0xff] }
 0x67d   :  { %3087 = vmatpush1.msra.mxu0 %v8881_v38  ;;  %3158 = vmatpush1.msra.mxu1 %v8887_v17  ;;  %v12778_v38 = vld [vmem:[#allocation18_spill] sm:$0xff]  ;;  %v12779_v17 = vld [vmem:[#allocation19_spill] sm:$0xff] }
 0x67e   :  { %3088 = vmatprep.subr.mxu0 %v8893_v60  ;;  %3159 = vmatprep.subr.mxu1 %v8899_v53  ;;  %v12780_v60 = vld [vmem:[#allocation20_spill] sm:$0xff]  ;;  %v12781_v53 = vld [vmem:[#allocation21_spill] sm:$0xff] }
 0x67f   :  { %3089 = vmatpush1.msra.mxu0 %v8905_v54  ;;  %3160 = vmatpush1.msra.mxu1 %v8911_v3  ;;  %v12782_v54 = vld [vmem:[#allocation22_spill] sm:$0xff]  ;;  %v12783_v3 = vld [vmem:[#allocation23_spill] sm:$0xff] }
 0x680   :  { %3090 = vmatprep.subr.mxu0 %v8917_v16  ;;  %3161 = vmatprep.subr.mxu1 %v8923_v47  ;;  %v12784_v16 = vld [vmem:[#allocation24_spill] sm:$0xff]  ;;  %v12785_v47 = vld [vmem:[#allocation25_spill] sm:$0xff] }
 0x681   :  { %3091 = vmatpush1.msra.mxu0 %v8929_v55  ;;  %3162 = vmatpush1.msra.mxu1 %v8935_v57  ;;  %v12786_v55 = vld [vmem:[#allocation26_spill] sm:$0xff]  ;;  %v12787_v57 = vld [vmem:[#allocation27_spill] sm:$0xff] }
 0x682   :  { %3092 = vmatprep.subr.mxu0 %v8941_v58  ;;  %3163 = vmatprep.subr.mxu1 %v8947_v62  ;;  %v12788_v58 = vld [vmem:[#allocation28_spill] sm:$0xff]  ;;  %v12789_v62 = vld [vmem:[#allocation29_spill] sm:$0xff] }
 0x683   :  { %3093 = vmatpush1.msra.mxu0 %v8953_v63  ;;  %3164 = vmatpush1.msra.mxu1 %v8959_v0  ;;  %v12790_v63 = vld [vmem:[#allocation30_spill] sm:$0xff]  ;;  %v12791_v0 = vld [vmem:[#allocation31_spill] sm:$0xff] }
 0x684   :  { %3094 = vmatprep.subr.mxu0 %v8965_v2  ;;  %3165 = vmatprep.subr.mxu1 %v8971_v5  ;;  %v12792_v2 = vld [vmem:[#allocation32_spill] sm:$0xff]  ;;  %v12793_v5 = vld [vmem:[#allocation33_spill] sm:$0xff] }
 0x685   :  { %3095 = vmatpush1.msra.mxu0 %v8977_v6  ;;  %3166 = vmatpush1.msra.mxu1 %v8983_v7  ;;  %v12794_v6 = vld [vmem:[#allocation34_spill] sm:$0xff]  ;;  %v12795_v7 = vld [vmem:[#allocation35_spill] sm:$0xff] }
 0x686   :  { %3096 = vmatprep.subr.mxu0 %v8989_v8  ;;  %3167 = vmatprep.subr.mxu1 %v8995_v10  ;;  %v12796_v8 = vld [vmem:[#allocation36_spill] sm:$0xff]  ;;  %v12797_v10 = vld [vmem:[#allocation37_spill] sm:$0xff] }
 0x687   :  { %3097 = vmatpush1.msra.mxu0 %v12760_v25  ;;  %3130 = vmatprep.mubr.f32.mxu0 %v12180_v19  ;;  %v12799_v25 = vld [vmem:[#allocation39_spill] sm:$0xff] }
 0x688   :  { %3168 = vmatpush1.msra.mxu1 %v12761_v32  ;;  %3201 = vmatprep.mubr.f32.mxu1 %v12180_v19  ;;  %v12800_v32 = vld [vmem:[#allocation40_spill] sm:$0xff] }
 0x689   :  { %3131 = vmatmul.mubr.f32.vlgmr.msra.gmra.mxu0 %v9431_v40  ;;  %3202 = vmatmul.mubr.f32.vlgmr.msra.gmra.mxu1 %v9431_v40  ;;  %v12798_v40 = vld [vmem:[#allocation38_spill] sm:$0xff] }
 0x68a   :  { %3237 = vmatprep.subr.mxu0 %v12762_v22  ;;  %3308 = vmatprep.subr.mxu1 %v12763_v28  ;;  %v12801_v22 = vld [vmem:[#allocation41_spill] sm:$0xff]  ;;  %v12802_v28 = vld [vmem:[#allocation42_spill] sm:$0xff] }
 0x68b   :  { %3238 = vmatpush1.msra.mxu0 %v12764_v1  ;;  %3309 = vmatpush1.msra.mxu1 %v12765_v20  ;;  %v12803_v1 = vld [vmem:[#allocation43_spill] sm:$0xff]  ;;  %v12804_v20 = vld [vmem:[#allocation44_spill] sm:$0xff] }
 0x68c   :  { %3239 = vmatprep.subr.mxu0 %v12766_v33  ;;  %3310 = vmatprep.subr.mxu1 %v12767_v35  ;;  %v12805_v33 = vld [vmem:[#allocation45_spill] sm:$0xff]  ;;  %v12806_v35 = vld [vmem:[#allocation46_spill] sm:$0xff] }
 0x68d   :  { %3240 = vmatpush1.msra.mxu0 %v12768_v36  ;;  %3311 = vmatpush1.msra.mxu1 %v12769_v37  ;;  %v12807_v36 = vld [vmem:[#allocation47_spill] sm:$0xff]  ;;  %v12808_v37 = vld [vmem:[#allocation48_spill] sm:$0xff] }
 0x68e   :  { %3241 = vmatprep.subr.mxu0 %v12770_v39  ;;  %3312 = vmatprep.subr.mxu1 %v12771_v41  ;;  %v12809_v39 = vld [vmem:[#allocation49_spill] sm:$0xff]  ;;  %v12810_v41 = vld [vmem:[#allocation50_spill] sm:$0xff] }
 0x68f   :  { %3242 = vmatpush1.msra.mxu0 %v12772_v42  ;;  %3313 = vmatpush1.msra.mxu1 %v12773_v45  ;;  %v12811_v42 = vld [vmem:[#allocation51_spill] sm:$0xff]  ;;  %v12812_v45 = vld [vmem:[#allocation52_spill] sm:$0xff] }
 0x690   :  { %3243 = vmatprep.subr.mxu0 %v12774_v46  ;;  %3314 = vmatprep.subr.mxu1 %v12775_v48  ;;  %v12813_v46 = vld [vmem:[#allocation53_spill] sm:$0xff]  ;;  %v12814_v48 = vld [vmem:[#allocation54_spill] sm:$0xff] }
 0x691   :  { %3244 = vmatpush1.msra.mxu0 %v12776_v29  ;;  %3315 = vmatpush1.msra.mxu1 %v12777_v24  ;;  %v12815_v29 = vld [vmem:[#allocation55_spill] sm:$0xff]  ;;  %v12816_v24 = vld [vmem:[#allocation56_spill] sm:$0xff] }
 0x692   :  { %3245 = vmatprep.subr.mxu0 %v12778_v38  ;;  %3316 = vmatprep.subr.mxu1 %v12779_v17  ;;  %v12817_v38 = vld [vmem:[#allocation57_spill] sm:$0xff]  ;;  %v12818_v17 = vld [vmem:[#allocation58_spill] sm:$0xff] }
 0x693   :  { %3246 = vmatpush1.msra.mxu0 %v12780_v60  ;;  %3317 = vmatpush1.msra.mxu1 %v12781_v53  ;;  %v12819_v60 = vld [vmem:[#allocation59_spill] sm:$0xff]  ;;  %v12820_v53 = vld [vmem:[#allocation60_spill] sm:$0xff] }
 0x694   :  { %3247 = vmatprep.subr.mxu0 %v12782_v54  ;;  %3318 = vmatprep.subr.mxu1 %v12783_v3  ;;  %v12821_v54 = vld [vmem:[#allocation61_spill] sm:$0xff]  ;;  %v12822_v3 = vld [vmem:[#allocation62_spill] sm:$0xff] }
 0x695   :  { %3248 = vmatpush1.msra.mxu0 %v12784_v16  ;;  %3319 = vmatpush1.msra.mxu1 %v12785_v47  ;;  %v12823_v16 = vld [vmem:[#allocation63_spill] sm:$0xff]  ;;  %v12824_v47 = vld [vmem:[#allocation64_spill] sm:$0xff] }
 0x696   :  { %3249 = vmatprep.subr.mxu0 %v12786_v55  ;;  %3320 = vmatprep.subr.mxu1 %v12787_v57  ;;  %v12825_v55 = vld [vmem:[#allocation65_spill] sm:$0xff]  ;;  %v12826_v57 = vld [vmem:[#allocation66_spill] sm:$0xff] }
 0x697   :  { %3250 = vmatpush1.msra.mxu0 %v12788_v58  ;;  %3321 = vmatpush1.msra.mxu1 %v12789_v62  ;;  %v12827_v58 = vld [vmem:[#allocation67_spill] sm:$0xff] }
 0x698   :  { %3251 = vmatprep.subr.mxu0 %v12790_v63  ;;  %3322 = vmatprep.subr.mxu1 %v12791_v0  ;;  %v12828_v0 = vld [vmem:[#allocation3_spill] sm:$0xff] }
 0x699   :  { %3252 = vmatpush1.msra.mxu0 %v12792_v2  ;;  %3323 = vmatpush1.msra.mxu1 %v12793_v5 }
 0x69a   :  { %3253 = vmatprep.subr.mxu0 %v12794_v6  ;;  %3324 = vmatprep.subr.mxu1 %v12795_v7 }
 0x69b   :  { %3254 = vmatpush1.msra.mxu0 %v12796_v8  ;;  %3325 = vmatpush1.msra.mxu1 %v12797_v10 }
 0x69c   :  { %3255 = vmatprep.subr.mxu0 %v12798_v40  ;;  %3326 = vmatprep.subr.mxu1 %v12799_v25 }
 0x69d   :  { %3256 = vmatpush1.msra.mxu0 %v12800_v32  ;;  %3327 = vmatpush1.msra.mxu1 %v12801_v22 }
 0x69e   :  { %3257 = vmatprep.subr.mxu0 %v12802_v28  ;;  %3328 = vmatprep.subr.mxu1 %v12803_v1 }
 0x69f   :  { %3258 = vmatpush1.msra.mxu0 %v12804_v20  ;;  %3329 = vmatpush1.msra.mxu1 %v12805_v33 }
 0x6a0   :  { %3259 = vmatprep.subr.mxu0 %v12806_v35  ;;  %3330 = vmatprep.subr.mxu1 %v12807_v36 }
 0x6a1   :  { %3260 = vmatpush1.msra.mxu0 %v12808_v37  ;;  %3331 = vmatpush1.msra.mxu1 %v12809_v39 }
 0x6a2   :  { %3261 = vmatprep.subr.mxu0 %v12810_v41  ;;  %3332 = vmatprep.subr.mxu1 %v12811_v42 }
 0x6a3   :  { %3262 = vmatpush1.msra.mxu0 %v12812_v45  ;;  %3333 = vmatpush1.msra.mxu1 %v12813_v46 }
 0x6a4   :  { %3263 = vmatprep.subr.mxu0 %v12814_v48  ;;  %3334 = vmatprep.subr.mxu1 %v12815_v29 }
 0x6a5   :  { %3264 = vmatpush1.msra.mxu0 %v12816_v24  ;;  %3335 = vmatpush1.msra.mxu1 %v12817_v38  ;;  %v12829_v38 = vld [vmem:[#allocation84_spill] sm:$0xff] }
 0x6a6   :  { %3265 = vmatprep.subr.mxu0 %v12818_v17  ;;  %3336 = vmatprep.subr.mxu1 %v12819_v60 }
 0x6a7   :  { %3266 = vmatpush1.msra.mxu0 %v12820_v53  ;;  %3337 = vmatpush1.msra.mxu1 %v12821_v54 }
 0x6a8   :  { %3267 = vmatprep.subr.mxu0 %v12822_v3  ;;  %3338 = vmatprep.subr.mxu1 %v12823_v16 }
 0x6a9   :  { %3268 = vmatpush1.msra.mxu0 %v12824_v47  ;;  %3339 = vmatpush1.msra.mxu1 %v12825_v55  ;;  %v12830_v47 = vld [vmem:[#allocation86_spill] sm:$0xff] }
 0x6aa   :  { %3301 = vmatprep.mubr.f32.mxu0 %v12180_v19  ;;  %3372 = vmatprep.mubr.f32.mxu1 %v12180_v19 }
 0x6ab   :  { %3379 = vmatprep.subr.mxu0 %v12826_v57  ;;  %3450 = vmatprep.subr.mxu1 %v12827_v58 }
 0x706   :  { %v2809_v62 = vpop.f32.mrf.mxu0  ;;  %v2880_v6 = vpop.f32.mrf.mxu1 }
 0x707   :  { %v2810_v2 = vadd.f32 %v2809_v62, %v12828_v0  ;;  %v2881_v33 = vadd.f32 %v2880_v6, %v7243_v34 }
 0x708   :  { %v2811_v63 = vpop.f32.mrf.mxu0  ;;  %v2882_v32 = vpop.f32.mrf.mxu1 }
 0x709   :  { %v2812_v7 = vadd.f32 %v2811_v63, %v7232_v61  ;;  %v2883_v20 = vadd.f32 %v2882_v32, %v7238_v30 }
 0x727   :  { %v2951_v5 = vpop.f32.mrf.mxu0  ;;  %v3022_v28 = vpop.f32.mrf.mxu1 }
 0x728   :  { %v3027_v8 = vadd.f32 %v2951_v5, %v2810_v2  ;;  %v3029_v36 = vadd.f32 %v3022_v28, %v2881_v33  ;;  %v12831_v5 = vld [vmem:[#allocation87_spill] sm:$0xff] }
 0x729   :  { %v2953_v10 = vpop.f32.mrf.mxu0  ;;  %v3024_v1 = vpop.f32.mrf.mxu1 }
 0x72a   :  { %v4579_v40 = vmul.f32 -1.442695, %v3027_v8  ;;  %v3028_v25 = vadd.f32 %v2953_v10, %v2812_v7  ;;  %v3030_v35 = vadd.f32 %v3024_v1, %v2883_v20  ;;  %v12832_v7 = vld [vmem:[#allocation85_spill] sm:$0xff] }
 0x72c   :  { %4765 = vpow2.f32 %v4579_v40  ;;  %v4580_v22 = vmul.f32 -1.442695, %v3028_v25  ;;  %v4581_v39 = vmul.f32 -1.442695, %v3030_v35 }
 0x72e   :  { %4767 = vpow2.f32 %v4580_v22 }
 0x72f   :  { %4769 = vtanh.f32 %v3029_v36 }
 0x739   :  { %v4766_v37 = vpop.eup %4765 }
 0x73a   :  { %v3040_v41 = vadd.f32 1.0, %v4766_v37 }
 0x73b   :  { %v4768_v42 = vpop.eup %4767 }
 0x73c   :  { %4771 = vrcp.f32 %v3040_v41  ;;  %v3041_v45 = vadd.f32 1.0, %v4768_v42  ;;  %v4770_v46 = vpop.eup %4769 }
 0x73d   :  { %4773 = vpow2.f32 %v4581_v39 }
 0x73e   :  { %4775 = vrcp.f32 %v3041_v45 }
 0x749   :  { %v4772_v48 = vpop.eup %4771  ;;  %v3132_v29 = vpop.f32.mrf.mxu0 }
 0x74a   :  { %v4774_v24 = vpop.eup %4773  ;;  %v3208_v17 = vadd.f32 %v3132_v29, %v12829_v38  ;;  %v3051_v54 = vmul.f32 %v4772_v48, %v4770_v46  ;;  %v3203_v62 = vpop.f32.mrf.mxu1 }
 0x74b   :  { %v4776_v60 = vpop.eup %4775  ;;  %v3134_v53 = vpop.f32.mrf.mxu0  ;;  %v3042_v57 = vadd.f32 1.0, %v4774_v24  ;;  %v3210_v8 = vadd.f32 %v3203_v62, %v12832_v7  ;;  %v12855_v62 = vld [vmem:[#allocation110_spill] sm:$0xff]  ;;  %v12860_v7 = vld [vmem:[#allocation115_spill] sm:$0xff] }
 0x74c   :  { %v3050_v3 = vmul.f32 %v4776_v60, %v9419_v52  ;;  %v4583_v16 = vmul.f32 -1.442695, %v3208_v17  ;;  %v3209_v55 = vadd.f32 %v3134_v53, %v12830_v47  ;;  %v3205_v2 = vpop.f32.mrf.mxu1  ;;  %v12848_v53 = vld [vmem:[#allocation103_spill] sm:$0xff] }
 0x74d   :  { %v3211_v6 = vadd.f32 %v3205_v2, %v12831_v5  ;;  %v12852_v47 = vld [vmem:[#allocation107_spill] sm:$0xff]  ;;  %v12857_v2 = vld [vmem:[#allocation112_spill] sm:$0xff]  ;;  %v12858_v5 = vld [vmem:[#allocation113_spill] sm:$0xff] }
 0x74e   :  { %v10076_v58 = vadd.f32 %v3051_v54, %v3050_v3  ;;  %4777 = vpow2.f32 %v4583_v16  ;;  %v4584_v63 = vmul.f32 -1.442695, %v3209_v55  ;;  %v12849_v54 = vld [vmem:[#allocation104_spill] sm:$0xff]  ;;  %v12850_v3 = vld [vmem:[#allocation105_spill] sm:$0xff]  ;;  %v12851_v16 = vld [vmem:[#allocation106_spill] sm:$0xff] }
 0x74f   :  { %v4585_v10 = vmul.f32 -1.442695, %v3211_v6  ;;  %v12853_v55 = vld [vmem:[#allocation108_spill] sm:$0xff]  ;;  %v12859_v6 = vld [vmem:[#allocation114_spill] sm:$0xff] }
 0x750   :  { %4779 = vpow2.f32 %v4584_v63  ;;  %v12856_v63 = vld [vmem:[#allocation111_spill] sm:$0xff] }
 0x751   :  { %4781 = vrcp.f32 %v3042_v57  ;;  %v12854_v57 = vld [vmem:[#allocation109_spill] sm:$0xff] }
 0x752   :  { %4783 = vtanh.f32 %v10076_v58 }
 0x753   :  { %4785 = vtanh.f32 %v3210_v8  ;;  %v12861_v8 = vld [vmem:[#allocation116_spill] sm:$0xff] }
 0x754   :  { %4787 = vpow2.f32 %v4585_v10  ;;  %v12862_v10 = vld [vmem:[#allocation117_spill] sm:$0xff] }
 0x75b   :  { %v4778_v52 = vpop.eup %4777 }
 0x75c   :  { %v3221_v40 = vadd.f32 1.0, %v4778_v52  ;;  %v12863_v52 = vld [vmem:[#allocation118_spill] sm:$0xff] }
 0x75d   :  { %v4780_v25 = vpop.eup %4779 }
 0x75e   :  { %v4782_v32 = vpop.eup %4781  ;;  %4789 = vrcp.f32 %v3221_v40  ;;  %v3222_v22 = vadd.f32 1.0, %v4780_v25  ;;  %v12864_v40 = vld [vmem:[#allocation119_spill] sm:$0xff]  ;;  %v12865_v25 = vld [vmem:[#allocation120_spill] sm:$0xff] }
 0x75f   :  { %v4784_v28 = vpop.eup %4783 }
 0x760   :  { %4791 = vrcp.f32 %v3222_v22  ;;  %v10081_v1 = vmul.f32 %v4784_v28, %v4782_v32  ;;  %v4786_v33 = vpop.eup %4785  ;;  %v12866_v32 = vld [vmem:[#allocation121_spill] sm:$0xff]  ;;  %v12867_v22 = vld [vmem:[#allocation122_spill] sm:$0xff]  ;;  %v12868_v28 = vld [vmem:[#allocation123_spill] sm:$0xff] }
 0x761   :  { %v4788_v35 = vpop.eup %4787 }
 0x762   :  { %v4582_v20 = vmul.f32 -1.442695, %v10081_v1  ;;  %v3223_v41 = vadd.f32 1.0, %v4788_v35  ;;  %v12871_v35 = vld [vmem:[#allocation126_spill] sm:$0xff] }
 0x764   :  { %4793 = vpow2.f32 %v4582_v20  ;;  %v12869_v20 = vld [vmem:[#allocation124_spill] sm:$0xff] }
 0x765   :  { %4795 = vrcp.f32 %v3223_v41  ;;  %v12875_v41 = vld [vmem:[#allocation130_spill] sm:$0xff] }
 0x76b   :  { %v4790_v36 = vpop.eup %4789 }
 0x76c   :  { %v3232_v37 = vmul.f32 %v4790_v36, %v4786_v33  ;;  %v12870_v33 = vld [vmem:[#allocation125_spill] sm:$0xff]  ;;  %v12872_v36 = vld [vmem:[#allocation127_spill] sm:$0xff] }
 0x76d   :  { %v4792_v39 = vpop.eup %4791 }
 0x76e   :  { %v3231_v42 = vmul.f32 %v4792_v39, %v9428_v26  ;;  %v12833_v26 = vld [vmem:[#allocation68_spill] sm:$0xff]  ;;  %v12874_v39 = vld [vmem:[#allocation129_spill] sm:$0xff] }
 0x770   :  { %v10085_v45 = vadd.f32 %v3232_v37, %v3231_v42  ;;  %v12873_v37 = vld [vmem:[#allocation128_spill] sm:$0xff]  ;;  %v12876_v42 = vld [vmem:[#allocation131_spill] sm:$0xff] }
 0x771   :  { %v4794_v46 = vpop.eup %4793 }
 0x772   :  { %4797 = vtanh.f32 %v10085_v45  ;;  %v3058_v48 = vadd.f32 1.0, %v4794_v46  ;;  %v4796_v29 = vpop.eup %4795  ;;  %v12877_v46 = vld [vmem:[#allocation132_spill] sm:$0xff] }
 0x774   :  { %4799 = vrcp.f32 %v3058_v48  ;;  %v12878_v48 = vld [vmem:[#allocation133_spill] sm:$0xff] }
 0x77f   :  { %v4798_v24 = vpop.eup %4797 }
 0x780   :  { %v10088_v38 = vmul.f32 %v4798_v24, %v4796_v29  ;;  %v12879_v29 = vld [vmem:[#allocation134_spill] sm:$0xff]  ;;  %v12880_v24 = vld [vmem:[#allocation135_spill] sm:$0xff] }
 0x781   :  { %v4800_v17 = vpop.eup %4799 }
 0x782   :  { %v3236_v60 = vmax.f32 %v10088_v38, 0.0  ;;  %3061 = vst [vmem:[%s11511_s7 + $0x20] sm:$0xff] %v4800_v17  ;;  %v12881_v17 = vld [vmem:[#allocation136_spill] sm:$0xff] }
 0x784   :  { %3302 = vmatmul.mubr.f32.vlgmr.msra.gmra.mxu0 %v3236_v60  ;;  %3373 = vmatmul.mubr.f32.vlgmr.msra.gmra.mxu1 %v3236_v60  ;;  %v12883_v60 = vld [vmem:[#allocation138_spill] sm:$0xff] }
 0x785   :  { %3380 = vmatpush1.msra.mxu0 %v9440_v4  ;;  %3451 = vmatpush1.msra.mxu1 %v9446_v12  ;;  %v12834_v4 = vld [vmem:[#allocation70_spill] sm:$0xff]  ;;  %v12835_v12 = vld [vmem:[#allocation71_spill] sm:$0xff] }
 0x786   :  { %3381 = vmatprep.subr.mxu0 %v9452_v50  ;;  %3452 = vmatprep.subr.mxu1 %v9458_v23  ;;  %v12836_v50 = vld [vmem:[#allocation69_spill] sm:$0xff]  ;;  %v12837_v23 = vld [vmem:[#allocation76_spill] sm:$0xff] }
 0x787   :  { %3382 = vmatpush1.msra.mxu0 %v9464_v44  ;;  %3453 = vmatpush1.msra.mxu1 %v9470_v13  ;;  %v12838_v44 = vld [vmem:[#allocation78_spill] sm:$0xff]  ;;  %v12839_v13 = vld [vmem:[#allocation79_spill] sm:$0xff] }
 0x788   :  { %3383 = vmatprep.subr.mxu0 %v9476_v51  ;;  %3454 = vmatprep.subr.mxu1 %v9482_v43  ;;  %v12840_v51 = vld [vmem:[#allocation77_spill] sm:$0xff]  ;;  %v12841_v43 = vld [vmem:[#allocation96_spill] sm:$0xff] }
 0x789   :  { %3384 = vmatpush1.msra.mxu0 %v9488_v9  ;;  %3455 = vmatpush1.msra.mxu1 %v9494_v56  ;;  %v12842_v9 = vld [vmem:[#allocation97_spill] sm:$0xff]  ;;  %v12843_v56 = vld [vmem:[#allocation98_spill] sm:$0xff] }
 0x78a   :  { %3385 = vmatprep.subr.mxu0 %v9500_v11  ;;  %3456 = vmatprep.subr.mxu1 %v9506_v31  ;;  %v12844_v11 = vld [vmem:[#allocation99_spill] sm:$0xff]  ;;  %v12845_v31 = vld [vmem:[#allocation100_spill] sm:$0xff] }
 0x78b   :  { %3386 = vmatpush1.msra.mxu0 %v9512_v14  ;;  %3457 = vmatpush1.msra.mxu1 %v9518_v15  ;;  %v12846_v14 = vld [vmem:[#allocation101_spill] sm:$0xff]  ;;  %v12847_v15 = vld [vmem:[#allocation102_spill] sm:$0xff] }
 0x78c   :  { %3387 = vmatprep.subr.mxu0 %v12833_v26  ;;  %3458 = vmatprep.subr.mxu1 %v12834_v4  ;;  %v12884_v26 = vld [vmem:[#allocation139_spill] sm:$0xff]  ;;  %v12885_v4 = vld [vmem:[#allocation140_spill] sm:$0xff] }
 0x78d   :  { %3388 = vmatpush1.msra.mxu0 %v12835_v12  ;;  %3459 = vmatpush1.msra.mxu1 %v12836_v50  ;;  %v12886_v12 = vld [vmem:[#allocation141_spill] sm:$0xff]  ;;  %v12887_v50 = vld [vmem:[#allocation142_spill] sm:$0xff] }
 0x78e   :  { %3389 = vmatprep.subr.mxu0 %v12837_v23  ;;  %3460 = vmatprep.subr.mxu1 %v12838_v44  ;;  %v12888_v23 = vld [vmem:[#allocation143_spill] sm:$0xff]  ;;  %v12889_v44 = vld [vmem:[#allocation144_spill] sm:$0xff] }
 0x78f   :  { %3390 = vmatpush1.msra.mxu0 %v12839_v13  ;;  %3461 = vmatpush1.msra.mxu1 %v12840_v51  ;;  %v12891_v13 = vld [vmem:[#allocation146_spill] sm:$0xff]  ;;  %v12892_v51 = vld [vmem:[#allocation147_spill] sm:$0xff] }
 0x790   :  { %3391 = vmatprep.subr.mxu0 %v12841_v43  ;;  %3462 = vmatprep.subr.mxu1 %v12842_v9  ;;  %v12893_v43 = vld [vmem:[#allocation148_spill] sm:$0xff]  ;;  %v12894_v9 = vld [vmem:[#allocation149_spill] sm:$0xff] }
 0x791   :  { %3392 = vmatpush1.msra.mxu0 %v12843_v56  ;;  %3463 = vmatpush1.msra.mxu1 %v12844_v11  ;;  %v12895_v56 = vld [vmem:[#allocation150_spill] sm:$0xff]  ;;  %v12896_v11 = vld [vmem:[#allocation151_spill] sm:$0xff] }
 0x792   :  { %3393 = vmatprep.subr.mxu0 %v12845_v31  ;;  %3464 = vmatprep.subr.mxu1 %v12846_v14  ;;  %v12897_v31 = vld [vmem:[#allocation152_spill] sm:$0xff]  ;;  %v12898_v14 = vld [vmem:[#allocation153_spill] sm:$0xff] }
 0x793   :  { %3394 = vmatpush1.msra.mxu0 %v12847_v15  ;;  %3465 = vmatpush1.msra.mxu1 %v12848_v53  ;;  %v12899_v15 = vld [vmem:[#allocation154_spill] sm:$0xff]  ;;  %v10187_v53 = vld [vmem:[%s11506_s2 + $0x128] sm:$0xff] }
 0x794   :  { %3395 = vmatprep.subr.mxu0 %v12849_v54  ;;  %3466 = vmatprep.subr.mxu1 %v12850_v3  ;;  %v10193_v54 = vld [vmem:[%s11506_s2 + $0x138] sm:$0xff]  ;;  %v10223_v3 = vld [vmem:[%s11506_s2 + $0x100] sm:$0xff] }
 0x795   :  { %3396 = vmatpush1.msra.mxu0 %v12851_v16  ;;  %3467 = vmatpush1.msra.mxu1 %v12852_v47  ;;  %v10229_v16 = vld [vmem:[%s11506_s2 + $0x110] sm:$0xff]  ;;  %v10235_v47 = vld [vmem:[%s11506_s2 + $0xe8] sm:$0xff] }
 0x796   :  { %3397 = vmatprep.subr.mxu0 %v12853_v55  ;;  %3468 = vmatprep.subr.mxu1 %v12854_v57  ;;  %v10241_v55 = vld [vmem:[%s11506_s2 + $0xf8] sm:$0xff]  ;;  %v10247_v57 = vld [vmem:[%s11506_s2 + $0xe0] sm:$0xff] }
 0x797   :  { %3398 = vmatpush1.msra.mxu0 %v12855_v62  ;;  %3469 = vmatpush1.msra.mxu1 %v12856_v63  ;;  %v10253_v62 = vld [vmem:[%s11506_s2 + $0xf0] sm:$0xff]  ;;  %v10259_v63 = vld [vmem:[%s11506_s2 + $0xc8] sm:$0xff] }
 0x798   :  { %3399 = vmatprep.subr.mxu0 %v12857_v2  ;;  %3470 = vmatprep.subr.mxu1 %v12858_v5  ;;  %v10265_v2 = vld [vmem:[%s11506_s2 + $0xd8] sm:$0xff]  ;;  %v10271_v5 = vld [vmem:[%s11506_s2 + $0xc0] sm:$0xff] }
 0x799   :  { %3400 = vmatpush1.msra.mxu0 %v12859_v6  ;;  %3471 = vmatpush1.msra.mxu1 %v12860_v7  ;;  %v10277_v6 = vld [vmem:[%s11506_s2 + $0xd0] sm:$0xff]  ;;  %v10283_v7 = vld [vmem:[%s11506_s2 + $0xa8] sm:$0xff] }
 0x79a   :  { %3401 = vmatprep.subr.mxu0 %v12861_v8  ;;  %3472 = vmatprep.subr.mxu1 %v12862_v10  ;;  %v10289_v8 = vld [vmem:[%s11506_s2 + $0xb8] sm:$0xff]  ;;  %v10295_v10 = vld [vmem:[%s11506_s2 + $0xa0] sm:$0xff] }
 0x79b   :  { %3402 = vmatpush1.msra.mxu0 %v12863_v52  ;;  %3473 = vmatpush1.msra.mxu1 %v12864_v40  ;;  %v10301_v52 = vld [vmem:[%s11506_s2 + $0xb0] sm:$0xff]  ;;  %v10307_v40 = vld [vmem:[%s11506_s2 + $0x88] sm:$0xff] }
 0x79c   :  { %3403 = vmatprep.subr.mxu0 %v12865_v25  ;;  %3474 = vmatprep.subr.mxu1 %v12866_v32  ;;  %v10313_v25 = vld [vmem:[%s11506_s2 + $0x98] sm:$0xff]  ;;  %v10319_v32 = vld [vmem:[%s11506_s2 + $0x80] sm:$0xff] }
 0x79d   :  { %3404 = vmatpush1.msra.mxu0 %v12867_v22  ;;  %3475 = vmatpush1.msra.mxu1 %v12868_v28  ;;  %v10325_v22 = vld [vmem:[%s11506_s2 + $0x90] sm:$0xff]  ;;  %v10331_v28 = vld [vmem:[%s11506_s2 + $0x68] sm:$0xff] }
 0x79e   :  { %3405 = vmatprep.subr.mxu0 %v12869_v20  ;;  %3476 = vmatprep.subr.mxu1 %v12870_v33  ;;  %v10337_v20 = vld [vmem:[%s11506_s2 + $0x78] sm:$0xff]  ;;  %v10343_v33 = vld [vmem:[%s11506_s2 + $0x60] sm:$0xff] }
 0x79f   :  { %3406 = vmatpush1.msra.mxu0 %v12871_v35  ;;  %3477 = vmatpush1.msra.mxu1 %v12872_v36  ;;  %v10349_v35 = vld [vmem:[%s11506_s2 + $0x70] sm:$0xff]  ;;  %v10355_v36 = vld [vmem:[%s11506_s2 + $0x48] sm:$0xff] }
 0x7a0   :  { %3407 = vmatprep.subr.mxu0 %v12873_v37  ;;  %3478 = vmatprep.subr.mxu1 %v12874_v39  ;;  %v10361_v37 = vld [vmem:[%s11506_s2 + $0x58] sm:$0xff]  ;;  %v10367_v39 = vld [vmem:[%s11506_s2 + $0x40] sm:$0xff] }
 0x7a1   :  { %3408 = vmatpush1.msra.mxu0 %v12875_v41  ;;  %3479 = vmatpush1.msra.mxu1 %v9782_v49  ;;  %v12882_v49 = vld [vmem:[#allocation137_spill] sm:$0xff] }
 0x7a2   :  { %3409 = vmatprep.subr.mxu0 %v12876_v42  ;;  %3480 = vmatprep.subr.mxu1 %v12877_v46  ;;  %v10373_v41 = vld [vmem:[%s11506_s2 + $0x50] sm:$0xff]  ;;  %v10379_v42 = vld [vmem:[%s11506_s2 + $0x28] sm:$0xff]  ;;  %v10385_v46 = vld [vmem:[%s11506_s2 + $0x38] sm:$0xff] }
 0x7a3   :  { %3410 = vmatpush1.msra.mxu0 %v12878_v48  ;;  %3443 = vmatprep.mubr.f32.mxu0 %v12180_v19  ;;  %v10391_v48 = vld [vmem:[%s11506_s2 + $0x20] sm:$0xff] }
 0x7a4   :  { %3481 = vmatpush1.msra.mxu1 %v12879_v29  ;;  %3514 = vmatprep.mubr.f32.mxu1 %v12180_v19  ;;  %v10397_v29 = vld [vmem:[%s11506_s2 + $0x30] sm:$0xff] }
 0x7a5   :  { %3444 = vmatmul.mubr.f32.vlgmr.msra.gmra.mxu0 %v10081_v1  ;;  %3515 = vmatmul.mubr.f32.vlgmr.msra.gmra.mxu1 %v10081_v1  ;;  %v12890_v1 = vld [vmem:[#allocation145_spill] sm:$0xff] }
 0x7a6   :  { %3560 = vmatprep.subr.mxu0 %v12880_v24  ;;  %3631 = vmatprep.subr.mxu1 %v12881_v17  ;;  %v10403_v24 = vld [vmem:[%s11506_s2 + $0x8] sm:$0xff]  ;;  %v10409_v17 = vld [vmem:[%s11506_s2 + $0x18] sm:$0xff] }
 0x7a7   :  { %3561 = vmatpush1.msra.mxu0 %v12882_v49  ;;  %3632 = vmatpush1.msra.mxu1 %v12883_v60  ;;  %v10415_v49 = vld [vmem:[%s11506_s2] sm:$0xff]  ;;  %v10422_v60 = vld [vmem:[%s11506_s2 + $0x10] sm:$0xff] }
 0x7a8   :  { %3562 = vmatprep.subr.mxu0 %v12884_v26  ;;  %3633 = vmatprep.subr.mxu1 %v12885_v4  ;;  %12900 = vst [vmem:[#allocation155_spill] sm:$0xff] %v10415_v49  ;;  %12901 = vst [vmem:[#allocation156_spill] sm:$0xff] %v10422_v60  ;;  %v10431_v26 = vld [vmem:[%s11507_s4 + $0x1e8] sm:$0xff]  ;;  %v10437_v4 = vld [vmem:[%s11507_s4 + $0x1f8] sm:$0xff] }
 0x7a9   :  { %3563 = vmatpush1.msra.mxu0 %v12886_v12  ;;  %3634 = vmatpush1.msra.mxu1 %v12887_v50  ;;  %12902 = vst [vmem:[#allocation157_spill] sm:$0xff] %v10431_v26  ;;  %12903 = vst [vmem:[#allocation158_spill] sm:$0xff] %v10437_v4  ;;  %v10443_v12 = vld [vmem:[%s11507_s4 + $0x1e0] sm:$0xff]  ;;  %v10455_v50 = vld [vmem:[%s11507_s4 + $0x1c8] sm:$0xff] }
 0x7aa   :  { %3564 = vmatprep.subr.mxu0 %v12888_v23  ;;  %3635 = vmatprep.subr.mxu1 %v12889_v44  ;;  %12904 = vst [vmem:[#allocation159_spill] sm:$0xff] %v10443_v12  ;;  %12906 = vst [vmem:[#allocation161_spill] sm:$0xff] %v10455_v50  ;;  %v10461_v23 = vld [vmem:[%s11507_s4 + $0x1d8] sm:$0xff]  ;;  %v10467_v44 = vld [vmem:[%s11507_s4 + $0x1c0] sm:$0xff] }
 0x7ab   :  { %3565 = vmatpush1.msra.mxu0 %v12890_v1  ;;  %3636 = vmatpush1.msra.mxu1 %v12891_v13  ;;  %12907 = vst [vmem:[#allocation162_spill] sm:$0xff] %v10461_v23  ;;  %12908 = vst [vmem:[#allocation80_spill] sm:$0xff] %v10467_v44  ;;  %v10473_v1 = vld [vmem:[%s11507_s4 + $0x1d0] sm:$0xff]  ;;  %v10479_v13 = vld [vmem:[%s11507_s4 + $0x1a8] sm:$0xff] }
 0x7ac   :  { %3566 = vmatprep.subr.mxu0 %v12892_v51  ;;  %3637 = vmatprep.subr.mxu1 %v12893_v43  ;;  %12909 = vst [vmem:[#allocation82_spill] sm:$0xff] %v10473_v1  ;;  %12910 = vst [vmem:[#allocation83_spill] sm:$0xff] %v10479_v13  ;;  %v10485_v51 = vld [vmem:[%s11507_s4 + $0x1b8] sm:$0xff]  ;;  %v10491_v43 = vld [vmem:[%s11507_s4 + $0x1a0] sm:$0xff] }
 0x7ad   :  { %3567 = vmatpush1.msra.mxu0 %v12894_v9  ;;  %3638 = vmatpush1.msra.mxu1 %v12895_v56  ;;  %12911 = vst [vmem:[#allocation81_spill] sm:$0xff] %v10485_v51  ;;  %12912 = vst [vmem:[#allocation72_spill] sm:$0xff] %v10491_v43  ;;  %v10497_v9 = vld [vmem:[%s11507_s4 + $0x1b0] sm:$0xff]  ;;  %v10503_v56 = vld [vmem:[%s11507_s4 + $0x188] sm:$0xff] }
 0x7ae   :  { %3568 = vmatprep.subr.mxu0 %v12896_v11  ;;  %3639 = vmatprep.subr.mxu1 %v12897_v31  ;;  %12913 = vst [vmem:[#allocation74_spill] sm:$0xff] %v10497_v9  ;;  %12914 = vst [vmem:[#allocation75_spill] sm:$0xff] %v10503_v56  ;;  %v10509_v11 = vld [vmem:[%s11507_s4 + $0x198] sm:$0xff]  ;;  %v10515_v31 = vld [vmem:[%s11507_s4 + $0x180] sm:$0xff] }
 0x7af   :  { %3569 = vmatpush1.msra.mxu0 %v12898_v14  ;;  %3640 = vmatpush1.msra.mxu1 %v12899_v15  ;;  %12915 = vst [vmem:[#allocation73_spill] sm:$0xff] %v10509_v11  ;;  %12916 = vst [vmem:[#allocation4_spill] sm:$0xff] %v10515_v31  ;;  %v10521_v14 = vld [vmem:[%s11507_s4 + $0x190] sm:$0xff]  ;;  %v10527_v15 = vld [vmem:[%s11507_s4 + $0x168] sm:$0xff] }
 0x7b0   :  { %3570 = vmatprep.subr.mxu0 %v9936_v18  ;;  %3641 = vmatprep.subr.mxu1 %v9942_v27  ;;  %v10205_v18 = vld [vmem:[%s11506_s2 + $0x130] sm:$0xff]  ;;  %v10211_v27 = vld [vmem:[%s11506_s2 + $0x108] sm:$0xff]  ;;  %12917 = vst [vmem:[#allocation5_spill] sm:$0xff] %v10521_v14  ;;  %12918 = vst [vmem:[#allocation6_spill] sm:$0xff] %v10527_v15 }
 0x7b1   :  { %3571 = vmatpush1.msra.mxu0 %v9948_v21  ;;  %3642 = vmatpush1.msra.mxu1 %v9954_v59  ;;  %v10199_v21 = vld [vmem:[%s11506_s2 + $0x120] sm:$0xff]  ;;  %v10217_v59 = vld [vmem:[%s11506_s2 + $0x118] sm:$0xff] }
 0x7b2   :  { %3572 = vmatprep.subr.mxu0 %v10187_v53  ;;  %3643 = vmatprep.subr.mxu1 %v10193_v54 }
 0x7b3   :  { %3573 = vmatpush1.msra.mxu0 %v10199_v21  ;;  %3644 = vmatpush1.msra.mxu1 %v10205_v18 }
 0x7b4   :  { %3574 = vmatprep.subr.mxu0 %v10211_v27  ;;  %3645 = vmatprep.subr.mxu1 %v10217_v59 }
 0x7b5   :  { %3575 = vmatpush1.msra.mxu0 %v10223_v3  ;;  %3646 = vmatpush1.msra.mxu1 %v10229_v16 }
 0x7b6   :  { %3576 = vmatprep.subr.mxu0 %v10235_v47  ;;  %3647 = vmatprep.subr.mxu1 %v10241_v55 }
 0x7b7   :  { %3577 = vmatpush1.msra.mxu0 %v10247_v57  ;;  %3648 = vmatpush1.msra.mxu1 %v10253_v62 }
 0x7b8   :  { %3578 = vmatprep.subr.mxu0 %v10259_v63  ;;  %3649 = vmatprep.subr.mxu1 %v10265_v2 }
 0x7b9   :  { %3579 = vmatpush1.msra.mxu0 %v10271_v5  ;;  %3650 = vmatpush1.msra.mxu1 %v10277_v6 }
 0x7ba   :  { %3580 = vmatprep.subr.mxu0 %v10283_v7  ;;  %3651 = vmatprep.subr.mxu1 %v10289_v8 }
 0x7bb   :  { %3581 = vmatpush1.msra.mxu0 %v10295_v10  ;;  %3652 = vmatpush1.msra.mxu1 %v10301_v52 }
 0x7bc   :  { %3582 = vmatprep.subr.mxu0 %v10307_v40  ;;  %3653 = vmatprep.subr.mxu1 %v10313_v25 }
 0x7bd   :  { %3583 = vmatpush1.msra.mxu0 %v10319_v32  ;;  %3654 = vmatpush1.msra.mxu1 %v10325_v22 }
 0x7be   :  { %3584 = vmatprep.subr.mxu0 %v10331_v28  ;;  %3655 = vmatprep.subr.mxu1 %v10337_v20 }
 0x7bf   :  { %3585 = vmatpush1.msra.mxu0 %v10343_v33  ;;  %3656 = vmatpush1.msra.mxu1 %v10349_v35 }
 0x7c0   :  { %3586 = vmatprep.subr.mxu0 %v10355_v36  ;;  %3657 = vmatprep.subr.mxu1 %v10361_v37 }
 0x7c1   :  { %3587 = vmatpush1.msra.mxu0 %v10367_v39  ;;  %3658 = vmatpush1.msra.mxu1 %v10373_v41 }
 0x7c2   :  { %3588 = vmatprep.subr.mxu0 %v10379_v42  ;;  %3659 = vmatprep.subr.mxu1 %v10385_v46 }
 0x7c3   :  { %3589 = vmatpush1.msra.mxu0 %v10391_v48  ;;  %3660 = vmatpush1.msra.mxu1 %v10397_v29 }
 0x7c4   :  { %3590 = vmatprep.subr.mxu0 %v10403_v24  ;;  %3661 = vmatprep.subr.mxu1 %v10409_v17 }
 0x7c5   :  { %3591 = vmatpush1.msra.mxu0 %v10415_v49  ;;  %3624 = vmatprep.mubr.f32.mxu0 %v12180_v19 }
 0x7c6   :  { %3662 = vmatpush1.msra.mxu1 %v10422_v60  ;;  %3695 = vmatprep.mubr.f32.mxu1 %v12180_v19 }
 0x7c7   :  { %3625 = vmatmul.mubr.f32.vlgmr.msra.gmra.mxu0 %v10088_v38  ;;  %3696 = vmatmul.mubr.f32.vlgmr.msra.gmra.mxu1 %v10088_v38  ;;  %v10449_v38 = vld [vmem:[%s11507_s4 + $0x1f0] sm:$0xff] }
 0x7c8   :  { %3731 = vmatprep.subr.mxu0 %v10431_v26  ;;  %3802 = vmatprep.subr.mxu1 %v10437_v4  ;;  %12905 = vst [vmem:[#allocation160_spill] sm:$0xff] %v10449_v38 }
 0x7c9   :  { %3732 = vmatpush1.msra.mxu0 %v10443_v12  ;;  %3803 = vmatpush1.msra.mxu1 %v10449_v38 }
 0x7ca   :  { %3733 = vmatprep.subr.mxu0 %v10455_v50  ;;  %3804 = vmatprep.subr.mxu1 %v10461_v23 }
 0x7cb   :  { %3734 = vmatpush1.msra.mxu0 %v10467_v44  ;;  %3805 = vmatpush1.msra.mxu1 %v10473_v1 }
 0x7cc   :  { %3735 = vmatprep.subr.mxu0 %v10479_v13  ;;  %3806 = vmatprep.subr.mxu1 %v10485_v51 }
 0x7cd   :  { %3736 = vmatpush1.msra.mxu0 %v10491_v43  ;;  %3807 = vmatpush1.msra.mxu1 %v10497_v9 }
 0x7ce   :  { %3737 = vmatprep.subr.mxu0 %v10503_v56  ;;  %3808 = vmatprep.subr.mxu1 %v10509_v11  ;;  %v10533_v11 = vld [vmem:[%s11507_s4 + $0x178] sm:$0xff] }
 0x7cf   :  { %3738 = vmatpush1.msra.mxu0 %v10515_v31  ;;  %3809 = vmatpush1.msra.mxu1 %v10521_v14  ;;  %12919 = vst [vmem:[#allocation7_spill] sm:$0xff] %v10533_v11  ;;  %v10539_v31 = vld [vmem:[%s11507_s4 + $0x160] sm:$0xff]  ;;  %v10545_v14 = vld [vmem:[%s11507_s4 + $0x170] sm:$0xff] }
 0x7d0   :  { %3739 = vmatprep.subr.mxu0 %v10527_v15  ;;  %3810 = vmatprep.subr.mxu1 %v10533_v11  ;;  %12920 = vst [vmem:[#allocation8_spill] sm:$0xff] %v10539_v31  ;;  %12921 = vst [vmem:[#allocation9_spill] sm:$0xff] %v10545_v14  ;;  %v10551_v15 = vld [vmem:[%s11507_s4 + $0x148] sm:$0xff]  ;;  %v10557_v11 = vld [vmem:[%s11507_s4 + $0x158] sm:$0xff] }
 0x7d1   :  { %3740 = vmatpush1.msra.mxu0 %v10539_v31  ;;  %3811 = vmatpush1.msra.mxu1 %v10545_v14  ;;  %12922 = vst [vmem:[#allocation10_spill] sm:$0xff] %v10551_v15  ;;  %12923 = vst [vmem:[#allocation11_spill] sm:$0xff] %v10557_v11  ;;  %v10563_v31 = vld [vmem:[%s11507_s4 + $0x140] sm:$0xff]  ;;  %v10569_v14 = vld [vmem:[%s11507_s4 + $0x150] sm:$0xff] }
 0x7d2   :  { %3741 = vmatprep.subr.mxu0 %v10551_v15  ;;  %3812 = vmatprep.subr.mxu1 %v10557_v11  ;;  %12924 = vst [vmem:[#allocation12_spill] sm:$0xff] %v10563_v31  ;;  %12925 = vst [vmem:[#allocation13_spill] sm:$0xff] %v10569_v14  ;;  %v10575_v15 = vld [vmem:[%s11507_s4 + $0x128] sm:$0xff]  ;;  %v10581_v11 = vld [vmem:[%s11507_s4 + $0x138] sm:$0xff] }
 0x7d3   :  { %3742 = vmatpush1.msra.mxu0 %v10563_v31  ;;  %3813 = vmatpush1.msra.mxu1 %v10569_v14  ;;  %12926 = vst [vmem:[#allocation14_spill] sm:$0xff] %v10575_v15  ;;  %12927 = vst [vmem:[#allocation15_spill] sm:$0xff] %v10581_v11  ;;  %v10587_v31 = vld [vmem:[%s11507_s4 + $0x120] sm:$0xff]  ;;  %v10593_v14 = vld [vmem:[%s11507_s4 + $0x130] sm:$0xff] }
 0x7d4   :  { %3743 = vmatprep.subr.mxu0 %v10575_v15  ;;  %3814 = vmatprep.subr.mxu1 %v10581_v11  ;;  %12928 = vst [vmem:[#allocation16_spill] sm:$0xff] %v10587_v31  ;;  %12929 = vst [vmem:[#allocation17_spill] sm:$0xff] %v10593_v14  ;;  %v10599_v15 = vld [vmem:[%s11507_s4 + $0x108] sm:$0xff]  ;;  %v10605_v11 = vld [vmem:[%s11507_s4 + $0x118] sm:$0xff] }
 0x7d5   :  { %3744 = vmatpush1.msra.mxu0 %v10587_v31  ;;  %3815 = vmatpush1.msra.mxu1 %v10593_v14  ;;  %12930 = vst [vmem:[#allocation18_spill] sm:$0xff] %v10599_v15  ;;  %12931 = vst [vmem:[#allocation19_spill] sm:$0xff] %v10605_v11  ;;  %v10611_v31 = vld [vmem:[%s11507_s4 + $0x100] sm:$0xff]  ;;  %v10617_v14 = vld [vmem:[%s11507_s4 + $0x110] sm:$0xff] }
 0x7d6   :  { %3745 = vmatprep.subr.mxu0 %v10599_v15  ;;  %3816 = vmatprep.subr.mxu1 %v10605_v11  ;;  %12932 = vst [vmem:[#allocation20_spill] sm:$0xff] %v10611_v31  ;;  %12933 = vst [vmem:[#allocation21_spill] sm:$0xff] %v10617_v14  ;;  %v10623_v15 = vld [vmem:[%s11507_s4 + $0xe8] sm:$0xff]  ;;  %v10629_v11 = vld [vmem:[%s11507_s4 + $0xf8] sm:$0xff] }
 0x7d7   :  { %3746 = vmatpush1.msra.mxu0 %v10611_v31  ;;  %3817 = vmatpush1.msra.mxu1 %v10617_v14  ;;  %12934 = vst [vmem:[#allocation22_spill] sm:$0xff] %v10623_v15  ;;  %12935 = vst [vmem:[#allocation23_spill] sm:$0xff] %v10629_v11  ;;  %v10635_v31 = vld [vmem:[%s11507_s4 + $0xe0] sm:$0xff]  ;;  %v10641_v14 = vld [vmem:[%s11507_s4 + $0xf0] sm:$0xff] }
 0x7d8   :  { %3747 = vmatprep.subr.mxu0 %v10623_v15  ;;  %3818 = vmatprep.subr.mxu1 %v10629_v11  ;;  %12936 = vst [vmem:[#allocation24_spill] sm:$0xff] %v10635_v31  ;;  %12937 = vst [vmem:[#allocation25_spill] sm:$0xff] %v10641_v14  ;;  %v10647_v15 = vld [vmem:[%s11507_s4 + $0xc8] sm:$0xff]  ;;  %v10653_v11 = vld [vmem:[%s11507_s4 + $0xd8] sm:$0xff] }
 0x7d9   :  { %3748 = vmatpush1.msra.mxu0 %v10635_v31  ;;  %3819 = vmatpush1.msra.mxu1 %v10641_v14  ;;  %12938 = vst [vmem:[#allocation26_spill] sm:$0xff] %v10647_v15  ;;  %12939 = vst [vmem:[#allocation27_spill] sm:$0xff] %v10653_v11  ;;  %v10659_v31 = vld [vmem:[%s11507_s4 + $0xc0] sm:$0xff]  ;;  %v10665_v14 = vld [vmem:[%s11507_s4 + $0xd0] sm:$0xff] }
 0x7da   :  { %3749 = vmatprep.subr.mxu0 %v10647_v15  ;;  %3820 = vmatprep.subr.mxu1 %v10653_v11  ;;  %12940 = vst [vmem:[#allocation28_spill] sm:$0xff] %v10659_v31  ;;  %12941 = vst [vmem:[#allocation29_spill] sm:$0xff] %v10665_v14  ;;  %v10671_v15 = vld [vmem:[%s11507_s4 + $0xa8] sm:$0xff]  ;;  %v10677_v11 = vld [vmem:[%s11507_s4 + $0xb8] sm:$0xff] }
 0x7db   :  { %3750 = vmatpush1.msra.mxu0 %v10659_v31  ;;  %3821 = vmatpush1.msra.mxu1 %v10665_v14  ;;  %12942 = vst [vmem:[#allocation30_spill] sm:$0xff] %v10671_v15  ;;  %12943 = vst [vmem:[#allocation31_spill] sm:$0xff] %v10677_v11  ;;  %v10683_v31 = vld [vmem:[%s11507_s4 + $0xa0] sm:$0xff]  ;;  %v10689_v14 = vld [vmem:[%s11507_s4 + $0xb0] sm:$0xff] }
 0x7dc   :  { %3751 = vmatprep.subr.mxu0 %v10671_v15  ;;  %3822 = vmatprep.subr.mxu1 %v10677_v11  ;;  %12944 = vst [vmem:[#allocation32_spill] sm:$0xff] %v10683_v31  ;;  %12945 = vst [vmem:[#allocation33_spill] sm:$0xff] %v10689_v14  ;;  %v10695_v15 = vld [vmem:[%s11507_s4 + $0x88] sm:$0xff]  ;;  %v10701_v11 = vld [vmem:[%s11507_s4 + $0x98] sm:$0xff] }
 0x7dd   :  { %3752 = vmatpush1.msra.mxu0 %v10683_v31  ;;  %3823 = vmatpush1.msra.mxu1 %v10689_v14  ;;  %12946 = vst [vmem:[#allocation34_spill] sm:$0xff] %v10695_v15  ;;  %12947 = vst [vmem:[#allocation35_spill] sm:$0xff] %v10701_v11  ;;  %v10707_v31 = vld [vmem:[%s11507_s4 + $0x80] sm:$0xff]  ;;  %v10713_v14 = vld [vmem:[%s11507_s4 + $0x90] sm:$0xff] }
 0x7de   :  { %3753 = vmatprep.subr.mxu0 %v10695_v15  ;;  %3824 = vmatprep.subr.mxu1 %v10701_v11  ;;  %12948 = vst [vmem:[#allocation36_spill] sm:$0xff] %v10707_v31  ;;  %12949 = vst [vmem:[#allocation37_spill] sm:$0xff] %v10713_v14  ;;  %v10719_v15 = vld [vmem:[%s11507_s4 + $0x68] sm:$0xff]  ;;  %v10725_v11 = vld [vmem:[%s11507_s4 + $0x78] sm:$0xff] }
 0x7df   :  { %3754 = vmatpush1.msra.mxu0 %v10707_v31  ;;  %3825 = vmatpush1.msra.mxu1 %v10713_v14  ;;  %12950 = vst [vmem:[#allocation38_spill] sm:$0xff] %v10719_v15  ;;  %12951 = vst [vmem:[#allocation39_spill] sm:$0xff] %v10725_v11  ;;  %v10731_v31 = vld [vmem:[%s11507_s4 + $0x60] sm:$0xff]  ;;  %v10737_v14 = vld [vmem:[%s11507_s4 + $0x70] sm:$0xff] }
 0x7e0   :  { %3755 = vmatprep.subr.mxu0 %v10719_v15  ;;  %3826 = vmatprep.subr.mxu1 %v10725_v11  ;;  %12952 = vst [vmem:[#allocation40_spill] sm:$0xff] %v10731_v31  ;;  %12953 = vst [vmem:[#allocation41_spill] sm:$0xff] %v10737_v14  ;;  %v10743_v15 = vld [vmem:[%s11507_s4 + $0x48] sm:$0xff]  ;;  %v10749_v11 = vld [vmem:[%s11507_s4 + $0x58] sm:$0xff] }
 0x7e1   :  { %3756 = vmatpush1.msra.mxu0 %v10731_v31  ;;  %3827 = vmatpush1.msra.mxu1 %v10737_v14  ;;  %12954 = vst [vmem:[#allocation42_spill] sm:$0xff] %v10743_v15  ;;  %12955 = vst [vmem:[#allocation43_spill] sm:$0xff] %v10749_v11  ;;  %v10755_v31 = vld [vmem:[%s11507_s4 + $0x40] sm:$0xff]  ;;  %v10761_v14 = vld [vmem:[%s11507_s4 + $0x50] sm:$0xff] }
 0x7e2   :  { %3757 = vmatprep.subr.mxu0 %v10743_v15  ;;  %3828 = vmatprep.subr.mxu1 %v10749_v11  ;;  %12956 = vst [vmem:[#allocation44_spill] sm:$0xff] %v10755_v31  ;;  %12957 = vst [vmem:[#allocation45_spill] sm:$0xff] %v10761_v14  ;;  %v10767_v15 = vld [vmem:[%s11507_s4 + $0x28] sm:$0xff]  ;;  %v10773_v11 = vld [vmem:[%s11507_s4 + $0x38] sm:$0xff] }
 0x7e3   :  { %3758 = vmatpush1.msra.mxu0 %v10755_v31  ;;  %3829 = vmatpush1.msra.mxu1 %v10761_v14  ;;  %12958 = vst [vmem:[#allocation46_spill] sm:$0xff] %v10767_v15  ;;  %12959 = vst [vmem:[#allocation47_spill] sm:$0xff] %v10773_v11  ;;  %v10779_v31 = vld [vmem:[%s11507_s4 + $0x20] sm:$0xff]  ;;  %v10785_v14 = vld [vmem:[%s11507_s4 + $0x30] sm:$0xff] }
 0x7e4   :  { %3759 = vmatprep.subr.mxu0 %v10767_v15  ;;  %3830 = vmatprep.subr.mxu1 %v10773_v11  ;;  %12960 = vst [vmem:[#allocation48_spill] sm:$0xff] %v10779_v31  ;;  %12961 = vst [vmem:[#allocation49_spill] sm:$0xff] %v10785_v14  ;;  %v10791_v15 = vld [vmem:[%s11507_s4 + $0x8] sm:$0xff]  ;;  %v10797_v11 = vld [vmem:[%s11507_s4 + $0x18] sm:$0xff] }
 0x7e5   :  { %3760 = vmatpush1.msra.mxu0 %v10779_v31  ;;  %3831 = vmatpush1.msra.mxu1 %v10785_v14  ;;  %12962 = vst [vmem:[#allocation50_spill] sm:$0xff] %v10791_v15  ;;  %12963 = vst [vmem:[#allocation51_spill] sm:$0xff] %v10797_v11  ;;  %v10803_v31 = vld [vmem:[%s11507_s4] sm:$0xff]  ;;  %v10809_v14 = vld [vmem:[%s11507_s4 + $0x10] sm:$0xff] }
 0x7e6   :  { %3761 = vmatprep.subr.mxu0 %v10791_v15  ;;  %3832 = vmatprep.subr.mxu1 %v10797_v11  ;;  %12964 = vst [vmem:[#allocation52_spill] sm:$0xff] %v10803_v31  ;;  %12965 = vst [vmem:[#allocation53_spill] sm:$0xff] %v10809_v14  ;;  %v10817_v11 = vld [vmem:[%s11508_s5 + $0x1e8] sm:$0xff] }
 0x7e7   :  { %3762 = vmatpush1.msra.mxu0 %v10803_v31  ;;  %3833 = vmatpush1.msra.mxu1 %v10809_v14  ;;  %12966 = vst [vmem:[#allocation54_spill] sm:$0xff] %v10817_v11  ;;  %v10823_v31 = vld [vmem:[%s11508_s5 + $0x1f8] sm:$0xff] }
 0x7e8   :  { %3795 = vmatprep.mubr.f32.mxu0 %v12180_v19  ;;  %3866 = vmatprep.mubr.f32.mxu1 %v12180_v19  ;;  %12967 = vst [vmem:[#allocation55_spill] sm:$0xff] %v10823_v31 }
 0x7e9   :  { %3873 = vmatprep.subr.mxu0 %v10817_v11  ;;  %3944 = vmatprep.subr.mxu1 %v10823_v31 }
 0x844   :  { %v3303_v15 = vpop.f32.mrf.mxu0  ;;  %v3374_v43 = vpop.f32.mrf.mxu1 }
 0x845   :  { %v3304_v56 = vadd.f32 %v3303_v15, %v12828_v0  ;;  %v3375_v4 = vadd.f32 %v3374_v43, %v7243_v34 }
 0x846   :  { %v3305_v14 = vpop.f32.mrf.mxu0  ;;  %v3376_v11 = vpop.f32.mrf.mxu1 }
 0x847   :  { %v3306_v51 = vadd.f32 %v3305_v14, %v7232_v61  ;;  %v3377_v31 = vadd.f32 %v3376_v11, %v7238_v30 }
 0x865   :  { %v3445_v9 = vpop.f32.mrf.mxu0  ;;  %v3516_v38 = vpop.f32.mrf.mxu1 }
 0x866   :  { %v3521_v13 = vadd.f32 %v3445_v9, %v3304_v56  ;;  %v3523_v15 = vadd.f32 %v3516_v38, %v3375_v4 }
 0x867   :  { %v3447_v1 = vpop.f32.mrf.mxu0  ;;  %v3518_v12 = vpop.f32.mrf.mxu1 }
 0x868   :  { %v4586_v44 = vmul.f32 -1.442695, %v3521_v13  ;;  %v3522_v23 = vadd.f32 %v3447_v1, %v3306_v51  ;;  %v3524_v26 = vadd.f32 %v3518_v12, %v3377_v31  ;;  %v12968_v51 = vld [vmem:[#allocation88_spill] sm:$0xff] }
 0x86a   :  { %4801 = vpow2.f32 %v4586_v44  ;;  %v4587_v50 = vmul.f32 -1.442695, %v3522_v23  ;;  %v4588_v60 = vmul.f32 -1.442695, %v3524_v26  ;;  %v12969_v26 = vld [vmem:[#allocation90_spill] sm:$0xff] }
 0x86c   :  { %4803 = vpow2.f32 %v4587_v50 }
 0x86d   :  { %4805 = vtanh.f32 %v3523_v15 }
 0x877   :  { %v4802_v0 = vpop.eup %4801 }
 0x878   :  { %v3534_v49 = vadd.f32 1.0, %v4802_v0 }
 0x879   :  { %v4804_v14 = vpop.eup %4803 }
 0x87a   :  { %4807 = vrcp.f32 %v3534_v49  ;;  %v3535_v13 = vadd.f32 1.0, %v4804_v14  ;;  %v4806_v44 = vpop.eup %4805  ;;  %v12970_v14 = vld [vmem:[#allocation91_spill] sm:$0xff] }
 0x87b   :  { %4809 = vpow2.f32 %v4588_v60 }
 0x87c   :  { %4811 = vrcp.f32 %v3535_v13 }
 0x887   :  { %v4808_v23 = vpop.eup %4807  ;;  %v3626_v1 = vpop.f32.mrf.mxu0 }
 0x888   :  { %v4810_v50 = vpop.eup %4809  ;;  %v3702_v9 = vadd.f32 %v3626_v1, %v12968_v51  ;;  %v3545_v43 = vmul.f32 %v4808_v23, %v4806_v44  ;;  %v3697_v49 = vpop.f32.mrf.mxu1  ;;  %v12971_v1 = vld [vmem:[#allocation89_spill] sm:$0xff] }
 0x889   :  { %v4812_v56 = vpop.eup %4811  ;;  %v3628_v11 = vpop.f32.mrf.mxu0  ;;  %v3536_v38 = vadd.f32 1.0, %v4810_v50  ;;  %v3704_v44 = vadd.f32 %v3697_v49, %v12971_v1 }
 0x88a   :  { %v3544_v4 = vmul.f32 %v4812_v56, %v10076_v58  ;;  %v4590_v12 = vmul.f32 -1.442695, %v3702_v9  ;;  %v3703_v0 = vadd.f32 %v3628_v11, %v12969_v26  ;;  %v3699_v15 = vpop.f32.mrf.mxu1 }
 0x88b   :  { %v3705_v13 = vadd.f32 %v3699_v15, %v12970_v14 }
 0x88c   :  { %v10833_v31 = vadd.f32 %v3545_v43, %v3544_v4  ;;  %4813 = vpow2.f32 %v4590_v12  ;;  %v4591_v60 = vmul.f32 -1.442695, %v3703_v0 }
 0x88d   :  { %v4592_v23 = vmul.f32 -1.442695, %v3705_v13 }
 0x88e   :  { %4815 = vpow2.f32 %v4591_v60 }
 0x88f   :  { %4817 = vrcp.f32 %v3536_v38 }
 0x890   :  { %4819 = vtanh.f32 %v10833_v31 }
 0x891   :  { %4821 = vtanh.f32 %v3704_v44 }
 0x892   :  { %4823 = vpow2.f32 %v4592_v23 }
 0x899   :  { %v4814_v58 = vpop.eup %4813 }
 0x89a   :  { %v3715_v51 = vadd.f32 1.0, %v4814_v58 }
 0x89b   :  { %v4816_v9 = vpop.eup %4815 }
 0x89c   :  { %v4818_v50 = vpop.eup %4817  ;;  %4825 = vrcp.f32 %v3715_v51  ;;  %v3716_v56 = vadd.f32 1.0, %v4816_v9 }
 0x89d   :  { %v4820_v11 = vpop.eup %4819 }
 0x89e   :  { %4827 = vrcp.f32 %v3716_v56  ;;  %v10838_v43 = vmul.f32 %v4820_v11, %v4818_v50  ;;  %v4822_v12 = vpop.eup %4821  ;;  %v10860_v50 = vld [vmem:[%s11508_s5 + $0x1f0] sm:$0xff]  ;;  %v10866_v56 = vld [vmem:[%s11508_s5 + $0x1c8] sm:$0xff]  ;;  %v10872_v11 = vld [vmem:[%s11508_s5 + $0x1d8] sm:$0xff] }
 0x89f   :  { %v4824_v26 = vpop.eup %4823 }
 0x8a0   :  { %v4589_v4 = vmul.f32 -1.442695, %v10838_v43  ;;  %v3717_v60 = vadd.f32 1.0, %v4824_v26  ;;  %v10890_v26 = vld [vmem:[%s11508_s5 + $0x1a8] sm:$0xff] }
 0x8a2   :  { %4829 = vpow2.f32 %v4589_v4  ;;  %v10878_v4 = vld [vmem:[%s11508_s5 + $0x1c0] sm:$0xff] }
 0x8a3   :  { %4831 = vrcp.f32 %v3717_v60  ;;  %v10914_v60 = vld [vmem:[%s11508_s5 + $0x188] sm:$0xff] }
 0x8a9   :  { %v4826_v0 = vpop.eup %4825 }
 0x8aa   :  { %v3726_v38 = vmul.f32 %v4826_v0, %v4822_v12  ;;  %v10884_v12 = vld [vmem:[%s11508_s5 + $0x1d0] sm:$0xff]  ;;  %v10896_v0 = vld [vmem:[%s11508_s5 + $0x1b8] sm:$0xff] }
 0x8ab   :  { %v4828_v49 = vpop.eup %4827 }
 0x8ac   :  { %v3725_v15 = vmul.f32 %v4828_v49, %v10085_v45  ;;  %v10854_v45 = vld [vmem:[%s11508_s5 + $0x1e0] sm:$0xff]  ;;  %v10908_v49 = vld [vmem:[%s11508_s5 + $0x1b0] sm:$0xff] }
 0x8ae   :  { %v10842_v14 = vadd.f32 %v3726_v38, %v3725_v15  ;;  %v10902_v38 = vld [vmem:[%s11508_s5 + $0x1a0] sm:$0xff]  ;;  %v10920_v15 = vld [vmem:[%s11508_s5 + $0x198] sm:$0xff] }
 0x8af   :  { %v4830_v13 = vpop.eup %4829 }
 0x8b0   :  { %4833 = vtanh.f32 %v10842_v14  ;;  %v3552_v1 = vadd.f32 1.0, %v4830_v13  ;;  %v4832_v44 = vpop.eup %4831  ;;  %v10926_v13 = vld [vmem:[%s11508_s5 + $0x180] sm:$0xff] }
 0x8b2   :  { %4835 = vrcp.f32 %v3552_v1  ;;  %v10932_v1 = vld [vmem:[%s11508_s5 + $0x190] sm:$0xff] }
 0x8bd   :  { %v4834_v23 = vpop.eup %4833 }
 0x8be   :  { %v10845_v58 = vmul.f32 %v4834_v23, %v4832_v44  ;;  %v10938_v44 = vld [vmem:[%s11508_s5 + $0x168] sm:$0xff]  ;;  %v10944_v23 = vld [vmem:[%s11508_s5 + $0x178] sm:$0xff] }
 0x8bf   :  { %v4836_v51 = vpop.eup %4835  ;;  %12972 = vst [vmem:[#allocation56_spill] sm:$0xff] %v10938_v44  ;;  %12973 = vst [vmem:[#allocation57_spill] sm:$0xff] %v10944_v23 }
 0x8c0   :  { %v3730_v9 = vmax.f32 %v10845_v58, 0.0  ;;  %3555 = vst [vmem:[%s11511_s7 + $0x28] sm:$0xff] %v4836_v51  ;;  %v10950_v51 = vld [vmem:[%s11508_s5 + $0x160] sm:$0xff] }
 0x8c1   :  { %12974 = vst [vmem:[#allocation58_spill] sm:$0xff] %v10950_v51 }
 0x8c2   :  { %3796 = vmatmul.mubr.f32.vlgmr.msra.gmra.mxu0 %v3730_v9  ;;  %3867 = vmatmul.mubr.f32.vlgmr.msra.gmra.mxu1 %v3730_v9  ;;  %v10956_v9 = vld [vmem:[%s11508_s5 + $0x170] sm:$0xff] }
 0x8c3   :  { %3874 = vmatpush1.msra.mxu0 %v10854_v45  ;;  %3945 = vmatpush1.msra.mxu1 %v10860_v50  ;;  %12975 = vst [vmem:[#allocation59_spill] sm:$0xff] %v10956_v9 }
 0x8c4   :  { %3875 = vmatprep.subr.mxu0 %v10866_v56  ;;  %3946 = vmatprep.subr.mxu1 %v10872_v11 }
 0x8c5   :  { %3876 = vmatpush1.msra.mxu0 %v10878_v4  ;;  %3947 = vmatpush1.msra.mxu1 %v10884_v12 }
 0x8c6   :  { %3877 = vmatprep.subr.mxu0 %v10890_v26  ;;  %3948 = vmatprep.subr.mxu1 %v10896_v0 }
 0x8c7   :  { %3878 = vmatpush1.msra.mxu0 %v10902_v38  ;;  %3949 = vmatpush1.msra.mxu1 %v10908_v49 }
 0x8c8   :  { %3879 = vmatprep.subr.mxu0 %v10914_v60  ;;  %3950 = vmatprep.subr.mxu1 %v10920_v15 }
 0x8c9   :  { %3880 = vmatpush1.msra.mxu0 %v10926_v13  ;;  %3951 = vmatpush1.msra.mxu1 %v10932_v1 }
 0x8ca   :  { %3881 = vmatprep.subr.mxu0 %v10938_v44  ;;  %3952 = vmatprep.subr.mxu1 %v10944_v23  ;;  %v10962_v44 = vld [vmem:[%s11508_s5 + $0x148] sm:$0xff]  ;;  %v10968_v23 = vld [vmem:[%s11508_s5 + $0x158] sm:$0xff] }
 0x8cb   :  { %3882 = vmatpush1.msra.mxu0 %v10950_v51  ;;  %3953 = vmatpush1.msra.mxu1 %v10956_v9  ;;  %12976 = vst [vmem:[#allocation60_spill] sm:$0xff] %v10962_v44  ;;  %12977 = vst [vmem:[#allocation61_spill] sm:$0xff] %v10968_v23  ;;  %v10974_v51 = vld [vmem:[%s11508_s5 + $0x140] sm:$0xff]  ;;  %v10980_v9 = vld [vmem:[%s11508_s5 + $0x150] sm:$0xff] }
 0x8cc   :  { %3883 = vmatprep.subr.mxu0 %v10962_v44  ;;  %3954 = vmatprep.subr.mxu1 %v10968_v23  ;;  %12978 = vst [vmem:[#allocation62_spill] sm:$0xff] %v10974_v51  ;;  %12979 = vst [vmem:[#allocation63_spill] sm:$0xff] %v10980_v9  ;;  %v10986_v44 = vld [vmem:[%s11508_s5 + $0x128] sm:$0xff]  ;;  %v10992_v23 = vld [vmem:[%s11508_s5 + $0x138] sm:$0xff] }
 0x8cd   :  { %3884 = vmatpush1.msra.mxu0 %v10974_v51  ;;  %3955 = vmatpush1.msra.mxu1 %v10980_v9  ;;  %12980 = vst [vmem:[#allocation64_spill] sm:$0xff] %v10986_v44  ;;  %12981 = vst [vmem:[#allocation65_spill] sm:$0xff] %v10992_v23  ;;  %v10998_v51 = vld [vmem:[%s11508_s5 + $0x120] sm:$0xff]  ;;  %v11004_v9 = vld [vmem:[%s11508_s5 + $0x130] sm:$0xff] }
 0x8ce   :  { %3885 = vmatprep.subr.mxu0 %v10986_v44  ;;  %3956 = vmatprep.subr.mxu1 %v10992_v23  ;;  %12982 = vst [vmem:[#allocation66_spill] sm:$0xff] %v10998_v51  ;;  %12983 = vst [vmem:[#allocation67_spill] sm:$0xff] %v11004_v9  ;;  %v11010_v44 = vld [vmem:[%s11508_s5 + $0x108] sm:$0xff]  ;;  %v11016_v23 = vld [vmem:[%s11508_s5 + $0x118] sm:$0xff] }
 0x8cf   :  { %3886 = vmatpush1.msra.mxu0 %v10998_v51  ;;  %3957 = vmatpush1.msra.mxu1 %v11004_v9  ;;  %12984 = vst [vmem:[#allocation84_spill] sm:$0xff] %v11010_v44  ;;  %12985 = vst [vmem:[#allocation86_spill] sm:$0xff] %v11016_v23  ;;  %v11022_v51 = vld [vmem:[%s11508_s5 + $0x100] sm:$0xff]  ;;  %v11028_v9 = vld [vmem:[%s11508_s5 + $0x110] sm:$0xff] }
 0x8d0   :  { %3887 = vmatprep.subr.mxu0 %v11010_v44  ;;  %3958 = vmatprep.subr.mxu1 %v11016_v23  ;;  %12986 = vst [vmem:[#allocation87_spill] sm:$0xff] %v11022_v51  ;;  %12987 = vst [vmem:[#allocation85_spill] sm:$0xff] %v11028_v9  ;;  %v11034_v44 = vld [vmem:[%s11508_s5 + $0xe8] sm:$0xff]  ;;  %v11040_v23 = vld [vmem:[%s11508_s5 + $0xf8] sm:$0xff] }
 0x8d1   :  { %3888 = vmatpush1.msra.mxu0 %v11022_v51  ;;  %3959 = vmatpush1.msra.mxu1 %v11028_v9  ;;  %12988 = vst [vmem:[#allocation68_spill] sm:$0xff] %v11034_v44  ;;  %12989 = vst [vmem:[#allocation70_spill] sm:$0xff] %v11040_v23  ;;  %v11046_v51 = vld [vmem:[%s11508_s5 + $0xe0] sm:$0xff]  ;;  %v11052_v9 = vld [vmem:[%s11508_s5 + $0xf0] sm:$0xff] }
 0x8d2   :  { %3889 = vmatprep.subr.mxu0 %v11034_v44  ;;  %3960 = vmatprep.subr.mxu1 %v11040_v23  ;;  %12990 = vst [vmem:[#allocation71_spill] sm:$0xff] %v11046_v51  ;;  %12991 = vst [vmem:[#allocation69_spill] sm:$0xff] %v11052_v9  ;;  %v11058_v44 = vld [vmem:[%s11508_s5 + $0xc8] sm:$0xff]  ;;  %v11064_v23 = vld [vmem:[%s11508_s5 + $0xd8] sm:$0xff] }
 0x8d3   :  { %3890 = vmatpush1.msra.mxu0 %v11046_v51  ;;  %3961 = vmatpush1.msra.mxu1 %v11052_v9  ;;  %12992 = vst [vmem:[#allocation76_spill] sm:$0xff] %v11058_v44  ;;  %12993 = vst [vmem:[#allocation78_spill] sm:$0xff] %v11064_v23  ;;  %v11070_v51 = vld [vmem:[%s11508_s5 + $0xc0] sm:$0xff]  ;;  %v11076_v9 = vld [vmem:[%s11508_s5 + $0xd0] sm:$0xff] }
 0x8d4   :  { %3891 = vmatprep.subr.mxu0 %v11058_v44  ;;  %3962 = vmatprep.subr.mxu1 %v11064_v23  ;;  %12994 = vst [vmem:[#allocation79_spill] sm:$0xff] %v11070_v51  ;;  %12995 = vst [vmem:[#allocation77_spill] sm:$0xff] %v11076_v9  ;;  %v11082_v44 = vld [vmem:[%s11508_s5 + $0xa8] sm:$0xff]  ;;  %v11088_v23 = vld [vmem:[%s11508_s5 + $0xb8] sm:$0xff] }
 0x8d5   :  { %3892 = vmatpush1.msra.mxu0 %v11070_v51  ;;  %3963 = vmatpush1.msra.mxu1 %v11076_v9  ;;  %12996 = vst [vmem:[#allocation96_spill] sm:$0xff] %v11082_v44  ;;  %12997 = vst [vmem:[#allocation97_spill] sm:$0xff] %v11088_v23  ;;  %v11094_v51 = vld [vmem:[%s11508_s5 + $0xa0] sm:$0xff]  ;;  %v11100_v9 = vld [vmem:[%s11508_s5 + $0xb0] sm:$0xff] }
 0x8d6   :  { %3893 = vmatprep.subr.mxu0 %v11082_v44  ;;  %3964 = vmatprep.subr.mxu1 %v11088_v23  ;;  %12998 = vst [vmem:[#allocation98_spill] sm:$0xff] %v11094_v51  ;;  %12999 = vst [vmem:[#allocation99_spill] sm:$0xff] %v11100_v9  ;;  %v11106_v44 = vld [vmem:[%s11508_s5 + $0x88] sm:$0xff]  ;;  %v11112_v23 = vld [vmem:[%s11508_s5 + $0x98] sm:$0xff] }
 0x8d7   :  { %3894 = vmatpush1.msra.mxu0 %v11094_v51  ;;  %3965 = vmatpush1.msra.mxu1 %v11100_v9  ;;  %13000 = vst [vmem:[#allocation100_spill] sm:$0xff] %v11106_v44  ;;  %13001 = vst [vmem:[#allocation101_spill] sm:$0xff] %v11112_v23  ;;  %v11118_v51 = vld [vmem:[%s11508_s5 + $0x80] sm:$0xff]  ;;  %v11124_v9 = vld [vmem:[%s11508_s5 + $0x90] sm:$0xff] }
 0x8d8   :  { %3895 = vmatprep.subr.mxu0 %v11106_v44  ;;  %3966 = vmatprep.subr.mxu1 %v11112_v23  ;;  %13002 = vst [vmem:[#allocation102_spill] sm:$0xff] %v11118_v51  ;;  %13003 = vst [vmem:[#allocation103_spill] sm:$0xff] %v11124_v9  ;;  %v11130_v44 = vld [vmem:[%s11508_s5 + $0x68] sm:$0xff]  ;;  %v11136_v23 = vld [vmem:[%s11508_s5 + $0x78] sm:$0xff] }
 0x8d9   :  { %3896 = vmatpush1.msra.mxu0 %v11118_v51  ;;  %3967 = vmatpush1.msra.mxu1 %v11124_v9  ;;  %13004 = vst [vmem:[#allocation104_spill] sm:$0xff] %v11130_v44  ;;  %13005 = vst [vmem:[#allocation105_spill] sm:$0xff] %v11136_v23  ;;  %v11142_v51 = vld [vmem:[%s11508_s5 + $0x60] sm:$0xff]  ;;  %v11148_v9 = vld [vmem:[%s11508_s5 + $0x70] sm:$0xff] }
 0x8da   :  { %3897 = vmatprep.subr.mxu0 %v11130_v44  ;;  %3968 = vmatprep.subr.mxu1 %v11136_v23  ;;  %13006 = vst [vmem:[#allocation106_spill] sm:$0xff] %v11142_v51  ;;  %13007 = vst [vmem:[#allocation107_spill] sm:$0xff] %v11148_v9  ;;  %v11154_v44 = vld [vmem:[%s11508_s5 + $0x48] sm:$0xff]  ;;  %v11160_v23 = vld [vmem:[%s11508_s5 + $0x58] sm:$0xff] }
 0x8db   :  { %3898 = vmatpush1.msra.mxu0 %v11142_v51  ;;  %3969 = vmatpush1.msra.mxu1 %v11148_v9  ;;  %13008 = vst [vmem:[#allocation108_spill] sm:$0xff] %v11154_v44  ;;  %13009 = vst [vmem:[#allocation109_spill] sm:$0xff] %v11160_v23  ;;  %v11166_v51 = vld [vmem:[%s11508_s5 + $0x40] sm:$0xff]  ;;  %v11172_v9 = vld [vmem:[%s11508_s5 + $0x50] sm:$0xff] }
 0x8dc   :  { %3899 = vmatprep.subr.mxu0 %v11154_v44  ;;  %3970 = vmatprep.subr.mxu1 %v11160_v23  ;;  %13010 = vst [vmem:[#allocation110_spill] sm:$0xff] %v11166_v51  ;;  %13011 = vst [vmem:[#allocation111_spill] sm:$0xff] %v11172_v9  ;;  %v11178_v44 = vld [vmem:[%s11508_s5 + $0x28] sm:$0xff]  ;;  %v11184_v23 = vld [vmem:[%s11508_s5 + $0x38] sm:$0xff] }
 0x8dd   :  { %3900 = vmatpush1.msra.mxu0 %v11166_v51  ;;  %3971 = vmatpush1.msra.mxu1 %v11172_v9  ;;  %13012 = vst [vmem:[#allocation112_spill] sm:$0xff] %v11178_v44  ;;  %13013 = vst [vmem:[#allocation113_spill] sm:$0xff] %v11184_v23  ;;  %v11190_v51 = vld [vmem:[%s11508_s5 + $0x20] sm:$0xff]  ;;  %v11196_v9 = vld [vmem:[%s11508_s5 + $0x30] sm:$0xff] }
 0x8de   :  { %3901 = vmatprep.subr.mxu0 %v11178_v44  ;;  %3972 = vmatprep.subr.mxu1 %v11184_v23  ;;  %13014 = vst [vmem:[#allocation114_spill] sm:$0xff] %v11190_v51  ;;  %13015 = vst [vmem:[#allocation115_spill] sm:$0xff] %v11196_v9  ;;  %v11202_v44 = vld [vmem:[%s11508_s5 + $0x8] sm:$0xff]  ;;  %v11208_v23 = vld [vmem:[%s11508_s5 + $0x18] sm:$0xff] }
 0x8df   :  { %3902 = vmatpush1.msra.mxu0 %v11190_v51  ;;  %3973 = vmatpush1.msra.mxu1 %v11196_v9  ;;  %13016 = vst [vmem:[#allocation116_spill] sm:$0xff] %v11202_v44  ;;  %13017 = vst [vmem:[#allocation117_spill] sm:$0xff] %v11208_v23  ;;  %v11214_v51 = vld [vmem:[%s11508_s5] sm:$0xff]  ;;  %v5472_v9 = vld [vmem:[%s11506_s2 + $0x1f0] sm:$0xff] }
 0x8e0   :  { %3903 = vmatprep.subr.mxu0 %v11202_v44  ;;  %3974 = vmatprep.subr.mxu1 %v11208_v23  ;;  %13018 = vst [vmem:[#allocation118_spill] sm:$0xff] %v11214_v51  ;;  %v11221_v44 = vld [vmem:[%s11508_s5 + $0x10] sm:$0xff]  ;;  %v5469_v23 = vld [vmem:[%s11506_s2 + $0x1e8] sm:$0xff] }
 0x8e1   :  { %3904 = vmatpush1.msra.mxu0 %v11214_v51  ;;  %3937 = vmatprep.mubr.f32.mxu0 %v12180_v19  ;;  %13019 = vst [vmem:[#allocation119_spill] sm:$0xff] %v11221_v44  ;;  %v5470_v51 = vld [vmem:[%s11506_s2 + $0x1f8] sm:$0xff] }
 0x8e2   :  { %3975 = vmatpush1.msra.mxu1 %v11221_v44  ;;  %4008 = vmatprep.mubr.f32.mxu1 %v12180_v19  ;;  %v5471_v44 = vld [vmem:[%s11506_s2 + $0x1e0] sm:$0xff] }
 0x8e3   :  { %3938 = vmatmul.mubr.f32.vlgmr.msra.gmra.mxu0 %v10838_v43  ;;  %4009 = vmatmul.mubr.f32.vlgmr.msra.gmra.mxu1 %v10838_v43  ;;  %v5473_v43 = vld [vmem:[%s11506_s2 + $0x1c8] sm:$0xff] }
 0x8e4   :  { %4054 = vmatprep.subr.mxu0 %v5469_v23  ;;  %4125 = vmatprep.subr.mxu1 %v5470_v51  ;;  %v5474_v23 = vld [vmem:[%s11506_s2 + $0x1d8] sm:$0xff]  ;;  %v5475_v51 = vld [vmem:[%s11506_s2 + $0x1c0] sm:$0xff] }
 0x8e5   :  { %4055 = vmatpush1.msra.mxu0 %v5471_v44  ;;  %4126 = vmatpush1.msra.mxu1 %v5472_v9  ;;  %v5476_v44 = vld [vmem:[%s11506_s2 + $0x1d0] sm:$0xff]  ;;  %v5477_v9 = vld [vmem:[%s11506_s2 + $0x1a8] sm:$0xff] }
 0x8e6   :  { %4056 = vmatprep.subr.mxu0 %v5473_v43  ;;  %4127 = vmatprep.subr.mxu1 %v5474_v23  ;;  %v5478_v43 = vld [vmem:[%s11506_s2 + $0x1b8] sm:$0xff]  ;;  %v5479_v23 = vld [vmem:[%s11506_s2 + $0x1a0] sm:$0xff] }
 0x8e7   :  { %4057 = vmatpush1.msra.mxu0 %v5475_v51  ;;  %4128 = vmatpush1.msra.mxu1 %v5476_v44  ;;  %v5480_v51 = vld [vmem:[%s11506_s2 + $0x1b0] sm:$0xff]  ;;  %v5481_v44 = vld [vmem:[%s11506_s2 + $0x188] sm:$0xff] }
 0x8e8   :  { %4058 = vmatprep.subr.mxu0 %v5477_v9  ;;  %4129 = vmatprep.subr.mxu1 %v5478_v43  ;;  %v5482_v9 = vld [vmem:[%s11506_s2 + $0x198] sm:$0xff]  ;;  %v5483_v43 = vld [vmem:[%s11506_s2 + $0x180] sm:$0xff] }
 0x8e9   :  { %4059 = vmatpush1.msra.mxu0 %v5479_v23  ;;  %4130 = vmatpush1.msra.mxu1 %v5480_v51  ;;  %v5484_v23 = vld [vmem:[%s11506_s2 + $0x190] sm:$0xff]  ;;  %v5485_v51 = vld [vmem:[%s11506_s2 + $0x168] sm:$0xff] }
 0x8ea   :  { %4060 = vmatprep.subr.mxu0 %v5481_v44  ;;  %4131 = vmatprep.subr.mxu1 %v5482_v9  ;;  %v5486_v44 = vld [vmem:[%s11506_s2 + $0x178] sm:$0xff]  ;;  %v5487_v9 = vld [vmem:[%s11506_s2 + $0x160] sm:$0xff] }
 0x8eb   :  { %4061 = vmatpush1.msra.mxu0 %v5483_v43  ;;  %4132 = vmatpush1.msra.mxu1 %v5484_v23  ;;  %v5488_v43 = vld [vmem:[%s11506_s2 + $0x170] sm:$0xff]  ;;  %v5489_v23 = vld [vmem:[%s11506_s2 + $0x148] sm:$0xff] }
 0x8ec   :  { %4062 = vmatprep.subr.mxu0 %v5485_v51  ;;  %4133 = vmatprep.subr.mxu1 %v5486_v44  ;;  %v5490_v51 = vld [vmem:[%s11506_s2 + $0x158] sm:$0xff]  ;;  %v5491_v44 = vld [vmem:[%s11506_s2 + $0x140] sm:$0xff] }
 0x8ed   :  { %4063 = vmatpush1.msra.mxu0 %v5487_v9  ;;  %4134 = vmatpush1.msra.mxu1 %v5488_v43  ;;  %v5492_v9 = vld [vmem:[%s11506_s2 + $0x150] sm:$0xff]  ;;  %v13059_v43 = vld [vmem:[#allocation27_spill] sm:$0xff] }
 0x8ee   :  { %4064 = vmatprep.subr.mxu0 %v5489_v23  ;;  %4135 = vmatprep.subr.mxu1 %v5490_v51  ;;  %v13060_v23 = vld [vmem:[#allocation28_spill] sm:$0xff]  ;;  %v13061_v51 = vld [vmem:[#allocation29_spill] sm:$0xff] }
 0x8ef   :  { %4065 = vmatpush1.msra.mxu0 %v5491_v44  ;;  %4136 = vmatpush1.msra.mxu1 %v5492_v9  ;;  %v13062_v44 = vld [vmem:[#allocation30_spill] sm:$0xff]  ;;  %v13063_v9 = vld [vmem:[#allocation31_spill] sm:$0xff] }
 0x8f0   :  { %4066 = vmatprep.subr.mxu0 %v10187_v53  ;;  %4137 = vmatprep.subr.mxu1 %v10193_v54  ;;  %v13020_v53 = vld [vmem:[#allocation155_spill] sm:$0xff]  ;;  %v13021_v54 = vld [vmem:[#allocation156_spill] sm:$0xff] }
 0x8f1   :  { %4067 = vmatpush1.msra.mxu0 %v10199_v21  ;;  %4138 = vmatpush1.msra.mxu1 %v10205_v18  ;;  %v13022_v21 = vld [vmem:[#allocation157_spill] sm:$0xff]  ;;  %v13023_v18 = vld [vmem:[#allocation158_spill] sm:$0xff] }
 0x8f2   :  { %4068 = vmatprep.subr.mxu0 %v10211_v27  ;;  %4139 = vmatprep.subr.mxu1 %v10217_v59  ;;  %v13024_v27 = vld [vmem:[#allocation159_spill] sm:$0xff]  ;;  %v13025_v59 = vld [vmem:[#allocation160_spill] sm:$0xff] }
 0x8f3   :  { %4069 = vmatpush1.msra.mxu0 %v10223_v3  ;;  %4140 = vmatpush1.msra.mxu1 %v10229_v16  ;;  %v13026_v3 = vld [vmem:[#allocation161_spill] sm:$0xff]  ;;  %v13027_v16 = vld [vmem:[#allocation162_spill] sm:$0xff] }
 0x8f4   :  { %4070 = vmatprep.subr.mxu0 %v10235_v47  ;;  %4141 = vmatprep.subr.mxu1 %v10241_v55  ;;  %v13028_v47 = vld [vmem:[#allocation80_spill] sm:$0xff]  ;;  %v13029_v55 = vld [vmem:[#allocation82_spill] sm:$0xff] }
 0x8f5   :  { %4071 = vmatpush1.msra.mxu0 %v10247_v57  ;;  %4142 = vmatpush1.msra.mxu1 %v10253_v62  ;;  %v13030_v57 = vld [vmem:[#allocation83_spill] sm:$0xff]  ;;  %v13031_v62 = vld [vmem:[#allocation81_spill] sm:$0xff] }
 0x8f6   :  { %4072 = vmatprep.subr.mxu0 %v10259_v63  ;;  %4143 = vmatprep.subr.mxu1 %v10265_v2  ;;  %v13032_v63 = vld [vmem:[#allocation72_spill] sm:$0xff]  ;;  %v13033_v2 = vld [vmem:[#allocation74_spill] sm:$0xff] }
 0x8f7   :  { %4073 = vmatpush1.msra.mxu0 %v10271_v5  ;;  %4144 = vmatpush1.msra.mxu1 %v10277_v6  ;;  %v13034_v5 = vld [vmem:[#allocation75_spill] sm:$0xff]  ;;  %v13035_v6 = vld [vmem:[#allocation73_spill] sm:$0xff] }
 0x8f8   :  { %4074 = vmatprep.subr.mxu0 %v10283_v7  ;;  %4145 = vmatprep.subr.mxu1 %v10289_v8  ;;  %v13036_v7 = vld [vmem:[#allocation4_spill] sm:$0xff]  ;;  %v13037_v8 = vld [vmem:[#allocation5_spill] sm:$0xff] }
 0x8f9   :  { %4075 = vmatpush1.msra.mxu0 %v10295_v10  ;;  %4146 = vmatpush1.msra.mxu1 %v10301_v52  ;;  %v13038_v10 = vld [vmem:[#allocation6_spill] sm:$0xff]  ;;  %v13039_v52 = vld [vmem:[#allocation7_spill] sm:$0xff] }
 0x8fa   :  { %4076 = vmatprep.subr.mxu0 %v10307_v40  ;;  %4147 = vmatprep.subr.mxu1 %v10313_v25  ;;  %v13040_v40 = vld [vmem:[#allocation8_spill] sm:$0xff]  ;;  %v13041_v25 = vld [vmem:[#allocation9_spill] sm:$0xff] }
 0x8fb   :  { %4077 = vmatpush1.msra.mxu0 %v10319_v32  ;;  %4148 = vmatpush1.msra.mxu1 %v10325_v22  ;;  %v13042_v32 = vld [vmem:[#allocation10_spill] sm:$0xff]  ;;  %v13043_v22 = vld [vmem:[#allocation11_spill] sm:$0xff] }
 0x8fc   :  { %4078 = vmatprep.subr.mxu0 %v10331_v28  ;;  %4149 = vmatprep.subr.mxu1 %v10337_v20  ;;  %v13044_v28 = vld [vmem:[#allocation12_spill] sm:$0xff]  ;;  %v13045_v20 = vld [vmem:[#allocation13_spill] sm:$0xff] }
 0x8fd   :  { %4079 = vmatpush1.msra.mxu0 %v10343_v33  ;;  %4150 = vmatpush1.msra.mxu1 %v10349_v35  ;;  %v13046_v33 = vld [vmem:[#allocation14_spill] sm:$0xff]  ;;  %v13047_v35 = vld [vmem:[#allocation15_spill] sm:$0xff] }
 0x8fe   :  { %4080 = vmatprep.subr.mxu0 %v10355_v36  ;;  %4151 = vmatprep.subr.mxu1 %v10361_v37  ;;  %v13048_v36 = vld [vmem:[#allocation16_spill] sm:$0xff]  ;;  %v13049_v37 = vld [vmem:[#allocation17_spill] sm:$0xff] }
 0x8ff   :  { %4081 = vmatpush1.msra.mxu0 %v10367_v39  ;;  %4152 = vmatpush1.msra.mxu1 %v10373_v41  ;;  %v13050_v39 = vld [vmem:[#allocation18_spill] sm:$0xff]  ;;  %v13051_v41 = vld [vmem:[#allocation19_spill] sm:$0xff] }
 0x900   :  { %4082 = vmatprep.subr.mxu0 %v10379_v42  ;;  %4153 = vmatprep.subr.mxu1 %v10385_v46  ;;  %v13052_v42 = vld [vmem:[#allocation20_spill] sm:$0xff]  ;;  %v13053_v46 = vld [vmem:[#allocation21_spill] sm:$0xff] }
 0x901   :  { %4083 = vmatpush1.msra.mxu0 %v10391_v48  ;;  %4154 = vmatpush1.msra.mxu1 %v10397_v29  ;;  %v13054_v48 = vld [vmem:[#allocation22_spill] sm:$0xff]  ;;  %v13055_v29 = vld [vmem:[#allocation23_spill] sm:$0xff] }
 0x902   :  { %4084 = vmatprep.subr.mxu0 %v10403_v24  ;;  %4155 = vmatprep.subr.mxu1 %v10409_v17  ;;  %v13056_v24 = vld [vmem:[#allocation24_spill] sm:$0xff]  ;;  %v13057_v17 = vld [vmem:[#allocation25_spill] sm:$0xff] }
 0x903   :  { %4085 = vmatpush1.msra.mxu0 %v13020_v53  ;;  %4118 = vmatprep.mubr.f32.mxu0 %v12180_v19  ;;  %v13064_v53 = vld [vmem:[#allocation32_spill] sm:$0xff] }
 0x904   :  { %4156 = vmatpush1.msra.mxu1 %v13021_v54  ;;  %4189 = vmatprep.mubr.f32.mxu1 %v12180_v19  ;;  %v13065_v54 = vld [vmem:[#allocation33_spill] sm:$0xff] }
 0x905   :  { %4119 = vmatmul.mubr.f32.vlgmr.msra.gmra.mxu0 %v10845_v58  ;;  %4190 = vmatmul.mubr.f32.vlgmr.msra.gmra.mxu1 %v10845_v58  ;;  %v13058_v58 = vld [vmem:[#allocation26_spill] sm:$0xff] }
 0x906   :  { %4225 = vmatprep.subr.mxu0 %v13022_v21  ;;  %4296 = vmatprep.subr.mxu1 %v13023_v18  ;;  %v13066_v21 = vld [vmem:[#allocation34_spill] sm:$0xff]  ;;  %v13067_v18 = vld [vmem:[#allocation35_spill] sm:$0xff] }
 0x907   :  { %4226 = vmatpush1.msra.mxu0 %v13024_v27  ;;  %4297 = vmatpush1.msra.mxu1 %v13025_v59  ;;  %v13068_v27 = vld [vmem:[#allocation36_spill] sm:$0xff]  ;;  %v13069_v59 = vld [vmem:[#allocation37_spill] sm:$0xff] }
 0x908   :  { %4227 = vmatprep.subr.mxu0 %v13026_v3  ;;  %4298 = vmatprep.subr.mxu1 %v13027_v16  ;;  %v13070_v3 = vld [vmem:[#allocation38_spill] sm:$0xff]  ;;  %v13071_v16 = vld [vmem:[#allocation39_spill] sm:$0xff] }
 0x909   :  { %4228 = vmatpush1.msra.mxu0 %v13028_v47  ;;  %4299 = vmatpush1.msra.mxu1 %v13029_v55  ;;  %v13072_v47 = vld [vmem:[#allocation40_spill] sm:$0xff]  ;;  %v13073_v55 = vld [vmem:[#allocation41_spill] sm:$0xff] }
 0x90a   :  { %4229 = vmatprep.subr.mxu0 %v13030_v57  ;;  %4300 = vmatprep.subr.mxu1 %v13031_v62  ;;  %v13074_v57 = vld [vmem:[#allocation42_spill] sm:$0xff]  ;;  %v13075_v62 = vld [vmem:[#allocation43_spill] sm:$0xff] }
 0x90b   :  { %4230 = vmatpush1.msra.mxu0 %v13032_v63  ;;  %4301 = vmatpush1.msra.mxu1 %v13033_v2  ;;  %v13076_v63 = vld [vmem:[#allocation44_spill] sm:$0xff]  ;;  %v13077_v2 = vld [vmem:[#allocation45_spill] sm:$0xff] }
 0x90c   :  { %4231 = vmatprep.subr.mxu0 %v13034_v5  ;;  %4302 = vmatprep.subr.mxu1 %v13035_v6  ;;  %v13078_v5 = vld [vmem:[#allocation46_spill] sm:$0xff]  ;;  %v13079_v6 = vld [vmem:[#allocation47_spill] sm:$0xff] }
 0x90d   :  { %4232 = vmatpush1.msra.mxu0 %v13036_v7  ;;  %4303 = vmatpush1.msra.mxu1 %v13037_v8  ;;  %v13080_v7 = vld [vmem:[#allocation48_spill] sm:$0xff]  ;;  %v13081_v8 = vld [vmem:[#allocation49_spill] sm:$0xff] }
 0x90e   :  { %4233 = vmatprep.subr.mxu0 %v13038_v10  ;;  %4304 = vmatprep.subr.mxu1 %v13039_v52  ;;  %v13082_v10 = vld [vmem:[#allocation50_spill] sm:$0xff]  ;;  %v13083_v52 = vld [vmem:[#allocation51_spill] sm:$0xff] }
 0x90f   :  { %4234 = vmatpush1.msra.mxu0 %v13040_v40  ;;  %4305 = vmatpush1.msra.mxu1 %v13041_v25  ;;  %v13084_v40 = vld [vmem:[#allocation52_spill] sm:$0xff]  ;;  %v13085_v25 = vld [vmem:[#allocation53_spill] sm:$0xff] }
 0x910   :  { %4235 = vmatprep.subr.mxu0 %v13042_v32  ;;  %4306 = vmatprep.subr.mxu1 %v13043_v22  ;;  %v13086_v32 = vld [vmem:[#allocation54_spill] sm:$0xff]  ;;  %v13087_v22 = vld [vmem:[#allocation55_spill] sm:$0xff] }
 0x911   :  { %4236 = vmatpush1.msra.mxu0 %v13044_v28  ;;  %4307 = vmatpush1.msra.mxu1 %v13045_v20 }
 0x912   :  { %4237 = vmatprep.subr.mxu0 %v13046_v33  ;;  %4308 = vmatprep.subr.mxu1 %v13047_v35  ;;  %v13088_v33 = vld [vmem:[#allocation3_spill] sm:$0xff] }
 0x913   :  { %4238 = vmatpush1.msra.mxu0 %v13048_v36  ;;  %4309 = vmatpush1.msra.mxu1 %v13049_v37 }
 0x914   :  { %4239 = vmatprep.subr.mxu0 %v13050_v39  ;;  %4310 = vmatprep.subr.mxu1 %v13051_v41 }
 0x915   :  { %4240 = vmatpush1.msra.mxu0 %v13052_v42  ;;  %4311 = vmatpush1.msra.mxu1 %v13053_v46 }
 0x916   :  { %4241 = vmatprep.subr.mxu0 %v13054_v48  ;;  %4312 = vmatprep.subr.mxu1 %v13055_v29 }
 0x917   :  { %4242 = vmatpush1.msra.mxu0 %v13056_v24  ;;  %4313 = vmatpush1.msra.mxu1 %v13057_v17 }
 0x918   :  { %4243 = vmatprep.subr.mxu0 %v13058_v58  ;;  %4314 = vmatprep.subr.mxu1 %v13059_v43 }
 0x919   :  { %4244 = vmatpush1.msra.mxu0 %v13060_v23  ;;  %4315 = vmatpush1.msra.mxu1 %v13061_v51 }
 0x91a   :  { %4245 = vmatprep.subr.mxu0 %v13062_v44  ;;  %4316 = vmatprep.subr.mxu1 %v13063_v9 }
 0x91b   :  { %4246 = vmatpush1.msra.mxu0 %v13064_v53  ;;  %4317 = vmatpush1.msra.mxu1 %v13065_v54 }
 0x91c   :  { %4247 = vmatprep.subr.mxu0 %v13066_v21  ;;  %4318 = vmatprep.subr.mxu1 %v13067_v18 }
 0x91d   :  { %4248 = vmatpush1.msra.mxu0 %v13068_v27  ;;  %4319 = vmatpush1.msra.mxu1 %v13069_v59 }
 0x91e   :  { %4249 = vmatprep.subr.mxu0 %v13070_v3  ;;  %4320 = vmatprep.subr.mxu1 %v13071_v16 }
 0x91f   :  { %4250 = vmatpush1.msra.mxu0 %v13072_v47  ;;  %4321 = vmatpush1.msra.mxu1 %v13073_v55  ;;  %v13089_v47 = vld [vmem:[#allocation92_spill] sm:$0xff] }
 0x920   :  { %4251 = vmatprep.subr.mxu0 %v13074_v57  ;;  %4322 = vmatprep.subr.mxu1 %v13075_v62 }
 0x921   :  { %4252 = vmatpush1.msra.mxu0 %v13076_v63  ;;  %4323 = vmatpush1.msra.mxu1 %v13077_v2 }
 0x922   :  { %4253 = vmatprep.subr.mxu0 %v13078_v5  ;;  %4324 = vmatprep.subr.mxu1 %v13079_v6  ;;  %v13090_v6 = vld [vmem:[#allocation94_spill] sm:$0xff] }
 0x923   :  { %4254 = vmatpush1.msra.mxu0 %v13080_v7  ;;  %4325 = vmatpush1.msra.mxu1 %v13081_v8 }
 0x924   :  { %4255 = vmatprep.subr.mxu0 %v13082_v10  ;;  %4326 = vmatprep.subr.mxu1 %v13083_v52 }
 0x925   :  { %4256 = vmatpush1.msra.mxu0 %v13084_v40  ;;  %4327 = vmatpush1.msra.mxu1 %v13085_v25 }
 0x926   :  { %4289 = vmatprep.mubr.f32.mxu0 %v12180_v19  ;;  %4360 = vmatprep.mubr.f32.mxu1 %v12180_v19 }
 0x927   :  { %4367 = vmatprep.subr.mxu0 %v13086_v32  ;;  %4438 = vmatprep.subr.mxu1 %v13087_v22  ;;  %v13091_v32 = vld [vmem:[#allocation95_spill] sm:$0xff] }
 0x982   :  { %v3797_v28 = vpop.f32.mrf.mxu0  ;;  %v3868_v37 = vpop.f32.mrf.mxu1 }
 0x983   :  { %v3798_v35 = vadd.f32 %v3797_v28, %v13088_v33  ;;  %v3869_v23 = vadd.f32 %v3868_v37, %v7243_v34  ;;  %v13092_v28 = vld [vmem:[#allocation93_spill] sm:$0xff] }
 0x984   :  { %v3799_v20 = vpop.f32.mrf.mxu0  ;;  %v3870_v29 = vpop.f32.mrf.mxu1 }
 0x985   :  { %v3800_v39 = vadd.f32 %v3799_v20, %v7232_v61  ;;  %v3871_v43 = vadd.f32 %v3870_v29, %v7238_v30 }
 0x9a3   :  { %v3939_v36 = vpop.f32.mrf.mxu0  ;;  %v4010_v17 = vpop.f32.mrf.mxu1 }
 0x9a4   :  { %v4015_v41 = vadd.f32 %v3939_v36, %v3798_v35  ;;  %v4017_v44 = vadd.f32 %v4010_v17, %v3869_v23 }
 0x9a5   :  { %v3941_v42 = vpop.f32.mrf.mxu0  ;;  %v4012_v58 = vpop.f32.mrf.mxu1 }
 0x9a6   :  { %v4593_v46 = vmul.f32 -1.442695, %v4015_v41  ;;  %v4016_v48 = vadd.f32 %v3941_v42, %v3800_v39  ;;  %v4018_v51 = vadd.f32 %v4012_v58, %v3871_v43 }
 0x9a8   :  { %4837 = vpow2.f32 %v4593_v46  ;;  %v4594_v24 = vmul.f32 -1.442695, %v4016_v48  ;;  %v4595_v53 = vmul.f32 -1.442695, %v4018_v51 }
 0x9aa   :  { %4839 = vpow2.f32 %v4594_v24 }
 0x9ab   :  { %4841 = vtanh.f32 %v4017_v44 }
 0x9b5   :  { %v4838_v9 = vpop.eup %4837 }
 0x9b6   :  { %v4028_v54 = vadd.f32 1.0, %v4838_v9 }
 0x9b7   :  { %v4840_v21 = vpop.eup %4839 }
 0x9b8   :  { %4843 = vrcp.f32 %v4028_v54  ;;  %v4029_v18 = vadd.f32 1.0, %v4840_v21  ;;  %v4842_v27 = vpop.eup %4841 }
 0x9b9   :  { %4845 = vpow2.f32 %v4595_v53 }
 0x9ba   :  { %4847 = vrcp.f32 %v4029_v18 }
 0x9c5   :  { %v4844_v59 = vpop.eup %4843  ;;  %v4120_v3 = vpop.f32.mrf.mxu0 }
 0x9c6   :  { %v4846_v16 = vpop.eup %4845  ;;  %v4196_v55 = vadd.f32 %v4120_v3, %v13089_v47  ;;  %v4039_v63 = vmul.f32 %v4844_v59, %v4842_v27  ;;  %v4191_v52 = vpop.f32.mrf.mxu1  ;;  %v13108_v3 = vld [vmem:[#allocation85_spill] sm:$0xff]  ;;  %v13110_v47 = vld [vmem:[#allocation70_spill] sm:$0xff] }
 0x9c7   :  { %v4848_v57 = vpop.eup %4847  ;;  %v4122_v62 = vpop.f32.mrf.mxu0  ;;  %v4030_v8 = vadd.f32 1.0, %v4846_v16  ;;  %v4198_v20 = vadd.f32 %v4191_v52, %v13092_v28  ;;  %v13109_v16 = vld [vmem:[#allocation68_spill] sm:$0xff]  ;;  %v13120_v52 = vld [vmem:[#allocation99_spill] sm:$0xff] }
 0x9c8   :  { %v4038_v2 = vmul.f32 %v4848_v57, %v10833_v31  ;;  %v4597_v5 = vmul.f32 -1.442695, %v4196_v55  ;;  %v4197_v7 = vadd.f32 %v4122_v62, %v13090_v6  ;;  %v4193_v25 = vpop.f32.mrf.mxu1  ;;  %v13111_v55 = vld [vmem:[#allocation71_spill] sm:$0xff]  ;;  %v13112_v57 = vld [vmem:[#allocation69_spill] sm:$0xff]  ;;  %v13113_v62 = vld [vmem:[#allocation76_spill] sm:$0xff] }
 0x9c9   :  { %v4199_v22 = vadd.f32 %v4193_v25, %v13091_v32  ;;  %v13117_v6 = vld [vmem:[#allocation96_spill] sm:$0xff]  ;;  %v13122_v25 = vld [vmem:[#allocation101_spill] sm:$0xff]  ;;  %v13123_v32 = vld [vmem:[#allocation102_spill] sm:$0xff] }
 0x9ca   :  { %v11418_v10 = vadd.f32 %v4039_v63, %v4038_v2  ;;  %4849 = vpow2.f32 %v4597_v5  ;;  %v4598_v40 = vmul.f32 -1.442695, %v4197_v7  ;;  %v13114_v63 = vld [vmem:[#allocation78_spill] sm:$0xff]  ;;  %v13115_v2 = vld [vmem:[#allocation79_spill] sm:$0xff]  ;;  %v13116_v5 = vld [vmem:[#allocation77_spill] sm:$0xff] }
 0x9cb   :  { %v4599_v35 = vmul.f32 -1.442695, %v4199_v22  ;;  %v13118_v7 = vld [vmem:[#allocation97_spill] sm:$0xff]  ;;  %v13124_v22 = vld [vmem:[#allocation103_spill] sm:$0xff]  ;;  %v13125_v28 = vld [vmem:[#allocation104_spill] sm:$0xff] }
 0x9cc   :  { %4851 = vpow2.f32 %v4598_v40  ;;  %v13121_v40 = vld [vmem:[#allocation100_spill] sm:$0xff] }
 0x9cd   :  { %4853 = vrcp.f32 %v4030_v8  ;;  %v13119_v8 = vld [vmem:[#allocation98_spill] sm:$0xff] }
 0x9ce   :  { %4855 = vtanh.f32 %v11418_v10 }
 0x9cf   :  { %4857 = vtanh.f32 %v4198_v20  ;;  %v13126_v20 = vld [vmem:[#allocation105_spill] sm:$0xff] }
 0x9d0   :  { %4859 = vpow2.f32 %v4599_v35  ;;  %v13127_v35 = vld [vmem:[#allocation106_spill] sm:$0xff] }
 0x9d7   :  { %v4850_v31 = vpop.eup %4849 }
 0x9d8   :  { %v4209_v36 = vadd.f32 1.0, %v4850_v31  ;;  %v13128_v31 = vld [vmem:[#allocation107_spill] sm:$0xff] }
 0x9d9   :  { %v4852_v37 = vpop.eup %4851 }
 0x9da   :  { %v4854_v39 = vpop.eup %4853  ;;  %4861 = vrcp.f32 %v4209_v36  ;;  %v4210_v41 = vadd.f32 1.0, %v4852_v37  ;;  %v13129_v36 = vld [vmem:[#allocation108_spill] sm:$0xff]  ;;  %v13130_v37 = vld [vmem:[#allocation109_spill] sm:$0xff] }
 0x9db   :  { %v4856_v42 = vpop.eup %4855 }
 0x9dc   :  { %4863 = vrcp.f32 %v4210_v41  ;;  %v11423_v46 = vmul.f32 %v4856_v42, %v4854_v39  ;;  %v4858_v29 = vpop.eup %4857  ;;  %v13131_v39 = vld [vmem:[#allocation110_spill] sm:$0xff]  ;;  %v13132_v41 = vld [vmem:[#allocation111_spill] sm:$0xff]  ;;  %v13133_v42 = vld [vmem:[#allocation112_spill] sm:$0xff] }
 0x9dd   :  { %v4860_v24 = vpop.eup %4859 }
 0x9de   :  { %v4596_v48 = vmul.f32 -1.442695, %v11423_v46  ;;  %v4211_v23 = vadd.f32 1.0, %v4860_v24  ;;  %v13136_v24 = vld [vmem:[#allocation115_spill] sm:$0xff] }
 0x9e0   :  { %4865 = vpow2.f32 %v4596_v48  ;;  %v13134_v48 = vld [vmem:[#allocation113_spill] sm:$0xff] }
 0x9e1   :  { %4867 = vrcp.f32 %v4211_v23  ;;  %v13140_v23 = vld [vmem:[#allocation119_spill] sm:$0xff] }
 0x9e7   :  { %v4862_v17 = vpop.eup %4861 }
 0x9e8   :  { %v4220_v58 = vmul.f32 %v4862_v17, %v4858_v29  ;;  %v13135_v29 = vld [vmem:[#allocation114_spill] sm:$0xff]  ;;  %v13137_v17 = vld [vmem:[#allocation116_spill] sm:$0xff] }
 0x9e9   :  { %v4864_v43 = vpop.eup %4863 }
 0x9ea   :  { %v4219_v51 = vmul.f32 %v4864_v43, %v10842_v14  ;;  %v13093_v14 = vld [vmem:[#allocation56_spill] sm:$0xff]  ;;  %v13139_v43 = vld [vmem:[#allocation118_spill] sm:$0xff] }
 0x9ec   :  { %v4221_v44 = vadd.f32 %v4220_v58, %v4219_v51  ;;  %v13138_v58 = vld [vmem:[#allocation117_spill] sm:$0xff] }
 0x9ed   :  { %v4866_v9 = vpop.eup %4865 }
 0x9ee   :  { %4869 = vtanh.f32 %v4221_v44  ;;  %v4046_v53 = vadd.f32 1.0, %v4866_v9  ;;  %v4868_v54 = vpop.eup %4867 }
 0x9f0   :  { %4871 = vrcp.f32 %v4046_v53 }
 0x9fb   :  { %v4870_v21 = vpop.eup %4869 }
 0x9fc   :  { %v4223_v18 = vmul.f32 %v4870_v21, %v4868_v54 }
 0x9fd   :  { %v4872_v27 = vpop.eup %4871 }
 0x9fe   :  { %v4224_v59 = vmax.f32 %v4223_v18, 0.0  ;;  %4049 = vst [vmem:[%s11511_s7 + $0x30] sm:$0xff] %v4872_v27 }
 0xa00   :  { %4290 = vmatmul.mubr.f32.vlgmr.msra.gmra.mxu0 %v4224_v59  ;;  %4361 = vmatmul.mubr.f32.vlgmr.msra.gmra.mxu1 %v4224_v59 }
 0xa01   :  { %4368 = vmatpush1.msra.mxu0 %v10854_v45  ;;  %4439 = vmatpush1.msra.mxu1 %v10860_v50  ;;  %v13094_v45 = vld [vmem:[#allocation57_spill] sm:$0xff]  ;;  %v13095_v50 = vld [vmem:[#allocation58_spill] sm:$0xff] }
 0xa02   :  { %4369 = vmatprep.subr.mxu0 %v10866_v56  ;;  %4440 = vmatprep.subr.mxu1 %v10872_v11  ;;  %v13096_v56 = vld [vmem:[#allocation59_spill] sm:$0xff]  ;;  %v13097_v11 = vld [vmem:[#allocation60_spill] sm:$0xff] }
 0xa03   :  { %4370 = vmatpush1.msra.mxu0 %v10878_v4  ;;  %4441 = vmatpush1.msra.mxu1 %v10884_v12  ;;  %v13098_v4 = vld [vmem:[#allocation61_spill] sm:$0xff]  ;;  %v13099_v12 = vld [vmem:[#allocation62_spill] sm:$0xff] }
 0xa04   :  { %4371 = vmatprep.subr.mxu0 %v10890_v26  ;;  %4442 = vmatprep.subr.mxu1 %v10896_v0  ;;  %v13100_v26 = vld [vmem:[#allocation63_spill] sm:$0xff]  ;;  %v13101_v0 = vld [vmem:[#allocation64_spill] sm:$0xff] }
 0xa05   :  { %4372 = vmatpush1.msra.mxu0 %v10902_v38  ;;  %4443 = vmatpush1.msra.mxu1 %v10908_v49  ;;  %v13102_v38 = vld [vmem:[#allocation65_spill] sm:$0xff]  ;;  %v13103_v49 = vld [vmem:[#allocation66_spill] sm:$0xff] }
 0xa06   :  { %4373 = vmatprep.subr.mxu0 %v10914_v60  ;;  %4444 = vmatprep.subr.mxu1 %v10920_v15  ;;  %v13104_v60 = vld [vmem:[#allocation67_spill] sm:$0xff]  ;;  %v13105_v15 = vld [vmem:[#allocation84_spill] sm:$0xff] }
 0xa07   :  { %4374 = vmatpush1.msra.mxu0 %v10926_v13  ;;  %4445 = vmatpush1.msra.mxu1 %v10932_v1  ;;  %v13106_v13 = vld [vmem:[#allocation86_spill] sm:$0xff]  ;;  %v13107_v1 = vld [vmem:[#allocation87_spill] sm:$0xff] }
 0xa08   :  { %4375 = vmatprep.subr.mxu0 %v13093_v14  ;;  %4446 = vmatprep.subr.mxu1 %v13094_v45 }
 0xa09   :  { %4376 = vmatpush1.msra.mxu0 %v13095_v50  ;;  %4447 = vmatpush1.msra.mxu1 %v13096_v56 }
 0xa0a   :  { %4377 = vmatprep.subr.mxu0 %v13097_v11  ;;  %4448 = vmatprep.subr.mxu1 %v13098_v4 }
 0xa0b   :  { %4378 = vmatpush1.msra.mxu0 %v13099_v12  ;;  %4449 = vmatpush1.msra.mxu1 %v13100_v26 }
 0xa0c   :  { %4379 = vmatprep.subr.mxu0 %v13101_v0  ;;  %4450 = vmatprep.subr.mxu1 %v13102_v38 }
 0xa0d   :  { %4380 = vmatpush1.msra.mxu0 %v13103_v49  ;;  %4451 = vmatpush1.msra.mxu1 %v13104_v60 }
 0xa0e   :  { %4381 = vmatprep.subr.mxu0 %v13105_v15  ;;  %4452 = vmatprep.subr.mxu1 %v13106_v13 }
 0xa0f   :  { %4382 = vmatpush1.msra.mxu0 %v13107_v1  ;;  %4453 = vmatpush1.msra.mxu1 %v13108_v3 }
 0xa10   :  { %4383 = vmatprep.subr.mxu0 %v13109_v16  ;;  %4454 = vmatprep.subr.mxu1 %v13110_v47 }
 0xa11   :  { %4384 = vmatpush1.msra.mxu0 %v13111_v55  ;;  %4455 = vmatpush1.msra.mxu1 %v13112_v57 }
 0xa12   :  { %4385 = vmatprep.subr.mxu0 %v13113_v62  ;;  %4456 = vmatprep.subr.mxu1 %v13114_v63 }
 0xa13   :  { %4386 = vmatpush1.msra.mxu0 %v13115_v2  ;;  %4457 = vmatpush1.msra.mxu1 %v13116_v5 }
 0xa14   :  { %4387 = vmatprep.subr.mxu0 %v13117_v6  ;;  %4458 = vmatprep.subr.mxu1 %v13118_v7 }
 0xa15   :  { %4388 = vmatpush1.msra.mxu0 %v13119_v8  ;;  %4459 = vmatpush1.msra.mxu1 %v13120_v52 }
 0xa16   :  { %4389 = vmatprep.subr.mxu0 %v13121_v40  ;;  %4460 = vmatprep.subr.mxu1 %v13122_v25 }
 0xa17   :  { %4390 = vmatpush1.msra.mxu0 %v13123_v32  ;;  %4461 = vmatpush1.msra.mxu1 %v13124_v22 }
 0xa18   :  { %4391 = vmatprep.subr.mxu0 %v13125_v28  ;;  %4462 = vmatprep.subr.mxu1 %v13126_v20 }
 0xa19   :  { %4392 = vmatpush1.msra.mxu0 %v13127_v35  ;;  %4463 = vmatpush1.msra.mxu1 %v13128_v31 }
 0xa1a   :  { %4393 = vmatprep.subr.mxu0 %v13129_v36  ;;  %4464 = vmatprep.subr.mxu1 %v13130_v37 }
 0xa1b   :  { %4394 = vmatpush1.msra.mxu0 %v13131_v39  ;;  %4465 = vmatpush1.msra.mxu1 %v13132_v41 }
 0xa1c   :  { %4395 = vmatprep.subr.mxu0 %v13133_v42  ;;  %4466 = vmatprep.subr.mxu1 %v13134_v48 }
 0xa1d   :  { %4396 = vmatpush1.msra.mxu0 %v13135_v29  ;;  %4467 = vmatpush1.msra.mxu1 %v13136_v24 }
 0xa1e   :  { %4397 = vmatprep.subr.mxu0 %v13137_v17  ;;  %4468 = vmatprep.subr.mxu1 %v13138_v58 }
 0xa1f   :  { %4398 = vmatpush1.msra.mxu0 %v13139_v43  ;;  %4431 = vmatprep.mubr.f32.mxu0 %v12180_v19 }
 0xa20   :  { %4469 = vmatpush1.msra.mxu1 %v13140_v23  ;;  %4502 = vmatprep.mubr.f32.mxu1 %v12180_v19 }
 0xa21   :  { %4432 = vmatmul.mubr.f32.vlgmr.msra.gmra.mxu0 %v11423_v46  ;;  %4503 = vmatmul.mubr.f32.vlgmr.msra.gmra.mxu1 %v11423_v46 }
 0xac0   :  { %v4291_v51 = vpop.f32.mrf.mxu0  ;;  %v4362_v53 = vpop.f32.mrf.mxu1 }
 0xac1   :  { %v4292_v9 = vadd.f32 %v4291_v51, %v13088_v33  ;;  %v4363_v4 = vadd.f32 %v4362_v53, %v7243_v34 }
 0xac2   :  { %v4293_v44 = vpop.f32.mrf.mxu0  ;;  %v4364_v59 = vpop.f32.mrf.mxu1 }
 0xac3   :  { %v4294_v21 = vadd.f32 %v4293_v44, %v7232_v61  ;;  %v4365_v46 = vadd.f32 %v4364_v59, %v7238_v30 }
 0xae1   :  { %v4433_v54 = vpop.f32.mrf.mxu0  ;;  %v4504_v50 = vpop.f32.mrf.mxu1 }
 0xae2   :  { %v4509_v18 = vadd.f32 %v4433_v54, %v4292_v9  ;;  %v4511_v26 = vadd.f32 %v4504_v50, %v4363_v4 }
 0xae3   :  { %v4435_v27 = vpop.f32.mrf.mxu0  ;;  %v4506_v56 = vpop.f32.mrf.mxu1 }
 0xae4   :  { %v4600_v14 = vmul.f32 -1.442695, %v4509_v18  ;;  %v4510_v45 = vadd.f32 %v4435_v27, %v4294_v21  ;;  %v4512_v11 = vadd.f32 %v4506_v56, %v4365_v46 }
 0xae6   :  { %4873 = vpow2.f32 %v4600_v14  ;;  %v4601_v19 = vmul.f32 -1.442695, %v4510_v45  ;;  %v4602_v33 = vmul.f32 -1.442695, %v4512_v11 }
 0xae8   :  { %4875 = vpow2.f32 %v4601_v19 }
 0xae9   :  { %4877 = vpow2.f32 %v4602_v33 }
 0xaf3   :  { %v4874_v12 = vpop.eup %4873 }
 0xaf4   :  { %v4522_v0 = vadd.f32 1.0, %v4874_v12 }
 0xaf5   :  { %v4876_v61 = vpop.eup %4875 }
 0xaf6   :  { %4879 = vrcp.f32 %v4522_v0  ;;  %v4523_v38 = vadd.f32 1.0, %v4876_v61  ;;  %v4878_v49 = vpop.eup %4877 }
 0xaf7   :  { %4881 = vtanh.f32 %v4511_v26  ;;  %v4524_v1 = vadd.f32 1.0, %v4878_v49 }
 0xaf8   :  { %4883 = vrcp.f32 %v4523_v38 }
 0xaf9   :  { %4885 = vrcp.f32 %v4524_v1 }
 0xb03   :  { %v4880_v60 = vpop.eup %4879 }
 0xb04   :  { %v4882_v15 = vpop.eup %4881 }
 0xb05   :  { %v4884_v13 = vpop.eup %4883  ;;  %v4533_v3 = vmul.f32 %v4882_v15, %v4880_v60 }
 0xb06   :  { %v4532_v30 = vmul.f32 %v4884_v13, %v11418_v10  ;;  %v4886_v34 = vpop.eup %4885 }
 0xb08   :  { %v4534_v16 = vadd.f32 %v4533_v3, %v4532_v30 }
 0xb0a   :  { %4887 = vtanh.f32 %v4534_v16 }
 0xb17   :  { %v4888_v47 = vpop.eup %4887 }
 0xb18   :  { %v4536_v55 = vmul.f32 %v4888_v47, %v4886_v34 }
 0xb1a   :  { %v4603_v57 = vmul.f32 -1.442695, %v4536_v55 }
 0xb1c   :  { %4889 = vpow2.f32 %v4603_v57 }
 0xb29   :  { %v4890_v62 = vpop.eup %4889 }
 0xb2a   :  { %v4540_v63 = vadd.f32 1.0, %v4890_v62 }
 0xb2c   :  { %4891 = vrcp.f32 %v4540_v63 }
 0xb39   :  { %v4892_v2 = vpop.eup %4891 }
 0xb3a   :  { %4543 = vst [vmem:[%s11511_s7 + $0x38] sm:$0xff] %v4892_v2 }

</bundles_post_ra>
